<compile_context>
chip_gen: v6e
topology: v6e:2x2x1
jax: 0.10.0
libtpu: 0.0.40
codegen_flags: <defaults>
</compile_context>

<pallas_src>
import functools

import jax
import jax.numpy as jnp
from jax.experimental import pallas as pl
from jax.experimental.pallas import tpu as pltpu


# ----------------------------------------------------------------------------
# Kernel: one (batch, query-tile) per grid step.
# ----------------------------------------------------------------------------
def _ldc_kernel(scal_ref,                  # SMEM (NS,) f32 scalar table
                x_tile_ref,                # (1, TQ, Cin)  raw input tile (residual)
                x_full_ref,                # (1, S, Cin)   raw input, row-major (full batch)
                xT_full_ref,               # (1, Cin, S)   raw input, channels-major
                pp_tile_ref,               # (1, TQ, 3)    p @ (wp1*bn_p_scale), query rows
                ppT_full_ref,              # (1, 3, S)     same, transposed (key rows)
                w1_ref,                    # (Cin, C)      linear1 (* bn1 scale)
                w1T_ref,                   # (C, Cin)
                wq_ref,                    # (C, C)
                wkT_ref,                   # (C, C)        wk.T
                wvp_ref,                   # (C, C)        wv, columns permuted by share-group
                wp2p_ref,                  # (3, C)        wp2, columns permuted
                w3p_ref,                   # (C, C)        linear3 (* bn3 scale), rows permuted
                vrow_ref,                  # (8, C)        packed row vectors
                vcol_ref,                  # (C, 2)        packed col vectors: sh1, bk
                o_ref,                     # (1, TQ, C)
                kt_s,                      # scratch (C, S)  cached k (channels-major)
                q_s,                       # scratch (S, C)  cached q (row-major)
                vp_s,                      # scratch (S, C)  cached v (perm. channels)
                *, C, Cs, share, TQ, offs):
    f32 = jnp.float32
    relu = lambda a: jnp.maximum(a, 0.0)

    def sc(name, i=0):                     # static scalar read from SMEM
        return scal_ref[offs[name] + i]

    vrow = vrow_ref[...]
    sh1_row = vrow[0:1, :]
    bq_row = vrow[1:2, :]
    bvp_row = vrow[2:3, :]
    bp2p_row = vrow[3:4, :]
    s2p_row = vrow[4:5, :]
    t2p_row = vrow[5:6, :]
    t3_row = vrow[6:7, :]
    vcol = vcol_ref[...]
    sh1_col = vcol[:, 0:1]
    bk_col = vcol[:, 1:2]

    # ---- per-batch precompute, cached across query tiles (scratch) ----------
    @pl.when(pl.program_id(1) == 0)
    def _():
        xT = xT_full_ref[0].astype(f32)                                     # (Cin, S)
        x_full = x_full_ref[0].astype(f32)                                  # (S, Cin)
        # channels-major pre (lane-dense on S) -> k
        pre_T = relu(jnp.dot(w1T_ref[...], xT, preferred_element_type=f32) + sh1_col)
        kt_s[...] = jnp.dot(wkT_ref[...], pre_T, preferred_element_type=f32) + bk_col
        # row-major pre -> q, v (permuted channels)
        pre = relu(jnp.dot(x_full, w1_ref[...], preferred_element_type=f32) + sh1_row)
        q_s[...] = jnp.dot(pre, wq_ref[...], preferred_element_type=f32) + bq_row
        vp_s[...] = jnp.dot(pre, wvp_ref[...], preferred_element_type=f32) + bvp_row

    row0 = pl.multiple_of(pl.program_id(1) * TQ, TQ)
    q = q_s[pl.ds(row0, TQ), :]                                             # (TQ, C)
    kt = kt_s[...]                                                          # (C, S)
    vp = vp_s[...]                                                          # (S, C)
    pp_tile = pp_tile_ref[0]                                                # (TQ, 3)
    ppT = ppT_full_ref[0]                                                   # (3, S)

    # ---- relative-position hidden planes, key axis on lanes -----------------
    # h_d[i, j] = relu( pp[j, d] - pp[i, d] + c_p[d] )          (BN_p folded)
    h = [relu(ppT[d:d + 1, :] - pp_tile[:, d:d + 1] + sc("c_p", d))
         for d in range(3)]                                                 # 3 x (TQ, S)

    # ---- attention-weight branch: BN_w1 + ReLU + ww1 (accumulate Cs planes) -
    w1p = [None] * Cs
    for c in range(C):
        prc = (h[0] * sc("wp2", 0 * C + c)
               + h[1] * sc("wp2", 1 * C + c)
               + h[2] * sc("wp2", 2 * C + c))                 # p_r (no bp2) for channel c
        wpre = prc + (kt[c:c + 1, :] - q[:, c:c + 1])         # k[j,c] - q[i,c] + p_r
        wrel = relu(wpre * sc("s_w1", c) + sc("cw1", c))      # folded BN_w1(+bp2) + ReLU
        for g in range(Cs):
            term = wrel * sc("ww1", c * Cs + g)
            w1p[g] = term if w1p[g] is None else w1p[g] + term

    # ---- BN_w2 + ReLU + ww2 + softmax over keys (lane reduce) ---------------
    wr = [relu(w1p[g] * sc("s_w2", g) + sc("cw2", g)) for g in range(Cs)]
    att = []
    for g2 in range(Cs):
        logit = wr[0] * sc("ww2", 0 * Cs + g2)
        for g in range(1, Cs):
            logit = logit + wr[g] * sc("ww2", g * Cs + g2)
        logit = logit + sc("bw2", g2)
        m = jnp.max(logit, axis=1, keepdims=True)                           # (TQ, 1)
        e = jnp.exp(logit - m)
        att.append(e * (1.0 / jnp.sum(e, axis=1, keepdims=True)))           # (TQ, S)

    # ---- aggregation: softmax-normalization identity + MXU for v.att --------
    #   out[i, c] = att_g . v[:, c] + sum_d wp2[d, c] * R[g, d][i] + bp2[c]
    wp2p = wp2p_ref[...]                                                    # (3, C)
    outs = []
    for g in range(Cs):
        a = att[g]
        r = [jnp.sum(h[d] * a, axis=1, keepdims=True) for d in range(3)]    # 3 x (TQ, 1)
        wblk = wp2p[:, g * share:(g + 1) * share]                           # (3, share)
        pr_g = (r[0] * wblk[0:1, :] + r[1] * wblk[1:2, :]
                + r[2] * wblk[2:3, :])                                      # (TQ, share)
        va_g = jnp.dot(a, vp[:, g * share:(g + 1) * share],
                       preferred_element_type=f32)                          # (TQ, share)
        outs.append(va_g + pr_g)
    t_perm = jnp.concatenate(outs, axis=1) + bp2p_row                       # (TQ, C) perm.

    # ---- LDC tail: BN2 + ReLU, linear3 (+ folded BN3), residual, ReLU -------
    y = relu(t_perm * s2p_row + t2p_row)
    x_tile = x_tile_ref[0].astype(f32)
    z = jnp.dot(y, w3p_ref[...], preferred_element_type=f32) + t3_row + x_tile
    o_ref[0] = relu(z).astype(o_ref.dtype)


# ----------------------------------------------------------------------------
# Tile selection from the chip's VMEM capacity (prefers an even parallel grid).
# ----------------------------------------------------------------------------
def _pick_tile(S, C, Cin, B):
    try:
        info = pltpu.get_tpu_info()
        vmem_phys = int(getattr(info, "vmem_capacity_bytes", 0)) or (64 << 20)
    except Exception:
        vmem_phys = 64 << 20               # conservative (v7x per-TC) fallback
    budget = vmem_phys // 2
    # batch-wide residents (x/xT/ppT double-buffered), k/q/v scratch caches, weights
    fixed = 8 * S * (2 * Cin + 3) + 8 * S * 3 * C + (2 << 20)
    avail = max(budget - fixed, 1 << 20)
    max_tq = max(8, avail // (16 * S * 4))  # ~16 live (TQ, S) f32 planes
    if vmem_phys >= (100 << 20):            # 128-MiB parts (v5e/v6e): allow bigger tiles
        cands = (512, 256, 128, 64, 32, 16, 8)
    else:                                   # 64-MiB parts (v7x): keep the 256 cap
        cands = (256, 128, 64, 32, 16, 8)
    feas = [c for c in cands if c <= S and S % c == 0 and c <= max_tq]
    if not feas:
        # TODO(synk): key-tile grid axis + online softmax for very large S
        return S, vmem_phys
    best = feas[0]
    if (B * (S // best)) % 2 == 1:          # v7x: balance the two TensorCores
        for c in feas:
            if (B * (S // c)) % 2 == 0 and c * 2 >= best:
                return c, vmem_phys
    return best, vmem_phys


# ----------------------------------------------------------------------------
# Wrapper: LDCReasoning.forward([p, x, o]) -> [p, x', o]
# ----------------------------------------------------------------------------
def ldc_reasoning(p, x, offset, params, share_planes=8):
    offset = [int(o) for o in offset]       # host-concrete (equal-size batches)
    S = offset[0]
    B = len(offset)
    n = offset[-1]
    if n != B * S or any(offset[i] != S * (i + 1) for i in range(B)):
        raise ValueError("queryandgroup_global requires equal-size batches")
    Cin = x.shape[1]
    C = params["w1"].shape[1]
    if Cin != C:
        raise ValueError("residual connection requires in_planes == planes")
    if C % share_planes != 0:
        raise ValueError("share_planes must divide planes")
    Cs = C // share_planes
    share = share_planes

    f32 = jnp.float32
    eps = 1e-5

    def fold(bn):
        g, b, m, v = (jnp.asarray(t, f32) for t in bn)
        s = g / jnp.sqrt(v + eps)
        return s, b - m * s

    s1, sh1 = fold(params["bn1"])
    s_p, sh_p = fold(params["bn_p"])
    s_w1, sh_w1 = fold(params["bn_w1"])
    s_w2, sh_w2 = fold(params["bn_w2"])
    s2, t2 = fold(params["bn2"])
    s3, t3 = fold(params["bn3"])

    # channel permutation: permuted index c_new = g*share + s  <->  orig c = s*Cs + g
    perm = jnp.array([(cn % share) * Cs + (cn // share) for cn in range(C)], jnp.int32)

    # folded weight matrices
    w1_f = jnp.asarray(params["w1"], f32) * s1[None, :]            # (Cin, C)
    w1T_f = w1_f.T                                                 # (C, Cin)
    wq = jnp.asarray(params["wq"], f32)
    bq = jnp.asarray(params["bq"], f32)
    wkT = jnp.asarray(params["wk"], f32).T                         # (C, C)
    bk = jnp.asarray(params["bk"], f32)
    wv_p = jnp.asarray(params["wv"], f32)[:, perm]                 # (C, C) perm cols
    bv_p = jnp.asarray(params["bv"], f32)[perm]
    w3_f = jnp.asarray(params["w3"], f32) * s3[None, :]            # (C, C)
    w3_p = w3_f[perm, :]                                           # rows permuted

    wp1_f = jnp.asarray(params["wp1"], f32) * s_p[None, :]         # bn_p scale into wp1
    c_p = jnp.asarray(params["bp1"], f32) * s_p + sh_p             # (3,)
    wp2 = jnp.asarray(params["wp2"], f32)                          # (3, C)
    bp2 = jnp.asarray(params["bp2"], f32)                          # (C,)
    wp2_p = wp2[:, perm]                                           # (3, C) perm cols
    bp2_p = bp2[perm]
    cw1 = bp2 * s_w1 + sh_w1                                       # folded bp2 + bn_w1 shift
    ww1 = jnp.asarray(params["ww1"], f32)                          # (C, Cs)
    cw2 = jnp.asarray(params["bw1"], f32) * s_w2 + sh_w2           # folded bw1 + bn_w2 shift
    ww2 = jnp.asarray(params["ww2"], f32)                          # (Cs, Cs)
    bw2 = jnp.asarray(params["bw2"], f32)                          # (Cs,)
    s2_p, t2_p = s2[perm], t2[perm]

    # data tensors
    p_b = jnp.asarray(p, f32).reshape(B, S, 3)
    x_b = jnp.asarray(x, f32).reshape(B, S, Cin)
    xT_b = jnp.transpose(x_b, (0, 2, 1))                           # (B, Cin, S)
    pp_b = p_b @ wp1_f                                             # (B, S, 3)
    ppT_b = jnp.transpose(pp_b, (0, 2, 1))                         # (B, 3, S)

    # packed row / column vectors (two VMEM blocks instead of ~10 tiny args)
    vrow = jnp.zeros((8, C), f32)
    vrow = (vrow.at[0].set(sh1).at[1].set(bq).at[2].set(bv_p)
                .at[3].set(bp2_p).at[4].set(s2_p).at[5].set(t2_p).at[6].set(t3))
    vcol = jnp.zeros((C, 2), f32)
    vcol = vcol.at[:, 0].set(sh1).at[:, 1].set(bk)

    # packed scalar table (SMEM), static offsets
    pieces = [("c_p", c_p), ("wp2", wp2.reshape(-1)),
              ("s_w1", s_w1), ("cw1", cw1), ("ww1", ww1.reshape(-1)),
              ("s_w2", s_w2), ("cw2", cw2), ("ww2", ww2.reshape(-1)),
              ("bw2", bw2)]
    offs, flat, cur = {}, [], 0
    for name, a in pieces:
        offs[name] = cur
        cur += int(a.shape[0])
        flat.append(a)
    scal = jnp.concatenate(flat, axis=0)

    TQ, vmem_phys = _pick_tile(S, C, Cin, B)
    nI = S // TQ
    vmem_limit = int(min(vmem_phys * 3 // 4, 112 * 1024 * 1024))

    kernel = functools.partial(_ldc_kernel, C=C, Cs=Cs, share=share, TQ=TQ, offs=offs)

    in_specs = [
        pl.BlockSpec(memory_space=pltpu.MemorySpace.SMEM),        # scal
        pl.BlockSpec((1, TQ, Cin), lambda b, i: (b, i, 0)),       # x_tile (residual)
        pl.BlockSpec((1, S, Cin), lambda b, i: (b, 0, 0)),        # x_full
        pl.BlockSpec((1, Cin, S), lambda b, i: (b, 0, 0)),        # xT_full
        pl.BlockSpec((1, TQ, 3), lambda b, i: (b, i, 0)),         # pp_tile
        pl.BlockSpec((1, 3, S), lambda b, i: (b, 0, 0)),          # ppT_full
        pl.BlockSpec((Cin, C), lambda b, i: (0, 0)),              # w1_f
        pl.BlockSpec((C, Cin), lambda b, i: (0, 0)),              # w1T_f
        pl.BlockSpec((C, C), lambda b, i: (0, 0)),                # wq
        pl.BlockSpec((C, C), lambda b, i: (0, 0)),                # wkT
        pl.BlockSpec((C, C), lambda b, i: (0, 0)),                # wv_p
        pl.BlockSpec((3, C), lambda b, i: (0, 0)),                # wp2_p
        pl.BlockSpec((C, C), lambda b, i: (0, 0)),                # w3_p
        pl.BlockSpec((8, C), lambda b, i: (0, 0)),                # vrow
        pl.BlockSpec((C, 2), lambda b, i: (0, 0)),                # vcol
    ]
    out_specs = pl.BlockSpec((1, TQ, C), lambda b, i: (b, i, 0))

    scratch_shapes = [
        pltpu.VMEM((C, S), f32),       # cached k (channels-major)
        pltpu.VMEM((S, C), f32),       # cached q (row-major)
        pltpu.VMEM((S, C), f32),       # cached v (permuted channels)
    ]

    out = pl.pallas_call(
        kernel,
        out_shape=jax.ShapeDtypeStruct((B, S, C), f32),
        grid=(B, nI),
        in_specs=in_specs,
        out_specs=out_specs,
        scratch_shapes=scratch_shapes,
        compiler_params=pltpu.CompilerParams(
            dimension_semantics=("parallel", "arbitrary"),
            vmem_limit_bytes=vmem_limit),
    )(scal, x_b, x_b, xT_b, pp_b, ppT_b,
      w1_f, w1T_f, wq, wkT, wv_p, wp2_p, w3_p, vrow, vcol)

    return p, out.reshape(n, C), offset


# ----------------------------------------------------------------------------
# Pure-JAX reference (same eval-mode BN semantics).
# ----------------------------------------------------------------------------
def ldc_reference(p, x, offset, params, share_planes):
    offset = [int(o) for o in offset]
    S, B = offset[0], len(offset)
    n = B * S
    C = params["w1"].shape[1]
    eps = 1e-5

    def bn(t, tup):
        g, b, m, v = tup
        return (t - m) / jnp.sqrt(v + eps) * g + b

    x = jnp.asarray(x, jnp.float32)
    p = jnp.asarray(p, jnp.float32)
    identity = x
    xx = jax.nn.relu(bn(x @ params["w1"], params["bn1"]))

    q = xx @ params["wq"] + params["bq"]
    k = xx @ params["wk"] + params["bk"]
    v = xx @ params["wv"] + params["bv"]
    pb = p.reshape(B, S, 3)
    qb, kb, vb = (t.reshape(B, S, C) for t in (q, k, v))

    delta = pb[:, None, :, :] - pb[:, :, None, :]                 # [b,i,j] = p[j]-p[i]
    h = delta @ params["wp1"] + params["bp1"]
    h = jax.nn.relu(bn(h, params["bn_p"]))
    p_r = h @ params["wp2"] + params["bp2"]                       # (B,S,S,C)

    w = kb[:, None, :, :] - qb[:, :, None, :] + p_r
    w = jax.nn.relu(bn(w, params["bn_w1"]))
    w = w @ params["ww1"] + params["bw1"]
    w = jax.nn.relu(bn(w, params["bn_w2"]))
    w = w @ params["ww2"] + params["bw2"]                         # (B,S,S,Cs)
    w = jax.nn.softmax(w, axis=2)

    Cs = C // share_planes
    vp = (vb[:, None, :, :] + p_r).reshape(B, S, S, share_planes, Cs)
    t_out = jnp.sum(vp * w[:, :, :, None, :], axis=2).reshape(n, C)

    y = jax.nn.relu(bn(t_out, params["bn2"]))
    z = bn(y @ params["w3"], params["bn3"]) + identity
    return jax.nn.relu(z)


# ----------------------------------------------------------------------------
# Deterministic parameter init (shapes follow the module __init__)
# ----------------------------------------------------------------------------
def init_params(key, planes, share_planes):
    C = planes
    Cs = C // share_planes
    ks = jax.random.split(key, 15)

    def lin(k, fi, fo, bias=True):
        k1, k2 = jax.random.split(k)
        bound = 1.0 / float(fi) ** 0.5
        w = jax.random.uniform(k1, (fi, fo), jnp.float32, -bound, bound)
        if not bias:
            return w
        b = jax.random.uniform(k2, (fo,), jnp.float32, -bound, bound)
        return w, b

    def bn(k, c):
        k1, k2, k3, k4 = jax.random.split(k, 4)
        gamma = jax.random.uniform(k1, (c,), jnp.float32, 0.5, 1.5)
        beta = jax.random.uniform(k2, (c,), jnp.float32, -0.1, 0.1)
        mean = 0.1 * jax.random.normal(k3, (c,), jnp.float32)
        var = jnp.abs(jax.random.normal(k4, (c,), jnp.float32)) * 0.5 + 0.5
        return gamma, beta, mean, var

    wq, bq = lin(ks[0], C, C)
    wk, bk = lin(ks[1], C, C)
    wv, bv = lin(ks[2], C, C)
    wp1, bp1 = lin(ks[3], 3, 3)
    wp2, bp2 = lin(ks[4], 3, C)
    ww1, bw1 = lin(ks[5], C, Cs)
    ww2, bw2 = lin(ks[6], Cs, Cs)
    w1 = lin(ks[7], C, C, bias=False)
    w3 = lin(ks[8], C, C, bias=False)
    return dict(w1=w1, bn1=bn(ks[9], C),
                wq=wq, bq=bq, wk=wk, bk=bk, wv=wv, bv=bv,
                wp1=wp1, bp1=bp1, bn_p=bn(ks[10], 3),
                wp2=wp2, bp2=bp2,
                bn_w1=bn(ks[11], C), ww1=ww1, bw1=bw1,
                bn_w2=bn(ks[12], Cs), ww2=ww2, bw2=bw2,
                w3=w3, bn2=bn(ks[13], C), bn3=bn(ks[14], C))


if __name__ == "__main__":
    key = jax.random.PRNGKey(0)
    planes, share_planes = 32, 8
    B, S = 2, 16
    n = B * S

    kp, kx, kw = jax.random.split(key, 3)
    p = jax.random.normal(kp, (n, 3), jnp.float32)
    x = jax.random.normal(kx, (n, planes), jnp.float32)
    offset = [S * (i + 1) for i in range(B)]          # [16, 32]
    params = init_params(kw, planes, share_planes)

    _, out, _ = ldc_reasoning(p, x, offset, params, share_planes)
    out = jax.block_until_ready(out)

    ref = ldc_reference(p, x, offset, params, share_planes)
    assert out.shape == (n, planes)
    if not jnp.allclose(out, ref, atol=2e-3, rtol=2e-3):
        err = float(jnp.max(jnp.abs(out - ref)))
        raise AssertionError(f"Pallas kernel does not match JAX reference (max err {err})")
    print("KERNEL_OK")
</pallas_src>

<mosaic_0001>
module attributes {stable_mosaic.version = 11 : i64} {
  func.func @_ldc_kernel(%arg0: i32, %arg1: i32, %arg2: memref<319xf32, #tpu.memory_space<smem>>, %arg3: memref<1x16x32xf32, #tpu.memory_space<vmem>>, %arg4: memref<1x16x32xf32, #tpu.memory_space<vmem>>, %arg5: memref<1x32x16xf32, #tpu.memory_space<vmem>>, %arg6: memref<1x16x3xf32, #tpu.memory_space<vmem>>, %arg7: memref<1x3x16xf32, #tpu.memory_space<vmem>>, %arg8: memref<32x32xf32, #tpu.memory_space<vmem>>, %arg9: memref<32x32xf32, #tpu.memory_space<vmem>>, %arg10: memref<32x32xf32, #tpu.memory_space<vmem>>, %arg11: memref<32x32xf32, #tpu.memory_space<vmem>>, %arg12: memref<32x32xf32, #tpu.memory_space<vmem>>, %arg13: memref<3x32xf32, #tpu.memory_space<vmem>>, %arg14: memref<32x32xf32, #tpu.memory_space<vmem>>, %arg15: memref<8x32xf32, #tpu.memory_space<vmem>>, %arg16: memref<32x2xf32, #tpu.memory_space<vmem>>, %arg17: memref<1x16x32xf32, #tpu.memory_space<vmem>>, %arg18: memref<32x16xf32, #tpu.memory_space<vmem>>, %arg19: memref<16x32xf32, #tpu.memory_space<vmem>>, %arg20: memref<16x32xf32, #tpu.memory_space<vmem>>) attributes {dimension_semantics = [#tpu.dimension_semantics<parallel>, #tpu.dimension_semantics<arbitrary>], iteration_bounds = array<i64: 2, 1>, scalar_prefetch = 0 : i64, scratch_operands = 3 : i64, tpu.core_type = #tpu.core_type<tc>, window_params = [{transform_indices = @transform_0, window_bounds = array<i64: 319>}, {transform_indices = @transform_1, window_bounds = array<i64: 1, 16, 32>}, {transform_indices = @transform_2, window_bounds = array<i64: 1, 16, 32>}, {transform_indices = @transform_3, window_bounds = array<i64: 1, 32, 16>}, {transform_indices = @transform_4, window_bounds = array<i64: 1, 16, 3>}, {transform_indices = @transform_5, window_bounds = array<i64: 1, 3, 16>}, {pipeline_mode = #tpu.pipeline_mode<synchronous>, transform_indices = @transform_6, window_bounds = array<i64: 32, 32>}, {pipeline_mode = #tpu.pipeline_mode<synchronous>, transform_indices = @transform_7, window_bounds = array<i64: 32, 32>}, {pipeline_mode = #tpu.pipeline_mode<synchronous>, transform_indices = @transform_8, window_bounds = array<i64: 32, 32>}, {pipeline_mode = #tpu.pipeline_mode<synchronous>, transform_indices = @transform_9, window_bounds = array<i64: 32, 32>}, {pipeline_mode = #tpu.pipeline_mode<synchronous>, transform_indices = @transform_10, window_bounds = array<i64: 32, 32>}, {pipeline_mode = #tpu.pipeline_mode<synchronous>, transform_indices = @transform_11, window_bounds = array<i64: 3, 32>}, {pipeline_mode = #tpu.pipeline_mode<synchronous>, transform_indices = @transform_12, window_bounds = array<i64: 32, 32>}, {pipeline_mode = #tpu.pipeline_mode<synchronous>, transform_indices = @transform_13, window_bounds = array<i64: 8, 32>}, {pipeline_mode = #tpu.pipeline_mode<synchronous>, transform_indices = @transform_14, window_bounds = array<i64: 32, 2>}, {transform_indices = @transform_15, window_bounds = array<i64: 1, 16, 32>}]} {
    %c0 = arith.constant 0 : index
    %c0_0 = arith.constant 0 : index
    %0 = vector.load %arg15[%c0, %c0_0] : memref<8x32xf32, #tpu.memory_space<vmem>>, vector<8x32xf32>
    %1 = vector.extract_strided_slice %0 {offsets = [0, 0], sizes = [1, 32], strides = [1, 1]} : vector<8x32xf32> to vector<1x32xf32>
    %2 = vector.extract_strided_slice %0 {offsets = [1, 0], sizes = [1, 32], strides = [1, 1]} : vector<8x32xf32> to vector<1x32xf32>
    %3 = vector.extract_strided_slice %0 {offsets = [2, 0], sizes = [1, 32], strides = [1, 1]} : vector<8x32xf32> to vector<1x32xf32>
    %4 = vector.extract_strided_slice %0 {offsets = [3, 0], sizes = [1, 32], strides = [1, 1]} : vector<8x32xf32> to vector<1x32xf32>
    %5 = vector.extract_strided_slice %0 {offsets = [4, 0], sizes = [1, 32], strides = [1, 1]} : vector<8x32xf32> to vector<1x32xf32>
    %6 = vector.extract_strided_slice %0 {offsets = [5, 0], sizes = [1, 32], strides = [1, 1]} : vector<8x32xf32> to vector<1x32xf32>
    %7 = vector.extract_strided_slice %0 {offsets = [6, 0], sizes = [1, 32], strides = [1, 1]} : vector<8x32xf32> to vector<1x32xf32>
    %c0_1 = arith.constant 0 : index
    %c0_2 = arith.constant 0 : index
    %8 = vector.load %arg16[%c0_1, %c0_2] : memref<32x2xf32, #tpu.memory_space<vmem>>, vector<32x2xf32>
    %9 = vector.extract_strided_slice %8 {offsets = [0, 0], sizes = [32, 1], strides = [1, 1]} : vector<32x2xf32> to vector<32x1xf32>
    %10 = vector.extract_strided_slice %8 {offsets = [0, 1], sizes = [32, 1], strides = [1, 1]} : vector<32x2xf32> to vector<32x1xf32>
    %c0_i32 = arith.constant 0 : i32
    %11 = arith.cmpi eq, %arg1, %c0_i32 : i32
    %12 = arith.extui %11 : i1 to i32
    %c0_i32_3 = arith.constant 0 : i32
    %13 = arith.cmpi ne, %12, %c0_i32_3 : i32
    scf.if %13 {
      %c0_95 = arith.constant 0 : index
      %c0_96 = arith.constant 0 : index
      %c0_97 = arith.constant 0 : index
      %1640 = vector.load %arg5[%c0_95, %c0_96, %c0_97] : memref<1x32x16xf32, #tpu.memory_space<vmem>>, vector<1x32x16xf32>
      %1641 = vector.shape_cast %1640 : vector<1x32x16xf32> to vector<32x16xf32>
      %c0_98 = arith.constant 0 : index
      %c0_99 = arith.constant 0 : index
      %c0_100 = arith.constant 0 : index
      %1642 = vector.load %arg4[%c0_98, %c0_99, %c0_100] : memref<1x16x32xf32, #tpu.memory_space<vmem>>, vector<1x16x32xf32>
      %1643 = vector.shape_cast %1642 : vector<1x16x32xf32> to vector<16x32xf32>
      %c0_101 = arith.constant 0 : index
      %c0_102 = arith.constant 0 : index
      %1644 = vector.load %arg9[%c0_101, %c0_102] : memref<32x32xf32, #tpu.memory_space<vmem>>, vector<32x32xf32>
      %cst_103 = arith.constant dense<0.000000e+00> : vector<32x16xf32>
      %1645 = tpu.matmul %1644, %1641, %cst_103 {dimension_numbers = #tpu.dot_dimension_numbers<[1], [0], [0], [1], [0, 0, 1, 1], [], []>} : vector<32x32xf32>, vector<32x16xf32>, vector<32x16xf32> -> vector<32x16xf32>
      %1646 = vector.broadcast %9 : vector<32x1xf32> to vector<32x16xf32>
      %1647 = arith.addf %1645, %1646 : vector<32x16xf32>
      %cst_104 = arith.constant 0.000000e+00 : f32
      %1648 = vector.broadcast %cst_104 : f32 to vector<32x16xf32>
      %1649 = arith.maximumf %1647, %1648 : vector<32x16xf32>
      %c0_105 = arith.constant 0 : index
      %c0_106 = arith.constant 0 : index
      %1650 = vector.load %arg11[%c0_105, %c0_106] : memref<32x32xf32, #tpu.memory_space<vmem>>, vector<32x32xf32>
      %cst_107 = arith.constant dense<0.000000e+00> : vector<32x16xf32>
      %1651 = tpu.matmul %1650, %1649, %cst_107 {dimension_numbers = #tpu.dot_dimension_numbers<[1], [0], [0], [1], [0, 0, 1, 1], [], []>} : vector<32x32xf32>, vector<32x16xf32>, vector<32x16xf32> -> vector<32x16xf32>
      %1652 = vector.broadcast %10 : vector<32x1xf32> to vector<32x16xf32>
      %1653 = arith.addf %1651, %1652 : vector<32x16xf32>
      %c0_108 = arith.constant 0 : index
      %c0_109 = arith.constant 0 : index
      %1654 = vector.load %arg18[%c0_108, %c0_109] : memref<32x16xf32, #tpu.memory_space<vmem>>, vector<32x16xf32>
      tpu.vector_store %arg18[%c0_108, %c0_109], %1653 {strides = array<i32>} : memref<32x16xf32, #tpu.memory_space<vmem>>, vector<32x16xf32>,
      %c0_110 = arith.constant 0 : index
      %c0_111 = arith.constant 0 : index
      %1655 = vector.load %arg8[%c0_110, %c0_111] : memref<32x32xf32, #tpu.memory_space<vmem>>, vector<32x32xf32>
      %cst_112 = arith.constant dense<0.000000e+00> : vector<16x32xf32>
      %1656 = tpu.matmul %1643, %1655, %cst_112 {dimension_numbers = #tpu.dot_dimension_numbers<[1], [0], [0], [1], [0, 0, 1, 1], [], []>} : vector<16x32xf32>, vector<32x32xf32>, vector<16x32xf32> -> vector<16x32xf32>
      %1657 = vector.broadcast %1 : vector<1x32xf32> to vector<16x32xf32>
      %1658 = arith.addf %1656, %1657 : vector<16x32xf32>
      %cst_113 = arith.constant 0.000000e+00 : f32
      %1659 = vector.broadcast %cst_113 : f32 to vector<16x32xf32>
      %1660 = arith.maximumf %1658, %1659 : vector<16x32xf32>
      %c0_114 = arith.constant 0 : index
      %c0_115 = arith.constant 0 : index
      %1661 = vector.load %arg10[%c0_114, %c0_115] : memref<32x32xf32, #tpu.memory_space<vmem>>, vector<32x32xf32>
      %cst_116 = arith.constant dense<0.000000e+00> : vector<16x32xf32>
      %1662 = tpu.matmul %1660, %1661, %cst_116 {dimension_numbers = #tpu.dot_dimension_numbers<[1], [0], [0], [1], [0, 0, 1, 1], [], []>} : vector<16x32xf32>, vector<32x32xf32>, vector<16x32xf32> -> vector<16x32xf32>
      %1663 = vector.broadcast %2 : vector<1x32xf32> to vector<16x32xf32>
      %1664 = arith.addf %1662, %1663 : vector<16x32xf32>
      %c0_117 = arith.constant 0 : index
      %c0_118 = arith.constant 0 : index
      %1665 = vector.load %arg19[%c0_117, %c0_118] : memref<16x32xf32, #tpu.memory_space<vmem>>, vector<16x32xf32>
      tpu.vector_store %arg19[%c0_117, %c0_118], %1664 {strides = array<i32>} : memref<16x32xf32, #tpu.memory_space<vmem>>, vector<16x32xf32>,
      %c0_119 = arith.constant 0 : index
      %c0_120 = arith.constant 0 : index
      %1666 = vector.load %arg12[%c0_119, %c0_120] : memref<32x32xf32, #tpu.memory_space<vmem>>, vector<32x32xf32>
      %cst_121 = arith.constant dense<0.000000e+00> : vector<16x32xf32>
      %1667 = tpu.matmul %1660, %1666, %cst_121 {dimension_numbers = #tpu.dot_dimension_numbers<[1], [0], [0], [1], [0, 0, 1, 1], [], []>} : vector<16x32xf32>, vector<32x32xf32>, vector<16x32xf32> -> vector<16x32xf32>
      %1668 = vector.broadcast %3 : vector<1x32xf32> to vector<16x32xf32>
      %1669 = arith.addf %1667, %1668 : vector<16x32xf32>
      %c0_122 = arith.constant 0 : index
      %c0_123 = arith.constant 0 : index
      %1670 = vector.load %arg20[%c0_122, %c0_123] : memref<16x32xf32, #tpu.memory_space<vmem>>, vector<16x32xf32>
      tpu.vector_store %arg20[%c0_122, %c0_123], %1669 {strides = array<i32>} : memref<16x32xf32, #tpu.memory_space<vmem>>, vector<16x32xf32>,
    } else {
    }
    %c16_i32 = arith.constant 16 : i32
    %14 = arith.muli %arg1, %c16_i32 : i32
    %15 = tpu.assume_multiple %14, 16 : i32
    %16 = arith.index_cast %15 : i32 to index
    %c0_4 = arith.constant 0 : index
    %17 = vector.load %arg19[%16, %c0_4] : memref<16x32xf32, #tpu.memory_space<vmem>>, vector<16x32xf32>
    %c0_5 = arith.constant 0 : index
    %c0_6 = arith.constant 0 : index
    %18 = vector.load %arg18[%c0_5, %c0_6] : memref<32x16xf32, #tpu.memory_space<vmem>>, vector<32x16xf32>
    %c0_7 = arith.constant 0 : index
    %c0_8 = arith.constant 0 : index
    %19 = vector.load %arg20[%c0_7, %c0_8] : memref<16x32xf32, #tpu.memory_space<vmem>>, vector<16x32xf32>
    %c0_9 = arith.constant 0 : index
    %c0_10 = arith.constant 0 : index
    %c0_11 = arith.constant 0 : index
    %20 = vector.load %arg6[%c0_9, %c0_10, %c0_11] : memref<1x16x3xf32, #tpu.memory_space<vmem>>, vector<1x16x3xf32>
    %21 = vector.shape_cast %20 : vector<1x16x3xf32> to vector<16x3xf32>
    %c0_12 = arith.constant 0 : index
    %c0_13 = arith.constant 0 : index
    %c0_14 = arith.constant 0 : index
    %22 = vector.load %arg7[%c0_12, %c0_13, %c0_14] : memref<1x3x16xf32, #tpu.memory_space<vmem>>, vector<1x3x16xf32>
    %23 = vector.shape_cast %22 : vector<1x3x16xf32> to vector<3x16xf32>
    %24 = vector.extract_strided_slice %23 {offsets = [0, 0], sizes = [1, 16], strides = [1, 1]} : vector<3x16xf32> to vector<1x16xf32>
    %25 = vector.extract_strided_slice %21 {offsets = [0, 0], sizes = [16, 1], strides = [1, 1]} : vector<16x3xf32> to vector<16x1xf32>
    %26 = vector.broadcast %24 : vector<1x16xf32> to vector<16x16xf32>
    %27 = vector.broadcast %25 : vector<16x1xf32> to vector<16x16xf32>
    %28 = arith.subf %26, %27 : vector<16x16xf32>
    %c0_15 = arith.constant 0 : index
    %29 = memref.load %arg2[%c0_15] : memref<319xf32, #tpu.memory_space<smem>>
    %30 = vector.broadcast %29 : f32 to vector<16x16xf32>
    %31 = arith.addf %28, %30 : vector<16x16xf32>
    %cst = arith.constant 0.000000e+00 : f32
    %32 = vector.broadcast %cst : f32 to vector<16x16xf32>
    %33 = arith.maximumf %31, %32 : vector<16x16xf32>
    %34 = vector.extract_strided_slice %23 {offsets = [1, 0], sizes = [1, 16], strides = [1, 1]} : vector<3x16xf32> to vector<1x16xf32>
    %35 = vector.extract_strided_slice %21 {offsets = [0, 1], sizes = [16, 1], strides = [1, 1]} : vector<16x3xf32> to vector<16x1xf32>
    %36 = vector.broadcast %34 : vector<1x16xf32> to vector<16x16xf32>
    %37 = vector.broadcast %35 : vector<16x1xf32> to vector<16x16xf32>
    %38 = arith.subf %36, %37 : vector<16x16xf32>
    %c1 = arith.constant 1 : index
    %39 = memref.load %arg2[%c1] : memref<319xf32, #tpu.memory_space<smem>>
    %40 = vector.broadcast %39 : f32 to vector<16x16xf32>
    %41 = arith.addf %38, %40 : vector<16x16xf32>
    %cst_16 = arith.constant 0.000000e+00 : f32
    %42 = vector.broadcast %cst_16 : f32 to vector<16x16xf32>
    %43 = arith.maximumf %41, %42 : vector<16x16xf32>
    %44 = vector.extract_strided_slice %23 {offsets = [2, 0], sizes = [1, 16], strides = [1, 1]} : vector<3x16xf32> to vector<1x16xf32>
    %45 = vector.extract_strided_slice %21 {offsets = [0, 2], sizes = [16, 1], strides = [1, 1]} : vector<16x3xf32> to vector<16x1xf32>
    %46 = vector.broadcast %44 : vector<1x16xf32> to vector<16x16xf32>
    %47 = vector.broadcast %45 : vector<16x1xf32> to vector<16x16xf32>
    %48 = arith.subf %46, %47 : vector<16x16xf32>
    %c2 = arith.constant 2 : index
    %49 = memref.load %arg2[%c2] : memref<319xf32, #tpu.memory_space<smem>>
    %50 = vector.broadcast %49 : f32 to vector<16x16xf32>
    %51 = arith.addf %48, %50 : vector<16x16xf32>
    %cst_17 = arith.constant 0.000000e+00 : f32
    %52 = vector.broadcast %cst_17 : f32 to vector<16x16xf32>
    %53 = arith.maximumf %51, %52 : vector<16x16xf32>
    %c3 = arith.constant 3 : index
    %54 = memref.load %arg2[%c3] : memref<319xf32, #tpu.memory_space<smem>>
    %55 = vector.broadcast %54 : f32 to vector<16x16xf32>
    %56 = arith.mulf %33, %55 : vector<16x16xf32>
    %c35 = arith.constant 35 : index
    %57 = memref.load %arg2[%c35] : memref<319xf32, #tpu.memory_space<smem>>
    %58 = vector.broadcast %57 : f32 to vector<16x16xf32>
    %59 = arith.mulf %43, %58 : vector<16x16xf32>
    %60 = arith.addf %56, %59 : vector<16x16xf32>
    %c67 = arith.constant 67 : index
    %61 = memref.load %arg2[%c67] : memref<319xf32, #tpu.memory_space<smem>>
    %62 = vector.broadcast %61 : f32 to vector<16x16xf32>
    %63 = arith.mulf %53, %62 : vector<16x16xf32>
    %64 = arith.addf %60, %63 : vector<16x16xf32>
    %65 = vector.extract_strided_slice %18 {offsets = [0, 0], sizes = [1, 16], strides = [1, 1]} : vector<32x16xf32> to vector<1x16xf32>
    %66 = vector.extract_strided_slice %17 {offsets = [0, 0], sizes = [16, 1], strides = [1, 1]} : vector<16x32xf32> to vector<16x1xf32>
    %67 = vector.broadcast %65 : vector<1x16xf32> to vector<16x16xf32>
    %68 = vector.broadcast %66 : vector<16x1xf32> to vector<16x16xf32>
    %69 = arith.subf %67, %68 : vector<16x16xf32>
    %70 = arith.addf %64, %69 : vector<16x16xf32>
    %c99 = arith.constant 99 : index
    %71 = memref.load %arg2[%c99] : memref<319xf32, #tpu.memory_space<smem>>
    %72 = vector.broadcast %71 : f32 to vector<16x16xf32>
    %73 = arith.mulf %70, %72 : vector<16x16xf32>
    %c131 = arith.constant 131 : index
    %74 = memref.load %arg2[%c131] : memref<319xf32, #tpu.memory_space<smem>>
    %75 = vector.broadcast %74 : f32 to vector<16x16xf32>
    %76 = arith.addf %73, %75 : vector<16x16xf32>
    %cst_18 = arith.constant 0.000000e+00 : f32
    %77 = vector.broadcast %cst_18 : f32 to vector<16x16xf32>
    %78 = arith.maximumf %76, %77 : vector<16x16xf32>
    %c163 = arith.constant 163 : index
    %79 = memref.load %arg2[%c163] : memref<319xf32, #tpu.memory_space<smem>>
    %80 = vector.broadcast %79 : f32 to vector<16x16xf32>
    %81 = arith.mulf %78, %80 : vector<16x16xf32>
    %c164 = arith.constant 164 : index
    %82 = memref.load %arg2[%c164] : memref<319xf32, #tpu.memory_space<smem>>
    %83 = vector.broadcast %82 : f32 to vector<16x16xf32>
    %84 = arith.mulf %78, %83 : vector<16x16xf32>
    %c165 = arith.constant 165 : index
    %85 = memref.load %arg2[%c165] : memref<319xf32, #tpu.memory_space<smem>>
    %86 = vector.broadcast %85 : f32 to vector<16x16xf32>
    %87 = arith.mulf %78, %86 : vector<16x16xf32>
    %c166 = arith.constant 166 : index
    %88 = memref.load %arg2[%c166] : memref<319xf32, #tpu.memory_space<smem>>
    %89 = vector.broadcast %88 : f32 to vector<16x16xf32>
    %90 = arith.mulf %78, %89 : vector<16x16xf32>
    %c4 = arith.constant 4 : index
    %91 = memref.load %arg2[%c4] : memref<319xf32, #tpu.memory_space<smem>>
    %92 = vector.broadcast %91 : f32 to vector<16x16xf32>
    %93 = arith.mulf %33, %92 : vector<16x16xf32>
    %c36 = arith.constant 36 : index
    %94 = memref.load %arg2[%c36] : memref<319xf32, #tpu.memory_space<smem>>
    %95 = vector.broadcast %94 : f32 to vector<16x16xf32>
    %96 = arith.mulf %43, %95 : vector<16x16xf32>
    %97 = arith.addf %93, %96 : vector<16x16xf32>
    %c68 = arith.constant 68 : index
    %98 = memref.load %arg2[%c68] : memref<319xf32, #tpu.memory_space<smem>>
    %99 = vector.broadcast %98 : f32 to vector<16x16xf32>
    %100 = arith.mulf %53, %99 : vector<16x16xf32>
    %101 = arith.addf %97, %100 : vector<16x16xf32>
    %102 = vector.extract_strided_slice %18 {offsets = [1, 0], sizes = [1, 16], strides = [1, 1]} : vector<32x16xf32> to vector<1x16xf32>
    %103 = vector.extract_strided_slice %17 {offsets = [0, 1], sizes = [16, 1], strides = [1, 1]} : vector<16x32xf32> to vector<16x1xf32>
    %104 = vector.broadcast %102 : vector<1x16xf32> to vector<16x16xf32>
    %105 = vector.broadcast %103 : vector<16x1xf32> to vector<16x16xf32>
    %106 = arith.subf %104, %105 : vector<16x16xf32>
    %107 = arith.addf %101, %106 : vector<16x16xf32>
    %c100 = arith.constant 100 : index
    %108 = memref.load %arg2[%c100] : memref<319xf32, #tpu.memory_space<smem>>
    %109 = vector.broadcast %108 : f32 to vector<16x16xf32>
    %110 = arith.mulf %107, %109 : vector<16x16xf32>
    %c132 = arith.constant 132 : index
    %111 = memref.load %arg2[%c132] : memref<319xf32, #tpu.memory_space<smem>>
    %112 = vector.broadcast %111 : f32 to vector<16x16xf32>
    %113 = arith.addf %110, %112 : vector<16x16xf32>
    %cst_19 = arith.constant 0.000000e+00 : f32
    %114 = vector.broadcast %cst_19 : f32 to vector<16x16xf32>
    %115 = arith.maximumf %113, %114 : vector<16x16xf32>
    %c167 = arith.constant 167 : index
    %116 = memref.load %arg2[%c167] : memref<319xf32, #tpu.memory_space<smem>>
    %117 = vector.broadcast %116 : f32 to vector<16x16xf32>
    %118 = arith.mulf %115, %117 : vector<16x16xf32>
    %119 = arith.addf %81, %118 : vector<16x16xf32>
    %c168 = arith.constant 168 : index
    %120 = memref.load %arg2[%c168] : memref<319xf32, #tpu.memory_space<smem>>
    %121 = vector.broadcast %120 : f32 to vector<16x16xf32>
    %122 = arith.mulf %115, %121 : vector<16x16xf32>
    %123 = arith.addf %84, %122 : vector<16x16xf32>
    %c169 = arith.constant 169 : index
    %124 = memref.load %arg2[%c169] : memref<319xf32, #tpu.memory_space<smem>>
    %125 = vector.broadcast %124 : f32 to vector<16x16xf32>
    %126 = arith.mulf %115, %125 : vector<16x16xf32>
    %127 = arith.addf %87, %126 : vector<16x16xf32>
    %c170 = arith.constant 170 : index
    %128 = memref.load %arg2[%c170] : memref<319xf32, #tpu.memory_space<smem>>
    %129 = vector.broadcast %128 : f32 to vector<16x16xf32>
    %130 = arith.mulf %115, %129 : vector<16x16xf32>
    %131 = arith.addf %90, %130 : vector<16x16xf32>
    %c5 = arith.constant 5 : index
    %132 = memref.load %arg2[%c5] : memref<319xf32, #tpu.memory_space<smem>>
    %133 = vector.broadcast %132 : f32 to vector<16x16xf32>
    %134 = arith.mulf %33, %133 : vector<16x16xf32>
    %c37 = arith.constant 37 : index
    %135 = memref.load %arg2[%c37] : memref<319xf32, #tpu.memory_space<smem>>
    %136 = vector.broadcast %135 : f32 to vector<16x16xf32>
    %137 = arith.mulf %43, %136 : vector<16x16xf32>
    %138 = arith.addf %134, %137 : vector<16x16xf32>
    %c69 = arith.constant 69 : index
    %139 = memref.load %arg2[%c69] : memref<319xf32, #tpu.memory_space<smem>>
    %140 = vector.broadcast %139 : f32 to vector<16x16xf32>
    %141 = arith.mulf %53, %140 : vector<16x16xf32>
    %142 = arith.addf %138, %141 : vector<16x16xf32>
    %143 = vector.extract_strided_slice %18 {offsets = [2, 0], sizes = [1, 16], strides = [1, 1]} : vector<32x16xf32> to vector<1x16xf32>
    %144 = vector.extract_strided_slice %17 {offsets = [0, 2], sizes = [16, 1], strides = [1, 1]} : vector<16x32xf32> to vector<16x1xf32>
    %145 = vector.broadcast %143 : vector<1x16xf32> to vector<16x16xf32>
    %146 = vector.broadcast %144 : vector<16x1xf32> to vector<16x16xf32>
    %147 = arith.subf %145, %146 : vector<16x16xf32>
    %148 = arith.addf %142, %147 : vector<16x16xf32>
    %c101 = arith.constant 101 : index
    %149 = memref.load %arg2[%c101] : memref<319xf32, #tpu.memory_space<smem>>
    %150 = vector.broadcast %149 : f32 to vector<16x16xf32>
    %151 = arith.mulf %148, %150 : vector<16x16xf32>
    %c133 = arith.constant 133 : index
    %152 = memref.load %arg2[%c133] : memref<319xf32, #tpu.memory_space<smem>>
    %153 = vector.broadcast %152 : f32 to vector<16x16xf32>
    %154 = arith.addf %151, %153 : vector<16x16xf32>
    %cst_20 = arith.constant 0.000000e+00 : f32
    %155 = vector.broadcast %cst_20 : f32 to vector<16x16xf32>
    %156 = arith.maximumf %154, %155 : vector<16x16xf32>
    %c171 = arith.constant 171 : index
    %157 = memref.load %arg2[%c171] : memref<319xf32, #tpu.memory_space<smem>>
    %158 = vector.broadcast %157 : f32 to vector<16x16xf32>
    %159 = arith.mulf %156, %158 : vector<16x16xf32>
    %160 = arith.addf %119, %159 : vector<16x16xf32>
    %c172 = arith.constant 172 : index
    %161 = memref.load %arg2[%c172] : memref<319xf32, #tpu.memory_space<smem>>
    %162 = vector.broadcast %161 : f32 to vector<16x16xf32>
    %163 = arith.mulf %156, %162 : vector<16x16xf32>
    %164 = arith.addf %123, %163 : vector<16x16xf32>
    %c173 = arith.constant 173 : index
    %165 = memref.load %arg2[%c173] : memref<319xf32, #tpu.memory_space<smem>>
    %166 = vector.broadcast %165 : f32 to vector<16x16xf32>
    %167 = arith.mulf %156, %166 : vector<16x16xf32>
    %168 = arith.addf %127, %167 : vector<16x16xf32>
    %c174 = arith.constant 174 : index
    %169 = memref.load %arg2[%c174] : memref<319xf32, #tpu.memory_space<smem>>
    %170 = vector.broadcast %169 : f32 to vector<16x16xf32>
    %171 = arith.mulf %156, %170 : vector<16x16xf32>
    %172 = arith.addf %131, %171 : vector<16x16xf32>
    %c6 = arith.constant 6 : index
    %173 = memref.load %arg2[%c6] : memref<319xf32, #tpu.memory_space<smem>>
    %174 = vector.broadcast %173 : f32 to vector<16x16xf32>
    %175 = arith.mulf %33, %174 : vector<16x16xf32>
    %c38 = arith.constant 38 : index
    %176 = memref.load %arg2[%c38] : memref<319xf32, #tpu.memory_space<smem>>
    %177 = vector.broadcast %176 : f32 to vector<16x16xf32>
    %178 = arith.mulf %43, %177 : vector<16x16xf32>
    %179 = arith.addf %175, %178 : vector<16x16xf32>
    %c70 = arith.constant 70 : index
    %180 = memref.load %arg2[%c70] : memref<319xf32, #tpu.memory_space<smem>>
    %181 = vector.broadcast %180 : f32 to vector<16x16xf32>
    %182 = arith.mulf %53, %181 : vector<16x16xf32>
    %183 = arith.addf %179, %182 : vector<16x16xf32>
    %184 = vector.extract_strided_slice %18 {offsets = [3, 0], sizes = [1, 16], strides = [1, 1]} : vector<32x16xf32> to vector<1x16xf32>
    %185 = vector.extract_strided_slice %17 {offsets = [0, 3], sizes = [16, 1], strides = [1, 1]} : vector<16x32xf32> to vector<16x1xf32>
    %186 = vector.broadcast %184 : vector<1x16xf32> to vector<16x16xf32>
    %187 = vector.broadcast %185 : vector<16x1xf32> to vector<16x16xf32>
    %188 = arith.subf %186, %187 : vector<16x16xf32>
    %189 = arith.addf %183, %188 : vector<16x16xf32>
    %c102 = arith.constant 102 : index
    %190 = memref.load %arg2[%c102] : memref<319xf32, #tpu.memory_space<smem>>
    %191 = vector.broadcast %190 : f32 to vector<16x16xf32>
    %192 = arith.mulf %189, %191 : vector<16x16xf32>
    %c134 = arith.constant 134 : index
    %193 = memref.load %arg2[%c134] : memref<319xf32, #tpu.memory_space<smem>>
    %194 = vector.broadcast %193 : f32 to vector<16x16xf32>
    %195 = arith.addf %192, %194 : vector<16x16xf32>
    %cst_21 = arith.constant 0.000000e+00 : f32
    %196 = vector.broadcast %cst_21 : f32 to vector<16x16xf32>
    %197 = arith.maximumf %195, %196 : vector<16x16xf32>
    %c175 = arith.constant 175 : index
    %198 = memref.load %arg2[%c175] : memref<319xf32, #tpu.memory_space<smem>>
    %199 = vector.broadcast %198 : f32 to vector<16x16xf32>
    %200 = arith.mulf %197, %199 : vector<16x16xf32>
    %201 = arith.addf %160, %200 : vector<16x16xf32>
    %c176 = arith.constant 176 : index
    %202 = memref.load %arg2[%c176] : memref<319xf32, #tpu.memory_space<smem>>
    %203 = vector.broadcast %202 : f32 to vector<16x16xf32>
    %204 = arith.mulf %197, %203 : vector<16x16xf32>
    %205 = arith.addf %164, %204 : vector<16x16xf32>
    %c177 = arith.constant 177 : index
    %206 = memref.load %arg2[%c177] : memref<319xf32, #tpu.memory_space<smem>>
    %207 = vector.broadcast %206 : f32 to vector<16x16xf32>
    %208 = arith.mulf %197, %207 : vector<16x16xf32>
    %209 = arith.addf %168, %208 : vector<16x16xf32>
    %c178 = arith.constant 178 : index
    %210 = memref.load %arg2[%c178] : memref<319xf32, #tpu.memory_space<smem>>
    %211 = vector.broadcast %210 : f32 to vector<16x16xf32>
    %212 = arith.mulf %197, %211 : vector<16x16xf32>
    %213 = arith.addf %172, %212 : vector<16x16xf32>
    %c7 = arith.constant 7 : index
    %214 = memref.load %arg2[%c7] : memref<319xf32, #tpu.memory_space<smem>>
    %215 = vector.broadcast %214 : f32 to vector<16x16xf32>
    %216 = arith.mulf %33, %215 : vector<16x16xf32>
    %c39 = arith.constant 39 : index
    %217 = memref.load %arg2[%c39] : memref<319xf32, #tpu.memory_space<smem>>
    %218 = vector.broadcast %217 : f32 to vector<16x16xf32>
    %219 = arith.mulf %43, %218 : vector<16x16xf32>
    %220 = arith.addf %216, %219 : vector<16x16xf32>
    %c71 = arith.constant 71 : index
    %221 = memref.load %arg2[%c71] : memref<319xf32, #tpu.memory_space<smem>>
    %222 = vector.broadcast %221 : f32 to vector<16x16xf32>
    %223 = arith.mulf %53, %222 : vector<16x16xf32>
    %224 = arith.addf %220, %223 : vector<16x16xf32>
    %225 = vector.extract_strided_slice %18 {offsets = [4, 0], sizes = [1, 16], strides = [1, 1]} : vector<32x16xf32> to vector<1x16xf32>
    %226 = vector.extract_strided_slice %17 {offsets = [0, 4], sizes = [16, 1], strides = [1, 1]} : vector<16x32xf32> to vector<16x1xf32>
    %227 = vector.broadcast %225 : vector<1x16xf32> to vector<16x16xf32>
    %228 = vector.broadcast %226 : vector<16x1xf32> to vector<16x16xf32>
    %229 = arith.subf %227, %228 : vector<16x16xf32>
    %230 = arith.addf %224, %229 : vector<16x16xf32>
    %c103 = arith.constant 103 : index
    %231 = memref.load %arg2[%c103] : memref<319xf32, #tpu.memory_space<smem>>
    %232 = vector.broadcast %231 : f32 to vector<16x16xf32>
    %233 = arith.mulf %230, %232 : vector<16x16xf32>
    %c135 = arith.constant 135 : index
    %234 = memref.load %arg2[%c135] : memref<319xf32, #tpu.memory_space<smem>>
    %235 = vector.broadcast %234 : f32 to vector<16x16xf32>
    %236 = arith.addf %233, %235 : vector<16x16xf32>
    %cst_22 = arith.constant 0.000000e+00 : f32
    %237 = vector.broadcast %cst_22 : f32 to vector<16x16xf32>
    %238 = arith.maximumf %236, %237 : vector<16x16xf32>
    %c179 = arith.constant 179 : index
    %239 = memref.load %arg2[%c179] : memref<319xf32, #tpu.memory_space<smem>>
    %240 = vector.broadcast %239 : f32 to vector<16x16xf32>
    %241 = arith.mulf %238, %240 : vector<16x16xf32>
    %242 = arith.addf %201, %241 : vector<16x16xf32>
    %c180 = arith.constant 180 : index
    %243 = memref.load %arg2[%c180] : memref<319xf32, #tpu.memory_space<smem>>
    %244 = vector.broadcast %243 : f32 to vector<16x16xf32>
    %245 = arith.mulf %238, %244 : vector<16x16xf32>
    %246 = arith.addf %205, %245 : vector<16x16xf32>
    %c181 = arith.constant 181 : index
    %247 = memref.load %arg2[%c181] : memref<319xf32, #tpu.memory_space<smem>>
    %248 = vector.broadcast %247 : f32 to vector<16x16xf32>
    %249 = arith.mulf %238, %248 : vector<16x16xf32>
    %250 = arith.addf %209, %249 : vector<16x16xf32>
    %c182 = arith.constant 182 : index
    %251 = memref.load %arg2[%c182] : memref<319xf32, #tpu.memory_space<smem>>
    %252 = vector.broadcast %251 : f32 to vector<16x16xf32>
    %253 = arith.mulf %238, %252 : vector<16x16xf32>
    %254 = arith.addf %213, %253 : vector<16x16xf32>
    %c8 = arith.constant 8 : index
    %255 = memref.load %arg2[%c8] : memref<319xf32, #tpu.memory_space<smem>>
    %256 = vector.broadcast %255 : f32 to vector<16x16xf32>
    %257 = arith.mulf %33, %256 : vector<16x16xf32>
    %c40 = arith.constant 40 : index
    %258 = memref.load %arg2[%c40] : memref<319xf32, #tpu.memory_space<smem>>
    %259 = vector.broadcast %258 : f32 to vector<16x16xf32>
    %260 = arith.mulf %43, %259 : vector<16x16xf32>
    %261 = arith.addf %257, %260 : vector<16x16xf32>
    %c72 = arith.constant 72 : index
    %262 = memref.load %arg2[%c72] : memref<319xf32, #tpu.memory_space<smem>>
    %263 = vector.broadcast %262 : f32 to vector<16x16xf32>
    %264 = arith.mulf %53, %263 : vector<16x16xf32>
    %265 = arith.addf %261, %264 : vector<16x16xf32>
    %266 = vector.extract_strided_slice %18 {offsets = [5, 0], sizes = [1, 16], strides = [1, 1]} : vector<32x16xf32> to vector<1x16xf32>
    %267 = vector.extract_strided_slice %17 {offsets = [0, 5], sizes = [16, 1], strides = [1, 1]} : vector<16x32xf32> to vector<16x1xf32>
    %268 = vector.broadcast %266 : vector<1x16xf32> to vector<16x16xf32>
    %269 = vector.broadcast %267 : vector<16x1xf32> to vector<16x16xf32>
    %270 = arith.subf %268, %269 : vector<16x16xf32>
    %271 = arith.addf %265, %270 : vector<16x16xf32>
    %c104 = arith.constant 104 : index
    %272 = memref.load %arg2[%c104] : memref<319xf32, #tpu.memory_space<smem>>
    %273 = vector.broadcast %272 : f32 to vector<16x16xf32>
    %274 = arith.mulf %271, %273 : vector<16x16xf32>
    %c136 = arith.constant 136 : index
    %275 = memref.load %arg2[%c136] : memref<319xf32, #tpu.memory_space<smem>>
    %276 = vector.broadcast %275 : f32 to vector<16x16xf32>
    %277 = arith.addf %274, %276 : vector<16x16xf32>
    %cst_23 = arith.constant 0.000000e+00 : f32
    %278 = vector.broadcast %cst_23 : f32 to vector<16x16xf32>
    %279 = arith.maximumf %277, %278 : vector<16x16xf32>
    %c183 = arith.constant 183 : index
    %280 = memref.load %arg2[%c183] : memref<319xf32, #tpu.memory_space<smem>>
    %281 = vector.broadcast %280 : f32 to vector<16x16xf32>
    %282 = arith.mulf %279, %281 : vector<16x16xf32>
    %283 = arith.addf %242, %282 : vector<16x16xf32>
    %c184 = arith.constant 184 : index
    %284 = memref.load %arg2[%c184] : memref<319xf32, #tpu.memory_space<smem>>
    %285 = vector.broadcast %284 : f32 to vector<16x16xf32>
    %286 = arith.mulf %279, %285 : vector<16x16xf32>
    %287 = arith.addf %246, %286 : vector<16x16xf32>
    %c185 = arith.constant 185 : index
    %288 = memref.load %arg2[%c185] : memref<319xf32, #tpu.memory_space<smem>>
    %289 = vector.broadcast %288 : f32 to vector<16x16xf32>
    %290 = arith.mulf %279, %289 : vector<16x16xf32>
    %291 = arith.addf %250, %290 : vector<16x16xf32>
    %c186 = arith.constant 186 : index
    %292 = memref.load %arg2[%c186] : memref<319xf32, #tpu.memory_space<smem>>
    %293 = vector.broadcast %292 : f32 to vector<16x16xf32>
    %294 = arith.mulf %279, %293 : vector<16x16xf32>
    %295 = arith.addf %254, %294 : vector<16x16xf32>
    %c9 = arith.constant 9 : index
    %296 = memref.load %arg2[%c9] : memref<319xf32, #tpu.memory_space<smem>>
    %297 = vector.broadcast %296 : f32 to vector<16x16xf32>
    %298 = arith.mulf %33, %297 : vector<16x16xf32>
    %c41 = arith.constant 41 : index
    %299 = memref.load %arg2[%c41] : memref<319xf32, #tpu.memory_space<smem>>
    %300 = vector.broadcast %299 : f32 to vector<16x16xf32>
    %301 = arith.mulf %43, %300 : vector<16x16xf32>
    %302 = arith.addf %298, %301 : vector<16x16xf32>
    %c73 = arith.constant 73 : index
    %303 = memref.load %arg2[%c73] : memref<319xf32, #tpu.memory_space<smem>>
    %304 = vector.broadcast %303 : f32 to vector<16x16xf32>
    %305 = arith.mulf %53, %304 : vector<16x16xf32>
    %306 = arith.addf %302, %305 : vector<16x16xf32>
    %307 = vector.extract_strided_slice %18 {offsets = [6, 0], sizes = [1, 16], strides = [1, 1]} : vector<32x16xf32> to vector<1x16xf32>
    %308 = vector.extract_strided_slice %17 {offsets = [0, 6], sizes = [16, 1], strides = [1, 1]} : vector<16x32xf32> to vector<16x1xf32>
    %309 = vector.broadcast %307 : vector<1x16xf32> to vector<16x16xf32>
    %310 = vector.broadcast %308 : vector<16x1xf32> to vector<16x16xf32>
    %311 = arith.subf %309, %310 : vector<16x16xf32>
    %312 = arith.addf %306, %311 : vector<16x16xf32>
    %c105 = arith.constant 105 : index
    %313 = memref.load %arg2[%c105] : memref<319xf32, #tpu.memory_space<smem>>
    %314 = vector.broadcast %313 : f32 to vector<16x16xf32>
    %315 = arith.mulf %312, %314 : vector<16x16xf32>
    %c137 = arith.constant 137 : index
    %316 = memref.load %arg2[%c137] : memref<319xf32, #tpu.memory_space<smem>>
    %317 = vector.broadcast %316 : f32 to vector<16x16xf32>
    %318 = arith.addf %315, %317 : vector<16x16xf32>
    %cst_24 = arith.constant 0.000000e+00 : f32
    %319 = vector.broadcast %cst_24 : f32 to vector<16x16xf32>
    %320 = arith.maximumf %318, %319 : vector<16x16xf32>
    %c187 = arith.constant 187 : index
    %321 = memref.load %arg2[%c187] : memref<319xf32, #tpu.memory_space<smem>>
    %322 = vector.broadcast %321 : f32 to vector<16x16xf32>
    %323 = arith.mulf %320, %322 : vector<16x16xf32>
    %324 = arith.addf %283, %323 : vector<16x16xf32>
    %c188 = arith.constant 188 : index
    %325 = memref.load %arg2[%c188] : memref<319xf32, #tpu.memory_space<smem>>
    %326 = vector.broadcast %325 : f32 to vector<16x16xf32>
    %327 = arith.mulf %320, %326 : vector<16x16xf32>
    %328 = arith.addf %287, %327 : vector<16x16xf32>
    %c189 = arith.constant 189 : index
    %329 = memref.load %arg2[%c189] : memref<319xf32, #tpu.memory_space<smem>>
    %330 = vector.broadcast %329 : f32 to vector<16x16xf32>
    %331 = arith.mulf %320, %330 : vector<16x16xf32>
    %332 = arith.addf %291, %331 : vector<16x16xf32>
    %c190 = arith.constant 190 : index
    %333 = memref.load %arg2[%c190] : memref<319xf32, #tpu.memory_space<smem>>
    %334 = vector.broadcast %333 : f32 to vector<16x16xf32>
    %335 = arith.mulf %320, %334 : vector<16x16xf32>
    %336 = arith.addf %295, %335 : vector<16x16xf32>
    %c10 = arith.constant 10 : index
    %337 = memref.load %arg2[%c10] : memref<319xf32, #tpu.memory_space<smem>>
    %338 = vector.broadcast %337 : f32 to vector<16x16xf32>
    %339 = arith.mulf %33, %338 : vector<16x16xf32>
    %c42 = arith.constant 42 : index
    %340 = memref.load %arg2[%c42] : memref<319xf32, #tpu.memory_space<smem>>
    %341 = vector.broadcast %340 : f32 to vector<16x16xf32>
    %342 = arith.mulf %43, %341 : vector<16x16xf32>
    %343 = arith.addf %339, %342 : vector<16x16xf32>
    %c74 = arith.constant 74 : index
    %344 = memref.load %arg2[%c74] : memref<319xf32, #tpu.memory_space<smem>>
    %345 = vector.broadcast %344 : f32 to vector<16x16xf32>
    %346 = arith.mulf %53, %345 : vector<16x16xf32>
    %347 = arith.addf %343, %346 : vector<16x16xf32>
    %348 = vector.extract_strided_slice %18 {offsets = [7, 0], sizes = [1, 16], strides = [1, 1]} : vector<32x16xf32> to vector<1x16xf32>
    %349 = vector.extract_strided_slice %17 {offsets = [0, 7], sizes = [16, 1], strides = [1, 1]} : vector<16x32xf32> to vector<16x1xf32>
    %350 = vector.broadcast %348 : vector<1x16xf32> to vector<16x16xf32>
    %351 = vector.broadcast %349 : vector<16x1xf32> to vector<16x16xf32>
    %352 = arith.subf %350, %351 : vector<16x16xf32>
    %353 = arith.addf %347, %352 : vector<16x16xf32>
    %c106 = arith.constant 106 : index
    %354 = memref.load %arg2[%c106] : memref<319xf32, #tpu.memory_space<smem>>
    %355 = vector.broadcast %354 : f32 to vector<16x16xf32>
    %356 = arith.mulf %353, %355 : vector<16x16xf32>
    %c138 = arith.constant 138 : index
    %357 = memref.load %arg2[%c138] : memref<319xf32, #tpu.memory_space<smem>>
    %358 = vector.broadcast %357 : f32 to vector<16x16xf32>
    %359 = arith.addf %356, %358 : vector<16x16xf32>
    %cst_25 = arith.constant 0.000000e+00 : f32
    %360 = vector.broadcast %cst_25 : f32 to vector<16x16xf32>
    %361 = arith.maximumf %359, %360 : vector<16x16xf32>
    %c191 = arith.constant 191 : index
    %362 = memref.load %arg2[%c191] : memref<319xf32, #tpu.memory_space<smem>>
    %363 = vector.broadcast %362 : f32 to vector<16x16xf32>
    %364 = arith.mulf %361, %363 : vector<16x16xf32>
    %365 = arith.addf %324, %364 : vector<16x16xf32>
    %c192 = arith.constant 192 : index
    %366 = memref.load %arg2[%c192] : memref<319xf32, #tpu.memory_space<smem>>
    %367 = vector.broadcast %366 : f32 to vector<16x16xf32>
    %368 = arith.mulf %361, %367 : vector<16x16xf32>
    %369 = arith.addf %328, %368 : vector<16x16xf32>
    %c193 = arith.constant 193 : index
    %370 = memref.load %arg2[%c193] : memref<319xf32, #tpu.memory_space<smem>>
    %371 = vector.broadcast %370 : f32 to vector<16x16xf32>
    %372 = arith.mulf %361, %371 : vector<16x16xf32>
    %373 = arith.addf %332, %372 : vector<16x16xf32>
    %c194 = arith.constant 194 : index
    %374 = memref.load %arg2[%c194] : memref<319xf32, #tpu.memory_space<smem>>
    %375 = vector.broadcast %374 : f32 to vector<16x16xf32>
    %376 = arith.mulf %361, %375 : vector<16x16xf32>
    %377 = arith.addf %336, %376 : vector<16x16xf32>
    %c11 = arith.constant 11 : index
    %378 = memref.load %arg2[%c11] : memref<319xf32, #tpu.memory_space<smem>>
    %379 = vector.broadcast %378 : f32 to vector<16x16xf32>
    %380 = arith.mulf %33, %379 : vector<16x16xf32>
    %c43 = arith.constant 43 : index
    %381 = memref.load %arg2[%c43] : memref<319xf32, #tpu.memory_space<smem>>
    %382 = vector.broadcast %381 : f32 to vector<16x16xf32>
    %383 = arith.mulf %43, %382 : vector<16x16xf32>
    %384 = arith.addf %380, %383 : vector<16x16xf32>
    %c75 = arith.constant 75 : index
    %385 = memref.load %arg2[%c75] : memref<319xf32, #tpu.memory_space<smem>>
    %386 = vector.broadcast %385 : f32 to vector<16x16xf32>
    %387 = arith.mulf %53, %386 : vector<16x16xf32>
    %388 = arith.addf %384, %387 : vector<16x16xf32>
    %389 = vector.extract_strided_slice %18 {offsets = [8, 0], sizes = [1, 16], strides = [1, 1]} : vector<32x16xf32> to vector<1x16xf32>
    %390 = vector.extract_strided_slice %17 {offsets = [0, 8], sizes = [16, 1], strides = [1, 1]} : vector<16x32xf32> to vector<16x1xf32>
    %391 = vector.broadcast %389 : vector<1x16xf32> to vector<16x16xf32>
    %392 = vector.broadcast %390 : vector<16x1xf32> to vector<16x16xf32>
    %393 = arith.subf %391, %392 : vector<16x16xf32>
    %394 = arith.addf %388, %393 : vector<16x16xf32>
    %c107 = arith.constant 107 : index
    %395 = memref.load %arg2[%c107] : memref<319xf32, #tpu.memory_space<smem>>
    %396 = vector.broadcast %395 : f32 to vector<16x16xf32>
    %397 = arith.mulf %394, %396 : vector<16x16xf32>
    %c139 = arith.constant 139 : index
    %398 = memref.load %arg2[%c139] : memref<319xf32, #tpu.memory_space<smem>>
    %399 = vector.broadcast %398 : f32 to vector<16x16xf32>
    %400 = arith.addf %397, %399 : vector<16x16xf32>
    %cst_26 = arith.constant 0.000000e+00 : f32
    %401 = vector.broadcast %cst_26 : f32 to vector<16x16xf32>
    %402 = arith.maximumf %400, %401 : vector<16x16xf32>
    %c195 = arith.constant 195 : index
    %403 = memref.load %arg2[%c195] : memref<319xf32, #tpu.memory_space<smem>>
    %404 = vector.broadcast %403 : f32 to vector<16x16xf32>
    %405 = arith.mulf %402, %404 : vector<16x16xf32>
    %406 = arith.addf %365, %405 : vector<16x16xf32>
    %c196 = arith.constant 196 : index
    %407 = memref.load %arg2[%c196] : memref<319xf32, #tpu.memory_space<smem>>
    %408 = vector.broadcast %407 : f32 to vector<16x16xf32>
    %409 = arith.mulf %402, %408 : vector<16x16xf32>
    %410 = arith.addf %369, %409 : vector<16x16xf32>
    %c197 = arith.constant 197 : index
    %411 = memref.load %arg2[%c197] : memref<319xf32, #tpu.memory_space<smem>>
    %412 = vector.broadcast %411 : f32 to vector<16x16xf32>
    %413 = arith.mulf %402, %412 : vector<16x16xf32>
    %414 = arith.addf %373, %413 : vector<16x16xf32>
    %c198 = arith.constant 198 : index
    %415 = memref.load %arg2[%c198] : memref<319xf32, #tpu.memory_space<smem>>
    %416 = vector.broadcast %415 : f32 to vector<16x16xf32>
    %417 = arith.mulf %402, %416 : vector<16x16xf32>
    %418 = arith.addf %377, %417 : vector<16x16xf32>
    %c12 = arith.constant 12 : index
    %419 = memref.load %arg2[%c12] : memref<319xf32, #tpu.memory_space<smem>>
    %420 = vector.broadcast %419 : f32 to vector<16x16xf32>
    %421 = arith.mulf %33, %420 : vector<16x16xf32>
    %c44 = arith.constant 44 : index
    %422 = memref.load %arg2[%c44] : memref<319xf32, #tpu.memory_space<smem>>
    %423 = vector.broadcast %422 : f32 to vector<16x16xf32>
    %424 = arith.mulf %43, %423 : vector<16x16xf32>
    %425 = arith.addf %421, %424 : vector<16x16xf32>
    %c76 = arith.constant 76 : index
    %426 = memref.load %arg2[%c76] : memref<319xf32, #tpu.memory_space<smem>>
    %427 = vector.broadcast %426 : f32 to vector<16x16xf32>
    %428 = arith.mulf %53, %427 : vector<16x16xf32>
    %429 = arith.addf %425, %428 : vector<16x16xf32>
    %430 = vector.extract_strided_slice %18 {offsets = [9, 0], sizes = [1, 16], strides = [1, 1]} : vector<32x16xf32> to vector<1x16xf32>
    %431 = vector.extract_strided_slice %17 {offsets = [0, 9], sizes = [16, 1], strides = [1, 1]} : vector<16x32xf32> to vector<16x1xf32>
    %432 = vector.broadcast %430 : vector<1x16xf32> to vector<16x16xf32>
    %433 = vector.broadcast %431 : vector<16x1xf32> to vector<16x16xf32>
    %434 = arith.subf %432, %433 : vector<16x16xf32>
    %435 = arith.addf %429, %434 : vector<16x16xf32>
    %c108 = arith.constant 108 : index
    %436 = memref.load %arg2[%c108] : memref<319xf32, #tpu.memory_space<smem>>
    %437 = vector.broadcast %436 : f32 to vector<16x16xf32>
    %438 = arith.mulf %435, %437 : vector<16x16xf32>
    %c140 = arith.constant 140 : index
    %439 = memref.load %arg2[%c140] : memref<319xf32, #tpu.memory_space<smem>>
    %440 = vector.broadcast %439 : f32 to vector<16x16xf32>
    %441 = arith.addf %438, %440 : vector<16x16xf32>
    %cst_27 = arith.constant 0.000000e+00 : f32
    %442 = vector.broadcast %cst_27 : f32 to vector<16x16xf32>
    %443 = arith.maximumf %441, %442 : vector<16x16xf32>
    %c199 = arith.constant 199 : index
    %444 = memref.load %arg2[%c199] : memref<319xf32, #tpu.memory_space<smem>>
    %445 = vector.broadcast %444 : f32 to vector<16x16xf32>
    %446 = arith.mulf %443, %445 : vector<16x16xf32>
    %447 = arith.addf %406, %446 : vector<16x16xf32>
    %c200 = arith.constant 200 : index
    %448 = memref.load %arg2[%c200] : memref<319xf32, #tpu.memory_space<smem>>
    %449 = vector.broadcast %448 : f32 to vector<16x16xf32>
    %450 = arith.mulf %443, %449 : vector<16x16xf32>
    %451 = arith.addf %410, %450 : vector<16x16xf32>
    %c201 = arith.constant 201 : index
    %452 = memref.load %arg2[%c201] : memref<319xf32, #tpu.memory_space<smem>>
    %453 = vector.broadcast %452 : f32 to vector<16x16xf32>
    %454 = arith.mulf %443, %453 : vector<16x16xf32>
    %455 = arith.addf %414, %454 : vector<16x16xf32>
    %c202 = arith.constant 202 : index
    %456 = memref.load %arg2[%c202] : memref<319xf32, #tpu.memory_space<smem>>
    %457 = vector.broadcast %456 : f32 to vector<16x16xf32>
    %458 = arith.mulf %443, %457 : vector<16x16xf32>
    %459 = arith.addf %418, %458 : vector<16x16xf32>
    %c13 = arith.constant 13 : index
    %460 = memref.load %arg2[%c13] : memref<319xf32, #tpu.memory_space<smem>>
    %461 = vector.broadcast %460 : f32 to vector<16x16xf32>
    %462 = arith.mulf %33, %461 : vector<16x16xf32>
    %c45 = arith.constant 45 : index
    %463 = memref.load %arg2[%c45] : memref<319xf32, #tpu.memory_space<smem>>
    %464 = vector.broadcast %463 : f32 to vector<16x16xf32>
    %465 = arith.mulf %43, %464 : vector<16x16xf32>
    %466 = arith.addf %462, %465 : vector<16x16xf32>
    %c77 = arith.constant 77 : index
    %467 = memref.load %arg2[%c77] : memref<319xf32, #tpu.memory_space<smem>>
    %468 = vector.broadcast %467 : f32 to vector<16x16xf32>
    %469 = arith.mulf %53, %468 : vector<16x16xf32>
    %470 = arith.addf %466, %469 : vector<16x16xf32>
    %471 = vector.extract_strided_slice %18 {offsets = [10, 0], sizes = [1, 16], strides = [1, 1]} : vector<32x16xf32> to vector<1x16xf32>
    %472 = vector.extract_strided_slice %17 {offsets = [0, 10], sizes = [16, 1], strides = [1, 1]} : vector<16x32xf32> to vector<16x1xf32>
    %473 = vector.broadcast %471 : vector<1x16xf32> to vector<16x16xf32>
    %474 = vector.broadcast %472 : vector<16x1xf32> to vector<16x16xf32>
    %475 = arith.subf %473, %474 : vector<16x16xf32>
    %476 = arith.addf %470, %475 : vector<16x16xf32>
    %c109 = arith.constant 109 : index
    %477 = memref.load %arg2[%c109] : memref<319xf32, #tpu.memory_space<smem>>
    %478 = vector.broadcast %477 : f32 to vector<16x16xf32>
    %479 = arith.mulf %476, %478 : vector<16x16xf32>
    %c141 = arith.constant 141 : index
    %480 = memref.load %arg2[%c141] : memref<319xf32, #tpu.memory_space<smem>>
    %481 = vector.broadcast %480 : f32 to vector<16x16xf32>
    %482 = arith.addf %479, %481 : vector<16x16xf32>
    %cst_28 = arith.constant 0.000000e+00 : f32
    %483 = vector.broadcast %cst_28 : f32 to vector<16x16xf32>
    %484 = arith.maximumf %482, %483 : vector<16x16xf32>
    %c203 = arith.constant 203 : index
    %485 = memref.load %arg2[%c203] : memref<319xf32, #tpu.memory_space<smem>>
    %486 = vector.broadcast %485 : f32 to vector<16x16xf32>
    %487 = arith.mulf %484, %486 : vector<16x16xf32>
    %488 = arith.addf %447, %487 : vector<16x16xf32>
    %c204 = arith.constant 204 : index
    %489 = memref.load %arg2[%c204] : memref<319xf32, #tpu.memory_space<smem>>
    %490 = vector.broadcast %489 : f32 to vector<16x16xf32>
    %491 = arith.mulf %484, %490 : vector<16x16xf32>
    %492 = arith.addf %451, %491 : vector<16x16xf32>
    %c205 = arith.constant 205 : index
    %493 = memref.load %arg2[%c205] : memref<319xf32, #tpu.memory_space<smem>>
    %494 = vector.broadcast %493 : f32 to vector<16x16xf32>
    %495 = arith.mulf %484, %494 : vector<16x16xf32>
    %496 = arith.addf %455, %495 : vector<16x16xf32>
    %c206 = arith.constant 206 : index
    %497 = memref.load %arg2[%c206] : memref<319xf32, #tpu.memory_space<smem>>
    %498 = vector.broadcast %497 : f32 to vector<16x16xf32>
    %499 = arith.mulf %484, %498 : vector<16x16xf32>
    %500 = arith.addf %459, %499 : vector<16x16xf32>
    %c14 = arith.constant 14 : index
    %501 = memref.load %arg2[%c14] : memref<319xf32, #tpu.memory_space<smem>>
    %502 = vector.broadcast %501 : f32 to vector<16x16xf32>
    %503 = arith.mulf %33, %502 : vector<16x16xf32>
    %c46 = arith.constant 46 : index
    %504 = memref.load %arg2[%c46] : memref<319xf32, #tpu.memory_space<smem>>
    %505 = vector.broadcast %504 : f32 to vector<16x16xf32>
    %506 = arith.mulf %43, %505 : vector<16x16xf32>
    %507 = arith.addf %503, %506 : vector<16x16xf32>
    %c78 = arith.constant 78 : index
    %508 = memref.load %arg2[%c78] : memref<319xf32, #tpu.memory_space<smem>>
    %509 = vector.broadcast %508 : f32 to vector<16x16xf32>
    %510 = arith.mulf %53, %509 : vector<16x16xf32>
    %511 = arith.addf %507, %510 : vector<16x16xf32>
    %512 = vector.extract_strided_slice %18 {offsets = [11, 0], sizes = [1, 16], strides = [1, 1]} : vector<32x16xf32> to vector<1x16xf32>
    %513 = vector.extract_strided_slice %17 {offsets = [0, 11], sizes = [16, 1], strides = [1, 1]} : vector<16x32xf32> to vector<16x1xf32>
    %514 = vector.broadcast %512 : vector<1x16xf32> to vector<16x16xf32>
    %515 = vector.broadcast %513 : vector<16x1xf32> to vector<16x16xf32>
    %516 = arith.subf %514, %515 : vector<16x16xf32>
    %517 = arith.addf %511, %516 : vector<16x16xf32>
    %c110 = arith.constant 110 : index
    %518 = memref.load %arg2[%c110] : memref<319xf32, #tpu.memory_space<smem>>
    %519 = vector.broadcast %518 : f32 to vector<16x16xf32>
    %520 = arith.mulf %517, %519 : vector<16x16xf32>
    %c142 = arith.constant 142 : index
    %521 = memref.load %arg2[%c142] : memref<319xf32, #tpu.memory_space<smem>>
    %522 = vector.broadcast %521 : f32 to vector<16x16xf32>
    %523 = arith.addf %520, %522 : vector<16x16xf32>
    %cst_29 = arith.constant 0.000000e+00 : f32
    %524 = vector.broadcast %cst_29 : f32 to vector<16x16xf32>
    %525 = arith.maximumf %523, %524 : vector<16x16xf32>
    %c207 = arith.constant 207 : index
    %526 = memref.load %arg2[%c207] : memref<319xf32, #tpu.memory_space<smem>>
    %527 = vector.broadcast %526 : f32 to vector<16x16xf32>
    %528 = arith.mulf %525, %527 : vector<16x16xf32>
    %529 = arith.addf %488, %528 : vector<16x16xf32>
    %c208 = arith.constant 208 : index
    %530 = memref.load %arg2[%c208] : memref<319xf32, #tpu.memory_space<smem>>
    %531 = vector.broadcast %530 : f32 to vector<16x16xf32>
    %532 = arith.mulf %525, %531 : vector<16x16xf32>
    %533 = arith.addf %492, %532 : vector<16x16xf32>
    %c209 = arith.constant 209 : index
    %534 = memref.load %arg2[%c209] : memref<319xf32, #tpu.memory_space<smem>>
    %535 = vector.broadcast %534 : f32 to vector<16x16xf32>
    %536 = arith.mulf %525, %535 : vector<16x16xf32>
    %537 = arith.addf %496, %536 : vector<16x16xf32>
    %c210 = arith.constant 210 : index
    %538 = memref.load %arg2[%c210] : memref<319xf32, #tpu.memory_space<smem>>
    %539 = vector.broadcast %538 : f32 to vector<16x16xf32>
    %540 = arith.mulf %525, %539 : vector<16x16xf32>
    %541 = arith.addf %500, %540 : vector<16x16xf32>
    %c15 = arith.constant 15 : index
    %542 = memref.load %arg2[%c15] : memref<319xf32, #tpu.memory_space<smem>>
    %543 = vector.broadcast %542 : f32 to vector<16x16xf32>
    %544 = arith.mulf %33, %543 : vector<16x16xf32>
    %c47 = arith.constant 47 : index
    %545 = memref.load %arg2[%c47] : memref<319xf32, #tpu.memory_space<smem>>
    %546 = vector.broadcast %545 : f32 to vector<16x16xf32>
    %547 = arith.mulf %43, %546 : vector<16x16xf32>
    %548 = arith.addf %544, %547 : vector<16x16xf32>
    %c79 = arith.constant 79 : index
    %549 = memref.load %arg2[%c79] : memref<319xf32, #tpu.memory_space<smem>>
    %550 = vector.broadcast %549 : f32 to vector<16x16xf32>
    %551 = arith.mulf %53, %550 : vector<16x16xf32>
    %552 = arith.addf %548, %551 : vector<16x16xf32>
    %553 = vector.extract_strided_slice %18 {offsets = [12, 0], sizes = [1, 16], strides = [1, 1]} : vector<32x16xf32> to vector<1x16xf32>
    %554 = vector.extract_strided_slice %17 {offsets = [0, 12], sizes = [16, 1], strides = [1, 1]} : vector<16x32xf32> to vector<16x1xf32>
    %555 = vector.broadcast %553 : vector<1x16xf32> to vector<16x16xf32>
    %556 = vector.broadcast %554 : vector<16x1xf32> to vector<16x16xf32>
    %557 = arith.subf %555, %556 : vector<16x16xf32>
    %558 = arith.addf %552, %557 : vector<16x16xf32>
    %c111 = arith.constant 111 : index
    %559 = memref.load %arg2[%c111] : memref<319xf32, #tpu.memory_space<smem>>
    %560 = vector.broadcast %559 : f32 to vector<16x16xf32>
    %561 = arith.mulf %558, %560 : vector<16x16xf32>
    %c143 = arith.constant 143 : index
    %562 = memref.load %arg2[%c143] : memref<319xf32, #tpu.memory_space<smem>>
    %563 = vector.broadcast %562 : f32 to vector<16x16xf32>
    %564 = arith.addf %561, %563 : vector<16x16xf32>
    %cst_30 = arith.constant 0.000000e+00 : f32
    %565 = vector.broadcast %cst_30 : f32 to vector<16x16xf32>
    %566 = arith.maximumf %564, %565 : vector<16x16xf32>
    %c211 = arith.constant 211 : index
    %567 = memref.load %arg2[%c211] : memref<319xf32, #tpu.memory_space<smem>>
    %568 = vector.broadcast %567 : f32 to vector<16x16xf32>
    %569 = arith.mulf %566, %568 : vector<16x16xf32>
    %570 = arith.addf %529, %569 : vector<16x16xf32>
    %c212 = arith.constant 212 : index
    %571 = memref.load %arg2[%c212] : memref<319xf32, #tpu.memory_space<smem>>
    %572 = vector.broadcast %571 : f32 to vector<16x16xf32>
    %573 = arith.mulf %566, %572 : vector<16x16xf32>
    %574 = arith.addf %533, %573 : vector<16x16xf32>
    %c213 = arith.constant 213 : index
    %575 = memref.load %arg2[%c213] : memref<319xf32, #tpu.memory_space<smem>>
    %576 = vector.broadcast %575 : f32 to vector<16x16xf32>
    %577 = arith.mulf %566, %576 : vector<16x16xf32>
    %578 = arith.addf %537, %577 : vector<16x16xf32>
    %c214 = arith.constant 214 : index
    %579 = memref.load %arg2[%c214] : memref<319xf32, #tpu.memory_space<smem>>
    %580 = vector.broadcast %579 : f32 to vector<16x16xf32>
    %581 = arith.mulf %566, %580 : vector<16x16xf32>
    %582 = arith.addf %541, %581 : vector<16x16xf32>
    %c16 = arith.constant 16 : index
    %583 = memref.load %arg2[%c16] : memref<319xf32, #tpu.memory_space<smem>>
    %584 = vector.broadcast %583 : f32 to vector<16x16xf32>
    %585 = arith.mulf %33, %584 : vector<16x16xf32>
    %c48 = arith.constant 48 : index
    %586 = memref.load %arg2[%c48] : memref<319xf32, #tpu.memory_space<smem>>
    %587 = vector.broadcast %586 : f32 to vector<16x16xf32>
    %588 = arith.mulf %43, %587 : vector<16x16xf32>
    %589 = arith.addf %585, %588 : vector<16x16xf32>
    %c80 = arith.constant 80 : index
    %590 = memref.load %arg2[%c80] : memref<319xf32, #tpu.memory_space<smem>>
    %591 = vector.broadcast %590 : f32 to vector<16x16xf32>
    %592 = arith.mulf %53, %591 : vector<16x16xf32>
    %593 = arith.addf %589, %592 : vector<16x16xf32>
    %594 = vector.extract_strided_slice %18 {offsets = [13, 0], sizes = [1, 16], strides = [1, 1]} : vector<32x16xf32> to vector<1x16xf32>
    %595 = vector.extract_strided_slice %17 {offsets = [0, 13], sizes = [16, 1], strides = [1, 1]} : vector<16x32xf32> to vector<16x1xf32>
    %596 = vector.broadcast %594 : vector<1x16xf32> to vector<16x16xf32>
    %597 = vector.broadcast %595 : vector<16x1xf32> to vector<16x16xf32>
    %598 = arith.subf %596, %597 : vector<16x16xf32>
    %599 = arith.addf %593, %598 : vector<16x16xf32>
    %c112 = arith.constant 112 : index
    %600 = memref.load %arg2[%c112] : memref<319xf32, #tpu.memory_space<smem>>
    %601 = vector.broadcast %600 : f32 to vector<16x16xf32>
    %602 = arith.mulf %599, %601 : vector<16x16xf32>
    %c144 = arith.constant 144 : index
    %603 = memref.load %arg2[%c144] : memref<319xf32, #tpu.memory_space<smem>>
    %604 = vector.broadcast %603 : f32 to vector<16x16xf32>
    %605 = arith.addf %602, %604 : vector<16x16xf32>
    %cst_31 = arith.constant 0.000000e+00 : f32
    %606 = vector.broadcast %cst_31 : f32 to vector<16x16xf32>
    %607 = arith.maximumf %605, %606 : vector<16x16xf32>
    %c215 = arith.constant 215 : index
    %608 = memref.load %arg2[%c215] : memref<319xf32, #tpu.memory_space<smem>>
    %609 = vector.broadcast %608 : f32 to vector<16x16xf32>
    %610 = arith.mulf %607, %609 : vector<16x16xf32>
    %611 = arith.addf %570, %610 : vector<16x16xf32>
    %c216 = arith.constant 216 : index
    %612 = memref.load %arg2[%c216] : memref<319xf32, #tpu.memory_space<smem>>
    %613 = vector.broadcast %612 : f32 to vector<16x16xf32>
    %614 = arith.mulf %607, %613 : vector<16x16xf32>
    %615 = arith.addf %574, %614 : vector<16x16xf32>
    %c217 = arith.constant 217 : index
    %616 = memref.load %arg2[%c217] : memref<319xf32, #tpu.memory_space<smem>>
    %617 = vector.broadcast %616 : f32 to vector<16x16xf32>
    %618 = arith.mulf %607, %617 : vector<16x16xf32>
    %619 = arith.addf %578, %618 : vector<16x16xf32>
    %c218 = arith.constant 218 : index
    %620 = memref.load %arg2[%c218] : memref<319xf32, #tpu.memory_space<smem>>
    %621 = vector.broadcast %620 : f32 to vector<16x16xf32>
    %622 = arith.mulf %607, %621 : vector<16x16xf32>
    %623 = arith.addf %582, %622 : vector<16x16xf32>
    %c17 = arith.constant 17 : index
    %624 = memref.load %arg2[%c17] : memref<319xf32, #tpu.memory_space<smem>>
    %625 = vector.broadcast %624 : f32 to vector<16x16xf32>
    %626 = arith.mulf %33, %625 : vector<16x16xf32>
    %c49 = arith.constant 49 : index
    %627 = memref.load %arg2[%c49] : memref<319xf32, #tpu.memory_space<smem>>
    %628 = vector.broadcast %627 : f32 to vector<16x16xf32>
    %629 = arith.mulf %43, %628 : vector<16x16xf32>
    %630 = arith.addf %626, %629 : vector<16x16xf32>
    %c81 = arith.constant 81 : index
    %631 = memref.load %arg2[%c81] : memref<319xf32, #tpu.memory_space<smem>>
    %632 = vector.broadcast %631 : f32 to vector<16x16xf32>
    %633 = arith.mulf %53, %632 : vector<16x16xf32>
    %634 = arith.addf %630, %633 : vector<16x16xf32>
    %635 = vector.extract_strided_slice %18 {offsets = [14, 0], sizes = [1, 16], strides = [1, 1]} : vector<32x16xf32> to vector<1x16xf32>
    %636 = vector.extract_strided_slice %17 {offsets = [0, 14], sizes = [16, 1], strides = [1, 1]} : vector<16x32xf32> to vector<16x1xf32>
    %637 = vector.broadcast %635 : vector<1x16xf32> to vector<16x16xf32>
    %638 = vector.broadcast %636 : vector<16x1xf32> to vector<16x16xf32>
    %639 = arith.subf %637, %638 : vector<16x16xf32>
    %640 = arith.addf %634, %639 : vector<16x16xf32>
    %c113 = arith.constant 113 : index
    %641 = memref.load %arg2[%c113] : memref<319xf32, #tpu.memory_space<smem>>
    %642 = vector.broadcast %641 : f32 to vector<16x16xf32>
    %643 = arith.mulf %640, %642 : vector<16x16xf32>
    %c145 = arith.constant 145 : index
    %644 = memref.load %arg2[%c145] : memref<319xf32, #tpu.memory_space<smem>>
    %645 = vector.broadcast %644 : f32 to vector<16x16xf32>
    %646 = arith.addf %643, %645 : vector<16x16xf32>
    %cst_32 = arith.constant 0.000000e+00 : f32
    %647 = vector.broadcast %cst_32 : f32 to vector<16x16xf32>
    %648 = arith.maximumf %646, %647 : vector<16x16xf32>
    %c219 = arith.constant 219 : index
    %649 = memref.load %arg2[%c219] : memref<319xf32, #tpu.memory_space<smem>>
    %650 = vector.broadcast %649 : f32 to vector<16x16xf32>
    %651 = arith.mulf %648, %650 : vector<16x16xf32>
    %652 = arith.addf %611, %651 : vector<16x16xf32>
    %c220 = arith.constant 220 : index
    %653 = memref.load %arg2[%c220] : memref<319xf32, #tpu.memory_space<smem>>
    %654 = vector.broadcast %653 : f32 to vector<16x16xf32>
    %655 = arith.mulf %648, %654 : vector<16x16xf32>
    %656 = arith.addf %615, %655 : vector<16x16xf32>
    %c221 = arith.constant 221 : index
    %657 = memref.load %arg2[%c221] : memref<319xf32, #tpu.memory_space<smem>>
    %658 = vector.broadcast %657 : f32 to vector<16x16xf32>
    %659 = arith.mulf %648, %658 : vector<16x16xf32>
    %660 = arith.addf %619, %659 : vector<16x16xf32>
    %c222 = arith.constant 222 : index
    %661 = memref.load %arg2[%c222] : memref<319xf32, #tpu.memory_space<smem>>
    %662 = vector.broadcast %661 : f32 to vector<16x16xf32>
    %663 = arith.mulf %648, %662 : vector<16x16xf32>
    %664 = arith.addf %623, %663 : vector<16x16xf32>
    %c18 = arith.constant 18 : index
    %665 = memref.load %arg2[%c18] : memref<319xf32, #tpu.memory_space<smem>>
    %666 = vector.broadcast %665 : f32 to vector<16x16xf32>
    %667 = arith.mulf %33, %666 : vector<16x16xf32>
    %c50 = arith.constant 50 : index
    %668 = memref.load %arg2[%c50] : memref<319xf32, #tpu.memory_space<smem>>
    %669 = vector.broadcast %668 : f32 to vector<16x16xf32>
    %670 = arith.mulf %43, %669 : vector<16x16xf32>
    %671 = arith.addf %667, %670 : vector<16x16xf32>
    %c82 = arith.constant 82 : index
    %672 = memref.load %arg2[%c82] : memref<319xf32, #tpu.memory_space<smem>>
    %673 = vector.broadcast %672 : f32 to vector<16x16xf32>
    %674 = arith.mulf %53, %673 : vector<16x16xf32>
    %675 = arith.addf %671, %674 : vector<16x16xf32>
    %676 = vector.extract_strided_slice %18 {offsets = [15, 0], sizes = [1, 16], strides = [1, 1]} : vector<32x16xf32> to vector<1x16xf32>
    %677 = vector.extract_strided_slice %17 {offsets = [0, 15], sizes = [16, 1], strides = [1, 1]} : vector<16x32xf32> to vector<16x1xf32>
    %678 = vector.broadcast %676 : vector<1x16xf32> to vector<16x16xf32>
    %679 = vector.broadcast %677 : vector<16x1xf32> to vector<16x16xf32>
    %680 = arith.subf %678, %679 : vector<16x16xf32>
    %681 = arith.addf %675, %680 : vector<16x16xf32>
    %c114 = arith.constant 114 : index
    %682 = memref.load %arg2[%c114] : memref<319xf32, #tpu.memory_space<smem>>
    %683 = vector.broadcast %682 : f32 to vector<16x16xf32>
    %684 = arith.mulf %681, %683 : vector<16x16xf32>
    %c146 = arith.constant 146 : index
    %685 = memref.load %arg2[%c146] : memref<319xf32, #tpu.memory_space<smem>>
    %686 = vector.broadcast %685 : f32 to vector<16x16xf32>
    %687 = arith.addf %684, %686 : vector<16x16xf32>
    %cst_33 = arith.constant 0.000000e+00 : f32
    %688 = vector.broadcast %cst_33 : f32 to vector<16x16xf32>
    %689 = arith.maximumf %687, %688 : vector<16x16xf32>
    %c223 = arith.constant 223 : index
    %690 = memref.load %arg2[%c223] : memref<319xf32, #tpu.memory_space<smem>>
    %691 = vector.broadcast %690 : f32 to vector<16x16xf32>
    %692 = arith.mulf %689, %691 : vector<16x16xf32>
    %693 = arith.addf %652, %692 : vector<16x16xf32>
    %c224 = arith.constant 224 : index
    %694 = memref.load %arg2[%c224] : memref<319xf32, #tpu.memory_space<smem>>
    %695 = vector.broadcast %694 : f32 to vector<16x16xf32>
    %696 = arith.mulf %689, %695 : vector<16x16xf32>
    %697 = arith.addf %656, %696 : vector<16x16xf32>
    %c225 = arith.constant 225 : index
    %698 = memref.load %arg2[%c225] : memref<319xf32, #tpu.memory_space<smem>>
    %699 = vector.broadcast %698 : f32 to vector<16x16xf32>
    %700 = arith.mulf %689, %699 : vector<16x16xf32>
    %701 = arith.addf %660, %700 : vector<16x16xf32>
    %c226 = arith.constant 226 : index
    %702 = memref.load %arg2[%c226] : memref<319xf32, #tpu.memory_space<smem>>
    %703 = vector.broadcast %702 : f32 to vector<16x16xf32>
    %704 = arith.mulf %689, %703 : vector<16x16xf32>
    %705 = arith.addf %664, %704 : vector<16x16xf32>
    %c19 = arith.constant 19 : index
    %706 = memref.load %arg2[%c19] : memref<319xf32, #tpu.memory_space<smem>>
    %707 = vector.broadcast %706 : f32 to vector<16x16xf32>
    %708 = arith.mulf %33, %707 : vector<16x16xf32>
    %c51 = arith.constant 51 : index
    %709 = memref.load %arg2[%c51] : memref<319xf32, #tpu.memory_space<smem>>
    %710 = vector.broadcast %709 : f32 to vector<16x16xf32>
    %711 = arith.mulf %43, %710 : vector<16x16xf32>
    %712 = arith.addf %708, %711 : vector<16x16xf32>
    %c83 = arith.constant 83 : index
    %713 = memref.load %arg2[%c83] : memref<319xf32, #tpu.memory_space<smem>>
    %714 = vector.broadcast %713 : f32 to vector<16x16xf32>
    %715 = arith.mulf %53, %714 : vector<16x16xf32>
    %716 = arith.addf %712, %715 : vector<16x16xf32>
    %717 = vector.extract_strided_slice %18 {offsets = [16, 0], sizes = [1, 16], strides = [1, 1]} : vector<32x16xf32> to vector<1x16xf32>
    %718 = vector.extract_strided_slice %17 {offsets = [0, 16], sizes = [16, 1], strides = [1, 1]} : vector<16x32xf32> to vector<16x1xf32>
    %719 = vector.broadcast %717 : vector<1x16xf32> to vector<16x16xf32>
    %720 = vector.broadcast %718 : vector<16x1xf32> to vector<16x16xf32>
    %721 = arith.subf %719, %720 : vector<16x16xf32>
    %722 = arith.addf %716, %721 : vector<16x16xf32>
    %c115 = arith.constant 115 : index
    %723 = memref.load %arg2[%c115] : memref<319xf32, #tpu.memory_space<smem>>
    %724 = vector.broadcast %723 : f32 to vector<16x16xf32>
    %725 = arith.mulf %722, %724 : vector<16x16xf32>
    %c147 = arith.constant 147 : index
    %726 = memref.load %arg2[%c147] : memref<319xf32, #tpu.memory_space<smem>>
    %727 = vector.broadcast %726 : f32 to vector<16x16xf32>
    %728 = arith.addf %725, %727 : vector<16x16xf32>
    %cst_34 = arith.constant 0.000000e+00 : f32
    %729 = vector.broadcast %cst_34 : f32 to vector<16x16xf32>
    %730 = arith.maximumf %728, %729 : vector<16x16xf32>
    %c227 = arith.constant 227 : index
    %731 = memref.load %arg2[%c227] : memref<319xf32, #tpu.memory_space<smem>>
    %732 = vector.broadcast %731 : f32 to vector<16x16xf32>
    %733 = arith.mulf %730, %732 : vector<16x16xf32>
    %734 = arith.addf %693, %733 : vector<16x16xf32>
    %c228 = arith.constant 228 : index
    %735 = memref.load %arg2[%c228] : memref<319xf32, #tpu.memory_space<smem>>
    %736 = vector.broadcast %735 : f32 to vector<16x16xf32>
    %737 = arith.mulf %730, %736 : vector<16x16xf32>
    %738 = arith.addf %697, %737 : vector<16x16xf32>
    %c229 = arith.constant 229 : index
    %739 = memref.load %arg2[%c229] : memref<319xf32, #tpu.memory_space<smem>>
    %740 = vector.broadcast %739 : f32 to vector<16x16xf32>
    %741 = arith.mulf %730, %740 : vector<16x16xf32>
    %742 = arith.addf %701, %741 : vector<16x16xf32>
    %c230 = arith.constant 230 : index
    %743 = memref.load %arg2[%c230] : memref<319xf32, #tpu.memory_space<smem>>
    %744 = vector.broadcast %743 : f32 to vector<16x16xf32>
    %745 = arith.mulf %730, %744 : vector<16x16xf32>
    %746 = arith.addf %705, %745 : vector<16x16xf32>
    %c20 = arith.constant 20 : index
    %747 = memref.load %arg2[%c20] : memref<319xf32, #tpu.memory_space<smem>>
    %748 = vector.broadcast %747 : f32 to vector<16x16xf32>
    %749 = arith.mulf %33, %748 : vector<16x16xf32>
    %c52 = arith.constant 52 : index
    %750 = memref.load %arg2[%c52] : memref<319xf32, #tpu.memory_space<smem>>
    %751 = vector.broadcast %750 : f32 to vector<16x16xf32>
    %752 = arith.mulf %43, %751 : vector<16x16xf32>
    %753 = arith.addf %749, %752 : vector<16x16xf32>
    %c84 = arith.constant 84 : index
    %754 = memref.load %arg2[%c84] : memref<319xf32, #tpu.memory_space<smem>>
    %755 = vector.broadcast %754 : f32 to vector<16x16xf32>
    %756 = arith.mulf %53, %755 : vector<16x16xf32>
    %757 = arith.addf %753, %756 : vector<16x16xf32>
    %758 = vector.extract_strided_slice %18 {offsets = [17, 0], sizes = [1, 16], strides = [1, 1]} : vector<32x16xf32> to vector<1x16xf32>
    %759 = vector.extract_strided_slice %17 {offsets = [0, 17], sizes = [16, 1], strides = [1, 1]} : vector<16x32xf32> to vector<16x1xf32>
    %760 = vector.broadcast %758 : vector<1x16xf32> to vector<16x16xf32>
    %761 = vector.broadcast %759 : vector<16x1xf32> to vector<16x16xf32>
    %762 = arith.subf %760, %761 : vector<16x16xf32>
    %763 = arith.addf %757, %762 : vector<16x16xf32>
    %c116 = arith.constant 116 : index
    %764 = memref.load %arg2[%c116] : memref<319xf32, #tpu.memory_space<smem>>
    %765 = vector.broadcast %764 : f32 to vector<16x16xf32>
    %766 = arith.mulf %763, %765 : vector<16x16xf32>
    %c148 = arith.constant 148 : index
    %767 = memref.load %arg2[%c148] : memref<319xf32, #tpu.memory_space<smem>>
    %768 = vector.broadcast %767 : f32 to vector<16x16xf32>
    %769 = arith.addf %766, %768 : vector<16x16xf32>
    %cst_35 = arith.constant 0.000000e+00 : f32
    %770 = vector.broadcast %cst_35 : f32 to vector<16x16xf32>
    %771 = arith.maximumf %769, %770 : vector<16x16xf32>
    %c231 = arith.constant 231 : index
    %772 = memref.load %arg2[%c231] : memref<319xf32, #tpu.memory_space<smem>>
    %773 = vector.broadcast %772 : f32 to vector<16x16xf32>
    %774 = arith.mulf %771, %773 : vector<16x16xf32>
    %775 = arith.addf %734, %774 : vector<16x16xf32>
    %c232 = arith.constant 232 : index
    %776 = memref.load %arg2[%c232] : memref<319xf32, #tpu.memory_space<smem>>
    %777 = vector.broadcast %776 : f32 to vector<16x16xf32>
    %778 = arith.mulf %771, %777 : vector<16x16xf32>
    %779 = arith.addf %738, %778 : vector<16x16xf32>
    %c233 = arith.constant 233 : index
    %780 = memref.load %arg2[%c233] : memref<319xf32, #tpu.memory_space<smem>>
    %781 = vector.broadcast %780 : f32 to vector<16x16xf32>
    %782 = arith.mulf %771, %781 : vector<16x16xf32>
    %783 = arith.addf %742, %782 : vector<16x16xf32>
    %c234 = arith.constant 234 : index
    %784 = memref.load %arg2[%c234] : memref<319xf32, #tpu.memory_space<smem>>
    %785 = vector.broadcast %784 : f32 to vector<16x16xf32>
    %786 = arith.mulf %771, %785 : vector<16x16xf32>
    %787 = arith.addf %746, %786 : vector<16x16xf32>
    %c21 = arith.constant 21 : index
    %788 = memref.load %arg2[%c21] : memref<319xf32, #tpu.memory_space<smem>>
    %789 = vector.broadcast %788 : f32 to vector<16x16xf32>
    %790 = arith.mulf %33, %789 : vector<16x16xf32>
    %c53 = arith.constant 53 : index
    %791 = memref.load %arg2[%c53] : memref<319xf32, #tpu.memory_space<smem>>
    %792 = vector.broadcast %791 : f32 to vector<16x16xf32>
    %793 = arith.mulf %43, %792 : vector<16x16xf32>
    %794 = arith.addf %790, %793 : vector<16x16xf32>
    %c85 = arith.constant 85 : index
    %795 = memref.load %arg2[%c85] : memref<319xf32, #tpu.memory_space<smem>>
    %796 = vector.broadcast %795 : f32 to vector<16x16xf32>
    %797 = arith.mulf %53, %796 : vector<16x16xf32>
    %798 = arith.addf %794, %797 : vector<16x16xf32>
    %799 = vector.extract_strided_slice %18 {offsets = [18, 0], sizes = [1, 16], strides = [1, 1]} : vector<32x16xf32> to vector<1x16xf32>
    %800 = vector.extract_strided_slice %17 {offsets = [0, 18], sizes = [16, 1], strides = [1, 1]} : vector<16x32xf32> to vector<16x1xf32>
    %801 = vector.broadcast %799 : vector<1x16xf32> to vector<16x16xf32>
    %802 = vector.broadcast %800 : vector<16x1xf32> to vector<16x16xf32>
    %803 = arith.subf %801, %802 : vector<16x16xf32>
    %804 = arith.addf %798, %803 : vector<16x16xf32>
    %c117 = arith.constant 117 : index
    %805 = memref.load %arg2[%c117] : memref<319xf32, #tpu.memory_space<smem>>
    %806 = vector.broadcast %805 : f32 to vector<16x16xf32>
    %807 = arith.mulf %804, %806 : vector<16x16xf32>
    %c149 = arith.constant 149 : index
    %808 = memref.load %arg2[%c149] : memref<319xf32, #tpu.memory_space<smem>>
    %809 = vector.broadcast %808 : f32 to vector<16x16xf32>
    %810 = arith.addf %807, %809 : vector<16x16xf32>
    %cst_36 = arith.constant 0.000000e+00 : f32
    %811 = vector.broadcast %cst_36 : f32 to vector<16x16xf32>
    %812 = arith.maximumf %810, %811 : vector<16x16xf32>
    %c235 = arith.constant 235 : index
    %813 = memref.load %arg2[%c235] : memref<319xf32, #tpu.memory_space<smem>>
    %814 = vector.broadcast %813 : f32 to vector<16x16xf32>
    %815 = arith.mulf %812, %814 : vector<16x16xf32>
    %816 = arith.addf %775, %815 : vector<16x16xf32>
    %c236 = arith.constant 236 : index
    %817 = memref.load %arg2[%c236] : memref<319xf32, #tpu.memory_space<smem>>
    %818 = vector.broadcast %817 : f32 to vector<16x16xf32>
    %819 = arith.mulf %812, %818 : vector<16x16xf32>
    %820 = arith.addf %779, %819 : vector<16x16xf32>
    %c237 = arith.constant 237 : index
    %821 = memref.load %arg2[%c237] : memref<319xf32, #tpu.memory_space<smem>>
    %822 = vector.broadcast %821 : f32 to vector<16x16xf32>
    %823 = arith.mulf %812, %822 : vector<16x16xf32>
    %824 = arith.addf %783, %823 : vector<16x16xf32>
    %c238 = arith.constant 238 : index
    %825 = memref.load %arg2[%c238] : memref<319xf32, #tpu.memory_space<smem>>
    %826 = vector.broadcast %825 : f32 to vector<16x16xf32>
    %827 = arith.mulf %812, %826 : vector<16x16xf32>
    %828 = arith.addf %787, %827 : vector<16x16xf32>
    %c22 = arith.constant 22 : index
    %829 = memref.load %arg2[%c22] : memref<319xf32, #tpu.memory_space<smem>>
    %830 = vector.broadcast %829 : f32 to vector<16x16xf32>
    %831 = arith.mulf %33, %830 : vector<16x16xf32>
    %c54 = arith.constant 54 : index
    %832 = memref.load %arg2[%c54] : memref<319xf32, #tpu.memory_space<smem>>
    %833 = vector.broadcast %832 : f32 to vector<16x16xf32>
    %834 = arith.mulf %43, %833 : vector<16x16xf32>
    %835 = arith.addf %831, %834 : vector<16x16xf32>
    %c86 = arith.constant 86 : index
    %836 = memref.load %arg2[%c86] : memref<319xf32, #tpu.memory_space<smem>>
    %837 = vector.broadcast %836 : f32 to vector<16x16xf32>
    %838 = arith.mulf %53, %837 : vector<16x16xf32>
    %839 = arith.addf %835, %838 : vector<16x16xf32>
    %840 = vector.extract_strided_slice %18 {offsets = [19, 0], sizes = [1, 16], strides = [1, 1]} : vector<32x16xf32> to vector<1x16xf32>
    %841 = vector.extract_strided_slice %17 {offsets = [0, 19], sizes = [16, 1], strides = [1, 1]} : vector<16x32xf32> to vector<16x1xf32>
    %842 = vector.broadcast %840 : vector<1x16xf32> to vector<16x16xf32>
    %843 = vector.broadcast %841 : vector<16x1xf32> to vector<16x16xf32>
    %844 = arith.subf %842, %843 : vector<16x16xf32>
    %845 = arith.addf %839, %844 : vector<16x16xf32>
    %c118 = arith.constant 118 : index
    %846 = memref.load %arg2[%c118] : memref<319xf32, #tpu.memory_space<smem>>
    %847 = vector.broadcast %846 : f32 to vector<16x16xf32>
    %848 = arith.mulf %845, %847 : vector<16x16xf32>
    %c150 = arith.constant 150 : index
    %849 = memref.load %arg2[%c150] : memref<319xf32, #tpu.memory_space<smem>>
    %850 = vector.broadcast %849 : f32 to vector<16x16xf32>
    %851 = arith.addf %848, %850 : vector<16x16xf32>
    %cst_37 = arith.constant 0.000000e+00 : f32
    %852 = vector.broadcast %cst_37 : f32 to vector<16x16xf32>
    %853 = arith.maximumf %851, %852 : vector<16x16xf32>
    %c239 = arith.constant 239 : index
    %854 = memref.load %arg2[%c239] : memref<319xf32, #tpu.memory_space<smem>>
    %855 = vector.broadcast %854 : f32 to vector<16x16xf32>
    %856 = arith.mulf %853, %855 : vector<16x16xf32>
    %857 = arith.addf %816, %856 : vector<16x16xf32>
    %c240 = arith.constant 240 : index
    %858 = memref.load %arg2[%c240] : memref<319xf32, #tpu.memory_space<smem>>
    %859 = vector.broadcast %858 : f32 to vector<16x16xf32>
    %860 = arith.mulf %853, %859 : vector<16x16xf32>
    %861 = arith.addf %820, %860 : vector<16x16xf32>
    %c241 = arith.constant 241 : index
    %862 = memref.load %arg2[%c241] : memref<319xf32, #tpu.memory_space<smem>>
    %863 = vector.broadcast %862 : f32 to vector<16x16xf32>
    %864 = arith.mulf %853, %863 : vector<16x16xf32>
    %865 = arith.addf %824, %864 : vector<16x16xf32>
    %c242 = arith.constant 242 : index
    %866 = memref.load %arg2[%c242] : memref<319xf32, #tpu.memory_space<smem>>
    %867 = vector.broadcast %866 : f32 to vector<16x16xf32>
    %868 = arith.mulf %853, %867 : vector<16x16xf32>
    %869 = arith.addf %828, %868 : vector<16x16xf32>
    %c23 = arith.constant 23 : index
    %870 = memref.load %arg2[%c23] : memref<319xf32, #tpu.memory_space<smem>>
    %871 = vector.broadcast %870 : f32 to vector<16x16xf32>
    %872 = arith.mulf %33, %871 : vector<16x16xf32>
    %c55 = arith.constant 55 : index
    %873 = memref.load %arg2[%c55] : memref<319xf32, #tpu.memory_space<smem>>
    %874 = vector.broadcast %873 : f32 to vector<16x16xf32>
    %875 = arith.mulf %43, %874 : vector<16x16xf32>
    %876 = arith.addf %872, %875 : vector<16x16xf32>
    %c87 = arith.constant 87 : index
    %877 = memref.load %arg2[%c87] : memref<319xf32, #tpu.memory_space<smem>>
    %878 = vector.broadcast %877 : f32 to vector<16x16xf32>
    %879 = arith.mulf %53, %878 : vector<16x16xf32>
    %880 = arith.addf %876, %879 : vector<16x16xf32>
    %881 = vector.extract_strided_slice %18 {offsets = [20, 0], sizes = [1, 16], strides = [1, 1]} : vector<32x16xf32> to vector<1x16xf32>
    %882 = vector.extract_strided_slice %17 {offsets = [0, 20], sizes = [16, 1], strides = [1, 1]} : vector<16x32xf32> to vector<16x1xf32>
    %883 = vector.broadcast %881 : vector<1x16xf32> to vector<16x16xf32>
    %884 = vector.broadcast %882 : vector<16x1xf32> to vector<16x16xf32>
    %885 = arith.subf %883, %884 : vector<16x16xf32>
    %886 = arith.addf %880, %885 : vector<16x16xf32>
    %c119 = arith.constant 119 : index
    %887 = memref.load %arg2[%c119] : memref<319xf32, #tpu.memory_space<smem>>
    %888 = vector.broadcast %887 : f32 to vector<16x16xf32>
    %889 = arith.mulf %886, %888 : vector<16x16xf32>
    %c151 = arith.constant 151 : index
    %890 = memref.load %arg2[%c151] : memref<319xf32, #tpu.memory_space<smem>>
    %891 = vector.broadcast %890 : f32 to vector<16x16xf32>
    %892 = arith.addf %889, %891 : vector<16x16xf32>
    %cst_38 = arith.constant 0.000000e+00 : f32
    %893 = vector.broadcast %cst_38 : f32 to vector<16x16xf32>
    %894 = arith.maximumf %892, %893 : vector<16x16xf32>
    %c243 = arith.constant 243 : index
    %895 = memref.load %arg2[%c243] : memref<319xf32, #tpu.memory_space<smem>>
    %896 = vector.broadcast %895 : f32 to vector<16x16xf32>
    %897 = arith.mulf %894, %896 : vector<16x16xf32>
    %898 = arith.addf %857, %897 : vector<16x16xf32>
    %c244 = arith.constant 244 : index
    %899 = memref.load %arg2[%c244] : memref<319xf32, #tpu.memory_space<smem>>
    %900 = vector.broadcast %899 : f32 to vector<16x16xf32>
    %901 = arith.mulf %894, %900 : vector<16x16xf32>
    %902 = arith.addf %861, %901 : vector<16x16xf32>
    %c245 = arith.constant 245 : index
    %903 = memref.load %arg2[%c245] : memref<319xf32, #tpu.memory_space<smem>>
    %904 = vector.broadcast %903 : f32 to vector<16x16xf32>
    %905 = arith.mulf %894, %904 : vector<16x16xf32>
    %906 = arith.addf %865, %905 : vector<16x16xf32>
    %c246 = arith.constant 246 : index
    %907 = memref.load %arg2[%c246] : memref<319xf32, #tpu.memory_space<smem>>
    %908 = vector.broadcast %907 : f32 to vector<16x16xf32>
    %909 = arith.mulf %894, %908 : vector<16x16xf32>
    %910 = arith.addf %869, %909 : vector<16x16xf32>
    %c24 = arith.constant 24 : index
    %911 = memref.load %arg2[%c24] : memref<319xf32, #tpu.memory_space<smem>>
    %912 = vector.broadcast %911 : f32 to vector<16x16xf32>
    %913 = arith.mulf %33, %912 : vector<16x16xf32>
    %c56 = arith.constant 56 : index
    %914 = memref.load %arg2[%c56] : memref<319xf32, #tpu.memory_space<smem>>
    %915 = vector.broadcast %914 : f32 to vector<16x16xf32>
    %916 = arith.mulf %43, %915 : vector<16x16xf32>
    %917 = arith.addf %913, %916 : vector<16x16xf32>
    %c88 = arith.constant 88 : index
    %918 = memref.load %arg2[%c88] : memref<319xf32, #tpu.memory_space<smem>>
    %919 = vector.broadcast %918 : f32 to vector<16x16xf32>
    %920 = arith.mulf %53, %919 : vector<16x16xf32>
    %921 = arith.addf %917, %920 : vector<16x16xf32>
    %922 = vector.extract_strided_slice %18 {offsets = [21, 0], sizes = [1, 16], strides = [1, 1]} : vector<32x16xf32> to vector<1x16xf32>
    %923 = vector.extract_strided_slice %17 {offsets = [0, 21], sizes = [16, 1], strides = [1, 1]} : vector<16x32xf32> to vector<16x1xf32>
    %924 = vector.broadcast %922 : vector<1x16xf32> to vector<16x16xf32>
    %925 = vector.broadcast %923 : vector<16x1xf32> to vector<16x16xf32>
    %926 = arith.subf %924, %925 : vector<16x16xf32>
    %927 = arith.addf %921, %926 : vector<16x16xf32>
    %c120 = arith.constant 120 : index
    %928 = memref.load %arg2[%c120] : memref<319xf32, #tpu.memory_space<smem>>
    %929 = vector.broadcast %928 : f32 to vector<16x16xf32>
    %930 = arith.mulf %927, %929 : vector<16x16xf32>
    %c152 = arith.constant 152 : index
    %931 = memref.load %arg2[%c152] : memref<319xf32, #tpu.memory_space<smem>>
    %932 = vector.broadcast %931 : f32 to vector<16x16xf32>
    %933 = arith.addf %930, %932 : vector<16x16xf32>
    %cst_39 = arith.constant 0.000000e+00 : f32
    %934 = vector.broadcast %cst_39 : f32 to vector<16x16xf32>
    %935 = arith.maximumf %933, %934 : vector<16x16xf32>
    %c247 = arith.constant 247 : index
    %936 = memref.load %arg2[%c247] : memref<319xf32, #tpu.memory_space<smem>>
    %937 = vector.broadcast %936 : f32 to vector<16x16xf32>
    %938 = arith.mulf %935, %937 : vector<16x16xf32>
    %939 = arith.addf %898, %938 : vector<16x16xf32>
    %c248 = arith.constant 248 : index
    %940 = memref.load %arg2[%c248] : memref<319xf32, #tpu.memory_space<smem>>
    %941 = vector.broadcast %940 : f32 to vector<16x16xf32>
    %942 = arith.mulf %935, %941 : vector<16x16xf32>
    %943 = arith.addf %902, %942 : vector<16x16xf32>
    %c249 = arith.constant 249 : index
    %944 = memref.load %arg2[%c249] : memref<319xf32, #tpu.memory_space<smem>>
    %945 = vector.broadcast %944 : f32 to vector<16x16xf32>
    %946 = arith.mulf %935, %945 : vector<16x16xf32>
    %947 = arith.addf %906, %946 : vector<16x16xf32>
    %c250 = arith.constant 250 : index
    %948 = memref.load %arg2[%c250] : memref<319xf32, #tpu.memory_space<smem>>
    %949 = vector.broadcast %948 : f32 to vector<16x16xf32>
    %950 = arith.mulf %935, %949 : vector<16x16xf32>
    %951 = arith.addf %910, %950 : vector<16x16xf32>
    %c25 = arith.constant 25 : index
    %952 = memref.load %arg2[%c25] : memref<319xf32, #tpu.memory_space<smem>>
    %953 = vector.broadcast %952 : f32 to vector<16x16xf32>
    %954 = arith.mulf %33, %953 : vector<16x16xf32>
    %c57 = arith.constant 57 : index
    %955 = memref.load %arg2[%c57] : memref<319xf32, #tpu.memory_space<smem>>
    %956 = vector.broadcast %955 : f32 to vector<16x16xf32>
    %957 = arith.mulf %43, %956 : vector<16x16xf32>
    %958 = arith.addf %954, %957 : vector<16x16xf32>
    %c89 = arith.constant 89 : index
    %959 = memref.load %arg2[%c89] : memref<319xf32, #tpu.memory_space<smem>>
    %960 = vector.broadcast %959 : f32 to vector<16x16xf32>
    %961 = arith.mulf %53, %960 : vector<16x16xf32>
    %962 = arith.addf %958, %961 : vector<16x16xf32>
    %963 = vector.extract_strided_slice %18 {offsets = [22, 0], sizes = [1, 16], strides = [1, 1]} : vector<32x16xf32> to vector<1x16xf32>
    %964 = vector.extract_strided_slice %17 {offsets = [0, 22], sizes = [16, 1], strides = [1, 1]} : vector<16x32xf32> to vector<16x1xf32>
    %965 = vector.broadcast %963 : vector<1x16xf32> to vector<16x16xf32>
    %966 = vector.broadcast %964 : vector<16x1xf32> to vector<16x16xf32>
    %967 = arith.subf %965, %966 : vector<16x16xf32>
    %968 = arith.addf %962, %967 : vector<16x16xf32>
    %c121 = arith.constant 121 : index
    %969 = memref.load %arg2[%c121] : memref<319xf32, #tpu.memory_space<smem>>
    %970 = vector.broadcast %969 : f32 to vector<16x16xf32>
    %971 = arith.mulf %968, %970 : vector<16x16xf32>
    %c153 = arith.constant 153 : index
    %972 = memref.load %arg2[%c153] : memref<319xf32, #tpu.memory_space<smem>>
    %973 = vector.broadcast %972 : f32 to vector<16x16xf32>
    %974 = arith.addf %971, %973 : vector<16x16xf32>
    %cst_40 = arith.constant 0.000000e+00 : f32
    %975 = vector.broadcast %cst_40 : f32 to vector<16x16xf32>
    %976 = arith.maximumf %974, %975 : vector<16x16xf32>
    %c251 = arith.constant 251 : index
    %977 = memref.load %arg2[%c251] : memref<319xf32, #tpu.memory_space<smem>>
    %978 = vector.broadcast %977 : f32 to vector<16x16xf32>
    %979 = arith.mulf %976, %978 : vector<16x16xf32>
    %980 = arith.addf %939, %979 : vector<16x16xf32>
    %c252 = arith.constant 252 : index
    %981 = memref.load %arg2[%c252] : memref<319xf32, #tpu.memory_space<smem>>
    %982 = vector.broadcast %981 : f32 to vector<16x16xf32>
    %983 = arith.mulf %976, %982 : vector<16x16xf32>
    %984 = arith.addf %943, %983 : vector<16x16xf32>
    %c253 = arith.constant 253 : index
    %985 = memref.load %arg2[%c253] : memref<319xf32, #tpu.memory_space<smem>>
    %986 = vector.broadcast %985 : f32 to vector<16x16xf32>
    %987 = arith.mulf %976, %986 : vector<16x16xf32>
    %988 = arith.addf %947, %987 : vector<16x16xf32>
    %c254 = arith.constant 254 : index
    %989 = memref.load %arg2[%c254] : memref<319xf32, #tpu.memory_space<smem>>
    %990 = vector.broadcast %989 : f32 to vector<16x16xf32>
    %991 = arith.mulf %976, %990 : vector<16x16xf32>
    %992 = arith.addf %951, %991 : vector<16x16xf32>
    %c26 = arith.constant 26 : index
    %993 = memref.load %arg2[%c26] : memref<319xf32, #tpu.memory_space<smem>>
    %994 = vector.broadcast %993 : f32 to vector<16x16xf32>
    %995 = arith.mulf %33, %994 : vector<16x16xf32>
    %c58 = arith.constant 58 : index
    %996 = memref.load %arg2[%c58] : memref<319xf32, #tpu.memory_space<smem>>
    %997 = vector.broadcast %996 : f32 to vector<16x16xf32>
    %998 = arith.mulf %43, %997 : vector<16x16xf32>
    %999 = arith.addf %995, %998 : vector<16x16xf32>
    %c90 = arith.constant 90 : index
    %1000 = memref.load %arg2[%c90] : memref<319xf32, #tpu.memory_space<smem>>
    %1001 = vector.broadcast %1000 : f32 to vector<16x16xf32>
    %1002 = arith.mulf %53, %1001 : vector<16x16xf32>
    %1003 = arith.addf %999, %1002 : vector<16x16xf32>
    %1004 = vector.extract_strided_slice %18 {offsets = [23, 0], sizes = [1, 16], strides = [1, 1]} : vector<32x16xf32> to vector<1x16xf32>
    %1005 = vector.extract_strided_slice %17 {offsets = [0, 23], sizes = [16, 1], strides = [1, 1]} : vector<16x32xf32> to vector<16x1xf32>
    %1006 = vector.broadcast %1004 : vector<1x16xf32> to vector<16x16xf32>
    %1007 = vector.broadcast %1005 : vector<16x1xf32> to vector<16x16xf32>
    %1008 = arith.subf %1006, %1007 : vector<16x16xf32>
    %1009 = arith.addf %1003, %1008 : vector<16x16xf32>
    %c122 = arith.constant 122 : index
    %1010 = memref.load %arg2[%c122] : memref<319xf32, #tpu.memory_space<smem>>
    %1011 = vector.broadcast %1010 : f32 to vector<16x16xf32>
    %1012 = arith.mulf %1009, %1011 : vector<16x16xf32>
    %c154 = arith.constant 154 : index
    %1013 = memref.load %arg2[%c154] : memref<319xf32, #tpu.memory_space<smem>>
    %1014 = vector.broadcast %1013 : f32 to vector<16x16xf32>
    %1015 = arith.addf %1012, %1014 : vector<16x16xf32>
    %cst_41 = arith.constant 0.000000e+00 : f32
    %1016 = vector.broadcast %cst_41 : f32 to vector<16x16xf32>
    %1017 = arith.maximumf %1015, %1016 : vector<16x16xf32>
    %c255 = arith.constant 255 : index
    %1018 = memref.load %arg2[%c255] : memref<319xf32, #tpu.memory_space<smem>>
    %1019 = vector.broadcast %1018 : f32 to vector<16x16xf32>
    %1020 = arith.mulf %1017, %1019 : vector<16x16xf32>
    %1021 = arith.addf %980, %1020 : vector<16x16xf32>
    %c256 = arith.constant 256 : index
    %1022 = memref.load %arg2[%c256] : memref<319xf32, #tpu.memory_space<smem>>
    %1023 = vector.broadcast %1022 : f32 to vector<16x16xf32>
    %1024 = arith.mulf %1017, %1023 : vector<16x16xf32>
    %1025 = arith.addf %984, %1024 : vector<16x16xf32>
    %c257 = arith.constant 257 : index
    %1026 = memref.load %arg2[%c257] : memref<319xf32, #tpu.memory_space<smem>>
    %1027 = vector.broadcast %1026 : f32 to vector<16x16xf32>
    %1028 = arith.mulf %1017, %1027 : vector<16x16xf32>
    %1029 = arith.addf %988, %1028 : vector<16x16xf32>
    %c258 = arith.constant 258 : index
    %1030 = memref.load %arg2[%c258] : memref<319xf32, #tpu.memory_space<smem>>
    %1031 = vector.broadcast %1030 : f32 to vector<16x16xf32>
    %1032 = arith.mulf %1017, %1031 : vector<16x16xf32>
    %1033 = arith.addf %992, %1032 : vector<16x16xf32>
    %c27 = arith.constant 27 : index
    %1034 = memref.load %arg2[%c27] : memref<319xf32, #tpu.memory_space<smem>>
    %1035 = vector.broadcast %1034 : f32 to vector<16x16xf32>
    %1036 = arith.mulf %33, %1035 : vector<16x16xf32>
    %c59 = arith.constant 59 : index
    %1037 = memref.load %arg2[%c59] : memref<319xf32, #tpu.memory_space<smem>>
    %1038 = vector.broadcast %1037 : f32 to vector<16x16xf32>
    %1039 = arith.mulf %43, %1038 : vector<16x16xf32>
    %1040 = arith.addf %1036, %1039 : vector<16x16xf32>
    %c91 = arith.constant 91 : index
    %1041 = memref.load %arg2[%c91] : memref<319xf32, #tpu.memory_space<smem>>
    %1042 = vector.broadcast %1041 : f32 to vector<16x16xf32>
    %1043 = arith.mulf %53, %1042 : vector<16x16xf32>
    %1044 = arith.addf %1040, %1043 : vector<16x16xf32>
    %1045 = vector.extract_strided_slice %18 {offsets = [24, 0], sizes = [1, 16], strides = [1, 1]} : vector<32x16xf32> to vector<1x16xf32>
    %1046 = vector.extract_strided_slice %17 {offsets = [0, 24], sizes = [16, 1], strides = [1, 1]} : vector<16x32xf32> to vector<16x1xf32>
    %1047 = vector.broadcast %1045 : vector<1x16xf32> to vector<16x16xf32>
    %1048 = vector.broadcast %1046 : vector<16x1xf32> to vector<16x16xf32>
    %1049 = arith.subf %1047, %1048 : vector<16x16xf32>
    %1050 = arith.addf %1044, %1049 : vector<16x16xf32>
    %c123 = arith.constant 123 : index
    %1051 = memref.load %arg2[%c123] : memref<319xf32, #tpu.memory_space<smem>>
    %1052 = vector.broadcast %1051 : f32 to vector<16x16xf32>
    %1053 = arith.mulf %1050, %1052 : vector<16x16xf32>
    %c155 = arith.constant 155 : index
    %1054 = memref.load %arg2[%c155] : memref<319xf32, #tpu.memory_space<smem>>
    %1055 = vector.broadcast %1054 : f32 to vector<16x16xf32>
    %1056 = arith.addf %1053, %1055 : vector<16x16xf32>
    %cst_42 = arith.constant 0.000000e+00 : f32
    %1057 = vector.broadcast %cst_42 : f32 to vector<16x16xf32>
    %1058 = arith.maximumf %1056, %1057 : vector<16x16xf32>
    %c259 = arith.constant 259 : index
    %1059 = memref.load %arg2[%c259] : memref<319xf32, #tpu.memory_space<smem>>
    %1060 = vector.broadcast %1059 : f32 to vector<16x16xf32>
    %1061 = arith.mulf %1058, %1060 : vector<16x16xf32>
    %1062 = arith.addf %1021, %1061 : vector<16x16xf32>
    %c260 = arith.constant 260 : index
    %1063 = memref.load %arg2[%c260] : memref<319xf32, #tpu.memory_space<smem>>
    %1064 = vector.broadcast %1063 : f32 to vector<16x16xf32>
    %1065 = arith.mulf %1058, %1064 : vector<16x16xf32>
    %1066 = arith.addf %1025, %1065 : vector<16x16xf32>
    %c261 = arith.constant 261 : index
    %1067 = memref.load %arg2[%c261] : memref<319xf32, #tpu.memory_space<smem>>
    %1068 = vector.broadcast %1067 : f32 to vector<16x16xf32>
    %1069 = arith.mulf %1058, %1068 : vector<16x16xf32>
    %1070 = arith.addf %1029, %1069 : vector<16x16xf32>
    %c262 = arith.constant 262 : index
    %1071 = memref.load %arg2[%c262] : memref<319xf32, #tpu.memory_space<smem>>
    %1072 = vector.broadcast %1071 : f32 to vector<16x16xf32>
    %1073 = arith.mulf %1058, %1072 : vector<16x16xf32>
    %1074 = arith.addf %1033, %1073 : vector<16x16xf32>
    %c28 = arith.constant 28 : index
    %1075 = memref.load %arg2[%c28] : memref<319xf32, #tpu.memory_space<smem>>
    %1076 = vector.broadcast %1075 : f32 to vector<16x16xf32>
    %1077 = arith.mulf %33, %1076 : vector<16x16xf32>
    %c60 = arith.constant 60 : index
    %1078 = memref.load %arg2[%c60] : memref<319xf32, #tpu.memory_space<smem>>
    %1079 = vector.broadcast %1078 : f32 to vector<16x16xf32>
    %1080 = arith.mulf %43, %1079 : vector<16x16xf32>
    %1081 = arith.addf %1077, %1080 : vector<16x16xf32>
    %c92 = arith.constant 92 : index
    %1082 = memref.load %arg2[%c92] : memref<319xf32, #tpu.memory_space<smem>>
    %1083 = vector.broadcast %1082 : f32 to vector<16x16xf32>
    %1084 = arith.mulf %53, %1083 : vector<16x16xf32>
    %1085 = arith.addf %1081, %1084 : vector<16x16xf32>
    %1086 = vector.extract_strided_slice %18 {offsets = [25, 0], sizes = [1, 16], strides = [1, 1]} : vector<32x16xf32> to vector<1x16xf32>
    %1087 = vector.extract_strided_slice %17 {offsets = [0, 25], sizes = [16, 1], strides = [1, 1]} : vector<16x32xf32> to vector<16x1xf32>
    %1088 = vector.broadcast %1086 : vector<1x16xf32> to vector<16x16xf32>
    %1089 = vector.broadcast %1087 : vector<16x1xf32> to vector<16x16xf32>
    %1090 = arith.subf %1088, %1089 : vector<16x16xf32>
    %1091 = arith.addf %1085, %1090 : vector<16x16xf32>
    %c124 = arith.constant 124 : index
    %1092 = memref.load %arg2[%c124] : memref<319xf32, #tpu.memory_space<smem>>
    %1093 = vector.broadcast %1092 : f32 to vector<16x16xf32>
    %1094 = arith.mulf %1091, %1093 : vector<16x16xf32>
    %c156 = arith.constant 156 : index
    %1095 = memref.load %arg2[%c156] : memref<319xf32, #tpu.memory_space<smem>>
    %1096 = vector.broadcast %1095 : f32 to vector<16x16xf32>
    %1097 = arith.addf %1094, %1096 : vector<16x16xf32>
    %cst_43 = arith.constant 0.000000e+00 : f32
    %1098 = vector.broadcast %cst_43 : f32 to vector<16x16xf32>
    %1099 = arith.maximumf %1097, %1098 : vector<16x16xf32>
    %c263 = arith.constant 263 : index
    %1100 = memref.load %arg2[%c263] : memref<319xf32, #tpu.memory_space<smem>>
    %1101 = vector.broadcast %1100 : f32 to vector<16x16xf32>
    %1102 = arith.mulf %1099, %1101 : vector<16x16xf32>
    %1103 = arith.addf %1062, %1102 : vector<16x16xf32>
    %c264 = arith.constant 264 : index
    %1104 = memref.load %arg2[%c264] : memref<319xf32, #tpu.memory_space<smem>>
    %1105 = vector.broadcast %1104 : f32 to vector<16x16xf32>
    %1106 = arith.mulf %1099, %1105 : vector<16x16xf32>
    %1107 = arith.addf %1066, %1106 : vector<16x16xf32>
    %c265 = arith.constant 265 : index
    %1108 = memref.load %arg2[%c265] : memref<319xf32, #tpu.memory_space<smem>>
    %1109 = vector.broadcast %1108 : f32 to vector<16x16xf32>
    %1110 = arith.mulf %1099, %1109 : vector<16x16xf32>
    %1111 = arith.addf %1070, %1110 : vector<16x16xf32>
    %c266 = arith.constant 266 : index
    %1112 = memref.load %arg2[%c266] : memref<319xf32, #tpu.memory_space<smem>>
    %1113 = vector.broadcast %1112 : f32 to vector<16x16xf32>
    %1114 = arith.mulf %1099, %1113 : vector<16x16xf32>
    %1115 = arith.addf %1074, %1114 : vector<16x16xf32>
    %c29 = arith.constant 29 : index
    %1116 = memref.load %arg2[%c29] : memref<319xf32, #tpu.memory_space<smem>>
    %1117 = vector.broadcast %1116 : f32 to vector<16x16xf32>
    %1118 = arith.mulf %33, %1117 : vector<16x16xf32>
    %c61 = arith.constant 61 : index
    %1119 = memref.load %arg2[%c61] : memref<319xf32, #tpu.memory_space<smem>>
    %1120 = vector.broadcast %1119 : f32 to vector<16x16xf32>
    %1121 = arith.mulf %43, %1120 : vector<16x16xf32>
    %1122 = arith.addf %1118, %1121 : vector<16x16xf32>
    %c93 = arith.constant 93 : index
    %1123 = memref.load %arg2[%c93] : memref<319xf32, #tpu.memory_space<smem>>
    %1124 = vector.broadcast %1123 : f32 to vector<16x16xf32>
    %1125 = arith.mulf %53, %1124 : vector<16x16xf32>
    %1126 = arith.addf %1122, %1125 : vector<16x16xf32>
    %1127 = vector.extract_strided_slice %18 {offsets = [26, 0], sizes = [1, 16], strides = [1, 1]} : vector<32x16xf32> to vector<1x16xf32>
    %1128 = vector.extract_strided_slice %17 {offsets = [0, 26], sizes = [16, 1], strides = [1, 1]} : vector<16x32xf32> to vector<16x1xf32>
    %1129 = vector.broadcast %1127 : vector<1x16xf32> to vector<16x16xf32>
    %1130 = vector.broadcast %1128 : vector<16x1xf32> to vector<16x16xf32>
    %1131 = arith.subf %1129, %1130 : vector<16x16xf32>
    %1132 = arith.addf %1126, %1131 : vector<16x16xf32>
    %c125 = arith.constant 125 : index
    %1133 = memref.load %arg2[%c125] : memref<319xf32, #tpu.memory_space<smem>>
    %1134 = vector.broadcast %1133 : f32 to vector<16x16xf32>
    %1135 = arith.mulf %1132, %1134 : vector<16x16xf32>
    %c157 = arith.constant 157 : index
    %1136 = memref.load %arg2[%c157] : memref<319xf32, #tpu.memory_space<smem>>
    %1137 = vector.broadcast %1136 : f32 to vector<16x16xf32>
    %1138 = arith.addf %1135, %1137 : vector<16x16xf32>
    %cst_44 = arith.constant 0.000000e+00 : f32
    %1139 = vector.broadcast %cst_44 : f32 to vector<16x16xf32>
    %1140 = arith.maximumf %1138, %1139 : vector<16x16xf32>
    %c267 = arith.constant 267 : index
    %1141 = memref.load %arg2[%c267] : memref<319xf32, #tpu.memory_space<smem>>
    %1142 = vector.broadcast %1141 : f32 to vector<16x16xf32>
    %1143 = arith.mulf %1140, %1142 : vector<16x16xf32>
    %1144 = arith.addf %1103, %1143 : vector<16x16xf32>
    %c268 = arith.constant 268 : index
    %1145 = memref.load %arg2[%c268] : memref<319xf32, #tpu.memory_space<smem>>
    %1146 = vector.broadcast %1145 : f32 to vector<16x16xf32>
    %1147 = arith.mulf %1140, %1146 : vector<16x16xf32>
    %1148 = arith.addf %1107, %1147 : vector<16x16xf32>
    %c269 = arith.constant 269 : index
    %1149 = memref.load %arg2[%c269] : memref<319xf32, #tpu.memory_space<smem>>
    %1150 = vector.broadcast %1149 : f32 to vector<16x16xf32>
    %1151 = arith.mulf %1140, %1150 : vector<16x16xf32>
    %1152 = arith.addf %1111, %1151 : vector<16x16xf32>
    %c270 = arith.constant 270 : index
    %1153 = memref.load %arg2[%c270] : memref<319xf32, #tpu.memory_space<smem>>
    %1154 = vector.broadcast %1153 : f32 to vector<16x16xf32>
    %1155 = arith.mulf %1140, %1154 : vector<16x16xf32>
    %1156 = arith.addf %1115, %1155 : vector<16x16xf32>
    %c30 = arith.constant 30 : index
    %1157 = memref.load %arg2[%c30] : memref<319xf32, #tpu.memory_space<smem>>
    %1158 = vector.broadcast %1157 : f32 to vector<16x16xf32>
    %1159 = arith.mulf %33, %1158 : vector<16x16xf32>
    %c62 = arith.constant 62 : index
    %1160 = memref.load %arg2[%c62] : memref<319xf32, #tpu.memory_space<smem>>
    %1161 = vector.broadcast %1160 : f32 to vector<16x16xf32>
    %1162 = arith.mulf %43, %1161 : vector<16x16xf32>
    %1163 = arith.addf %1159, %1162 : vector<16x16xf32>
    %c94 = arith.constant 94 : index
    %1164 = memref.load %arg2[%c94] : memref<319xf32, #tpu.memory_space<smem>>
    %1165 = vector.broadcast %1164 : f32 to vector<16x16xf32>
    %1166 = arith.mulf %53, %1165 : vector<16x16xf32>
    %1167 = arith.addf %1163, %1166 : vector<16x16xf32>
    %1168 = vector.extract_strided_slice %18 {offsets = [27, 0], sizes = [1, 16], strides = [1, 1]} : vector<32x16xf32> to vector<1x16xf32>
    %1169 = vector.extract_strided_slice %17 {offsets = [0, 27], sizes = [16, 1], strides = [1, 1]} : vector<16x32xf32> to vector<16x1xf32>
    %1170 = vector.broadcast %1168 : vector<1x16xf32> to vector<16x16xf32>
    %1171 = vector.broadcast %1169 : vector<16x1xf32> to vector<16x16xf32>
    %1172 = arith.subf %1170, %1171 : vector<16x16xf32>
    %1173 = arith.addf %1167, %1172 : vector<16x16xf32>
    %c126 = arith.constant 126 : index
    %1174 = memref.load %arg2[%c126] : memref<319xf32, #tpu.memory_space<smem>>
    %1175 = vector.broadcast %1174 : f32 to vector<16x16xf32>
    %1176 = arith.mulf %1173, %1175 : vector<16x16xf32>
    %c158 = arith.constant 158 : index
    %1177 = memref.load %arg2[%c158] : memref<319xf32, #tpu.memory_space<smem>>
    %1178 = vector.broadcast %1177 : f32 to vector<16x16xf32>
    %1179 = arith.addf %1176, %1178 : vector<16x16xf32>
    %cst_45 = arith.constant 0.000000e+00 : f32
    %1180 = vector.broadcast %cst_45 : f32 to vector<16x16xf32>
    %1181 = arith.maximumf %1179, %1180 : vector<16x16xf32>
    %c271 = arith.constant 271 : index
    %1182 = memref.load %arg2[%c271] : memref<319xf32, #tpu.memory_space<smem>>
    %1183 = vector.broadcast %1182 : f32 to vector<16x16xf32>
    %1184 = arith.mulf %1181, %1183 : vector<16x16xf32>
    %1185 = arith.addf %1144, %1184 : vector<16x16xf32>
    %c272 = arith.constant 272 : index
    %1186 = memref.load %arg2[%c272] : memref<319xf32, #tpu.memory_space<smem>>
    %1187 = vector.broadcast %1186 : f32 to vector<16x16xf32>
    %1188 = arith.mulf %1181, %1187 : vector<16x16xf32>
    %1189 = arith.addf %1148, %1188 : vector<16x16xf32>
    %c273 = arith.constant 273 : index
    %1190 = memref.load %arg2[%c273] : memref<319xf32, #tpu.memory_space<smem>>
    %1191 = vector.broadcast %1190 : f32 to vector<16x16xf32>
    %1192 = arith.mulf %1181, %1191 : vector<16x16xf32>
    %1193 = arith.addf %1152, %1192 : vector<16x16xf32>
    %c274 = arith.constant 274 : index
    %1194 = memref.load %arg2[%c274] : memref<319xf32, #tpu.memory_space<smem>>
    %1195 = vector.broadcast %1194 : f32 to vector<16x16xf32>
    %1196 = arith.mulf %1181, %1195 : vector<16x16xf32>
    %1197 = arith.addf %1156, %1196 : vector<16x16xf32>
    %c31 = arith.constant 31 : index
    %1198 = memref.load %arg2[%c31] : memref<319xf32, #tpu.memory_space<smem>>
    %1199 = vector.broadcast %1198 : f32 to vector<16x16xf32>
    %1200 = arith.mulf %33, %1199 : vector<16x16xf32>
    %c63 = arith.constant 63 : index
    %1201 = memref.load %arg2[%c63] : memref<319xf32, #tpu.memory_space<smem>>
    %1202 = vector.broadcast %1201 : f32 to vector<16x16xf32>
    %1203 = arith.mulf %43, %1202 : vector<16x16xf32>
    %1204 = arith.addf %1200, %1203 : vector<16x16xf32>
    %c95 = arith.constant 95 : index
    %1205 = memref.load %arg2[%c95] : memref<319xf32, #tpu.memory_space<smem>>
    %1206 = vector.broadcast %1205 : f32 to vector<16x16xf32>
    %1207 = arith.mulf %53, %1206 : vector<16x16xf32>
    %1208 = arith.addf %1204, %1207 : vector<16x16xf32>
    %1209 = vector.extract_strided_slice %18 {offsets = [28, 0], sizes = [1, 16], strides = [1, 1]} : vector<32x16xf32> to vector<1x16xf32>
    %1210 = vector.extract_strided_slice %17 {offsets = [0, 28], sizes = [16, 1], strides = [1, 1]} : vector<16x32xf32> to vector<16x1xf32>
    %1211 = vector.broadcast %1209 : vector<1x16xf32> to vector<16x16xf32>
    %1212 = vector.broadcast %1210 : vector<16x1xf32> to vector<16x16xf32>
    %1213 = arith.subf %1211, %1212 : vector<16x16xf32>
    %1214 = arith.addf %1208, %1213 : vector<16x16xf32>
    %c127 = arith.constant 127 : index
    %1215 = memref.load %arg2[%c127] : memref<319xf32, #tpu.memory_space<smem>>
    %1216 = vector.broadcast %1215 : f32 to vector<16x16xf32>
    %1217 = arith.mulf %1214, %1216 : vector<16x16xf32>
    %c159 = arith.constant 159 : index
    %1218 = memref.load %arg2[%c159] : memref<319xf32, #tpu.memory_space<smem>>
    %1219 = vector.broadcast %1218 : f32 to vector<16x16xf32>
    %1220 = arith.addf %1217, %1219 : vector<16x16xf32>
    %cst_46 = arith.constant 0.000000e+00 : f32
    %1221 = vector.broadcast %cst_46 : f32 to vector<16x16xf32>
    %1222 = arith.maximumf %1220, %1221 : vector<16x16xf32>
    %c275 = arith.constant 275 : index
    %1223 = memref.load %arg2[%c275] : memref<319xf32, #tpu.memory_space<smem>>
    %1224 = vector.broadcast %1223 : f32 to vector<16x16xf32>
    %1225 = arith.mulf %1222, %1224 : vector<16x16xf32>
    %1226 = arith.addf %1185, %1225 : vector<16x16xf32>
    %c276 = arith.constant 276 : index
    %1227 = memref.load %arg2[%c276] : memref<319xf32, #tpu.memory_space<smem>>
    %1228 = vector.broadcast %1227 : f32 to vector<16x16xf32>
    %1229 = arith.mulf %1222, %1228 : vector<16x16xf32>
    %1230 = arith.addf %1189, %1229 : vector<16x16xf32>
    %c277 = arith.constant 277 : index
    %1231 = memref.load %arg2[%c277] : memref<319xf32, #tpu.memory_space<smem>>
    %1232 = vector.broadcast %1231 : f32 to vector<16x16xf32>
    %1233 = arith.mulf %1222, %1232 : vector<16x16xf32>
    %1234 = arith.addf %1193, %1233 : vector<16x16xf32>
    %c278 = arith.constant 278 : index
    %1235 = memref.load %arg2[%c278] : memref<319xf32, #tpu.memory_space<smem>>
    %1236 = vector.broadcast %1235 : f32 to vector<16x16xf32>
    %1237 = arith.mulf %1222, %1236 : vector<16x16xf32>
    %1238 = arith.addf %1197, %1237 : vector<16x16xf32>
    %c32 = arith.constant 32 : index
    %1239 = memref.load %arg2[%c32] : memref<319xf32, #tpu.memory_space<smem>>
    %1240 = vector.broadcast %1239 : f32 to vector<16x16xf32>
    %1241 = arith.mulf %33, %1240 : vector<16x16xf32>
    %c64 = arith.constant 64 : index
    %1242 = memref.load %arg2[%c64] : memref<319xf32, #tpu.memory_space<smem>>
    %1243 = vector.broadcast %1242 : f32 to vector<16x16xf32>
    %1244 = arith.mulf %43, %1243 : vector<16x16xf32>
    %1245 = arith.addf %1241, %1244 : vector<16x16xf32>
    %c96 = arith.constant 96 : index
    %1246 = memref.load %arg2[%c96] : memref<319xf32, #tpu.memory_space<smem>>
    %1247 = vector.broadcast %1246 : f32 to vector<16x16xf32>
    %1248 = arith.mulf %53, %1247 : vector<16x16xf32>
    %1249 = arith.addf %1245, %1248 : vector<16x16xf32>
    %1250 = vector.extract_strided_slice %18 {offsets = [29, 0], sizes = [1, 16], strides = [1, 1]} : vector<32x16xf32> to vector<1x16xf32>
    %1251 = vector.extract_strided_slice %17 {offsets = [0, 29], sizes = [16, 1], strides = [1, 1]} : vector<16x32xf32> to vector<16x1xf32>
    %1252 = vector.broadcast %1250 : vector<1x16xf32> to vector<16x16xf32>
    %1253 = vector.broadcast %1251 : vector<16x1xf32> to vector<16x16xf32>
    %1254 = arith.subf %1252, %1253 : vector<16x16xf32>
    %1255 = arith.addf %1249, %1254 : vector<16x16xf32>
    %c128 = arith.constant 128 : index
    %1256 = memref.load %arg2[%c128] : memref<319xf32, #tpu.memory_space<smem>>
    %1257 = vector.broadcast %1256 : f32 to vector<16x16xf32>
    %1258 = arith.mulf %1255, %1257 : vector<16x16xf32>
    %c160 = arith.constant 160 : index
    %1259 = memref.load %arg2[%c160] : memref<319xf32, #tpu.memory_space<smem>>
    %1260 = vector.broadcast %1259 : f32 to vector<16x16xf32>
    %1261 = arith.addf %1258, %1260 : vector<16x16xf32>
    %cst_47 = arith.constant 0.000000e+00 : f32
    %1262 = vector.broadcast %cst_47 : f32 to vector<16x16xf32>
    %1263 = arith.maximumf %1261, %1262 : vector<16x16xf32>
    %c279 = arith.constant 279 : index
    %1264 = memref.load %arg2[%c279] : memref<319xf32, #tpu.memory_space<smem>>
    %1265 = vector.broadcast %1264 : f32 to vector<16x16xf32>
    %1266 = arith.mulf %1263, %1265 : vector<16x16xf32>
    %1267 = arith.addf %1226, %1266 : vector<16x16xf32>
    %c280 = arith.constant 280 : index
    %1268 = memref.load %arg2[%c280] : memref<319xf32, #tpu.memory_space<smem>>
    %1269 = vector.broadcast %1268 : f32 to vector<16x16xf32>
    %1270 = arith.mulf %1263, %1269 : vector<16x16xf32>
    %1271 = arith.addf %1230, %1270 : vector<16x16xf32>
    %c281 = arith.constant 281 : index
    %1272 = memref.load %arg2[%c281] : memref<319xf32, #tpu.memory_space<smem>>
    %1273 = vector.broadcast %1272 : f32 to vector<16x16xf32>
    %1274 = arith.mulf %1263, %1273 : vector<16x16xf32>
    %1275 = arith.addf %1234, %1274 : vector<16x16xf32>
    %c282 = arith.constant 282 : index
    %1276 = memref.load %arg2[%c282] : memref<319xf32, #tpu.memory_space<smem>>
    %1277 = vector.broadcast %1276 : f32 to vector<16x16xf32>
    %1278 = arith.mulf %1263, %1277 : vector<16x16xf32>
    %1279 = arith.addf %1238, %1278 : vector<16x16xf32>
    %c33 = arith.constant 33 : index
    %1280 = memref.load %arg2[%c33] : memref<319xf32, #tpu.memory_space<smem>>
    %1281 = vector.broadcast %1280 : f32 to vector<16x16xf32>
    %1282 = arith.mulf %33, %1281 : vector<16x16xf32>
    %c65 = arith.constant 65 : index
    %1283 = memref.load %arg2[%c65] : memref<319xf32, #tpu.memory_space<smem>>
    %1284 = vector.broadcast %1283 : f32 to vector<16x16xf32>
    %1285 = arith.mulf %43, %1284 : vector<16x16xf32>
    %1286 = arith.addf %1282, %1285 : vector<16x16xf32>
    %c97 = arith.constant 97 : index
    %1287 = memref.load %arg2[%c97] : memref<319xf32, #tpu.memory_space<smem>>
    %1288 = vector.broadcast %1287 : f32 to vector<16x16xf32>
    %1289 = arith.mulf %53, %1288 : vector<16x16xf32>
    %1290 = arith.addf %1286, %1289 : vector<16x16xf32>
    %1291 = vector.extract_strided_slice %18 {offsets = [30, 0], sizes = [1, 16], strides = [1, 1]} : vector<32x16xf32> to vector<1x16xf32>
    %1292 = vector.extract_strided_slice %17 {offsets = [0, 30], sizes = [16, 1], strides = [1, 1]} : vector<16x32xf32> to vector<16x1xf32>
    %1293 = vector.broadcast %1291 : vector<1x16xf32> to vector<16x16xf32>
    %1294 = vector.broadcast %1292 : vector<16x1xf32> to vector<16x16xf32>
    %1295 = arith.subf %1293, %1294 : vector<16x16xf32>
    %1296 = arith.addf %1290, %1295 : vector<16x16xf32>
    %c129 = arith.constant 129 : index
    %1297 = memref.load %arg2[%c129] : memref<319xf32, #tpu.memory_space<smem>>
    %1298 = vector.broadcast %1297 : f32 to vector<16x16xf32>
    %1299 = arith.mulf %1296, %1298 : vector<16x16xf32>
    %c161 = arith.constant 161 : index
    %1300 = memref.load %arg2[%c161] : memref<319xf32, #tpu.memory_space<smem>>
    %1301 = vector.broadcast %1300 : f32 to vector<16x16xf32>
    %1302 = arith.addf %1299, %1301 : vector<16x16xf32>
    %cst_48 = arith.constant 0.000000e+00 : f32
    %1303 = vector.broadcast %cst_48 : f32 to vector<16x16xf32>
    %1304 = arith.maximumf %1302, %1303 : vector<16x16xf32>
    %c283 = arith.constant 283 : index
    %1305 = memref.load %arg2[%c283] : memref<319xf32, #tpu.memory_space<smem>>
    %1306 = vector.broadcast %1305 : f32 to vector<16x16xf32>
    %1307 = arith.mulf %1304, %1306 : vector<16x16xf32>
    %1308 = arith.addf %1267, %1307 : vector<16x16xf32>
    %c284 = arith.constant 284 : index
    %1309 = memref.load %arg2[%c284] : memref<319xf32, #tpu.memory_space<smem>>
    %1310 = vector.broadcast %1309 : f32 to vector<16x16xf32>
    %1311 = arith.mulf %1304, %1310 : vector<16x16xf32>
    %1312 = arith.addf %1271, %1311 : vector<16x16xf32>
    %c285 = arith.constant 285 : index
    %1313 = memref.load %arg2[%c285] : memref<319xf32, #tpu.memory_space<smem>>
    %1314 = vector.broadcast %1313 : f32 to vector<16x16xf32>
    %1315 = arith.mulf %1304, %1314 : vector<16x16xf32>
    %1316 = arith.addf %1275, %1315 : vector<16x16xf32>
    %c286 = arith.constant 286 : index
    %1317 = memref.load %arg2[%c286] : memref<319xf32, #tpu.memory_space<smem>>
    %1318 = vector.broadcast %1317 : f32 to vector<16x16xf32>
    %1319 = arith.mulf %1304, %1318 : vector<16x16xf32>
    %1320 = arith.addf %1279, %1319 : vector<16x16xf32>
    %c34 = arith.constant 34 : index
    %1321 = memref.load %arg2[%c34] : memref<319xf32, #tpu.memory_space<smem>>
    %1322 = vector.broadcast %1321 : f32 to vector<16x16xf32>
    %1323 = arith.mulf %33, %1322 : vector<16x16xf32>
    %c66 = arith.constant 66 : index
    %1324 = memref.load %arg2[%c66] : memref<319xf32, #tpu.memory_space<smem>>
    %1325 = vector.broadcast %1324 : f32 to vector<16x16xf32>
    %1326 = arith.mulf %43, %1325 : vector<16x16xf32>
    %1327 = arith.addf %1323, %1326 : vector<16x16xf32>
    %c98 = arith.constant 98 : index
    %1328 = memref.load %arg2[%c98] : memref<319xf32, #tpu.memory_space<smem>>
    %1329 = vector.broadcast %1328 : f32 to vector<16x16xf32>
    %1330 = arith.mulf %53, %1329 : vector<16x16xf32>
    %1331 = arith.addf %1327, %1330 : vector<16x16xf32>
    %1332 = vector.extract_strided_slice %18 {offsets = [31, 0], sizes = [1, 16], strides = [1, 1]} : vector<32x16xf32> to vector<1x16xf32>
    %1333 = vector.extract_strided_slice %17 {offsets = [0, 31], sizes = [16, 1], strides = [1, 1]} : vector<16x32xf32> to vector<16x1xf32>
    %1334 = vector.broadcast %1332 : vector<1x16xf32> to vector<16x16xf32>
    %1335 = vector.broadcast %1333 : vector<16x1xf32> to vector<16x16xf32>
    %1336 = arith.subf %1334, %1335 : vector<16x16xf32>
    %1337 = arith.addf %1331, %1336 : vector<16x16xf32>
    %c130 = arith.constant 130 : index
    %1338 = memref.load %arg2[%c130] : memref<319xf32, #tpu.memory_space<smem>>
    %1339 = vector.broadcast %1338 : f32 to vector<16x16xf32>
    %1340 = arith.mulf %1337, %1339 : vector<16x16xf32>
    %c162 = arith.constant 162 : index
    %1341 = memref.load %arg2[%c162] : memref<319xf32, #tpu.memory_space<smem>>
    %1342 = vector.broadcast %1341 : f32 to vector<16x16xf32>
    %1343 = arith.addf %1340, %1342 : vector<16x16xf32>
    %cst_49 = arith.constant 0.000000e+00 : f32
    %1344 = vector.broadcast %cst_49 : f32 to vector<16x16xf32>
    %1345 = arith.maximumf %1343, %1344 : vector<16x16xf32>
    %c287 = arith.constant 287 : index
    %1346 = memref.load %arg2[%c287] : memref<319xf32, #tpu.memory_space<smem>>
    %1347 = vector.broadcast %1346 : f32 to vector<16x16xf32>
    %1348 = arith.mulf %1345, %1347 : vector<16x16xf32>
    %1349 = arith.addf %1308, %1348 : vector<16x16xf32>
    %c288 = arith.constant 288 : index
    %1350 = memref.load %arg2[%c288] : memref<319xf32, #tpu.memory_space<smem>>
    %1351 = vector.broadcast %1350 : f32 to vector<16x16xf32>
    %1352 = arith.mulf %1345, %1351 : vector<16x16xf32>
    %1353 = arith.addf %1312, %1352 : vector<16x16xf32>
    %c289 = arith.constant 289 : index
    %1354 = memref.load %arg2[%c289] : memref<319xf32, #tpu.memory_space<smem>>
    %1355 = vector.broadcast %1354 : f32 to vector<16x16xf32>
    %1356 = arith.mulf %1345, %1355 : vector<16x16xf32>
    %1357 = arith.addf %1316, %1356 : vector<16x16xf32>
    %c290 = arith.constant 290 : index
    %1358 = memref.load %arg2[%c290] : memref<319xf32, #tpu.memory_space<smem>>
    %1359 = vector.broadcast %1358 : f32 to vector<16x16xf32>
    %1360 = arith.mulf %1345, %1359 : vector<16x16xf32>
    %1361 = arith.addf %1320, %1360 : vector<16x16xf32>
    %c291 = arith.constant 291 : index
    %1362 = memref.load %arg2[%c291] : memref<319xf32, #tpu.memory_space<smem>>
    %1363 = vector.broadcast %1362 : f32 to vector<16x16xf32>
    %1364 = arith.mulf %1349, %1363 : vector<16x16xf32>
    %c295 = arith.constant 295 : index
    %1365 = memref.load %arg2[%c295] : memref<319xf32, #tpu.memory_space<smem>>
    %1366 = vector.broadcast %1365 : f32 to vector<16x16xf32>
    %1367 = arith.addf %1364, %1366 : vector<16x16xf32>
    %cst_50 = arith.constant 0.000000e+00 : f32
    %1368 = vector.broadcast %cst_50 : f32 to vector<16x16xf32>
    %1369 = arith.maximumf %1367, %1368 : vector<16x16xf32>
    %c292 = arith.constant 292 : index
    %1370 = memref.load %arg2[%c292] : memref<319xf32, #tpu.memory_space<smem>>
    %1371 = vector.broadcast %1370 : f32 to vector<16x16xf32>
    %1372 = arith.mulf %1353, %1371 : vector<16x16xf32>
    %c296 = arith.constant 296 : index
    %1373 = memref.load %arg2[%c296] : memref<319xf32, #tpu.memory_space<smem>>
    %1374 = vector.broadcast %1373 : f32 to vector<16x16xf32>
    %1375 = arith.addf %1372, %1374 : vector<16x16xf32>
    %cst_51 = arith.constant 0.000000e+00 : f32
    %1376 = vector.broadcast %cst_51 : f32 to vector<16x16xf32>
    %1377 = arith.maximumf %1375, %1376 : vector<16x16xf32>
    %c293 = arith.constant 293 : index
    %1378 = memref.load %arg2[%c293] : memref<319xf32, #tpu.memory_space<smem>>
    %1379 = vector.broadcast %1378 : f32 to vector<16x16xf32>
    %1380 = arith.mulf %1357, %1379 : vector<16x16xf32>
    %c297 = arith.constant 297 : index
    %1381 = memref.load %arg2[%c297] : memref<319xf32, #tpu.memory_space<smem>>
    %1382 = vector.broadcast %1381 : f32 to vector<16x16xf32>
    %1383 = arith.addf %1380, %1382 : vector<16x16xf32>
    %cst_52 = arith.constant 0.000000e+00 : f32
    %1384 = vector.broadcast %cst_52 : f32 to vector<16x16xf32>
    %1385 = arith.maximumf %1383, %1384 : vector<16x16xf32>
    %c294 = arith.constant 294 : index
    %1386 = memref.load %arg2[%c294] : memref<319xf32, #tpu.memory_space<smem>>
    %1387 = vector.broadcast %1386 : f32 to vector<16x16xf32>
    %1388 = arith.mulf %1361, %1387 : vector<16x16xf32>
    %c298 = arith.constant 298 : index
    %1389 = memref.load %arg2[%c298] : memref<319xf32, #tpu.memory_space<smem>>
    %1390 = vector.broadcast %1389 : f32 to vector<16x16xf32>
    %1391 = arith.addf %1388, %1390 : vector<16x16xf32>
    %cst_53 = arith.constant 0.000000e+00 : f32
    %1392 = vector.broadcast %cst_53 : f32 to vector<16x16xf32>
    %1393 = arith.maximumf %1391, %1392 : vector<16x16xf32>
    %c299 = arith.constant 299 : index
    %1394 = memref.load %arg2[%c299] : memref<319xf32, #tpu.memory_space<smem>>
    %1395 = vector.broadcast %1394 : f32 to vector<16x16xf32>
    %1396 = arith.mulf %1369, %1395 : vector<16x16xf32>
    %c303 = arith.constant 303 : index
    %1397 = memref.load %arg2[%c303] : memref<319xf32, #tpu.memory_space<smem>>
    %1398 = vector.broadcast %1397 : f32 to vector<16x16xf32>
    %1399 = arith.mulf %1377, %1398 : vector<16x16xf32>
    %1400 = arith.addf %1396, %1399 : vector<16x16xf32>
    %c307 = arith.constant 307 : index
    %1401 = memref.load %arg2[%c307] : memref<319xf32, #tpu.memory_space<smem>>
    %1402 = vector.broadcast %1401 : f32 to vector<16x16xf32>
    %1403 = arith.mulf %1385, %1402 : vector<16x16xf32>
    %1404 = arith.addf %1400, %1403 : vector<16x16xf32>
    %c311 = arith.constant 311 : index
    %1405 = memref.load %arg2[%c311] : memref<319xf32, #tpu.memory_space<smem>>
    %1406 = vector.broadcast %1405 : f32 to vector<16x16xf32>
    %1407 = arith.mulf %1393, %1406 : vector<16x16xf32>
    %1408 = arith.addf %1404, %1407 : vector<16x16xf32>
    %c315 = arith.constant 315 : index
    %1409 = memref.load %arg2[%c315] : memref<319xf32, #tpu.memory_space<smem>>
    %1410 = vector.broadcast %1409 : f32 to vector<16x16xf32>
    %1411 = arith.addf %1408, %1410 : vector<16x16xf32>
    %cst_54 = arith.constant dense<0xFF800000> : vector<16xf32>
    %1412 = vector.multi_reduction <maximumf>, %1411, %cst_54 [1] : vector<16x16xf32> to vector<16xf32>
    %1413 = vector.shape_cast %1412 : vector<16xf32> to vector<16x1xf32>
    %1414 = vector.broadcast %1413 : vector<16x1xf32> to vector<16x16xf32>
    %1415 = arith.subf %1411, %1414 : vector<16x16xf32>
    %1416 = math.exp %1415 : vector<16x16xf32>
    %cst_55 = arith.constant dense<0.000000e+00> : vector<16xf32>
    %1417 = vector.multi_reduction <add>, %1416, %cst_55 [1] : vector<16x16xf32> to vector<16xf32>
    %1418 = vector.shape_cast %1417 : vector<16xf32> to vector<16x1xf32>
    %cst_56 = arith.constant 1.000000e+00 : f32
    %1419 = vector.broadcast %cst_56 : f32 to vector<16x1xf32>
    %1420 = arith.divf %1419, %1418 : vector<16x1xf32>
    %1421 = vector.broadcast %1420 : vector<16x1xf32> to vector<16x16xf32>
    %1422 = arith.mulf %1416, %1421 : vector<16x16xf32>
    %c300 = arith.constant 300 : index
    %1423 = memref.load %arg2[%c300] : memref<319xf32, #tpu.memory_space<smem>>
    %1424 = vector.broadcast %1423 : f32 to vector<16x16xf32>
    %1425 = arith.mulf %1369, %1424 : vector<16x16xf32>
    %c304 = arith.constant 304 : index
    %1426 = memref.load %arg2[%c304] : memref<319xf32, #tpu.memory_space<smem>>
    %1427 = vector.broadcast %1426 : f32 to vector<16x16xf32>
    %1428 = arith.mulf %1377, %1427 : vector<16x16xf32>
    %1429 = arith.addf %1425, %1428 : vector<16x16xf32>
    %c308 = arith.constant 308 : index
    %1430 = memref.load %arg2[%c308] : memref<319xf32, #tpu.memory_space<smem>>
    %1431 = vector.broadcast %1430 : f32 to vector<16x16xf32>
    %1432 = arith.mulf %1385, %1431 : vector<16x16xf32>
    %1433 = arith.addf %1429, %1432 : vector<16x16xf32>
    %c312 = arith.constant 312 : index
    %1434 = memref.load %arg2[%c312] : memref<319xf32, #tpu.memory_space<smem>>
    %1435 = vector.broadcast %1434 : f32 to vector<16x16xf32>
    %1436 = arith.mulf %1393, %1435 : vector<16x16xf32>
    %1437 = arith.addf %1433, %1436 : vector<16x16xf32>
    %c316 = arith.constant 316 : index
    %1438 = memref.load %arg2[%c316] : memref<319xf32, #tpu.memory_space<smem>>
    %1439 = vector.broadcast %1438 : f32 to vector<16x16xf32>
    %1440 = arith.addf %1437, %1439 : vector<16x16xf32>
    %cst_57 = arith.constant dense<0xFF800000> : vector<16xf32>
    %1441 = vector.multi_reduction <maximumf>, %1440, %cst_57 [1] : vector<16x16xf32> to vector<16xf32>
    %1442 = vector.shape_cast %1441 : vector<16xf32> to vector<16x1xf32>
    %1443 = vector.broadcast %1442 : vector<16x1xf32> to vector<16x16xf32>
    %1444 = arith.subf %1440, %1443 : vector<16x16xf32>
    %1445 = math.exp %1444 : vector<16x16xf32>
    %cst_58 = arith.constant dense<0.000000e+00> : vector<16xf32>
    %1446 = vector.multi_reduction <add>, %1445, %cst_58 [1] : vector<16x16xf32> to vector<16xf32>
    %1447 = vector.shape_cast %1446 : vector<16xf32> to vector<16x1xf32>
    %cst_59 = arith.constant 1.000000e+00 : f32
    %1448 = vector.broadcast %cst_59 : f32 to vector<16x1xf32>
    %1449 = arith.divf %1448, %1447 : vector<16x1xf32>
    %1450 = vector.broadcast %1449 : vector<16x1xf32> to vector<16x16xf32>
    %1451 = arith.mulf %1445, %1450 : vector<16x16xf32>
    %c301 = arith.constant 301 : index
    %1452 = memref.load %arg2[%c301] : memref<319xf32, #tpu.memory_space<smem>>
    %1453 = vector.broadcast %1452 : f32 to vector<16x16xf32>
    %1454 = arith.mulf %1369, %1453 : vector<16x16xf32>
    %c305 = arith.constant 305 : index
    %1455 = memref.load %arg2[%c305] : memref<319xf32, #tpu.memory_space<smem>>
    %1456 = vector.broadcast %1455 : f32 to vector<16x16xf32>
    %1457 = arith.mulf %1377, %1456 : vector<16x16xf32>
    %1458 = arith.addf %1454, %1457 : vector<16x16xf32>
    %c309 = arith.constant 309 : index
    %1459 = memref.load %arg2[%c309] : memref<319xf32, #tpu.memory_space<smem>>
    %1460 = vector.broadcast %1459 : f32 to vector<16x16xf32>
    %1461 = arith.mulf %1385, %1460 : vector<16x16xf32>
    %1462 = arith.addf %1458, %1461 : vector<16x16xf32>
    %c313 = arith.constant 313 : index
    %1463 = memref.load %arg2[%c313] : memref<319xf32, #tpu.memory_space<smem>>
    %1464 = vector.broadcast %1463 : f32 to vector<16x16xf32>
    %1465 = arith.mulf %1393, %1464 : vector<16x16xf32>
    %1466 = arith.addf %1462, %1465 : vector<16x16xf32>
    %c317 = arith.constant 317 : index
    %1467 = memref.load %arg2[%c317] : memref<319xf32, #tpu.memory_space<smem>>
    %1468 = vector.broadcast %1467 : f32 to vector<16x16xf32>
    %1469 = arith.addf %1466, %1468 : vector<16x16xf32>
    %cst_60 = arith.constant dense<0xFF800000> : vector<16xf32>
    %1470 = vector.multi_reduction <maximumf>, %1469, %cst_60 [1] : vector<16x16xf32> to vector<16xf32>
    %1471 = vector.shape_cast %1470 : vector<16xf32> to vector<16x1xf32>
    %1472 = vector.broadcast %1471 : vector<16x1xf32> to vector<16x16xf32>
    %1473 = arith.subf %1469, %1472 : vector<16x16xf32>
    %1474 = math.exp %1473 : vector<16x16xf32>
    %cst_61 = arith.constant dense<0.000000e+00> : vector<16xf32>
    %1475 = vector.multi_reduction <add>, %1474, %cst_61 [1] : vector<16x16xf32> to vector<16xf32>
    %1476 = vector.shape_cast %1475 : vector<16xf32> to vector<16x1xf32>
    %cst_62 = arith.constant 1.000000e+00 : f32
    %1477 = vector.broadcast %cst_62 : f32 to vector<16x1xf32>
    %1478 = arith.divf %1477, %1476 : vector<16x1xf32>
    %1479 = vector.broadcast %1478 : vector<16x1xf32> to vector<16x16xf32>
    %1480 = arith.mulf %1474, %1479 : vector<16x16xf32>
    %c302 = arith.constant 302 : index
    %1481 = memref.load %arg2[%c302] : memref<319xf32, #tpu.memory_space<smem>>
    %1482 = vector.broadcast %1481 : f32 to vector<16x16xf32>
    %1483 = arith.mulf %1369, %1482 : vector<16x16xf32>
    %c306 = arith.constant 306 : index
    %1484 = memref.load %arg2[%c306] : memref<319xf32, #tpu.memory_space<smem>>
    %1485 = vector.broadcast %1484 : f32 to vector<16x16xf32>
    %1486 = arith.mulf %1377, %1485 : vector<16x16xf32>
    %1487 = arith.addf %1483, %1486 : vector<16x16xf32>
    %c310 = arith.constant 310 : index
    %1488 = memref.load %arg2[%c310] : memref<319xf32, #tpu.memory_space<smem>>
    %1489 = vector.broadcast %1488 : f32 to vector<16x16xf32>
    %1490 = arith.mulf %1385, %1489 : vector<16x16xf32>
    %1491 = arith.addf %1487, %1490 : vector<16x16xf32>
    %c314 = arith.constant 314 : index
    %1492 = memref.load %arg2[%c314] : memref<319xf32, #tpu.memory_space<smem>>
    %1493 = vector.broadcast %1492 : f32 to vector<16x16xf32>
    %1494 = arith.mulf %1393, %1493 : vector<16x16xf32>
    %1495 = arith.addf %1491, %1494 : vector<16x16xf32>
    %c318 = arith.constant 318 : index
    %1496 = memref.load %arg2[%c318] : memref<319xf32, #tpu.memory_space<smem>>
    %1497 = vector.broadcast %1496 : f32 to vector<16x16xf32>
    %1498 = arith.addf %1495, %1497 : vector<16x16xf32>
    %cst_63 = arith.constant dense<0xFF800000> : vector<16xf32>
    %1499 = vector.multi_reduction <maximumf>, %1498, %cst_63 [1] : vector<16x16xf32> to vector<16xf32>
    %1500 = vector.shape_cast %1499 : vector<16xf32> to vector<16x1xf32>
    %1501 = vector.broadcast %1500 : vector<16x1xf32> to vector<16x16xf32>
    %1502 = arith.subf %1498, %1501 : vector<16x16xf32>
    %1503 = math.exp %1502 : vector<16x16xf32>
    %cst_64 = arith.constant dense<0.000000e+00> : vector<16xf32>
    %1504 = vector.multi_reduction <add>, %1503, %cst_64 [1] : vector<16x16xf32> to vector<16xf32>
    %1505 = vector.shape_cast %1504 : vector<16xf32> to vector<16x1xf32>
    %cst_65 = arith.constant 1.000000e+00 : f32
    %1506 = vector.broadcast %cst_65 : f32 to vector<16x1xf32>
    %1507 = arith.divf %1506, %1505 : vector<16x1xf32>
    %1508 = vector.broadcast %1507 : vector<16x1xf32> to vector<16x16xf32>
    %1509 = arith.mulf %1503, %1508 : vector<16x16xf32>
    %c0_66 = arith.constant 0 : index
    %c0_67 = arith.constant 0 : index
    %1510 = vector.load %arg13[%c0_66, %c0_67] : memref<3x32xf32, #tpu.memory_space<vmem>>, vector<3x32xf32>
    %1511 = arith.mulf %33, %1422 : vector<16x16xf32>
    %cst_68 = arith.constant dense<0.000000e+00> : vector<16xf32>
    %1512 = vector.multi_reduction <add>, %1511, %cst_68 [1] : vector<16x16xf32> to vector<16xf32>
    %1513 = vector.shape_cast %1512 : vector<16xf32> to vector<16x1xf32>
    %1514 = arith.mulf %43, %1422 : vector<16x16xf32>
    %cst_69 = arith.constant dense<0.000000e+00> : vector<16xf32>
    %1515 = vector.multi_reduction <add>, %1514, %cst_69 [1] : vector<16x16xf32> to vector<16xf32>
    %1516 = vector.shape_cast %1515 : vector<16xf32> to vector<16x1xf32>
    %1517 = arith.mulf %53, %1422 : vector<16x16xf32>
    %cst_70 = arith.constant dense<0.000000e+00> : vector<16xf32>
    %1518 = vector.multi_reduction <add>, %1517, %cst_70 [1] : vector<16x16xf32> to vector<16xf32>
    %1519 = vector.shape_cast %1518 : vector<16xf32> to vector<16x1xf32>
    %1520 = vector.extract_strided_slice %1510 {offsets = [0, 0], sizes = [3, 8], strides = [1, 1]} : vector<3x32xf32> to vector<3x8xf32>
    %1521 = vector.extract_strided_slice %1520 {offsets = [0, 0], sizes = [1, 8], strides = [1, 1]} : vector<3x8xf32> to vector<1x8xf32>
    %1522 = vector.broadcast %1513 : vector<16x1xf32> to vector<16x8xf32>
    %1523 = vector.broadcast %1521 : vector<1x8xf32> to vector<16x8xf32>
    %1524 = arith.mulf %1522, %1523 : vector<16x8xf32>
    %1525 = vector.extract_strided_slice %1520 {offsets = [1, 0], sizes = [1, 8], strides = [1, 1]} : vector<3x8xf32> to vector<1x8xf32>
    %1526 = vector.broadcast %1516 : vector<16x1xf32> to vector<16x8xf32>
    %1527 = vector.broadcast %1525 : vector<1x8xf32> to vector<16x8xf32>
    %1528 = arith.mulf %1526, %1527 : vector<16x8xf32>
    %1529 = arith.addf %1524, %1528 : vector<16x8xf32>
    %1530 = vector.extract_strided_slice %1520 {offsets = [2, 0], sizes = [1, 8], strides = [1, 1]} : vector<3x8xf32> to vector<1x8xf32>
    %1531 = vector.broadcast %1519 : vector<16x1xf32> to vector<16x8xf32>
    %1532 = vector.broadcast %1530 : vector<1x8xf32> to vector<16x8xf32>
    %1533 = arith.mulf %1531, %1532 : vector<16x8xf32>
    %1534 = arith.addf %1529, %1533 : vector<16x8xf32>
    %1535 = vector.extract_strided_slice %19 {offsets = [0, 0], sizes = [16, 8], strides = [1, 1]} : vector<16x32xf32> to vector<16x8xf32>
    %cst_71 = arith.constant dense<0.000000e+00> : vector<16x8xf32>
    %1536 = tpu.matmul %1422, %1535, %cst_71 {dimension_numbers = #tpu.dot_dimension_numbers<[1], [0], [0], [1], [0, 0, 1, 1], [], []>} : vector<16x16xf32>, vector<16x8xf32>, vector<16x8xf32> -> vector<16x8xf32>
    %1537 = arith.addf %1536, %1534 : vector<16x8xf32>
    %1538 = arith.mulf %33, %1451 : vector<16x16xf32>
    %cst_72 = arith.constant dense<0.000000e+00> : vector<16xf32>
    %1539 = vector.multi_reduction <add>, %1538, %cst_72 [1] : vector<16x16xf32> to vector<16xf32>
    %1540 = vector.shape_cast %1539 : vector<16xf32> to vector<16x1xf32>
    %1541 = arith.mulf %43, %1451 : vector<16x16xf32>
    %cst_73 = arith.constant dense<0.000000e+00> : vector<16xf32>
    %1542 = vector.multi_reduction <add>, %1541, %cst_73 [1] : vector<16x16xf32> to vector<16xf32>
    %1543 = vector.shape_cast %1542 : vector<16xf32> to vector<16x1xf32>
    %1544 = arith.mulf %53, %1451 : vector<16x16xf32>
    %cst_74 = arith.constant dense<0.000000e+00> : vector<16xf32>
    %1545 = vector.multi_reduction <add>, %1544, %cst_74 [1] : vector<16x16xf32> to vector<16xf32>
    %1546 = vector.shape_cast %1545 : vector<16xf32> to vector<16x1xf32>
    %1547 = vector.extract_strided_slice %1510 {offsets = [0, 8], sizes = [3, 8], strides = [1, 1]} : vector<3x32xf32> to vector<3x8xf32>
    %1548 = vector.extract_strided_slice %1547 {offsets = [0, 0], sizes = [1, 8], strides = [1, 1]} : vector<3x8xf32> to vector<1x8xf32>
    %1549 = vector.broadcast %1540 : vector<16x1xf32> to vector<16x8xf32>
    %1550 = vector.broadcast %1548 : vector<1x8xf32> to vector<16x8xf32>
    %1551 = arith.mulf %1549, %1550 : vector<16x8xf32>
    %1552 = vector.extract_strided_slice %1547 {offsets = [1, 0], sizes = [1, 8], strides = [1, 1]} : vector<3x8xf32> to vector<1x8xf32>
    %1553 = vector.broadcast %1543 : vector<16x1xf32> to vector<16x8xf32>
    %1554 = vector.broadcast %1552 : vector<1x8xf32> to vector<16x8xf32>
    %1555 = arith.mulf %1553, %1554 : vector<16x8xf32>
    %1556 = arith.addf %1551, %1555 : vector<16x8xf32>
    %1557 = vector.extract_strided_slice %1547 {offsets = [2, 0], sizes = [1, 8], strides = [1, 1]} : vector<3x8xf32> to vector<1x8xf32>
    %1558 = vector.broadcast %1546 : vector<16x1xf32> to vector<16x8xf32>
    %1559 = vector.broadcast %1557 : vector<1x8xf32> to vector<16x8xf32>
    %1560 = arith.mulf %1558, %1559 : vector<16x8xf32>
    %1561 = arith.addf %1556, %1560 : vector<16x8xf32>
    %1562 = vector.extract_strided_slice %19 {offsets = [0, 8], sizes = [16, 8], strides = [1, 1]} : vector<16x32xf32> to vector<16x8xf32>
    %cst_75 = arith.constant dense<0.000000e+00> : vector<16x8xf32>
    %1563 = tpu.matmul %1451, %1562, %cst_75 {dimension_numbers = #tpu.dot_dimension_numbers<[1], [0], [0], [1], [0, 0, 1, 1], [], []>} : vector<16x16xf32>, vector<16x8xf32>, vector<16x8xf32> -> vector<16x8xf32>
    %1564 = arith.addf %1563, %1561 : vector<16x8xf32>
    %1565 = arith.mulf %33, %1480 : vector<16x16xf32>
    %cst_76 = arith.constant dense<0.000000e+00> : vector<16xf32>
    %1566 = vector.multi_reduction <add>, %1565, %cst_76 [1] : vector<16x16xf32> to vector<16xf32>
    %1567 = vector.shape_cast %1566 : vector<16xf32> to vector<16x1xf32>
    %1568 = arith.mulf %43, %1480 : vector<16x16xf32>
    %cst_77 = arith.constant dense<0.000000e+00> : vector<16xf32>
    %1569 = vector.multi_reduction <add>, %1568, %cst_77 [1] : vector<16x16xf32> to vector<16xf32>
    %1570 = vector.shape_cast %1569 : vector<16xf32> to vector<16x1xf32>
    %1571 = arith.mulf %53, %1480 : vector<16x16xf32>
    %cst_78 = arith.constant dense<0.000000e+00> : vector<16xf32>
    %1572 = vector.multi_reduction <add>, %1571, %cst_78 [1] : vector<16x16xf32> to vector<16xf32>
    %1573 = vector.shape_cast %1572 : vector<16xf32> to vector<16x1xf32>
    %1574 = vector.extract_strided_slice %1510 {offsets = [0, 16], sizes = [3, 8], strides = [1, 1]} : vector<3x32xf32> to vector<3x8xf32>
    %1575 = vector.extract_strided_slice %1574 {offsets = [0, 0], sizes = [1, 8], strides = [1, 1]} : vector<3x8xf32> to vector<1x8xf32>
    %1576 = vector.broadcast %1567 : vector<16x1xf32> to vector<16x8xf32>
    %1577 = vector.broadcast %1575 : vector<1x8xf32> to vector<16x8xf32>
    %1578 = arith.mulf %1576, %1577 : vector<16x8xf32>
    %1579 = vector.extract_strided_slice %1574 {offsets = [1, 0], sizes = [1, 8], strides = [1, 1]} : vector<3x8xf32> to vector<1x8xf32>
    %1580 = vector.broadcast %1570 : vector<16x1xf32> to vector<16x8xf32>
    %1581 = vector.broadcast %1579 : vector<1x8xf32> to vector<16x8xf32>
    %1582 = arith.mulf %1580, %1581 : vector<16x8xf32>
    %1583 = arith.addf %1578, %1582 : vector<16x8xf32>
    %1584 = vector.extract_strided_slice %1574 {offsets = [2, 0], sizes = [1, 8], strides = [1, 1]} : vector<3x8xf32> to vector<1x8xf32>
    %1585 = vector.broadcast %1573 : vector<16x1xf32> to vector<16x8xf32>
    %1586 = vector.broadcast %1584 : vector<1x8xf32> to vector<16x8xf32>
    %1587 = arith.mulf %1585, %1586 : vector<16x8xf32>
    %1588 = arith.addf %1583, %1587 : vector<16x8xf32>
    %1589 = vector.extract_strided_slice %19 {offsets = [0, 16], sizes = [16, 8], strides = [1, 1]} : vector<16x32xf32> to vector<16x8xf32>
    %cst_79 = arith.constant dense<0.000000e+00> : vector<16x8xf32>
    %1590 = tpu.matmul %1480, %1589, %cst_79 {dimension_numbers = #tpu.dot_dimension_numbers<[1], [0], [0], [1], [0, 0, 1, 1], [], []>} : vector<16x16xf32>, vector<16x8xf32>, vector<16x8xf32> -> vector<16x8xf32>
    %1591 = arith.addf %1590, %1588 : vector<16x8xf32>
    %1592 = arith.mulf %33, %1509 : vector<16x16xf32>
    %cst_80 = arith.constant dense<0.000000e+00> : vector<16xf32>
    %1593 = vector.multi_reduction <add>, %1592, %cst_80 [1] : vector<16x16xf32> to vector<16xf32>
    %1594 = vector.shape_cast %1593 : vector<16xf32> to vector<16x1xf32>
    %1595 = arith.mulf %43, %1509 : vector<16x16xf32>
    %cst_81 = arith.constant dense<0.000000e+00> : vector<16xf32>
    %1596 = vector.multi_reduction <add>, %1595, %cst_81 [1] : vector<16x16xf32> to vector<16xf32>
    %1597 = vector.shape_cast %1596 : vector<16xf32> to vector<16x1xf32>
    %1598 = arith.mulf %53, %1509 : vector<16x16xf32>
    %cst_82 = arith.constant dense<0.000000e+00> : vector<16xf32>
    %1599 = vector.multi_reduction <add>, %1598, %cst_82 [1] : vector<16x16xf32> to vector<16xf32>
    %1600 = vector.shape_cast %1599 : vector<16xf32> to vector<16x1xf32>
    %1601 = vector.extract_strided_slice %1510 {offsets = [0, 24], sizes = [3, 8], strides = [1, 1]} : vector<3x32xf32> to vector<3x8xf32>
    %1602 = vector.extract_strided_slice %1601 {offsets = [0, 0], sizes = [1, 8], strides = [1, 1]} : vector<3x8xf32> to vector<1x8xf32>
    %1603 = vector.broadcast %1594 : vector<16x1xf32> to vector<16x8xf32>
    %1604 = vector.broadcast %1602 : vector<1x8xf32> to vector<16x8xf32>
    %1605 = arith.mulf %1603, %1604 : vector<16x8xf32>
    %1606 = vector.extract_strided_slice %1601 {offsets = [1, 0], sizes = [1, 8], strides = [1, 1]} : vector<3x8xf32> to vector<1x8xf32>
    %1607 = vector.broadcast %1597 : vector<16x1xf32> to vector<16x8xf32>
    %1608 = vector.broadcast %1606 : vector<1x8xf32> to vector<16x8xf32>
    %1609 = arith.mulf %1607, %1608 : vector<16x8xf32>
    %1610 = arith.addf %1605, %1609 : vector<16x8xf32>
    %1611 = vector.extract_strided_slice %1601 {offsets = [2, 0], sizes = [1, 8], strides = [1, 1]} : vector<3x8xf32> to vector<1x8xf32>
    %1612 = vector.broadcast %1600 : vector<16x1xf32> to vector<16x8xf32>
    %1613 = vector.broadcast %1611 : vector<1x8xf32> to vector<16x8xf32>
    %1614 = arith.mulf %1612, %1613 : vector<16x8xf32>
    %1615 = arith.addf %1610, %1614 : vector<16x8xf32>
    %1616 = vector.extract_strided_slice %19 {offsets = [0, 24], sizes = [16, 8], strides = [1, 1]} : vector<16x32xf32> to vector<16x8xf32>
    %cst_83 = arith.constant dense<0.000000e+00> : vector<16x8xf32>
    %1617 = tpu.matmul %1509, %1616, %cst_83 {dimension_numbers = #tpu.dot_dimension_numbers<[1], [0], [0], [1], [0, 0, 1, 1], [], []>} : vector<16x16xf32>, vector<16x8xf32>, vector<16x8xf32> -> vector<16x8xf32>
    %1618 = arith.addf %1617, %1615 : vector<16x8xf32>
    %1619 = tpu.concatenate %1537, %1564, %1591, %1618 in 1 : vector<16x8xf32>, vector<16x8xf32>, vector<16x8xf32>, vector<16x8xf32> -> vector<16x32xf32>
    %1620 = vector.broadcast %4 : vector<1x32xf32> to vector<16x32xf32>
    %1621 = arith.addf %1619, %1620 : vector<16x32xf32>
    %1622 = vector.broadcast %5 : vector<1x32xf32> to vector<16x32xf32>
    %1623 = arith.mulf %1621, %1622 : vector<16x32xf32>
    %1624 = vector.broadcast %6 : vector<1x32xf32> to vector<16x32xf32>
    %1625 = arith.addf %1623, %1624 : vector<16x32xf32>
    %cst_84 = arith.constant 0.000000e+00 : f32
    %1626 = vector.broadcast %cst_84 : f32 to vector<16x32xf32>
    %1627 = arith.maximumf %1625, %1626 : vector<16x32xf32>
    %c0_85 = arith.constant 0 : index
    %c0_86 = arith.constant 0 : index
    %c0_87 = arith.constant 0 : index
    %1628 = vector.load %arg3[%c0_85, %c0_86, %c0_87] : memref<1x16x32xf32, #tpu.memory_space<vmem>>, vector<1x16x32xf32>
    %1629 = vector.shape_cast %1628 : vector<1x16x32xf32> to vector<16x32xf32>
    %c0_88 = arith.constant 0 : index
    %c0_89 = arith.constant 0 : index
    %1630 = vector.load %arg14[%c0_88, %c0_89] : memref<32x32xf32, #tpu.memory_space<vmem>>, vector<32x32xf32>
    %cst_90 = arith.constant dense<0.000000e+00> : vector<16x32xf32>
    %1631 = tpu.matmul %1627, %1630, %cst_90 {dimension_numbers = #tpu.dot_dimension_numbers<[1], [0], [0], [1], [0, 0, 1, 1], [], []>} : vector<16x32xf32>, vector<32x32xf32>, vector<16x32xf32> -> vector<16x32xf32>
    %1632 = vector.broadcast %7 : vector<1x32xf32> to vector<16x32xf32>
    %1633 = arith.addf %1631, %1632 : vector<16x32xf32>
    %1634 = arith.addf %1633, %1629 : vector<16x32xf32>
    %cst_91 = arith.constant 0.000000e+00 : f32
    %1635 = vector.broadcast %cst_91 : f32 to vector<16x32xf32>
    %1636 = arith.maximumf %1634, %1635 : vector<16x32xf32>
    %c0_92 = arith.constant 0 : index
    %c0_93 = arith.constant 0 : index
    %c0_94 = arith.constant 0 : index
    %1637 = vector.load %arg17[%c0_92, %c0_93, %c0_94] : memref<1x16x32xf32, #tpu.memory_space<vmem>>, vector<1x16x32xf32>
    %1638 = vector.shape_cast %1637 : vector<1x16x32xf32> to vector<16x32xf32>
    %1639 = vector.shape_cast %1636 : vector<16x32xf32> to vector<1x16x32xf32>
    tpu.vector_store %arg17[%c0_92, %c0_93, %c0_94], %1639 {strides = array<i32>} : memref<1x16x32xf32, #tpu.memory_space<vmem>>, vector<1x16x32xf32>,
    return
  }
  func.func @transform_0(%arg0: i32, %arg1: i32) -> i32 {
    %c0_i32 = arith.constant 0 : i32
    %c0_i32_0 = arith.constant 0 : i32
    return %c0_i32 : i32
  }
  func.func @transform_1(%arg0: i32, %arg1: i32) -> (i32, i32, i32) {
    %c0_i32 = arith.constant 0 : i32
    %c0_i32_0 = arith.constant 0 : i32
    return %arg0, %arg1, %c0_i32 : i32, i32, i32
  }
  func.func @transform_2(%arg0: i32, %arg1: i32) -> (i32, i32, i32) {
    %c0_i32 = arith.constant 0 : i32
    %c0_i32_0 = arith.constant 0 : i32
    %c0_i32_1 = arith.constant 0 : i32
    return %arg0, %c0_i32, %c0_i32_0 : i32, i32, i32
  }
  func.func @transform_3(%arg0: i32, %arg1: i32) -> (i32, i32, i32) {
    %c0_i32 = arith.constant 0 : i32
    %c0_i32_0 = arith.constant 0 : i32
    %c0_i32_1 = arith.constant 0 : i32
    return %arg0, %c0_i32, %c0_i32_0 : i32, i32, i32
  }
  func.func @transform_4(%arg0: i32, %arg1: i32) -> (i32, i32, i32) {
    %c0_i32 = arith.constant 0 : i32
    %c0_i32_0 = arith.constant 0 : i32
    return %arg0, %arg1, %c0_i32 : i32, i32, i32
  }
  func.func @transform_5(%arg0: i32, %arg1: i32) -> (i32, i32, i32) {
    %c0_i32 = arith.constant 0 : i32
    %c0_i32_0 = arith.constant 0 : i32
    %c0_i32_1 = arith.constant 0 : i32
    return %arg0, %c0_i32, %c0_i32_0 : i32, i32, i32
  }
  func.func @transform_6(%arg0: i32, %arg1: i32) -> (i32, i32) {
    %c0_i32 = arith.constant 0 : i32
    %c0_i32_0 = arith.constant 0 : i32
    %c0_i32_1 = arith.constant 0 : i32
    return %c0_i32, %c0_i32_0 : i32, i32
  }
  func.func @transform_7(%arg0: i32, %arg1: i32) -> (i32, i32) {
    %c0_i32 = arith.constant 0 : i32
    %c0_i32_0 = arith.constant 0 : i32
    %c0_i32_1 = arith.constant 0 : i32
    return %c0_i32, %c0_i32_0 : i32, i32
  }
  func.func @transform_8(%arg0: i32, %arg1: i32) -> (i32, i32) {
    %c0_i32 = arith.constant 0 : i32
    %c0_i32_0 = arith.constant 0 : i32
    %c0_i32_1 = arith.constant 0 : i32
    return %c0_i32, %c0_i32_0 : i32, i32
  }
  func.func @transform_9(%arg0: i32, %arg1: i32) -> (i32, i32) {
    %c0_i32 = arith.constant 0 : i32
    %c0_i32_0 = arith.constant 0 : i32
    %c0_i32_1 = arith.constant 0 : i32
    return %c0_i32, %c0_i32_0 : i32, i32
  }
  func.func @transform_10(%arg0: i32, %arg1: i32) -> (i32, i32) {
    %c0_i32 = arith.constant 0 : i32
    %c0_i32_0 = arith.constant 0 : i32
    %c0_i32_1 = arith.constant 0 : i32
    return %c0_i32, %c0_i32_0 : i32, i32
  }
  func.func @transform_11(%arg0: i32, %arg1: i32) -> (i32, i32) {
    %c0_i32 = arith.constant 0 : i32
    %c0_i32_0 = arith.constant 0 : i32
    %c0_i32_1 = arith.constant 0 : i32
    return %c0_i32, %c0_i32_0 : i32, i32
  }
  func.func @transform_12(%arg0: i32, %arg1: i32) -> (i32, i32) {
    %c0_i32 = arith.constant 0 : i32
    %c0_i32_0 = arith.constant 0 : i32
    %c0_i32_1 = arith.constant 0 : i32
    return %c0_i32, %c0_i32_0 : i32, i32
  }
  func.func @transform_13(%arg0: i32, %arg1: i32) -> (i32, i32) {
    %c0_i32 = arith.constant 0 : i32
    %c0_i32_0 = arith.constant 0 : i32
    %c0_i32_1 = arith.constant 0 : i32
    return %c0_i32, %c0_i32_0 : i32, i32
  }
  func.func @transform_14(%arg0: i32, %arg1: i32) -> (i32, i32) {
    %c0_i32 = arith.constant 0 : i32
    %c0_i32_0 = arith.constant 0 : i32
    %c0_i32_1 = arith.constant 0 : i32
    return %c0_i32, %c0_i32_0 : i32, i32
  }
  func.func @transform_15(%arg0: i32, %arg1: i32) -> (i32, i32, i32) {
    %c0_i32 = arith.constant 0 : i32
    %c0_i32_0 = arith.constant 0 : i32
    return %arg0, %arg1, %c0_i32 : i32, i32, i32
  }
}

</mosaic_0001>

<bundles_post_ra>
// kernel: tpu_custom_call.1
= control target key start
LH: loop header
LB: loop body
LE: loop exit
PB: predicated region body
PF: predicated region fallthrough
CT: control target
= control target key end

     0   :  { %s9537_s0 = inlined_call_operand.hbm [shape: f32[319], index: 0, kind: input, shape index: {}]   ;;  %s9538_s1 = inlined_call_operand.vmem [shape: f32[2,16,32], index: 1, kind: input, shape index: {}]   ;;  %s9539_s2 = inlined_call_operand.vmem [shape: f32[2,16,32], index: 2, kind: input, shape index: {}]   ;;  %s9540_s3 = inlined_call_operand.vmem [shape: f32[2,32,16], index: 3, kind: input, shape index: {}]   ;;  %s9541_s4 = inlined_call_operand.vmem [shape: f32[2,16,3], index: 4, kind: input, shape index: {}]   ;;  %s9542_s5 = inlined_call_operand.vmem [shape: f32[2,3,16], index: 5, kind: input, shape index: {}]   ;;  %s9543_s6 = inlined_call_operand.vmem [shape: f32[32,32], index: 6, kind: input, shape index: {}]   ;;  %s9544_s7 = inlined_call_operand.vmem [shape: f32[32,32], index: 7, kind: input, shape index: {}]   ;;  %s9545_s8 = inlined_call_operand.vmem [shape: f32[32,32], index: 8, kind: input, shape index: {}]   ;;  %s9546_s9 = inlined_call_operand.hbm [shape: f32[32,32], index: 9, kind: input, shape index: {}]   ;;  %s9547_s10 = inlined_call_operand.hbm [shape: f32[32,32], index: 10, kind: input, shape index: {}]   ;;  %s9548_s11 = inlined_call_operand.hbm [shape: f32[3,32], index: 11, kind: input, shape index: {}]   ;;  %s9549_s12 = inlined_call_operand.hbm [shape: f32[32,32], index: 12, kind: input, shape index: {}]   ;;  %s9550_s13 = inlined_call_operand.vmem [shape: f32[8,32], index: 13, kind: input, shape index: {}]   ;;  %s9551_s14 = inlined_call_operand.vmem [shape: f32[32,2], index: 14, kind: input, shape index: {}]   ;;  %s9552_s15 = inlined_call_operand.hbm [shape: f32[2,16,32], index: 15, kind: output, shape index: {}]  }
   0x1   :  { %10053 = sst [smem:[#allocation263_spill]] %s9537_s0 }
   0x2   :  { %10054 = sst [smem:[#allocation264_spill]] %s9538_s1 }
   0x3   :  { %10055 = sst [smem:[#allocation265_spill]] %s9539_s2 }
   0x4   :  { %10056 = sst [smem:[#allocation266_spill]] %s9540_s3 }
   0x5   :  { %10057 = sst [smem:[#allocation267_spill]] %s9541_s4 }
   0x6   :  { %10058 = sst [smem:[#allocation268_spill]] %s9542_s5 }
   0x7   :  { %10059 = sst [smem:[#allocation269_spill]] %s9543_s6 }
   0x8   :  { %10060 = sst [smem:[#allocation270_spill]] %s9544_s7 }
   0x9   :  { %10061 = sst [smem:[#allocation271_spill]] %s9545_s8 }
   0xa   :  { %10062 = sst [smem:[#allocation272_spill]] %s9546_s9 }
   0xb   :  { %10063 = sst [smem:[#allocation273_spill]] %s9547_s10 }
   0xc   :  { %10064 = sst [smem:[#allocation274_spill]] %s9548_s11 }
   0xd   :  { %10065 = sst [smem:[#allocation275_spill]] %s9549_s12 }
   0xe   :  { %10066 = sst [smem:[#allocation276_spill]] %s9550_s13 }
   0xf   :  { %10067 = sst [smem:[#allocation277_spill]] %s9551_s14 }
  0x10   :  { %10068 = sst [smem:[#allocation278_spill]] %s9552_s15 }
  0x11   :  { %20 = vsyncpa [#allocation8], 0 }
  0x12   :  { %21 = vsyncpa [#allocation6], 0 }
  0x13   :  { %22 = vsyncpa [#allocation11], 0 }
  0x14   :  { %23 = vsyncpa [#allocation14], 0 }
  0x15   :  { %24 = vsyncpa [#allocation7], 0 }
  0x16   :  { %26 = vsyncpa [#allocation7 + $0x1], 0  ;;  %s5633_s18 = smov 0   ;;  %s5635_s19 = smov 0  }
  0x17   :  { %s5637_s20 = smov 0   ;;  %s5639_s21 = smov 0  }
  0x18   :  { %s5641_s22 = smov 0   ;;  %s5643_s23 = smov 0  }
  0x19 LB: > { %10069 = sst [smem:[#allocation21_spill]] %s5484_s18  ;;  %s4509_s24 = sadd.s32 4294967295, %s5504_s23   ;;  %s5504_s23 = sphi %s5643_s23, %s32_s23   ;;  %s5500_s22 = sphi %s5641_s22, %s11616_s22   ;;  %s5496_s21 = sphi %s5639_s21, %s11615_s21   ;;  %s5492_s20 = sphi %s5637_s20, %s11614_s20   ;;  %s5488_s19 = sphi %s5635_s19, %s11613_s19   ;;  %s5484_s18 = sphi %s5633_s18, %s11612_s18  }
  0x1a   : > { %10070 = sst [smem:[#allocation22_spill]] %s5488_s19  ;;  %s4510_s25 = sadd.s32 4294967294, %s5504_s23  }
  0x1b   : > { %10071 = sst [smem:[#allocation23_spill]] %s5492_s20  ;;  %s44_s26 = sadd.s32 1, %s5500_s22 }
  0x1c   : > { %10072 = sst [smem:[#allocation24_spill]] %s5496_s21  ;;  %s397_s27 = sadd.s32 1, %s5492_s20 }
  0x1d   : > { %10073 = sst [smem:[#allocation25_spill]] %s5500_s22  ;;  %p46_p0 = scmp.ge.s32.totalorder %s44_s26, 2 }
  0x1e   : > { %10074 = sst [smem:[#allocation26_spill]] %s5504_s23  ;;  %p407_p1 = scmp.ne.s32.totalorder %s5492_s20, %s5488_s19 }
  0x1f   : > { %p408_p2 = scmp.eq.s32.totalorder %s4509_s24, 1  ;;  %p413_p3 = scmp.ne.s32.totalorder %s5488_s19, %s5484_s18 }
  0x20   : > { %s11618_s26 = smov (%p46_p0, %s44_s26), 0  ;;  %p414_p5 = scmp.eq.s32.totalorder %s4510_s25, 1 }
  0x21   : > { %10075 = sst [smem:[#allocation27_spill]] %s11618_s26  ;;  %p5673_p4 = por %p408_p2, %p407_p1 }
  0x22   : > { %s392_s29 = ssub.s32 %s5500_s22, %s11618_s26  ;;  %p4511_p6 = scmp.ge.s32.totalorder %s5504_s23, 1 }
  0x23   : > { %s10076_s28 = scalar_select %p5673_p4, 1, 0 }
  0x24   : > { %p395_p7 = scmp.eq.s32.totalorder %s392_s29, 0  ;;  %p5680_p8 = por %p414_p5, %p413_p3 }
  0x25   : > { %10077 = sst [smem:[#allocation28_spill]] %s10076_s28  ;;  %p421_p9 = scmp.lt.s32.totalorder %s5504_s23, 3 }
  0x26   : > { %s10078_s30 = scalar_select %p5680_p8, 1, 0 }
  0x27   : > { %s5686_s16 = scalar_select %p395_p7, %s5492_s20, %s397_s27  }
  0x28   : > { %10079 = sst [smem:[#allocation29_spill]] %s10078_s30  ;;  %p5688_p10 = pnand %p4511_p6, %p421_p9 }
  0x29   : > { %10080 = sst [smem:[#allocation30_spill]] %s5686_s16  ;;  %p5692_p11 = scmp.eq.s32.totalorder %s4509_s24, 0 }
  0x2a   : > { %p5064_p12 = pneg %p5688_p10  ;;  %s5506_s25 = smov [#allocation10]  }
  0x2b   : > { %s464_s29 = sshll.u32 %s5506_s25, 4  ;;  %s465_s29 = int_to_ptr.vmem [resolvable:$true] %s464_s29 }
  0x2c   : > { %p5700_p13 = pnand %p5692_p11, %p5064_p12  ;;  %s5308_s27 = scalar_lea.vmem %s465_s29, 512 }
  0x2d   : > { %p5309_p1 = scmp.ne.s32.totalorder %s465_s29, %s5308_s27  ;;  %p5316_p5 = scmp.lt.s32.totalorder %s465_s29, %s465_s29 }
  0x2e   : > { %p5299_p0 = pneg %p5700_p13  ;;  %p5317_p6 = scmp.lt.s32.totalorder %s5308_s27, %s5308_s27 }
  0x30   : > { %p5311_p2 = pnand %p5309_p1, %p5299_p0  ;;  %p5318_p7 = por %p5317_p6, %p5316_p5 }
  0x32   : > { %p5312_p3 = pneg %p5311_p2 }
  0x34   : > { %p5319_p9 = pnand %p5318_p7, %p5312_p3 }
  0x36   : > { %5322 = shalt.err (!%p5319_p9)
}
  0x37   : > { %s5507_s24 = smov 128   ;;  %s5508_s25 = smov 8  }
  0x38   : > { %s10084_s10 = sld [smem:[#allocation273_spill]]  ;;  %s5509_s20 = smov [#allocation5]  }
  0x39   : > { %s10085_s0 = sld [smem:[#allocation263_spill]]  ;;  %s5510_s23 = smov [#allocation9]  }
  0x3a   : > { %s451_s15 = sshll.u32 %s5510_s23, 4  ;;  %s5511_s28 = smov [#allocation12]   ;;  %s452_s15 = int_to_ptr.vmem [resolvable:$true] %s451_s15 }
  0x3b   : > { %s478_s1 = sshll.u32 %s5511_s28, 4  ;;  %s5345_s19 = scalar_lea.vmem %s452_s15, 512  ;;  %s479_s1 = int_to_ptr.vmem [resolvable:$true] %s478_s1 }
  0x3c   : > { %p5346_p12 = scmp.ne.s32.totalorder %s452_s15, %s5345_s19  ;;  %p5353_p3 = scmp.lt.s32.totalorder %s452_s15, %s452_s15 }
  0x3d   : > { %p5354_p5 = scmp.lt.s32.totalorder %s5345_s19, %s5345_s19 }
  0x3e   : > { %5073 = dma.hbm_to_vmem [thread:$0]  (!%p5700_p13), %s10084_s10, 512, %s465_s29, [#allocation11], %s5507_s24, %s5507_s24, %s5508_s25  }
  0x3f   : > { %5067 = dma.hbm_to_smem (!%p5700_p13), %s10085_s0, 48, %s5509_s20, [#allocation8]  }
  0x40   : > { %p5348_p1 = pnand %p5346_p12, %p5299_p0  ;;  %p5355_p6 = por %p5354_p5, %p5353_p3 }
  0x42   : > { %p5349_p2 = pneg %p5348_p1 }
  0x44   : > { %p5356_p7 = pnand %p5355_p6, %p5349_p2 }
  0x46   : > { %5359 = shalt.err (!%p5356_p7)
}
  0x47   : > { %s10086_s9 = sld [smem:[#allocation272_spill]]  ;;  %s5371_s23 = scalar_lea.vmem %s479_s1, 64 }
  0x48   : > { %p5372_p9 = scmp.ne.s32.totalorder %s479_s1, %s5371_s23  ;;  %p5379_p3 = scmp.lt.s32.totalorder %s479_s1, %s479_s1 }
  0x49   : > { %p5380_p2 = scmp.lt.s32.totalorder %s5371_s23, %s5371_s23 }
  0x4a   : > { %p5374_p12 = pnand %p5372_p9, %p5299_p0 }
  0x4b   : > { %p5381_p5 = por %p5380_p2, %p5379_p3 }
  0x4c   : > { %p5375_p1 = pneg %p5374_p12 }
  0x4d   : > { %5070 = dma.hbm_to_vmem [thread:$0]  (!%p5700_p13), %s10086_s9, 512, %s452_s15, [#allocation6], %s5507_s24, %s5507_s24, %s5508_s25  }
  0x4e   : > { %p5382_p6 = pnand %p5381_p5, %p5375_p1 }
  0x50   : > { %5385 = shalt.err (!%p5382_p6)
}
  0x51   : > { %s10087_s11 = sld [smem:[#allocation274_spill]]  ;;  %s5512_s15 = smov [#allocation13]  }
  0x52   : > { %s488_s30 = sshll.u32 %s5512_s15, 4  ;;  %s489_s30 = int_to_ptr.vmem [resolvable:$true] %s488_s30 }
  0x53   : > { %s5397_s16 = scalar_lea.vmem %s489_s30, 512  ;;  %p5405_p8 = scmp.lt.s32.totalorder %s489_s30, %s489_s30 }
  0x54   : > { %p5398_p7 = scmp.ne.s32.totalorder %s489_s30, %s5397_s16  ;;  %p5406_p3 = scmp.lt.s32.totalorder %s5397_s16, %s5397_s16 }
  0x56   : > { %p5400_p9 = pnand %p5398_p7, %p5299_p0  ;;  %p5407_p1 = por %p5406_p3, %p5405_p8 }
  0x57   : > { %5076 = dma.hbm_to_vmem [thread:$0]  (!%p5700_p13), %s10087_s11, 64, %s479_s1, [#allocation11]  }
  0x58   : > { %p5401_p12 = pneg %p5400_p9 }
  0x5a   : > { %p5408_p2 = pnand %p5407_p1, %p5401_p12 }
  0x5c   : > { %5411 = shalt.err (!%p5408_p2)
}
  0x5d   : > { %s10088_s12 = sld [smem:[#allocation275_spill]] }
  0x5f   : > { %559 = sbr.rel (%p5688_p10) target bundleno = 2258 (0x8d2), region = 80 }
  0x63   : > { %5079 = dma.hbm_to_vmem [thread:$0]  (!%p5700_p13), %s10088_s12, 512, %s489_s30, [#allocation14], %s5507_s24, %s5507_s24, %s5508_s25  }
  0x64   : > { %5463 = dma.done.wait (%p5692_p11), [#allocation8], 48  }
  0x65   : > { %5465 = vsyncadd (%p5692_p11), [#allocation8], 4294967248 }
  0x66   : > { %5467 = dma.done.wait (%p5692_p11), [#allocation6], 512  }
  0x67   : > { %5469 = vsyncadd (%p5692_p11), [#allocation6], 4294966784 }
  0x68   : > { %5471 = dma.done.wait (%p5692_p11), [#allocation11], 576  }
  0x69   : > { %5473 = vsyncadd (%p5692_p11), [#allocation11], 4294966720 }
  0x6a   : > { %5475 = dma.done.wait (%p5692_p11), [#allocation14], 512  }
  0x6b   : > { %5477 = vsyncadd (%p5692_p11), [#allocation14], 4294966784 }
  0x6c   : > { %581 = sfence }
  0x6d   : > { %p652_p8 = scmp.lt.s32.totalorder %s5496_s21, 1  ;;  %s10089_s7 = sld [smem:[#allocation270_spill]]  ;;  %vm725_vm0 = vcmask 261120   ;;  %v9652_v1 = vmov 0   ;;  %v9726_v14 = vmov 2   ;;  %v9651_v20 = vmov 1  }
  0x6e   : > { %5190 = vset.pattern.permute.xlu1 %v9652_v1  ;;  %s10090_s14 = sld [smem:[#allocation277_spill]]  ;;  %5189 = vset.pattern.permute.xlu0 %v9652_v1  ;;  %v1134_v23 = vld [vmem:[#allocation10 + $0x18] sm:$0xff]  ;;  %v1133_v24 = vld [vmem:[#allocation10 + $0x10] sm:$0xff]  ;;  %v1132_v25 = vld [vmem:[#allocation10 + $0x8] sm:$0xff]  ;;  %v953_v28 = vlaneseq  ;;  %vm944_vm1 = vcmask 130048   ;;  %vm4179_vm2 = vcmask 64512  }
  0x6f   : > { %s5777_s24 = scalar_select %p652_p8, %s5496_s21, 1  ;;  %v827_v26 = vld [vmem:[#allocation9] sm:$0xff]  ;;  %v828_v55 = vld [vmem:[#allocation9 + $0x8] sm:$0xff]  ;;  %v829_v57 = vld [vmem:[#allocation9 + $0x10] sm:$0xff]  ;;  %vm4184_vm3 = vcmask 195584  }
  0x70   : > { %s10091_s3 = sld [smem:[#allocation266_spill]]  ;;  %4964 = vmatprep.mubr.msk.f32.mxu1 %vm725_vm0, %v827_v26  ;;  %v1131_v27 = vld [vmem:[#allocation10] sm:$0xff]  ;;  %v5844_v29 = vshrl.u32 %v953_v28, 7  ;;  %v830_v59 = vld [vmem:[#allocation9 + $0x18] sm:$0xff] }
  0x71   : > { %s4883_s22 = sshll.u32 %s5777_s24, 5  ;;  %s5797_s16 = sshll.u32 %s5777_s24, 4 }
  0x72   : > { %10092 = sst [smem:[#allocation31_spill]] %s5797_s16  ;;  %v5852_v35 = vsub.s32 0, %v5844_v29 }
  0x73   : > { %v701_v0 = vld [vmem:[%s10089_s7] sm:$0xff]  ;;  %s10093_s4 = sld [smem:[#allocation267_spill]]  ;;  %v702_v11 = vld [vmem:[%s10089_s7 + $0x8] sm:$0xff]  ;;  %v703_v15 = vld [vmem:[%s10089_s7 + $0x10] sm:$0xff] }
  0x74   : > { %4950 = vmatprep.mubr.msk.f32.mxu0 %vm725_vm0, %v701_v0  ;;  %v5782_v2 = vld [vmem:[%s10090_s14 + $0x8] sm:$0xff]  ;;  %v690_v3 = vld [vmem:[%s10090_s14 + $0x18] sm:$0xff]  ;;  %v687_v4 = vld [vmem:[%s10090_s14] sm:$0xff]  ;;  %s10094_s6 = sld [smem:[#allocation269_spill]]  ;;  %10097 = vst [vmem:[#allocation32_spill] sm:$0xff] %v5852_v35 }
  0x75   : > { %712 = vperm.xlu1 %5190, %v5782_v2   ;;  %722 = vperm.xlu0 %5189, %v690_v3   ;;  %v689_v5 = vld [vmem:[%s10090_s14 + $0x10] sm:$0xff]  ;;  %s10095_s2 = sld [smem:[#allocation265_spill]]  ;;  %v704_v17 = vld [vmem:[%s10089_s7 + $0x18] sm:$0xff] }
  0x76   : > { %s670_s30 = scalar_lea.vmem %s10091_s3, %s4883_s22  ;;  %s10096_s13 = sld [smem:[#allocation276_spill]] }
  0x77   : > { %v698_v6 = vld [vmem:[%s670_s30 + $0x18] sm:$0xff]  ;;  %v697_v7 = vld [vmem:[%s670_s30 + $0x10] sm:$0xff]  ;;  %v696_v8 = vld [vmem:[%s670_s30 + $0x8] sm:$0xff]  ;;  %s10098_s8 = sld [smem:[#allocation271_spill]] }
  0x78   : > { %4942 = vmatprep.subr.mxu0 %v698_v6  ;;  %v695_v10 = vld [vmem:[%s670_s30] sm:$0xff]  ;;  %s5877_s27 = sld [smem:[#allocation5 + $0x1]] }
  0x79   : > { %s679_s25 = scalar_lea.vmem %s10093_s4, %s5797_s16  ;;  %707 = vperm.xlu1 %5190, %v687_v4   ;;  %4943 = vmatpush3.msra.mxu0 %v698_v6  ;;  %s5879_s18 = sld [smem:[#allocation5 + $0x2]] }
  0x7a   : > { %v1226_v9 = vld [vmem:[%s679_s25] sm:$0xff]  ;;  %717 = vperm.xlu0 %5189, %v689_v5   ;;  %4944 = vmatprep.subr.mxu0 %v697_v7  ;;  %v952_v12 = vld [vmem:[%s10094_s6 + $0x18] sm:$0xff]  ;;  %v1227_v13 = vld [vmem:[%s679_s25 + $0x8] sm:$0xff]  ;;  %s5875_s25 = sld [smem:[#allocation5]] }
  0x7b   : > { %4945 = vmatpush3.msra.mxu0 %v697_v7  ;;  %v951_v16 = vld [vmem:[%s10094_s6 + $0x10] sm:$0xff]  ;;  %s665_s29 = scalar_lea.vmem %s10095_s2, %s5797_s16  ;;  %v950_v18 = vld [vmem:[%s10094_s6 + $0x8] sm:$0xff]  ;;  %v949_v21 = vld [vmem:[%s10094_s6] sm:$0xff]  ;;  %s5881_s20 = sld [smem:[#allocation5 + $0x4]] }
  0x7c   : > { %4946 = vmatprep.subr.mxu0 %v696_v8  ;;  %v699_v19 = vld [vmem:[%s665_s29] sm:$0xff]  ;;  %v700_v22 = vld [vmem:[%s665_s29 + $0x8] sm:$0xff]  ;;  %s5883_s22 = sld [smem:[#allocation5 + $0x24]] }
  0x7d   : > { %1235 = vperm.xlu1 %5190, %v1226_v9   ;;  %4947 = vmatpush3.msra.mxu0 %v696_v8  ;;  %v5849_v34 = vld [vmem:[%s10096_s13] sm:$0xff]  ;;  %v1043_v56 = vld [vmem:[%s10098_s8 + $0x18] sm:$0xff]  ;;  %v1042_v58 = vld [vmem:[%s10098_s8 + $0x10] sm:$0xff]  ;;  %s5885_s23 = sld [smem:[#allocation5 + $0x44]] }
  0x7e   : > { %5193 = vset.pattern.permute.xlu0 %v9726_v14  ;;  %4948 = vmatprep.subr.mxu0 %v695_v10  ;;  %v956_v38 = vrot.slane %v5849_v34, %v5852_v35  ;;  %v1041_v60 = vld [vmem:[%s10098_s8 + $0x8] sm:$0xff]  ;;  %v1040_v61 = vld [vmem:[%s10098_s8] sm:$0xff]  ;;  %s5887_s19 = sld [smem:[#allocation5 + $0x3]]  ;;  %v1266_v7 = vstv %s5877_s27 }
  0x7f   : > { %1280 = vperm.xlu0 %5193, %v1227_v13   ;;  %4949 = vmatpush3.msra.mxu0 %v695_v10  ;;  %s5889_s28 = sld [smem:[#allocation5 + $0x23]]  ;;  %v1286_v10 = vstv %s5879_s18 }
  0x80   : > { %4951 = vmatmul.mubr.msk.f32.vlgmr.msra.gmra.mxu0 %vm725_vm0, %v702_v11  ;;  %4970 = vmatprep.subr.mxu0 %v952_v12  ;;  %10099 = sst [smem:[#allocation33_spill]] %s5875_s25 }
  0x81   : > { %4953 = vmatprep.mubr.msk.f32.mxu0 %vm725_vm0, %v703_v15  ;;  %4971 = vmatpush3.msra.mxu0 %v952_v12  ;;  %10100 = sst [smem:[#allocation34_spill]] %s5881_s20  ;;  %v9672_v11 = vstv %s5881_s20 }
  0x82   : > { %4972 = vmatprep.subr.mxu0 %v951_v16  ;;  %5191 = vset.pattern.permute.xlu1 %v9651_v20  ;;  %10101 = sst [smem:[#allocation35_spill]] %s5883_s22  ;;  %v9704_v12 = vstv %s5883_s22 }
  0x83   : > { %4973 = vmatpush3.msra.mxu0 %v951_v16  ;;  %1256 = vperm.xlu1 %5191, %v1226_v9   ;;  %10102 = sst [smem:[#allocation36_spill]] %s5885_s23 }
  0x84   : > { %4954 = vmatmul.mubr.msk.f32.gmra.mxu0 %vm725_vm0, %v704_v17  ;;  %4974 = vmatprep.subr.mxu0 %v950_v18  ;;  %10103 = sst [smem:[#allocation37_spill]] %s5887_s19  ;;  %v9666_v15 = vstv %s5887_s19 }
  0x85   : > { %4975 = vmatpush3.msra.mxu0 %v950_v18  ;;  %4978 = vmatprep.mubr.msk.f32.mxu0 %vm725_vm0, %v699_v19  ;;  %10104 = sst [smem:[#allocation38_spill]] %s5889_s28  ;;  %v9703_v16 = vstv %s5889_s28 }
  0x86   : > { %4976 = vmatprep.subr.mxu0 %v949_v21  ;;  %5194 = vset.pattern.permute.xlu0 %v9651_v20  ;;  %s5891_s15 = sld [smem:[#allocation5 + $0x43]] }
  0x87   : > { %4977 = vmatpush3.msra.mxu0 %v949_v21  ;;  %1260 = vperm.xlu1 %5191, %v1227_v13   ;;  %s5893_s30 = sld [smem:[#allocation5 + $0x5]] }
  0x88   : > { %4979 = vmatmul.mubr.msk.f32.vlgmr.msra.gmra.mxu0 %vm725_vm0, %v700_v22  ;;  %832 = vperm.xlu0 %5194, %v687_v4   ;;  %s5895_s1 = sld [smem:[#allocation5 + $0x25]] }
  0x89   : > { %4992 = vmatprep.subr.mxu0 %v1134_v23  ;;  %s5897_s29 = sld [smem:[#allocation5 + $0x45]] }
  0x8a   : > { %4993 = vmatpush3.msra.mxu0 %v1134_v23  ;;  %s5899_s26 = sld [smem:[#allocation5 + $0x6]] }
  0x8b   : > { %5192 = vset.pattern.permute.xlu1 %v9726_v14  ;;  %4994 = vmatprep.subr.mxu0 %v1133_v24  ;;  %s5901_s17 = sld [smem:[#allocation5 + $0x26]] }
  0x8c   : > { %1276 = vperm.xlu1 %5192, %v1226_v9   ;;  %844 = vperm.xlu0 %5194, %v690_v3   ;;  %10105 = sst [smem:[#allocation39_spill]] %s5891_s15  ;;  %v6025_v3 = vsub.s32 2, %v5844_v29  ;;  %v9729_v17 = vstv %s5891_s15 }
  0x8d   : > { %4995 = vmatpush3.msra.mxu0 %v1133_v24  ;;  %10106 = sst [smem:[#allocation40_spill]] %s5893_s30  ;;  %v9660_v18 = vstv %s5893_s30 }
  0x8e   : > { %4996 = vmatprep.subr.mxu0 %v1132_v25  ;;  %10107 = sst [smem:[#allocation41_spill]] %s5895_s1  ;;  %10168 = vst [vmem:[#allocation101_spill] sm:$0xff] %v6025_v3  ;;  %v9702_v21 = vstv %s5895_s1 }
  0x8f   : > { %4997 = vmatpush3.msra.mxu0 %v1132_v25  ;;  %10108 = sst [smem:[#allocation42_spill]] %s5897_s29  ;;  %v9711_v22 = vstv %s5897_s29 }
  0x90   : > { %5195 = vset.pattern.permute.xlu1 %v9651_v20  ;;  %5196 = vset.pattern.permute.xlu0 %v9652_v1  ;;  %10109 = sst [smem:[#allocation43_spill]] %s5899_s26  ;;  %v9670_v23 = vstv %s5899_s26 }
  0x91   : > { %836 = vperm.xlu1 %5195, %v5782_v2   ;;  %1240 = vperm.xlu0 %5196, %v1227_v13   ;;  %10110 = sst [smem:[#allocation44_spill]] %s5901_s17  ;;  %v6022_v2 = vsub.s32 1, %v5844_v29  ;;  %v9730_v13 = vstv %s5885_s23  ;;  %v9706_v24 = vstv %s5901_s17 }
  0x92   : > { %4998 = vmatprep.subr.mxu0 %v1131_v27  ;;  %s5903_s0 = sld [smem:[#allocation5 + $0x46]] }
  0x93   : > { %4999 = vmatpush3.msra.mxu0 %v1131_v27  ;;  %s5905_s2 = sld [smem:[#allocation5 + $0x7]]  ;;  %10167 = vst [vmem:[#allocation100_spill] sm:$0xff] %v6022_v2 }
  0x94   : > { %s5907_s3 = sld [smem:[#allocation5 + $0x27]] }
  0x95   : > { %840 = vperm.xlu1 %5195, %v689_v5   ;;  %s5909_s4 = sld [smem:[#allocation5 + $0x47]]  ;;  %v9653_v5 = vstv %s5875_s25 }
  0x96   : > { %s5911_s6 = sld [smem:[#allocation5 + $0x9]] }
  0x97   : > { %s5913_s7 = sld [smem:[#allocation5 + $0x29]] }
  0x98   : > { %10111 = sst [smem:[#allocation45_spill]] %s5903_s0  ;;  %v9727_v25 = vstv %s5903_s0 }
  0x99   : > { %10112 = sst [smem:[#allocation46_spill]] %s5905_s2  ;;  %v9674_v26 = vstv %s5905_s2 }
  0x9a   : > { %10113 = sst [smem:[#allocation47_spill]] %s5907_s3  ;;  %v9707_v27 = vstv %s5907_s3 }
  0x9b   : > { %10114 = sst [smem:[#allocation48_spill]] %s5909_s4  ;;  %v9748_v28 = vstv %s5909_s4 }
  0x9c   : > { %10115 = sst [smem:[#allocation49_spill]] %s5911_s6 }
  0x9d   : > { %10116 = sst [smem:[#allocation50_spill]] %s5913_s7 }
  0x9e   : > { %s5915_s8 = sld [smem:[#allocation5 + $0x49]] }
  0x9f   : > { %s5917_s9 = sld [smem:[#allocation5 + $0x8]] }
  0xa0   : > { %s5919_s10 = sld [smem:[#allocation5 + $0x28]] }
  0xa1   : > { %s5921_s11 = sld [smem:[#allocation5 + $0x48]] }
  0xa2   : > { %s5923_s12 = sld [smem:[#allocation5 + $0xc]] }
  0xa3   : > { %s5925_s14 = sld [smem:[#allocation5 + $0x2c]] }
  0xa4   : > { %10117 = sst [smem:[#allocation51_spill]] %s5915_s8 }
  0xa5   : > { %10118 = sst [smem:[#allocation52_spill]] %s5917_s9 }
  0xa6   : > { %10119 = sst [smem:[#allocation53_spill]] %s5919_s10 }
  0xa7   : > { %10120 = sst [smem:[#allocation54_spill]] %s5921_s11 }
  0xa8   : > { %10121 = sst [smem:[#allocation55_spill]] %s5923_s12 }
  0xa9   : > { %10122 = sst [smem:[#allocation56_spill]] %s5925_s14 }
  0xaa   : > { %s5927_s21 = sld [smem:[#allocation5 + $0x4c]] }
  0xab   : > { %s5929_s16 = sld [smem:[#allocation5 + $0xa]] }
  0xac   : > { %s5931_s13 = sld [smem:[#allocation5 + $0x2a]] }
  0xad   : > { %s5933_s6 = sld [smem:[#allocation5 + $0x4a]] }
  0xae   : > { %s5935_s7 = sld [smem:[#allocation5 + $0xd]] }
  0xaf   : > { %s5937_s8 = sld [smem:[#allocation5 + $0x2d]] }
  0xb0   : > { %10123 = sst [smem:[#allocation57_spill]] %s5927_s21 }
  0xb1   : > { %10124 = sst [smem:[#allocation58_spill]] %s5929_s16 }
  0xb2   : > { %10125 = sst [smem:[#allocation59_spill]] %s5931_s13 }
  0xb3   : > { %10126 = sst [smem:[#allocation60_spill]] %s5933_s6 }
  0xb4   : > { %10127 = sst [smem:[#allocation61_spill]] %s5935_s7 }
  0xb5   : > { %10128 = sst [smem:[#allocation62_spill]] %s5937_s8 }
  0xb6   : > { %s5939_s9 = sld [smem:[#allocation5 + $0x4d]] }
  0xb7   : > { %s5941_s10 = sld [smem:[#allocation5 + $0xb]] }
  0xb8   : > { %s5943_s11 = sld [smem:[#allocation5 + $0x2b]] }
  0xb9   : > { %s5945_s12 = sld [smem:[#allocation5 + $0x4b]] }
  0xba   : > { %s5947_s14 = sld [smem:[#allocation5 + $0x10]] }
  0xbb   : > { %s5949_s21 = sld [smem:[#allocation5 + $0x30]] }
  0xbc   : > { %10129 = sst [smem:[#allocation63_spill]] %s5939_s9 }
  0xbd   : > { %10130 = sst [smem:[#allocation64_spill]] %s5941_s10 }
  0xbe   : > { %10131 = sst [smem:[#allocation65_spill]] %s5943_s11 }
  0xbf   : > { %10132 = sst [smem:[#allocation66_spill]] %s5945_s12 }
  0xc0   : > { %10133 = sst [smem:[#allocation67_spill]] %s5947_s14 }
  0xc1   : > { %10134 = sst [smem:[#allocation68_spill]] %s5949_s21 }
  0xc2   : > { %s5951_s16 = sld [smem:[#allocation5 + $0x50]] }
  0xc3   : > { %s5953_s13 = sld [smem:[#allocation5 + $0xe]] }
  0xc4   : > { %s5955_s6 = sld [smem:[#allocation5 + $0x2e]] }
  0xc5   : > { %s5957_s7 = sld [smem:[#allocation5 + $0x4e]] }
  0xc6   : > { %s5959_s8 = sld [smem:[#allocation5 + $0x13]] }
  0xc7   : > { %s5961_s9 = sld [smem:[#allocation5 + $0x33]] }
  0xc8   : > { %10135 = sst [smem:[#allocation69_spill]] %s5951_s16 }
  0xc9   : > { %10136 = sst [smem:[#allocation70_spill]] %s5953_s13 }
  0xca   : > { %10137 = sst [smem:[#allocation71_spill]] %s5955_s6 }
  0xcb   : > { %10138 = sst [smem:[#allocation72_spill]] %s5957_s7 }
  0xcc   : > { %10139 = sst [smem:[#allocation73_spill]] %s5959_s8 }
  0xcd   : > { %10140 = sst [smem:[#allocation74_spill]] %s5961_s9 }
  0xce   : > { %s5963_s10 = sld [smem:[#allocation5 + $0x53]] }
  0xcf   : > { %s5965_s11 = sld [smem:[#allocation5 + $0xf]] }
  0xd0   : > { %s5967_s12 = sld [smem:[#allocation5 + $0x2f]] }
  0xd1   : > { %s5969_s14 = sld [smem:[#allocation5 + $0x4f]] }
  0xd2   : > { %s5971_s21 = sld [smem:[#allocation5 + $0x17]] }
  0xd3   : > { %s5973_s13 = sld [smem:[#allocation5 + $0x37]] }
  0xd4   : > { %10141 = sst [smem:[#allocation75_spill]] %s5963_s10 }
  0xd5   : > { %10142 = sst [smem:[#allocation76_spill]] %s5965_s11 }
  0xd6   : > { %10143 = sst [smem:[#allocation77_spill]] %s5967_s12 }
  0xd7   : > { %10144 = sst [smem:[#allocation78_spill]] %s5969_s14 }
  0xd8   : > { %10145 = sst [smem:[#allocation79_spill]] %s5971_s21 }
  0xd9   : > { %10146 = sst [smem:[#allocation80_spill]] %s5973_s13 }
  0xda   : > { %s5975_s6 = sld [smem:[#allocation5 + $0x57]] }
  0xdb   : > { %s5977_s7 = sld [smem:[#allocation5 + $0x11]] }
  0xdc   : > { %s5979_s8 = sld [smem:[#allocation5 + $0x31]] }
  0xdd   : > { %s5981_s9 = sld [smem:[#allocation5 + $0x51]] }
  0xde   : > { %s5983_s10 = sld [smem:[#allocation5 + $0x1a]] }
  0xdf   : > { %s5985_s11 = sld [smem:[#allocation5 + $0x3a]] }
  0xe0   : > { %10147 = sst [smem:[#allocation81_spill]] %s5975_s6 }
  0xe1   : > { %10148 = sst [smem:[#allocation82_spill]] %s5977_s7 }
  0xe2   : > { %10149 = sst [smem:[#allocation83_spill]] %s5979_s8 }
  0xe3   : > { %10150 = sst [smem:[#allocation84_spill]] %s5981_s9  ;;  %s4533_s9 = sshll.u32 %s5777_s24, 2 }
  0xe4   : > { %10151 = sst [smem:[#allocation85_spill]] %s5983_s10 }
  0xe5   : > { %10152 = sst [smem:[#allocation86_spill]] %s5985_s11 }
  0xe6   : > { %s5987_s12 = sld [smem:[#allocation5 + $0x5a]] }
  0xe7   : > { %s5989_s14 = sld [smem:[#allocation5 + $0x12]] }
  0xe8   : > { %s5991_s21 = sld [smem:[#allocation5 + $0x32]] }
  0xe9   : > { %s5993_s16 = sld [smem:[#allocation5 + $0x52]] }
  0xea   : > { %s5995_s13 = sld [smem:[#allocation5 + $0x1d]] }
  0xeb   : > { %s5997_s6 = sld [smem:[#allocation5 + $0x3d]] }
  0xec   : > { %10153 = sst [smem:[#allocation87_spill]] %s5987_s12 }
  0xed   : > { %10154 = sst [smem:[#allocation88_spill]] %s5989_s14 }
  0xee   : > { %10155 = sst [smem:[#allocation89_spill]] %s5991_s21 }
  0xef   : > { %10156 = sst [smem:[#allocation90_spill]] %s5993_s16 }
  0xf0   : > { %v723_v30 = vpop.permute.xlu0 %722  ;;  %v713_v32 = vpop.permute.xlu1 %712  ;;  %10157 = sst [smem:[#allocation91_spill]] %s5995_s13 }
  0xf1   : > { %10158 = sst [smem:[#allocation92_spill]] %s5997_s6 }
  0xf2   : > { %s6001_s8 = sld [smem:[#allocation5 + $0x5d]] }
  0xf3   : > { %s6004_s10 = sld [smem:[#allocation5 + $0x14]] }
  0xf4   : > { %v708_v44 = vpop.permute.xlu1 %707  ;;  %s6006_s11 = sld [smem:[#allocation5 + $0x34]] }
  0xf5   : > { %v718_v39 = vpop.permute.xlu0 %717  ;;  %s6008_s12 = sld [smem:[#allocation5 + $0x54]] }
  0xf6   : > { %s10163_s5 = sld [smem:[#allocation268_spill]] }
  0xf7   : > { %s6013_s13 = sld [smem:[#allocation5 + $0x20]] }
  0xf8   : > { %v5999_v62 = vpop.permute.xlu1 %1235  ;;  %10159 = sst [smem:[#allocation93_spill]] %s6001_s8 }
  0xf9   : > { %10160 = sst [smem:[#allocation94_spill]] %s6004_s10 }
  0xfa   : > { %10161 = sst [smem:[#allocation95_spill]] %s6006_s11  ;;  %v6062_v19 = vpop.permute.xlu0 %1280 }
  0xfb   : > { %10162 = sst [smem:[#allocation96_spill]] %s6008_s12 }
  0xfc   : > { %s684_s16 = scalar_lea.vmem %s10163_s5, %s4533_s9  ;;  %s6015_s6 = sld [smem:[#allocation5 + $0x40]] }
  0xfd   : > { %10164 = sst [smem:[#allocation97_spill]] %s6013_s13  ;;  %v1228_v0 = vld [vmem:[%s684_s16] sm:$0x7] }
  0xfe   : > { %v6017_v63 = vpop.permute.xlu1 %1256  ;;  %s6019_s24 = sld [smem:[#allocation5 + $0x60]]  ;;  %v6034_v4 = vrot.slane %v1228_v0, %v5852_v35  ;;  %v6040_v6 = vrot.slane %v1228_v0, %v6022_v2  ;;  %v6044_v8 = vrot.slane %v1228_v0, %v6025_v3 }
  0xff   : > { %s6027_s9 = sld [smem:[#allocation5 + $0x15]] }
 0x100   : > { %s6029_s14 = sld [smem:[#allocation5 + $0x35]]  ;;  %v1263_v0 = vsub.f32 %v6040_v6, %v6017_v63 }
 0x101   : > { %s6031_s21 = sld [smem:[#allocation5 + $0x55]] }
 0x102   : > { %10165 = sst [smem:[#allocation98_spill]] %s6015_s6  ;;  %v6048_v9 = vpop.permute.xlu1 %1260 }
 0x103   : > { %s6036_s16 = sld [smem:[#allocation5 + $0x16]] }
 0x104   : > { %10166 = sst [smem:[#allocation99_spill]] %s6019_s24 }
 0x105   : > { %10169 = sst [smem:[#allocation102_spill]] %s6027_s9 }
 0x106   : > { %10170 = sst [smem:[#allocation103_spill]] %s6029_s14 }
 0x107   : > { %10171 = sst [smem:[#allocation104_spill]] %s6031_s21 }
 0x108   : > { %s6046_s5 = sld [smem:[#allocation5 + $0x36]] }
 0x109   : > { %10172 = sst [smem:[#allocation105_spill]] %s6036_s16 }
 0x10a   : > { %s6054_s21 = sld [smem:[#allocation5 + $0x56]] }
 0x10b   : > { %s10175_s14 = sld [smem:[#allocation49_spill]] }
 0x10c   : > { %s10176_s9 = sld [smem:[#allocation50_spill]] }
 0x10d   : > { %s6060_s16 = sld [smem:[#allocation5 + $0x18]] }
 0x10e   : > { %10173 = sst [smem:[#allocation106_spill]] %s6046_s5 }
 0x10f   : > { %s10177_s5 = sld [smem:[#allocation51_spill]] }
 0x110   : > { %10174 = sst [smem:[#allocation107_spill]] %s6054_s21 }
 0x111   : > { %s10179_s24 = sld [smem:[#allocation52_spill]] }
 0x112   : > { %s10180_s6 = sld [smem:[#allocation53_spill]] }
 0x113   : > { %10178 = sst [smem:[#allocation108_spill]] %s6060_s16 }
 0x114   : > { %s10181_s13 = sld [smem:[#allocation54_spill]] }
 0x115   : > { %s10182_s23 = sld [smem:[#allocation55_spill]] }
 0x116   : > { %s6068_s21 = sld [smem:[#allocation5 + $0x38]] }
 0x117   : > { %s10184_s12 = sld [smem:[#allocation56_spill]] }
 0x118   : > { %s10186_s11 = sld [smem:[#allocation58_spill]] }
 0x119   : > { %s10187_s16 = sld [smem:[#allocation59_spill]] }
 0x11a   : > { %s6074_s10 = sld [smem:[#allocation5 + $0x58]] }
 0x11b   : > { %s10190_s22 = sld [smem:[#allocation61_spill]] }
 0x11c   : > { %10183 = sst [smem:[#allocation109_spill]] %s6068_s21 }
 0x11d   : > { %s6081_s0 = sld [smem:[#allocation5 + $0x19]] }
 0x11e   : > { %s10194_s4 = sld [smem:[#allocation64_spill]] }
 0x11f   : > { %s6087_s3 = sld [smem:[#allocation5 + $0x39]] }
 0x120   : > { %10188 = sst [smem:[#allocation110_spill]] %s6074_s10 }
 0x121   : > { %s10196_s10 = sld [smem:[#allocation65_spill]] }
 0x122   : > { %s10197_s28 = sld [smem:[#allocation66_spill]] }
 0x123   : > { %10193 = sst [smem:[#allocation111_spill]] %s6081_s0 }
 0x124   : > { %s6095_s0 = sld [smem:[#allocation5 + $0x59]] }
 0x125   : > { %10195 = sst [smem:[#allocation112_spill]] %s6087_s3 }
 0x126   : > { %s6101_s3 = sld [smem:[#allocation5 + $0x1b]] }
 0x127   : > { %s6115_s21 = sld [smem:[#allocation5 + $0x5b]] }
 0x128   : > { %s10211_s25 = sld [smem:[#allocation76_spill]] }
 0x129   : > { %s6122_s17 = sld [smem:[#allocation5 + $0x1c]] }
 0x12a   : > { %10201 = sst [smem:[#allocation113_spill]] %s6095_s0 }
 0x12b   : > { %s6109_s0 = sld [smem:[#allocation5 + $0x3b]] }
 0x12c   : > { %10204 = sst [smem:[#allocation114_spill]] %s6101_s3 }
 0x12d   : > { %10210 = sst [smem:[#allocation116_spill]] %s6115_s21 }
 0x12e   : > { %s10212_s3 = sld [smem:[#allocation77_spill]] }
 0x12f   : > { %10213 = sst [smem:[#allocation117_spill]] %s6122_s17 }
 0x130   : > { %s6129_s21 = sld [smem:[#allocation5 + $0x3c]] }
 0x131   : > { %10208 = sst [smem:[#allocation115_spill]] %s6109_s0 }
 0x132   : > { %s10214_s0 = sld [smem:[#allocation78_spill]] }
 0x133   : > { %s10218_s8 = sld [smem:[#allocation80_spill]] }
 0x134   : > { %s6134_s17 = sld [smem:[#allocation5 + $0x5c]]  ;;  %v9690_v20 = vstv %s10212_s3 }
 0x135   : > { %s10221_s15 = sld [smem:[#allocation83_spill]] }
 0x136   : > { %10216 = sst [smem:[#allocation118_spill]] %s6129_s21 }
 0x137   : > { %s6139_s29 = sld [smem:[#allocation5 + $0x1e]] }
 0x138   : > { %v9717_v1 = vstv %s10214_s0  ;;  %s10224_s21 = sld [smem:[#allocation85_spill]] }
 0x139   : > { %s6170_s1 = sld [smem:[#allocation5 + $0x1f]] }
 0x13a   : > { %10220 = sst [smem:[#allocation120_spill]] %s6134_s17 }
 0x13b   : > { %s6148_s17 = sld [smem:[#allocation5 + $0x3e]] }
 0x13c   : > { %s10236_s19 = sld [smem:[#allocation90_spill]] }
 0x13d   : > { %10222 = sst [smem:[#allocation121_spill]] %s6139_s29 }
 0x13e   : > { %s6214_s20 = sld [smem:[#allocation5 + $0x41]] }
 0x13f   : > { %10228 = sst [smem:[#allocation123_spill]] %s6170_s1 }
 0x140   : > { %v4952_v31 = vpop.f32.mrf.mxu0  ;;  %s6234_s30 = sld [smem:[#allocation5 + $0x61]] }
 0x141   : > { %v810_v41 = vadd.f32 %v4952_v31, %v713_v32  ;;  %v9676_v31 = vstv %s10175_s14  ;;  %v9750_v32 = vstv %s10176_s9  ;;  %s10198_s9 = sld [smem:[#allocation67_spill]] }
 0x142   : > { %v804_v33 = vpop.f32.mrf.mxu0  ;;  %s10242_s18 = sld [smem:[#allocation91_spill]] }
 0x143   : > { %v805_v46 = vadd.f32 %v804_v33, %v708_v44  ;;  %v824_v50 = vmax.f32 %v810_v41, 0.0  ;;  %v9744_v33 = vstv %s10177_s5  ;;  %v9728_v41 = vstv %s10184_s12  ;;  %s10199_s5 = sld [smem:[#allocation68_spill]] }
 0x144   : > { %v4955_v36 = vpop.f32.mrf.mxu0  ;;  %v9723_v44 = vstv %s10187_s16  ;;  %s10223_s12 = sld [smem:[#allocation84_spill]] }
 0x145   : > { %v820_v37 = vadd.f32 %v4955_v36, %v723_v30  ;;  %v823_v53 = vmax.f32 %v805_v46, 0.0  ;;  %v1243_v30 = vsub.f32 %v6034_v4, %v5999_v62  ;;  %v9665_v36 = vstv %s10179_s24  ;;  %10225 = sst [smem:[#allocation84_spill]] %s6148_s17 }
 0x146   : > { %v814_v40 = vpop.f32.mrf.mxu0  ;;  %v9678_v46 = vstv %s10190_s22  ;;  %s6155_s16 = sld [smem:[#allocation5 + $0x5e]] }
 0x147   : > { %v826_v42 = vmax.f32 %v820_v37, 0.0  ;;  %v815_v43 = vadd.f32 %v814_v40, %v718_v39  ;;  %v9694_v37 = vstv %s10180_s6  ;;  %v9680_v39 = vstv %s10182_s23  ;;  %v6089_v40 = vpop.permute.xlu1 %1276  ;;  %s10203_s6 = sld [smem:[#allocation71_spill]] }
 0x148   : > { %v4980_v45 = vpop.f32.mrf.mxu0  ;;  %s6185_s24 = sld [smem:[#allocation5 + $0x3f]] }
 0x149   : > { %v825_v47 = vmax.f32 %v815_v43, 0.0  ;;  %4956 = vmatprep.subr.mxu1 %v826_v42  ;;  %v1035_v48 = vadd.f32 %v4980_v45, %v956_v38  ;;  %v9675_v43 = vstv %s10186_s11  ;;  %v9700_v45 = vstv %s5977_s7  ;;  %10237 = sst [smem:[#allocation128_spill]] %s6214_s20 }
 0x14a   : > { %4957 = vmatpush3.msra.mxu1 %v826_v42  ;;  %v1029_v49 = vpop.f32.mrf.mxu0  ;;  %10240 = sst [smem:[#allocation129_spill]] %s6234_s30 }
 0x14b   : > { %4958 = vmatprep.subr.mxu1 %v825_v47  ;;  %v1030_v51 = vadd.f32 %v1029_v49, %v956_v38  ;;  %v1039_v52 = vmax.f32 %v1035_v48, 0.0  ;;  %v9713_v38 = vstv %s10181_s13  ;;  %s10202_s13 = sld [smem:[#allocation70_spill]]  ;;  %v1247_v49 = vadd.f32 %v9653_v5, %v1243_v30 }
 0x14c   : > { %4959 = vmatpush3.msra.mxu1 %v825_v47  ;;  %v1267_v5 = vadd.f32 %v1266_v7, %v1263_v0  ;;  %v9763_v47 = vstv %s10221_s15  ;;  %10226 = sst [smem:[#allocation122_spill]] %s6155_s16 }
 0x14d   : > { %4960 = vmatprep.subr.mxu1 %v824_v50  ;;  %v1038_v54 = vmax.f32 %v1030_v51, 0.0  ;;  %v1138_v51 = vrot.slane %v5849_v34, %v6025_v3  ;;  %s6253_s11 = sld [smem:[#allocation5 + $0x22]] }
 0x14e   : > { %4961 = vmatpush3.msra.mxu1 %v824_v50  ;;  %v833_v50 = vpop.permute.xlu0 %832  ;;  %10231 = sst [smem:[#allocation124_spill]] %s6185_s24 }
 0x14f   : > { %4962 = vmatprep.subr.mxu1 %v823_v53  ;;  %5000 = vmatprep.mubr.msk.f32.mxu0 %vm725_vm0, %v1038_v54  ;;  %s10243_s22 = sld [smem:[#allocation92_spill]] }
 0x150   : > { %4963 = vmatpush3.msra.mxu1 %v823_v53  ;;  %5001 = vmatmul.mubr.msk.f32.vlgmr.msra.gmra.mxu0 %vm725_vm0, %v1039_v52  ;;  %v9691_v53 = vstv %s10196_s10  ;;  %s6275_s30 = sld [smem:[#allocation5 + $0x62]] }
 0x151   : > { %4965 = vmatmul.mubr.msk.f32.vlgmr.msra.gmra.mxu1 %vm725_vm0, %v828_v55  ;;  %4981 = vmatprep.subr.mxu1 %v1043_v56  ;;  %v9693_v55 = vstv %s10198_s9  ;;  %s10251_s3 = sld [smem:[#allocation94_spill]] }
 0x152   : > { %4982 = vmatpush3.msra.mxu1 %v1043_v56  ;;  %4967 = vmatprep.mubr.msk.f32.mxu1 %vm725_vm0, %v829_v57  ;;  %v9662_v56 = vstv %s10211_s25  ;;  %s6206_s25 = sld [smem:[#allocation5 + $0x21]] }
 0x153   : > { %4983 = vmatprep.subr.mxu1 %v1042_v58  ;;  %10241 = sst [smem:[#allocation130_spill]] %s6253_s11 }
 0x154   : > { %4984 = vmatpush3.msra.mxu1 %v1042_v58  ;;  %v1284_v58 = vsub.f32 %v6044_v8, %v6062_v19  ;;  %v6131_v19 = vmax.f32 %v1247_v49, 0.0  ;;  %s6292_s2 = sld [smem:[#allocation5 + $0x64]] }
 0x155   : > { %4968 = vmatmul.mubr.msk.f32.gmra.mxu1 %vm725_vm0, %v830_v59  ;;  %4985 = vmatprep.subr.mxu1 %v1041_v60  ;;  %v837_v59 = vpop.permute.xlu1 %836  ;;  %s10255_s7 = sld [smem:[#allocation95_spill]] }
 0x156   : > { %4986 = vmatpush3.msra.mxu1 %v1041_v60  ;;  %4989 = vmatprep.mubr.msk.f32.mxu1 %vm725_vm0, %v1038_v54  ;;  %v9716_v54 = vstv %s10197_s28  ;;  %v9687_v60 = vstv %s10202_s13  ;;  %10217 = vst [vmem:[#allocation119_spill] sm:$0xff] %v6131_v19  ;;  %v6143_v49 = vadd.f32 %v1286_v10, %v1284_v58  ;;  %v6163_v0 = vmul.f32 %v9660_v18, %v6131_v19  ;;  %10248 = sst [smem:[#allocation132_spill]] %s6275_s30 }
 0x157   : > { %4987 = vmatprep.subr.mxu1 %v1040_v61  ;;  %v6183_v18 = vmul.f32 %v9662_v56, %v6131_v19  ;;  %v6200_v56 = vmul.f32 %v9672_v11, %v6131_v19  ;;  %s6301_s27 = sld [smem:[#allocation5 + $0x84]] }
 0x158   : > { %4988 = vmatpush3.msra.mxu1 %v1040_v61  ;;  %10234 = sst [smem:[#allocation127_spill]] %s6206_s25 }
 0x159   : > { %4990 = vmatmul.mubr.msk.f32.vlgmr.msra.gmra.mxu1 %vm725_vm0, %v1039_v52  ;;  %v9663_v52 = vstv %s10194_s4  ;;  %s10235_s4 = sld [smem:[#allocation89_spill]] }
 0x15a   : > { %10252 = sst [smem:[#allocation94_spill]] %s6292_s2 }
 0x15b   : > { %s10257_s20 = sld [smem:[#allocation96_spill]] }
 0x15c   : > { %s10258_s29 = sld [smem:[#allocation97_spill]] }
 0x15d   : > { %10256 = sst [smem:[#allocation95_spill]] %s6301_s27 }
 0x15e   : > { %s6310_s2 = sld [smem:[#allocation5 + $0xa7]] }
 0x15f   : > { %s6320_s27 = sld [smem:[#allocation5 + $0xa8]] }
 0x160   : > { %s6328_s26 = sld [smem:[#allocation5 + $0xa9]] }
 0x161   : > { %s6335_s10 = sld [smem:[#allocation5 + $0xaa]] }
 0x162   : > { %s10268_s13 = sld [smem:[#allocation105_spill]] }
 0x163   : > { %s10269_s9 = sld [smem:[#allocation106_spill]] }
 0x164   : > { %10259 = sst [smem:[#allocation134_spill]] %s6310_s2 }
 0x165   : > { %10262 = sst [smem:[#allocation135_spill]] %s6320_s27 }
 0x166   : > { %10265 = sst [smem:[#allocation136_spill]] %s6328_s26 }
 0x167   : > { %10267 = sst [smem:[#allocation137_spill]] %s6335_s10 }
 0x168   : > { %s10270_s26 = sld [smem:[#allocation102_spill]] }
 0x169   : > { %s6345_s23 = sld [smem:[#allocation5 + $0x63]] }
 0x16a   : > { %s6364_s14 = sld [smem:[#allocation5 + $0xa3]] }
 0x16b   : > { %s10280_s28 = sld [smem:[#allocation107_spill]] }
 0x16c   : > { %s6400_s27 = sld [smem:[#allocation5 + $0xa6]] }
 0x16d   : > { %s6417_s10 = sld [smem:[#allocation5 + $0x86]] }
 0x16e   : > { %s6449_s0 = sld [smem:[#allocation5 + $0xb1]] }
 0x16f   : > { %10271 = sst [smem:[#allocation138_spill]] %s6345_s23 }
 0x170   : > { %s10275_s23 = sld [smem:[#allocation103_spill]] }
 0x171   : > { %10276 = sst [smem:[#allocation140_spill]] %s6364_s14 }
 0x172   : > { %s10284_s14 = sld [smem:[#allocation112_spill]] }
 0x173   : > { %10287 = sst [smem:[#allocation145_spill]] %s6400_s27 }
 0x174   : > { %10294 = sst [smem:[#allocation150_spill]] %s6417_s10 }
 0x175   : > { %s10295_s27 = sld [smem:[#allocation62_spill]] }
 0x176   : > { %s10301_s10 = sld [smem:[#allocation60_spill]] }
 0x177   : > { %10307 = sst [smem:[#allocation156_spill]] %s6449_s0 }
 0x178   : > { %s10308_s2 = sld [smem:[#allocation63_spill]] }
 0x179   : > { %s10324_s0 = sld [smem:[#allocation114_spill]] }
 0x17a   : > { %s6567_s15 = sld [smem:[#allocation5 + $0xc9]] }
 0x180   : > { %10350 = sst [smem:[#allocation172_spill]] %s6567_s15 }
 0x181   : > { %s10357_s15 = sld [smem:[#allocation80_spill]] }
 0x210   : > { %v5002_v30 = vpop.f32.mrf.mxu0 }
 0x211   : > { %v4966_v57 = vpop.f32.mrf.mxu1  ;;  %v1211_v62 = vadd.f32 %v5002_v30, %v1138_v51  ;;  %v845_v30 = vpop.permute.xlu0 %844 }
 0x212   : > { %v931_v63 = vadd.f32 %v4966_v57, %v837_v59  ;;  %v1205_v48 = vpop.f32.mrf.mxu0  ;;  %v9806_v57 = vstv %s10218_s8  ;;  %v9826_v59 = vstv %s10224_s21  ;;  %s10229_s8 = sld [smem:[#allocation88_spill]] }
 0x213   : > { %v925_v42 = vpop.f32.mrf.mxu1  ;;  %1215 = vst.msk [vmem:[#allocation4 + $0x8] sm:$0xff] %vm725_vm0, %v1211_v62  ;;  %v1206_v61 = vadd.f32 %v1205_v48, %v1138_v51  ;;  %v841_v48 = vpop.permute.xlu1 %840  ;;  %v9778_v51 = vstv %s10223_s12  ;;  %s6190_s21 = sld [smem:[#allocation5 + $0x5f]] }
 0x214   : > { %946 = vst.msk [vmem:[#allocation2 + $0x8] sm:$0xff] %vm944_vm1, %v931_v63  ;;  %v926_v58 = vadd.f32 %v925_v42, %v833_v50  ;;  %v6168_v42 = vmul.f32 %v9665_v36, %v6131_v19  ;;  %v6178_v63 = vmul.f32 %v9663_v52, %v6131_v19  ;;  %v6202_v52 = vmax.f32 %v1267_v5, 0.0 }
 0x215   : > { %v4969_v62 = vpop.f32.mrf.mxu1  ;;  %1214 = vst.msk [vmem:[#allocation4] sm:$0xff] %vm725_vm0, %v1206_v61  ;;  %v1047_v61 = vrot.slane %v5849_v34, %v6022_v2  ;;  %v6195_v34 = vmul.f32 %v9666_v15, %v6131_v19  ;;  %v6211_v36 = vmul.f32 %v9670_v23, %v6131_v19  ;;  %v6219_v5 = vmul.f32 %v9674_v26, %v6131_v19 }
 0x216   : > { %945 = vst.msk [vmem:[#allocation2] sm:$0xff] %vm944_vm1, %v926_v58  ;;  %v941_v50 = vadd.f32 %v4969_v62, %v845_v30  ;;  %v1283_v58 = vsub.f32 %v6044_v8, %v6089_v40  ;;  %10233 = vst [vmem:[#allocation126_spill] sm:$0xff] %v6202_v52  ;;  %v6239_v26 = vmul.f32 %v9680_v39, %v6131_v19  ;;  %v9784_v62 = vmov 13  }
 0x217   : > { %v935_v30 = vpop.f32.mrf.mxu1  ;;  %v1621_v39 = vmul.f32 %v9694_v37, %v6202_v52 }
 0x218   : > { %948 = vst.msk [vmem:[#allocation2 + $0x18] sm:$0xff] %vm944_vm1, %v941_v50  ;;  %v936_v8 = vadd.f32 %v935_v30, %v841_v48  ;;  %v9682_v40 = vstv %s10229_s8  ;;  %v6224_v48 = vmul.f32 %v9676_v31, %v6131_v19  ;;  %v6229_v50 = vmul.f32 %v9675_v43, %v6131_v19  ;;  %s6262_s8 = sld [smem:[#allocation5 + $0x42]] }
 0x219   : > { %10232 = sst [smem:[#allocation125_spill]] %s6190_s21  ;;  %v4991_v15 = vpop.f32.mrf.mxu1  ;;  %v1264_v30 = vsub.f32 %v6040_v6, %v6048_v9  ;;  %v6244_v43 = vmul.f32 %v9678_v46, %v6131_v19  ;;  %v1287_v31 = vadd.f32 %v1286_v10, %v1283_v58  ;;  %v9699_v9 = vstv %s10235_s4 }
 0x21a   : > { %947 = vst.msk [vmem:[#allocation2 + $0x10] sm:$0xff] %vm944_vm1, %v936_v8  ;;  %v1126_v23 = vadd.f32 %v4991_v15, %v1047_v61  ;;  %v1225_v11 = vld [vmem:[#allocation4 + $0x8] sm:$0xff]  ;;  %v9720_v15 = vstv %s10236_s19  ;;  %v2277_v8 = vmul.f32 %v9682_v40, %v6131_v19  ;;  %v1423_v58 = vmul.f32 %v9702_v21, %v6202_v52  ;;  %s10260_s4 = sld [smem:[#allocation98_spill]] }
 0x21b   : > { %v1120_v6 = vpop.f32.mrf.mxu1  ;;  %5003 = vmatprep.subr.mxu1 %v1225_v11  ;;  %v6267_v40 = vmul.f32 %v9687_v60, %v6131_v19  ;;  %v6289_v60 = vadd.f32 %v1266_v7, %v1264_v30  ;;  %v6299_v37 = vmax.f32 %v1287_v31, 0.0  ;;  %v1357_v30 = vmul.f32 %v9704_v12, %v6202_v52  ;;  %s6387_s19 = sld [smem:[#allocation5 + $0xa5]] }
 0x21c   : > { %1130 = vst.msk [vmem:[#allocation3 + $0x8] sm:$0xff] %vm725_vm0, %v1126_v23  ;;  %v1121_v46 = vadd.f32 %v1120_v6, %v1047_v61  ;;  %5004 = vmatpush3.msra.mxu1 %v1225_v11  ;;  %v1224_v10 = vld [vmem:[#allocation4] sm:$0xff]  ;;  %v1819_v11 = vmul.f32 %v9691_v53, %v6202_v52  ;;  %v2083_v23 = vmul.f32 %v9690_v20, %v6202_v52  ;;  %v9825_v20 = vstv %s10242_s18  ;;  %s6467_s18 = sld [smem:[#allocation5 + $0x69]] }
 0x21d   : > { %5005 = vmatprep.subr.mxu1 %v1224_v10  ;;  %v6280_v61 = vmul.f32 %v9693_v55, %v6131_v19  ;;  %v6285_v6 = vmul.f32 %v9700_v45, %v6131_v19  ;;  %v9829_v53 = vstv %s10243_s22  ;;  %v2281_v55 = vmul.f32 %v9699_v9, %v6202_v52  ;;  %10254 = vst [vmem:[#allocation133_spill] sm:$0xff] %v6299_v37  ;;  %s10293_s22 = sld [smem:[#allocation104_spill]] }
 0x21e   : > { %10244 = sst [smem:[#allocation131_spill]] %s6262_s8  ;;  %1129 = vst.msk [vmem:[#allocation3] sm:$0xff] %vm725_vm0, %v1121_v46  ;;  %5006 = vmatpush3.msra.mxu1 %v1224_v10  ;;  %v1297_v46 = vmul.f32 %v9703_v16, %v6202_v52  ;;  %v1425_v10 = vadd.f32 %v1423_v58, %v6163_v0  ;;  %v1623_v31 = vadd.f32 %v1621_v39, %v6168_v42  ;;  %v9776_v21 = vstv %s10251_s3 }
 0x21f   : > { %v1489_v9 = vmul.f32 %v9706_v24, %v6202_v52  ;;  %v1555_v45 = vmul.f32 %v9707_v27, %v6202_v52  ;;  %v1821_v16 = vadd.f32 %v1819_v11, %v6178_v63  ;;  %v2085_v12 = vadd.f32 %v2083_v23, %v6183_v18 }
 0x220   : > { %v1687_v0 = vmul.f32 %v9750_v32, %v6202_v52  ;;  %v9777_v39 = vstv %s10255_s7  ;;  %v9790_v42 = vstv %s10257_s20  ;;  %v9835_v58 = vstv %s10258_s29  ;;  %s6411_s29 = sld [smem:[#allocation5 + $0x66]] }
 0x221   : > { %v2283_v24 = vadd.f32 %v2281_v55, %v2277_v8  ;;  %v9836_v63 = vstv %s10260_s4  ;;  %v1429_v18 = vmul.f32 %v9711_v22, %v6299_v37  ;;  %v1299_v11 = vadd.f32 %v1297_v46, %v6195_v34  ;;  %s6355_s4 = sld [smem:[#allocation5 + $0x83]] }
 0x222   : > { %v1359_v23 = vadd.f32 %v1357_v30, %v6200_v56  ;;  %v1627_v8 = vmul.f32 %v9713_v38, %v6299_v37  ;;  %v1491_v22 = vadd.f32 %v1489_v9, %v6211_v36  ;;  %v6353_v34 = vadd.f32 %v1555_v45, %v6219_v5  ;;  %10282 = sst [smem:[#allocation143_spill]] %s6387_s19 }
 0x223   : > { %v6333_v27 = vld [vmem:[#allocation3 + $0x8] sm:$0xff]  ;;  %v1825_v56 = vmul.f32 %v9716_v54, %v6299_v37  ;;  %v1689_v46 = vadd.f32 %v1687_v0, %v6224_v48  ;;  %v1753_v30 = vmul.f32 %v9723_v44, %v6202_v52  ;;  %v9743_v38 = vstv %s10268_s13  ;;  %s6426_s13 = sld [smem:[#allocation5 + $0xaf]] }
 0x224   : > { %1376 = vperm.xlu1 %5195, %v6333_v27   ;;  %1318 = vperm.xlu0 %5196, %v6333_v27   ;;  %v9733_v36 = vstv %s10269_s9  ;;  %v2089_v45 = vmul.f32 %v9717_v1, %v6299_v37  ;;  %v2287_v5 = vmul.f32 %v9720_v15, %v6299_v37  ;;  %v9803_v48 = vstv %s10270_s26  ;;  %s10298_s9 = sld [smem:[#allocation108_spill]] }
 0x225   : > { %v6377_v9 = vadd.f32 %v1429_v18, %v1425_v10  ;;  %v1303_v0 = vmul.f32 %v9729_v17, %v6299_v37  ;;  %v1885_v54 = vmul.f32 %v9728_v41, %v6202_v52  ;;  %v9724_v1 = vmov 3   ;;  %s10306_s19 = sld [smem:[#allocation57_spill]] }
 0x226   : > { %v9787_v15 = vstv %s10275_s23  ;;  %v6390_v10 = vadd.f32 %v1627_v8, %v1623_v31  ;;  %v1363_v18 = vmul.f32 %v9730_v13, %v6299_v37  ;;  %v1495_v44 = vmul.f32 %v9727_v25, %v6299_v37  ;;  %10290 = sst [smem:[#allocation147_spill]] %s6411_s29 }
 0x227   : > { %10274 = sst [smem:[#allocation139_spill]] %s6355_s4  ;;  %10281 = vst [vmem:[#allocation142_spill] sm:$0xff] %v6377_v9  ;;  %v2541_v31 = vmul.f32 %v9743_v38, %v6131_v19  ;;  %v2545_v8 = vmul.f32 %v9733_v36, %v6202_v52  ;;  %v6413_v25 = vadd.f32 %v2089_v45, %v2085_v12  ;;  %v6415_v41 = vadd.f32 %v2287_v5, %v2283_v24 }
 0x228   : > { %s6374_s4 = sld [smem:[#allocation5 + $0xa4]]  ;;  %5197 = vset.pattern.permute.xlu1 %v9726_v14  ;;  %5198 = vset.pattern.permute.xlu0 %v9724_v1  ;;  %10285 = vst [vmem:[#allocation144_spill] sm:$0xff] %v6390_v10  ;;  %v9742_v1 = vstv %s10280_s28  ;;  %v6403_v14 = vadd.f32 %v1825_v56, %v1821_v16  ;;  %v9746_v13 = vstv %s10284_s14  ;;  %v6421_v16 = vadd.f32 %v1303_v0, %v1299_v11 }
 0x229   : > { %1442 = vperm.xlu1 %5197, %v6333_v27   ;;  %1508 = vperm.xlu0 %5198, %v6333_v27   ;;  %10291 = vst [vmem:[#allocation148_spill] sm:$0xff] %v6413_v25  ;;  %10292 = vst [vmem:[#allocation149_spill] sm:$0xff] %v6415_v41  ;;  %v1561_v56 = vmul.f32 %v9748_v28, %v6299_v37  ;;  %10297 = sst [smem:[#allocation152_spill]] %s6426_s13  ;;  %v2551_v36 = vmul.f32 %v9742_v1, %v6299_v37  ;;  %v9739_v11 = vmov 4   ;;  %v9740_v5 = vmov 6  }
 0x22a   : > { %10289 = vst [vmem:[#allocation146_spill] sm:$0xff] %v6403_v14  ;;  %10296 = vst [vmem:[#allocation151_spill] sm:$0xff] %v6421_v16  ;;  %v6431_v12 = vadd.f32 %v1363_v18, %v1359_v23  ;;  %v6433_v24 = vadd.f32 %v1495_v44, %v1491_v22  ;;  %v1693_v45 = vmul.f32 %v9744_v33, %v6299_v37  ;;  %s10302_s29 = sld [smem:[#allocation113_spill]]  ;;  %v9801_v23 = vstv %s10293_s22 }
 0x22b   : > { %s6440_s28 = sld [smem:[#allocation5 + $0xb0]]  ;;  %v2547_v0 = vadd.f32 %v2545_v8, %v2541_v31  ;;  %v1755_v22 = vadd.f32 %v1753_v30, %v6229_v50  ;;  %v10305_v44 = vstv %s10295_s27  ;;  %v2743_v31 = vmul.f32 %v9746_v13, %v6202_v52 }
 0x22c   : > { %10299 = vst [vmem:[#allocation153_spill] sm:$0xff] %v6431_v12  ;;  %10300 = vst [vmem:[#allocation154_spill] sm:$0xff] %v6433_v24  ;;  %s10304_s13 = sld [smem:[#allocation109_spill]]  ;;  %v1951_v18 = vmul.f32 %v10305_v44, %v6202_v52  ;;  %v10309_v50 = vstv %s10301_s10  ;;  %v10311_v44 = vstv %s10203_s6  ;;  %v6471_v33 = vadd.f32 %v1561_v56, %v6353_v34  ;;  %v7086_v24 = vld [vmem:[#allocation2 + $0x10] sm:$0xff] }
 0x22d   : > { %5199 = vset.pattern.permute.xlu1 %v9739_v11  ;;  %5201 = vset.pattern.permute.xlu0 %v9740_v5  ;;  %v9794_v11 = vstv %s10298_s9  ;;  %v1759_v30 = vmul.f32 %v10309_v50, %v6299_v37  ;;  %v2017_v1 = vmul.f32 %v10311_v44, %v6202_v52  ;;  %s10312_s27 = sld [smem:[#allocation110_spill]]  ;;  %v1887_v13 = vadd.f32 %v1885_v54, %v6239_v26 }
 0x22e   : > { %10279 = sst [smem:[#allocation141_spill]] %s6374_s4  ;;  %1574 = vperm.xlu1 %5199, %v6333_v27   ;;  %1706 = vperm.xlu0 %5201, %v6333_v27   ;;  %10314 = vst [vmem:[#allocation159_spill] sm:$0xff] %v6471_v33  ;;  %v6478_v50 = vadd.f32 %v2551_v36, %v2547_v0  ;;  %v10318_v28 = vstv %s10306_s19  ;;  %v1953_v32 = vadd.f32 %v1951_v18, %v6244_v43  ;;  %v10320_v55 = vstv %s10308_s2 }
 0x22f   : > { %s10283_s4 = sld [smem:[#allocation111_spill]]  ;;  %v1891_v44 = vmul.f32 %v10318_v28, %v6299_v37  ;;  %v1957_v7 = vmul.f32 %v10320_v55, %v6299_v37  ;;  %v9764_v34 = vmov 5   ;;  %v10326_v54 = vstv %s10199_s5 }
 0x230   : > { %v9762_v8 = vstv %s10302_s29  ;;  %10313 = sst [smem:[#allocation158_spill]] %s6467_s18  ;;  %10317 = vst [vmem:[#allocation162_spill] sm:$0xff] %v6478_v50  ;;  %v2149_v55 = vmul.f32 %v10326_v54, %v6202_v52  ;;  %v6503_v56 = vadd.f32 %v1759_v30, %v1755_v22  ;;  %v9820_v54 = vstv %s10324_s0 }
 0x231   : > { %10303 = sst [smem:[#allocation155_spill]] %s6440_s28  ;;  %v2749_v43 = vmul.f32 %v9762_v8, %v6299_v37  ;;  %v6519_v22 = vadd.f32 %v1891_v44, %v1887_v13  ;;  %v9769_v13 = vmov 10  }
 0x232   : > { %s6461_s28 = sld [smem:[#allocation5 + $0xb2]]  ;;  %v9796_v38 = vstv %s10304_s13  ;;  %5200 = vset.pattern.permute.xlu1 %v9764_v34  ;;  %10329 = vst [vmem:[#allocation165_spill] sm:$0xff] %v6503_v56  ;;  %v9770_v34 = vmov 7  }
 0x233   : > { %s6476_s14 = sld [smem:[#allocation5 + $0x89]]  ;;  %v9823_v26 = vstv %s10312_s27  ;;  %1640 = vperm.xlu1 %5200, %v6333_v27   ;;  %10336 = vst [vmem:[#allocation167_spill] sm:$0xff] %v6519_v22 }
 0x234   : > { %s10321_s18 = sld [smem:[#allocation72_spill]] }
 0x235   : > { %v9745_v17 = vstv %s10283_s4  ;;  %s10319_s4 = sld [smem:[#allocation117_spill]] }
 0x236   : > { %v2739_v5 = vmul.f32 %v9745_v17, %v6131_v19  ;;  %v6473_v17 = vadd.f32 %v1693_v45, %v1689_v46  ;;  %v9760_v46 = vmov 9   ;;  %s10325_s6 = sld [smem:[#allocation115_spill]]  ;;  %v2019_v45 = vadd.f32 %v2017_v1, %v6267_v40 }
 0x237   : > { %5204 = vset.pattern.permute.xlu0 %v9760_v46  ;;  %s6500_s2 = sld [smem:[#allocation5 + $0xbc]]  ;;  %v6521_v1 = vadd.f32 %v1957_v7, %v1953_v32  ;;  %5202 = vset.pattern.permute.xlu1 %v9770_v34  ;;  %v2221_v34 = vmul.f32 %v9778_v51, %v6299_v37 }
 0x238   : > { %10310 = sst [smem:[#allocation157_spill]] %s6461_s28  ;;  %10315 = vst [vmem:[#allocation160_spill] sm:$0xff] %v6473_v17  ;;  %v2745_v28 = vadd.f32 %v2743_v31, %v2739_v5  ;;  %1904 = vperm.xlu0 %5204, %v6333_v27   ;;  %v2215_v31 = vmul.f32 %v9763_v47, %v6202_v52  ;;  %1772 = vperm.xlu1 %5202, %v6333_v27  }
 0x239   : > { %10316 = sst [smem:[#allocation161_spill]] %s6476_s14  ;;  %10337 = vst [vmem:[#allocation168_spill] sm:$0xff] %v6521_v1 }
 0x23a   : > { %s10322_s28 = sld [smem:[#allocation118_spill]]  ;;  %v10330_v5 = vstv %s10321_s18  ;;  %v6525_v40 = vadd.f32 %v2749_v43, %v2745_v28  ;;  %v9832_v43 = vmov 8  }
 0x23b   : > { %s6489_s14 = sld [smem:[#allocation5 + $0xbb]]  ;;  %v9775_v36 = vstv %s10319_s4  ;;  %v2023_v0 = vmul.f32 %v10330_v5, %v6299_v37  ;;  %v2151_v5 = vadd.f32 %v2149_v55, %v6280_v61 }
 0x23c   : > { %s10328_s10 = sld [smem:[#allocation69_spill]]  ;;  %v9824_v46 = vstv %s10325_s6  ;;  %10339 = vst [vmem:[#allocation169_spill] sm:$0xff] %v6525_v40  ;;  %v2937_v30 = vmul.f32 %v9775_v36, %v6131_v19  ;;  %5205 = vset.pattern.permute.xlu0 %v9769_v13  ;;  %v2217_v13 = vadd.f32 %v2215_v31, %v6285_v6  ;;  %v9791_v31 = vstv %s6185_s24  ;;  %5203 = vset.pattern.permute.xlu1 %v9832_v43 }
 0x23d   : > { %10327 = sst [smem:[#allocation164_spill]] %s6500_s2  ;;  %1970 = vperm.xlu0 %5205, %v6333_v27   ;;  %v6553_v55 = vadd.f32 %v2023_v0, %v2019_v45  ;;  %v9788_v45 = vstv %s6170_s1  ;;  %1838 = vperm.xlu1 %5203, %v6333_v27  }
 0x23e   : > { %s6509_s29 = sld [smem:[#allocation5 + $0xbd]] }
 0x23f   : > { %s6515_s5 = sld [smem:[#allocation5 + $0xbe]]  ;;  %10348 = vst [vmem:[#allocation171_spill] sm:$0xff] %v6553_v55 }
 0x240   : > { %v9773_v18 = vstv %s10322_s28  ;;  %s10334_s2 = sld [smem:[#allocation73_spill]] }
 0x241   : > { %10323 = sst [smem:[#allocation163_spill]] %s6489_s14  ;;  %v2941_v61 = vmul.f32 %v9773_v18, %v6202_v52  ;;  %5208 = vset.pattern.permute.xlu0 %v9784_v62  ;;  %v3139_v62 = vmul.f32 %v9791_v31, %v6202_v52  ;;  %v6631_v31 = vmul.f32 %v9801_v23, %v6299_v37  ;;  %v9817_v23 = vstv %s6275_s30 }
 0x242   : > { %s10332_s14 = sld [smem:[#allocation120_spill]]  ;;  %v10341_v8 = vstv %s10328_s10  ;;  %2168 = vperm.xlu0 %5208, %v6333_v27  }
 0x243   : > { %s10335_s19 = sld [smem:[#allocation74_spill]]  ;;  %v2155_v47 = vmul.f32 %v10341_v8, %v6299_v37  ;;  %v2943_v36 = vadd.f32 %v2941_v61, %v2937_v30  ;;  %v2475_v30 = vmul.f32 %v9803_v48, %v6131_v19 }
 0x244   : > { %10331 = sst [smem:[#allocation69_spill]] %s6509_s29 }
 0x245   : > { %10333 = sst [smem:[#allocation166_spill]] %s6515_s5  ;;  %v6574_v0 = vadd.f32 %v2155_v47, %v2151_v5  ;;  %v9834_v47 = vstv %s6148_s17  ;;  %v6587_v5 = vadd.f32 %v2221_v34, %v2217_v13  ;;  %v3135_v34 = vmul.f32 %v9788_v45, %v6131_v19 }
 0x246   : > { %s6523_s18 = sld [smem:[#allocation5 + $0x6c]]  ;;  %v10344_v7 = vstv %s10334_s2  ;;  %v10536_v17 = vstv %s10334_s2 }
 0x247   : > { %s10340_s29 = sld [smem:[#allocation116_spill]]  ;;  %v2343_v8 = vmul.f32 %v10344_v7, %v6131_v19  ;;  %v2409_v7 = vmul.f32 %v9776_v21, %v6131_v19  ;;  %10351 = vst [vmem:[#allocation173_spill] sm:$0xff] %v6574_v0  ;;  %10355 = vst [vmem:[#allocation176_spill] sm:$0xff] %v6587_v5 }
 0x248   : > { %s10343_s5 = sld [smem:[#allocation121_spill]]  ;;  %v9786_v32 = vstv %s10332_s14 }
 0x249   : > { %v10345_v44 = vstv %s10335_s19  ;;  %s6550_s4 = sld [smem:[#allocation5 + $0xc7]]  ;;  %v2947_v6 = vmul.f32 %v9786_v32, %v6299_v37 }
 0x24a   : > { %v2347_v28 = vmul.f32 %v10345_v44, %v6202_v52  ;;  %s6559_s28 = sld [smem:[#allocation5 + $0xc8]]  ;;  %v2413_v44 = vmul.f32 %v9777_v39, %v6202_v52 }
 0x24b   : > { %s6584_s14 = sld [smem:[#allocation5 + $0x6d]]  ;;  %v6614_v32 = vadd.f32 %v2947_v6, %v2943_v36  ;;  %v2673_v36 = vmul.f32 %v9794_v11, %v6131_v19  ;;  %v1241_v6 = vpop.permute.xlu0 %1240  ;;  %v9814_v11 = vstv %s6253_s11 }
 0x24c   : > { %10338 = sst [smem:[#allocation73_spill]] %s6523_s18  ;;  %v2349_v21 = vadd.f32 %v2347_v28, %v2343_v8  ;;  %v2415_v13 = vadd.f32 %v2413_v44, %v2409_v7  ;;  %v2419_v8 = vmul.f32 %v9790_v42, %v6299_v37  ;;  %v9802_v28 = vstv %s6190_s21 }
 0x24d   : > { %s6536_s18 = sld [smem:[#allocation5 + $0x8c]]  ;;  %10361 = vst [vmem:[#allocation178_spill] sm:$0xff] %v6614_v32  ;;  %v2611_v44 = vmul.f32 %v9806_v57, %v6202_v52  ;;  %v1244_v57 = vsub.f32 %v6034_v4, %v1241_v6  ;;  %v3343_v4 = vmul.f32 %v9817_v23, %v6299_v37 }
 0x24e   : > { %v9833_v18 = vstv %s10343_s5  ;;  %s6612_s23 = sld [smem:[#allocation5 + $0xcc]] }
 0x24f   : > { %10346 = sst [smem:[#allocation170_spill]] %s6550_s4 }
 0x250   : > { %s6576_s4 = sld [smem:[#allocation5 + $0xca]] }
 0x251   : > { %10354 = sst [smem:[#allocation175_spill]] %s6584_s14 }
 0x252   : > { %s6606_s14 = sld [smem:[#allocation5 + $0xcb]] }
 0x253   : > { %10342 = sst [smem:[#allocation74_spill]] %s6536_s18 }
 0x254   : > { %s10347_s18 = sld [smem:[#allocation75_spill]] }
 0x255   : > { %10349 = sst [smem:[#allocation75_spill]] %s6559_s28 }
 0x256   : > { %10352 = sst [smem:[#allocation174_spill]] %s6576_s4 }
 0x257   : > { %s10356_s4 = sld [smem:[#allocation79_spill]] }
 0x258   : > { %s6597_s28 = sld [smem:[#allocation5 + $0x8d]] }
 0x259   : > { %10359 = sst [smem:[#allocation80_spill]] %s6606_s14 }
 0x25a   : > { %v10353_v39 = vstv %s10347_s18  ;;  %10360 = sst [smem:[#allocation177_spill]] %s6612_s23 }
 0x25b   : > { %v2353_v51 = vmul.f32 %v10353_v39, %v6299_v37  ;;  %v2479_v39 = vmul.f32 %v9787_v15, %v6202_v52  ;;  %s6624_s14 = sld [smem:[#allocation5 + $0xcd]] }
 0x25c   : > { %s10365_s23 = sld [smem:[#allocation81_spill]] }
 0x25d   : > { %v6616_v15 = vadd.f32 %v2353_v51, %v2349_v21  ;;  %v10363_v45 = vstv %s10356_s4  ;;  %v6626_v42 = vadd.f32 %v2479_v39, %v2475_v30  ;;  %v2677_v21 = vmul.f32 %v9796_v38, %v6202_v52  ;;  %s6654_s24 = sld [smem:[#allocation5 + $0x70]] }
 0x25e   : > { %10358 = sst [smem:[#allocation79_spill]] %s6597_s28  ;;  %v2607_v7 = vmul.f32 %v10363_v45, %v6131_v19  ;;  %v9800_v51 = vmov 11   ;;  %v9799_v45 = vmov 16   ;;  %v9866_v30 = vstv %s6206_s25 }
 0x25f   : > { %10362 = vst [vmem:[#allocation179_spill] sm:$0xff] %v6616_v15  ;;  %5206 = vset.pattern.permute.xlu1 %v9800_v51  ;;  %5211 = vset.pattern.permute.xlu0 %v9799_v45  ;;  %v6647_v39 = vmul.f32 %v9802_v28, %v6299_v37  ;;  %s10367_s28 = sld [smem:[#allocation85_spill]]  ;;  %v6650_v38 = vadd.f32 %v2419_v8, %v2415_v13  ;;  %v9819_v51 = vstv %s6262_s8 }
 0x260   : > { %2036 = vperm.xlu1 %5206, %v6333_v27   ;;  %2366 = vperm.xlu0 %5211, %v6333_v27   ;;  %s10370_s1 = sld [smem:[#allocation86_spill]]  ;;  %v6656_v45 = vadd.f32 %v3139_v62, %v3135_v34  ;;  %v6667_v13 = vadd.f32 %v2611_v44, %v2607_v7  ;;  %v6672_v8 = vmul.f32 %v9823_v26, %v6299_v37 }
 0x261   : > { %10364 = sst [smem:[#allocation180_spill]] %s6624_s14  ;;  %10368 = vst [vmem:[#allocation181_spill] sm:$0xff] %v6650_v38  ;;  %v3333_v62 = vmul.f32 %v9814_v11, %v6131_v19  ;;  %v2679_v34 = vadd.f32 %v2677_v21, %v2673_v36  ;;  %v3337_v7 = vmul.f32 %v9819_v51, %v6202_v52  ;;  %v2871_v36 = vmul.f32 %v9820_v54, %v6131_v19 }
 0x262   : > { %s6641_s14 = sld [smem:[#allocation5 + $0xce]]  ;;  %v10371_v28 = vstv %s10365_s23  ;;  %v9827_v21 = vmov 12   ;;  %v9822_v11 = vmov 20   ;;  %v3003_v51 = vmul.f32 %v9825_v20, %v6131_v19 }
 0x263   : > { %10369 = sst [smem:[#allocation85_spill]] %s6654_s24  ;;  %v6663_v48 = vmul.f32 %v10371_v28, %v6299_v37  ;;  %v2805_v28 = vmul.f32 %v9826_v59, %v6131_v19  ;;  %v3007_v54 = vmul.f32 %v9829_v53, %v6202_v52  ;;  %v3069_v26 = vmul.f32 %v9833_v18, %v6131_v19 }
 0x264   : > { %s10373_s24 = sld [smem:[#allocation128_spill]]  ;;  %5207 = vset.pattern.permute.xlu1 %v9827_v21  ;;  %5215 = vset.pattern.permute.xlu0 %v9822_v11  ;;  %v3201_v20 = vmul.f32 %v9835_v58, %v6131_v19  ;;  %v3205_v53 = vmul.f32 %v9836_v63, %v6202_v52  ;;  %v3339_v43 = vadd.f32 %v3337_v7, %v3333_v62  ;;  %v10392_v63 = vstv %s10340_s29 }
 0x265   : > { %s6675_s21 = sld [smem:[#allocation5 + $0xd7]]  ;;  %2102 = vperm.xlu1 %5207, %v6333_v27   ;;  %2630 = vperm.xlu0 %5215, %v6333_v27   ;;  %v2881_v61 = vmul.f32 %v10392_v63, %v6299_v37  ;;  %v3009_v38 = vadd.f32 %v3007_v54, %v3003_v51  ;;  %v6749_v62 = vmax.f32 %v6289_v60, 0.0  ;;  %v9840_v7 = vmov 23  }
 0x266   : > { %s10375_s13 = sld [smem:[#allocation91_spill]]  ;;  %v10379_v44 = vstv %s10370_s1  ;;  %v10397_v63 = vstv %s6155_s16  ;;  %v6769_v51 = vadd.f32 %v6631_v31, %v6626_v42  ;;  %v6785_v42 = vadd.f32 %v3343_v4, %v3339_v43 }
 0x267   : > { %s10376_s9 = sld [smem:[#allocation92_spill]]  ;;  %v2809_v6 = vmul.f32 %v10379_v44, %v6202_v52  ;;  %v2875_v44 = vmul.f32 %v9824_v46, %v6202_v52  ;;  %v3073_v46 = vmul.f32 %v9834_v47, %v6202_v52  ;;  %v3267_v47 = vmul.f32 %v9866_v30, %v6131_v19  ;;  %10394 = vst [vmem:[#allocation183_spill] sm:$0xff] %v6749_v62 }
 0x268   : > { %10366 = sst [smem:[#allocation81_spill]] %s6641_s14  ;;  %v3079_v54 = vmul.f32 %v10397_v63, %v6299_v37  ;;  %10400 = vst [vmem:[#allocation186_spill] sm:$0xff] %v6769_v51  ;;  %10408 = vst [vmem:[#allocation189_spill] sm:$0xff] %v6785_v42  ;;  %v6805_v43 = vmax.f32 %v6143_v49, 0.0  ;;  %v10574_v41 = vstv %s10370_s1 }
 0x269   : > { %s6665_s14 = sld [smem:[#allocation5 + $0x90]]  ;;  %5218 = vset.pattern.permute.xlu0 %v9840_v7 }
 0x26a   : > { %s10378_s27 = sld [smem:[#allocation129_spill]]  ;;  %v9862_v23 = vstv %s10373_s24  ;;  %2828 = vperm.xlu0 %5218, %v6333_v27   ;;  %10416 = vst [vmem:[#allocation196_spill] sm:$0xff] %v6805_v43 }
 0x26b   : > { %10374 = sst [smem:[#allocation182_spill]] %s6675_s21  ;;  %v3271_v58 = vmul.f32 %v9862_v23, %v6202_v52 }
 0x26c   : > { %s10380_s11 = sld [smem:[#allocation97_spill]] }
 0x26d   : > { %s10381_s21 = sld [smem:[#allocation33_spill]] }
 0x26e   : > { %s10382_s8 = sld [smem:[#allocation98_spill]] }
 0x26f   : > { %10372 = sst [smem:[#allocation86_spill]] %s6665_s14 }
 0x270   : > { %s6683_s14 = sld [smem:[#allocation5 + $0xd8]] }
 0x271   : > { %s6699_s30 = sld [smem:[#allocation5 + $0xd9]] }
 0x272   : > { %s6713_s0 = sld [smem:[#allocation5 + $0xda]] }
 0x273   : > { %v10386_v59 = vstv %s10381_s21  ;;  %s6732_s6 = sld [smem:[#allocation5 + $0x93]] }
 0x274   : > { %v1248_v21 = vadd.f32 %v10386_v59, %v1244_v57  ;;  %s6743_s21 = sld [smem:[#allocation5 + $0xe3]]  ;;  %v2811_v57 = vadd.f32 %v2809_v6, %v2805_v28  ;;  %v2877_v59 = vadd.f32 %v2875_v44, %v2871_v36  ;;  %v3075_v36 = vadd.f32 %v3073_v46, %v3069_v26 }
 0x275   : > { %v3207_v44 = vadd.f32 %v3205_v53, %v3201_v20  ;;  %v3273_v46 = vadd.f32 %v3271_v58, %v3267_v47  ;;  %v10403_v26 = vstv %s10378_s27  ;;  %s10404_s16 = sld [smem:[#allocation34_spill]]  ;;  %v6789_v20 = vadd.f32 %v6663_v48, %v6667_v13 }
 0x276   : > { %10377 = sst [smem:[#allocation91_spill]] %s6683_s14  ;;  %v6763_v60 = vmax.f32 %v1248_v21, 0.0  ;;  %v3277_v63 = vmul.f32 %v10403_v26, %v6299_v37  ;;  %v6783_v21 = vadd.f32 %v6647_v39, %v6656_v45  ;;  %v6792_v53 = vadd.f32 %v6672_v8, %v2679_v34 }
 0x277   : > { %10383 = sst [smem:[#allocation92_spill]] %s6699_s30  ;;  %10409 = vst [vmem:[#allocation190_spill] sm:$0xff] %v6789_v20  ;;  %v6798_v31 = vadd.f32 %v2881_v61, %v2877_v59  ;;  %v9867_v45 = vmov 15   ;;  %v9859_v48 = vmov 26   ;;  %v6822_v13 = vsub.s32 3, %v5844_v29 }
 0x278   : > { %s10384_s14 = sld [smem:[#allocation87_spill]]  ;;  %10398 = vst [vmem:[#allocation184_spill] sm:$0xff] %v6763_v60  ;;  %10407 = vst [vmem:[#allocation188_spill] sm:$0xff] %v6783_v21  ;;  %5221 = vset.pattern.permute.xlu0 %v9859_v48  ;;  %v6825_v8 = vsub.s32 4, %v5844_v29  ;;  %v6828_v34 = vsub.s32 6, %v5844_v29  ;;  %v6832_v4 = vadd.f32 %v3277_v63, %v3273_v46  ;;  %v6838_v59 = vsub.s32 7, %v5844_v29 }
 0x279   : > { %10385 = sst [smem:[#allocation97_spill]] %s6713_s0  ;;  %10410 = vst [vmem:[#allocation191_spill] sm:$0xff] %v6792_v53  ;;  %10413 = vst [vmem:[#allocation193_spill] sm:$0xff] %v6798_v31  ;;  %3026 = vperm.xlu0 %5221, %v6333_v27   ;;  %v2344_v33 = vmul.f32 %v10536_v17, %v6763_v60  ;;  %v9890_v17 = vmov 22   ;;  %v10556_v21 = vstv %s10347_s18 }
 0x27a   : > { %s6727_s30 = sld [smem:[#allocation5 + $0x73]]  ;;  %10427 = vst [vmem:[#allocation198_spill] sm:$0xff] %v6822_v13  ;;  %10429 = vst [vmem:[#allocation199_spill] sm:$0xff] %v6825_v8  ;;  %v2354_v32 = vmul.f32 %v10556_v21, %v6805_v43 }
 0x27b   : > { %10388 = sst [smem:[#allocation98_spill]] %s6732_s6  ;;  %v10418_v39 = vstv %s10404_s16  ;;  %10430 = vst [vmem:[#allocation200_spill] sm:$0xff] %v6828_v34  ;;  %10432 = vst [vmem:[#allocation201_spill] sm:$0xff] %v6832_v4 }
 0x27c   : > { %s10389_s0 = sld [smem:[#allocation93_spill]] }
 0x27d   : > { %10391 = sst [smem:[#allocation87_spill]] %s6743_s21 }
 0x27e   : > { %v10390_v11 = vstv %s10384_s14  ;;  %s10393_s6 = sld [smem:[#allocation99_spill]] }
 0x27f   : > { %v2815_v18 = vmul.f32 %v10390_v11, %v6299_v37  ;;  %v9860_v11 = vmov 14   ;;  %s6765_s21 = sld [smem:[#allocation5 + $0xe5]] }
 0x280   : > { %10387 = sst [smem:[#allocation33_spill]] %s6727_s30  ;;  %5209 = vset.pattern.permute.xlu1 %v9860_v11 }
 0x281   : > { %s6753_s30 = sld [smem:[#allocation5 + $0xe4]]  ;;  %2234 = vperm.xlu1 %5209, %v6333_v27   ;;  %v6796_v58 = vadd.f32 %v2815_v18, %v2811_v57  ;;  %v1354_v18 = vmul.f32 %v10418_v39, %v6763_v60  ;;  %v6835_v57 = vsub.s32 5, %v5844_v29 }
 0x282   : > { %v10396_v28 = vstv %s10389_s0  ;;  %s6779_s24 = sld [smem:[#allocation5 + $0x77]] }
 0x283   : > { %v3013_v6 = vmul.f32 %v10396_v28, %v6299_v37  ;;  %10412 = vst [vmem:[#allocation192_spill] sm:$0xff] %v6796_v58  ;;  %s10421_s27 = sld [smem:[#allocation40_spill]]  ;;  %10433 = vst [vmem:[#allocation202_spill] sm:$0xff] %v6835_v57 }
 0x284   : > { %v10401_v7 = vstv %s10393_s6  ;;  %s10422_s25 = sld [smem:[#allocation41_spill]] }
 0x285   : > { %10399 = sst [smem:[#allocation185_spill]] %s6765_s21  ;;  %v3211_v28 = vmul.f32 %v10401_v7, %v6299_v37  ;;  %v6800_v47 = vadd.f32 %v3013_v6, %v3009_v38  ;;  %v6802_v7 = vadd.f32 %v3079_v54, %v3075_v36  ;;  %5210 = vset.pattern.permute.xlu1 %v9867_v45 }
 0x286   : > { %s10406_s21 = sld [smem:[#allocation35_spill]]  ;;  %2300 = vperm.xlu1 %5210, %v6333_v27  }
 0x287   : > { %10395 = sst [smem:[#allocation93_spill]] %s6753_s30  ;;  %10414 = vst [vmem:[#allocation194_spill] sm:$0xff] %v6800_v47  ;;  %10415 = vst [vmem:[#allocation195_spill] sm:$0xff] %v6802_v7  ;;  %v6817_v49 = vadd.f32 %v3211_v28, %v3207_v44 }
 0x288   : > { %s6774_s30 = sld [smem:[#allocation5 + $0xe6]] }
 0x289   : > { %10405 = sst [smem:[#allocation34_spill]] %s6779_s24  ;;  %10424 = vst [vmem:[#allocation197_spill] sm:$0xff] %v6817_v49  ;;  %v10440_v28 = vstv %s10421_s27 }
 0x28a   : > { %s10417_s24 = sld [smem:[#allocation37_spill]]  ;;  %v1420_v46 = vmul.f32 %v10440_v28, %v6763_v60  ;;  %v10441_v26 = vstv %s10422_s25  ;;  %v9863_v28 = vmov 17  }
 0x28b   : > { %s6815_s29 = sld [smem:[#allocation5 + $0xf3]]  ;;  %v1424_v63 = vmul.f32 %v10441_v26, %v6749_v62  ;;  %5212 = vset.pattern.permute.xlu1 %v9863_v28 }
 0x28c   : > { %v10420_v61 = vstv %s10406_s21  ;;  %s10425_s17 = sld [smem:[#allocation43_spill]]  ;;  %2432 = vperm.xlu1 %5212, %v6333_v27  }
 0x28d   : > { %v1358_v38 = vmul.f32 %v10420_v61, %v6749_v62  ;;  %s10426_s5 = sld [smem:[#allocation44_spill]] }
 0x28e   : > { %10402 = sst [smem:[#allocation187_spill]] %s6774_s30 }
 0x28f   : > { %s6794_s30 = sld [smem:[#allocation5 + $0x97]]  ;;  %v1360_v29 = vadd.f32 %v1358_v38, %v1354_v18  ;;  %v9865_v18 = vmov 29  }
 0x290   : > { %s10428_s16 = sld [smem:[#allocation46_spill]]  ;;  %v10436_v6 = vstv %s10417_s24  ;;  %5224 = vset.pattern.permute.xlu0 %v9865_v18 }
 0x291   : > { %10423 = sst [smem:[#allocation37_spill]] %s6815_s29  ;;  %v1294_v36 = vmul.f32 %v10436_v6, %v6763_v60  ;;  %3224 = vperm.xlu0 %5224, %v6333_v27  }
 0x292   : > { %s6830_s21 = sld [smem:[#allocation5 + $0xf4]]  ;;  %v10444_v39 = vstv %s10425_s17 }
 0x293   : > { %s10434_s29 = sld [smem:[#allocation47_spill]]  ;;  %v1486_v61 = vmul.f32 %v10444_v39, %v6763_v60  ;;  %v10446_v6 = vstv %s10426_s5 }
 0x294   : > { %s6840_s22 = sld [smem:[#allocation5 + $0xf5]]  ;;  %v1490_v48 = vmul.f32 %v10446_v6, %v6749_v62 }
 0x295   : > { %10411 = sst [smem:[#allocation35_spill]] %s6794_s30 }
 0x296   : > { %s10419_s30 = sld [smem:[#allocation38_spill]]  ;;  %v1492_v47 = vadd.f32 %v1490_v48, %v1486_v61  ;;  %v9874_v48 = vmov 18   ;;  %v10479_v61 = vmov 2  }
 0x297   : > { %s10437_s6 = sld [smem:[#allocation49_spill]]  ;;  %5213 = vset.pattern.permute.xlu1 %v9874_v48  ;;  %5228 = vset.pattern.permute.xlu0 %v10479_v61 }
 0x298   : > { %10431 = sst [smem:[#allocation38_spill]] %s6830_s21  ;;  %2498 = vperm.xlu1 %5213, %v6333_v27  }
 0x299   : > { %s10439_s20 = sld [smem:[#allocation50_spill]]  ;;  %v10453_v38 = vstv %s10434_s29 }
 0x29a   : > { %10435 = sst [smem:[#allocation40_spill]] %s6840_s22  ;;  %v1556_v26 = vmul.f32 %v10453_v38, %v6749_v62 }
 0x29b   : > { %s6854_s21 = sld [smem:[#allocation5 + $0xf6]] }
 0x29c   : > { %v10438_v54 = vstv %s10419_s30  ;;  %s10443_s26 = sld [smem:[#allocation36_spill]] }
 0x29d   : > { %v1298_v44 = vmul.f32 %v10438_v54, %v6749_v62  ;;  %s10445_s22 = sld [smem:[#allocation52_spill]]  ;;  %v10448_v54 = vstv %s10428_s16  ;;  %v10454_v39 = vstv %s10437_s6 }
 0x29e   : > { %s10447_s24 = sld [smem:[#allocation53_spill]]  ;;  %v1552_v11 = vmul.f32 %v10448_v54, %v6763_v60  ;;  %v1684_v6 = vmul.f32 %v10454_v39, %v6763_v60 }
 0x29f   : > { %s6865_s30 = sld [smem:[#allocation5 + $0x7a]]  ;;  %v10456_v54 = vstv %s10439_s20 }
 0x2a0   : > { %s10450_s27 = sld [smem:[#allocation39_spill]]  ;;  %v1688_v23 = vmul.f32 %v10456_v54, %v6749_v62  ;;  %v1300_v54 = vadd.f32 %v1298_v44, %v1294_v36 }
 0x2a1   : > { %10442 = sst [smem:[#allocation41_spill]] %s6854_s21 }
 0x2a2   : > { %s10451_s25 = sld [smem:[#allocation55_spill]]  ;;  %v10459_v28 = vstv %s10443_s26 }
 0x2a3   : > { %s10452_s21 = sld [smem:[#allocation56_spill]]  ;;  %v1364_v18 = vmul.f32 %v10459_v28, %v6805_v43  ;;  %v10461_v38 = vstv %s10445_s22  ;;  %v1426_v28 = vadd.f32 %v1424_v63, %v1420_v46  ;;  %v6920_v63 = vld [vmem:[#allocation3] sm:$0xff] }
 0x2a4   : > { %s10455_s5 = sld [smem:[#allocation42_spill]]  ;;  %v1618_v30 = vmul.f32 %v10461_v38, %v6763_v60  ;;  %v10462_v45 = vstv %s10447_s24  ;;  %1438 = vperm.xlu0 %5228, %v6920_v63  }
 0x2a5   : > { %10449 = sst [smem:[#allocation43_spill]] %s6865_s30  ;;  %v1622_v39 = vmul.f32 %v10462_v45, %v6749_v62  ;;  %v6942_v61 = vadd.f32 %v1364_v18, %v1360_v29 }
 0x2a6   : > { %s10457_s17 = sld [smem:[#allocation45_spill]]  ;;  %v10465_v37 = vstv %s10450_s27 }
 0x2a7   : > { %s6878_s16 = sld [smem:[#allocation5 + $0x9a]]  ;;  %v1304_v19 = vmul.f32 %v10465_v37, %v6805_v43  ;;  %v1558_v37 = vadd.f32 %v1556_v26, %v1552_v11 }
 0x2a8   : > { %s10460_s30 = sld [smem:[#allocation48_spill]]  ;;  %v10466_v52 = vstv %s10451_s25 }
 0x2a9   : > { %s10463_s6 = sld [smem:[#allocation51_spill]]  ;;  %v1882_v4 = vmul.f32 %v10466_v52, %v6763_v60  ;;  %v10467_v49 = vstv %s10452_s21 }
 0x2aa   : > { %s6891_s20 = sld [smem:[#allocation5 + $0xff]]  ;;  %v1886_v7 = vmul.f32 %v10467_v49, %v6749_v62  ;;  %v10470_v38 = vstv %s10455_s5  ;;  %v1690_v49 = vadd.f32 %v1688_v23, %v1684_v6 }
 0x2ab   : > { %s6902_s29 = sld [smem:[#allocation5 + $0x100]]  ;;  %v1430_v45 = vmul.f32 %v10470_v38, %v6805_v43  ;;  %v1624_v38 = vadd.f32 %v1622_v39, %v1618_v30 }
 0x2ac   : > { %s10469_s22 = sld [smem:[#allocation54_spill]]  ;;  %v10472_v36 = vstv %s10457_s17  ;;  %v1888_v23 = vadd.f32 %v1886_v7, %v1882_v4 }
 0x2ad   : > { %10458 = sst [smem:[#allocation44_spill]] %s6878_s16  ;;  %v1496_v44 = vmul.f32 %v10472_v36, %v6805_v43  ;;  %v6950_v48 = vadd.f32 %v1430_v45, %v1426_v28  ;;  %v9880_v45 = vmov 19  }
 0x2ae   : > { %s10471_s26 = sld [smem:[#allocation57_spill]]  ;;  %v10474_v52 = vstv %s10460_s30  ;;  %5214 = vset.pattern.permute.xlu1 %v9880_v45 }
 0x2af   : > { %s6910_s24 = sld [smem:[#allocation5 + $0x101]]  ;;  %v1562_v31 = vmul.f32 %v10474_v52, %v6805_v43  ;;  %v10477_v58 = vstv %s10463_s6  ;;  %v6952_v7 = vadd.f32 %v1496_v44, %v1492_v47  ;;  %v10498_v44 = vmov 5   ;;  %2564 = vperm.xlu1 %5214, %v6333_v27  }
 0x2b0   : > { %10464 = sst [smem:[#allocation46_spill]] %s6891_s20  ;;  %v1694_v46 = vmul.f32 %v10477_v58, %v6805_v43  ;;  %5231 = vset.pattern.permute.xlu0 %v10498_v44 }
 0x2b1   : > { %10468 = sst [smem:[#allocation47_spill]] %s6902_s29  ;;  %v6954_v4 = vadd.f32 %v1562_v31, %v1558_v37  ;;  %1636 = vperm.xlu0 %5231, %v6920_v63  }
 0x2b2   : > { %s10475_s27 = sld [smem:[#allocation58_spill]]  ;;  %v10480_v11 = vstv %s10469_s22 }
 0x2b3   : > { %s10476_s21 = sld [smem:[#allocation59_spill]]  ;;  %v1628_v26 = vmul.f32 %v10480_v11, %v6805_v43  ;;  %v6944_v11 = vadd.f32 %v1304_v19, %v1300_v54 }
 0x2b4   : > { %s6918_s25 = sld [smem:[#allocation5 + $0x102]]  ;;  %v10481_v36 = vstv %s10471_s26 }
 0x2b5   : > { %10473 = sst [smem:[#allocation49_spill]] %s6910_s24  ;;  %v1892_v52 = vmul.f32 %v10481_v36, %v6805_v43  ;;  %v6946_v36 = vld [vmem:[#allocation2 + $0x8] sm:$0xff]  ;;  %v6960_v29 = vadd.f32 %v1628_v26, %v1624_v38 }
 0x2b6   : > { %s6930_s30 = sld [smem:[#allocation5 + $0x7d]]  ;;  %v7070_v56 = vrot.slane %v6946_v36, %v6835_v57 }
 0x2b7   : > { %s10483_s5 = sld [smem:[#allocation60_spill]]  ;;  %v6975_v37 = vadd.f32 %v1892_v52, %v1888_v23 }
 0x2b8   : > { %v10484_v58 = vstv %s10475_s27  ;;  %s10485_s17 = sld [smem:[#allocation61_spill]]  ;;  %10535 = vst [vmem:[#allocation211_spill] sm:$0xff] %v7070_v56 }
 0x2b9   : > { %v1750_v6 = vmul.f32 %v10484_v58, %v6763_v60  ;;  %v10486_v30 = vstv %s10476_s21  ;;  %s10487_s6 = sld [smem:[#allocation62_spill]]  ;;  %v6956_v58 = vadd.f32 %v1694_v46, %v1690_v49  ;;  %v6979_v49 = vrot.slane %v6946_v36, %v6022_v2 }
 0x2ba   : > { %10478 = sst [smem:[#allocation50_spill]] %s6918_s25  ;;  %v1754_v39 = vmul.f32 %v10486_v30, %v6749_v62  ;;  %v1220_v30 = vld [vmem:[#allocation2] sm:$0xff] }
 0x2bb   : > { %s6940_s22 = sld [smem:[#allocation5 + $0x9d]]  ;;  %10499 = vst [vmem:[#allocation203_spill] sm:$0xff] %v6979_v49  ;;  %v7006_v44 = vrot.slane %v1220_v30, %v6822_v13  ;;  %v7022_v51 = vrot.slane %v1220_v30, %v6828_v34  ;;  %v7025_v15 = vrot.slane %v1220_v30, %v6835_v57 }
 0x2bc   : > { %10482 = sst [smem:[#allocation36_spill]] %s6930_s30  ;;  %v1756_v46 = vadd.f32 %v1754_v39, %v1750_v6  ;;  %v6997_v6 = vrot.slane %v1220_v30, %v6022_v2  ;;  %v7000_v39 = vrot.slane %v1220_v30, %v5852_v35 }
 0x2bd   : > { %s6948_s26 = sld [smem:[#allocation5 + $0x10b]]  ;;  %v10493_v19 = vstv %s10483_s5  ;;  %10510 = vst [vmem:[#allocation206_spill] sm:$0xff] %v7006_v44  ;;  %10518 = vst [vmem:[#allocation208_spill] sm:$0xff] %v7022_v51 }
 0x2be   : > { %s6958_s27 = sld [smem:[#allocation5 + $0x10c]]  ;;  %v1760_v18 = vmul.f32 %v10493_v19, %v6805_v43  ;;  %v10495_v54 = vstv %s10485_s17  ;;  %10508 = vst [vmem:[#allocation204_spill] sm:$0xff] %v6997_v6  ;;  %10509 = vst [vmem:[#allocation205_spill] sm:$0xff] %v7000_v39 }
 0x2bf   : > { %s10491_s21 = sld [smem:[#allocation63_spill]]  ;;  %v1948_v28 = vmul.f32 %v10495_v54, %v6763_v60  ;;  %v10496_v47 = vstv %s10487_s6 }
 0x2c0   : > { %s10494_s30 = sld [smem:[#allocation65_spill]]  ;;  %v1952_v31 = vmul.f32 %v10496_v47, %v6749_v62  ;;  %v7003_v47 = vrot.slane %v1220_v30, %v6025_v3  ;;  %v7027_v5 = vadd.f32 %v1760_v18, %v1756_v46 }
 0x2c1   : > { %10488 = sst [smem:[#allocation52_spill]] %s6940_s22 }
 0x2c2   : > { %s10492_s22 = sld [smem:[#allocation64_spill]] }
 0x2c3   : > { %10489 = sst [smem:[#allocation53_spill]] %s6948_s26 }
 0x2c4   : > { %10490 = sst [smem:[#allocation39_spill]] %s6958_s27 }
 0x2c5   : > { %s6971_s26 = sld [smem:[#allocation5 + $0x10d]]  ;;  %v10503_v38 = vstv %s10491_s21 }
 0x2c6   : > { %s10500_s5 = sld [smem:[#allocation67_spill]]  ;;  %v1958_v26 = vmul.f32 %v10503_v38, %v6805_v43  ;;  %v10505_v23 = vstv %s10494_s30  ;;  %v7011_v38 = vrot.slane %v1220_v30, %v6825_v8 }
 0x2c7   : > { %s10501_s17 = sld [smem:[#allocation68_spill]]  ;;  %v1820_v54 = vmul.f32 %v10505_v23, %v6749_v62 }
 0x2c8   : > { %s6981_s27 = sld [smem:[#allocation5 + $0x10e]]  ;;  %v10504_v19 = vstv %s10492_s22  ;;  %10514 = vst [vmem:[#allocation207_spill] sm:$0xff] %v7011_v38 }
 0x2c9   : > { %v1816_v52 = vmul.f32 %v10504_v19, %v6763_v60  ;;  %s10506_s6 = sld [smem:[#allocation66_spill]]  ;;  %v1954_v19 = vadd.f32 %v1952_v31, %v1948_v28  ;;  %v9884_v31 = vmov 21  }
 0x2ca   : > { %s10511_s22 = sld [smem:[#allocation70_spill]]  ;;  %5216 = vset.pattern.permute.xlu1 %v9884_v31  ;;  %v10532_v31 = vstv %s10328_s10 }
 0x2cb   : > { %10497 = sst [smem:[#allocation55_spill]] %s6971_s26  ;;  %2696 = vperm.xlu1 %5216, %v6333_v27   ;;  %v2156_v22 = vmul.f32 %v10532_v31, %v6805_v43 }
 0x2cc   : > { %s6994_s26 = sld [smem:[#allocation5 + $0x80]]  ;;  %v10515_v23 = vstv %s10500_s5 }
 0x2cd   : > { %s7008_s21 = sld [smem:[#allocation5 + $0xa0]]  ;;  %v2146_v45 = vmul.f32 %v10515_v23, %v6763_v60  ;;  %v10516_v53 = vstv %s10501_s17  ;;  %v1822_v23 = vadd.f32 %v1820_v54, %v1816_v52  ;;  %v7051_v52 = vrot.slane %v6946_v36, %v6025_v3 }
 0x2ce   : > { %10502 = sst [smem:[#allocation56_spill]] %s6981_s27  ;;  %v2150_v20 = vmul.f32 %v10516_v53, %v6749_v62  ;;  %v10522_v53 = vmov 8  }
 0x2cf   : > { %s10513_s30 = sld [smem:[#allocation71_spill]]  ;;  %v10519_v0 = vstv %s10506_s6  ;;  %5234 = vset.pattern.permute.xlu0 %v10522_v53  ;;  %10529 = vst [vmem:[#allocation210_spill] sm:$0xff] %v7051_v52  ;;  %v7060_v53 = vadd.f32 %v1958_v26, %v1954_v19  ;;  %v10538_v26 = vstv %s10335_s19  ;;  %5217 = vset.pattern.permute.xlu1 %v9890_v17  ;;  %v10553_v17 = vstv %s10356_s4 }
 0x2d0   : > { %v1826_v28 = vmul.f32 %v10519_v0, %v6805_v43  ;;  %s7032_s27 = sld [smem:[#allocation5 + $0x118]]  ;;  %v10524_v55 = vstv %s10511_s22  ;;  %1834 = vperm.xlu0 %5234, %v6920_v63   ;;  %v7047_v0 = vrot.slane %v1220_v30, %v6838_v59  ;;  %v2348_v19 = vmul.f32 %v10538_v26, %v6749_v62  ;;  %2762 = vperm.xlu1 %5217, %v6333_v27  }
 0x2d1   : > { %v2014_v1 = vmul.f32 %v10524_v55, %v6763_v60  ;;  %s7042_s17 = sld [smem:[#allocation5 + $0x119]]  ;;  %v7055_v55 = vrot.slane %v6946_v36, %v5852_v35  ;;  %v10544_v26 = vmov 12   ;;  %v2608_v12 = vmul.f32 %v10553_v17, %v6763_v60 }
 0x2d2   : > { %10507 = sst [smem:[#allocation42_spill]] %s6994_s26  ;;  %10528 = vst [vmem:[#allocation209_spill] sm:$0xff] %v7047_v0  ;;  %v2350_v42 = vadd.f32 %v2348_v19, %v2344_v33 }
 0x2d3   : > { %10512 = sst [smem:[#allocation45_spill]] %s7008_s21 }
 0x2d4   : > { %s7019_s26 = sld [smem:[#allocation5 + $0x117]]  ;;  %5238 = vset.pattern.permute.xlu0 %v10544_v26  ;;  %v7124_v26 = vrot.slane %v7086_v24, %v5852_v35  ;;  %v7166_v25 = vadd.f32 %v2354_v32, %v2350_v42  ;;  %v5540_v42 = vmov 25   ;;  %v7207_v32 = vrot.slane %v7086_v24, %v6838_v59 }
 0x2d5   : > { %v10525_v18 = vstv %s10513_s30  ;;  %s10530_s22 = sld [smem:[#allocation72_spill]]  ;;  %2098 = vperm.xlu0 %5238, %v6920_v63  }
 0x2d6   : > { %10521 = sst [smem:[#allocation51_spill]] %s7032_s27  ;;  %v2018_v46 = vmul.f32 %v10525_v18, %v6749_v62  ;;  %v2152_v18 = vadd.f32 %v2150_v20, %v2146_v45  ;;  %v7081_v45 = vadd.f32 %v1826_v28, %v1822_v23  ;;  %10558 = vst [vmem:[#allocation213_spill] sm:$0xff] %v7124_v26  ;;  %10595 = vst [vmem:[#allocation219_spill] sm:$0xff] %v7207_v32 }
 0x2d7   : > { %10526 = sst [smem:[#allocation54_spill]] %s7042_s17  ;;  %v7232_v32 = vrot.slane %v6946_v36, %v6838_v59 }
 0x2d8   : > { %s7057_s30 = sld [smem:[#allocation5 + $0x11a]]  ;;  %v2020_v31 = vadd.f32 %v2018_v46, %v2014_v1  ;;  %v7095_v1 = vrot.slane %v6946_v36, %v6822_v13  ;;  %v7108_v20 = vadd.f32 %v2156_v22, %v2152_v18  ;;  %v7144_v22 = vrot.slane %v6946_v36, %v6825_v8 }
 0x2d9   : > { %s7065_s27 = sld [smem:[#allocation5 + $0x65]]  ;;  %10604 = vst [vmem:[#allocation221_spill] sm:$0xff] %v7232_v32 }
 0x2da   : > { %10517 = sst [smem:[#allocation48_spill]] %s7019_s26  ;;  %10545 = vst [vmem:[#allocation212_spill] sm:$0xff] %v7095_v1 }
 0x2db   : > { %s10534_s26 = sld [smem:[#allocation76_spill]]  ;;  %v10541_v30 = vstv %s10530_s22 }
 0x2dc   : > { %s10537_s25 = sld [smem:[#allocation77_spill]]  ;;  %v2024_v54 = vmul.f32 %v10541_v30, %v6805_v43 }
 0x2dd   : > { %s7078_s21 = sld [smem:[#allocation5 + $0x85]] }
 0x2de   : > { %10531 = sst [smem:[#allocation57_spill]] %s7057_s30  ;;  %v7129_v18 = vadd.f32 %v2024_v54, %v2020_v31  ;;  %v10567_v54 = vstv %s10365_s23 }
 0x2df   : > { %s7088_s2 = sld [smem:[#allocation5 + $0xab]]  ;;  %v2618_v31 = vmul.f32 %v10567_v54, %v6805_v43  ;;  %v2810_v54 = vmul.f32 %v10574_v41, %v6749_v62  ;;  %v10580_v41 = vstv %s10223_s12 }
 0x2e0   : > { %s10549_s22 = sld [smem:[#allocation82_spill]]  ;;  %10560 = vst [vmem:[#allocation214_spill] sm:$0xff] %v7129_v18 }
 0x2e1   : > { %v10546_v28 = vstv %s10534_s26  ;;  %s7103_s6 = sld [smem:[#allocation5 + $0xac]] }
 0x2e2   : > { %v2080_v23 = vmul.f32 %v10546_v28, %v6763_v60  ;;  %v10548_v46 = vstv %s10537_s25  ;;  %s10552_s17 = sld [smem:[#allocation78_spill]]  ;;  %v10554_v28 = vstv %s10357_s15 }
 0x2e3   : > { %10539 = sst [smem:[#allocation58_spill]] %s7078_s21  ;;  %v2084_v30 = vmul.f32 %v10548_v46, %v6749_v62  ;;  %v2612_v16 = vmul.f32 %v10554_v28, %v6749_v62 }
 0x2e4   : > { %s7116_s25 = sld [smem:[#allocation5 + $0xad]] }
 0x2e5   : > { %10542 = sst [smem:[#allocation59_spill]] %s7088_s2  ;;  %v2086_v21 = vadd.f32 %v2084_v30, %v2080_v23  ;;  %v2614_v30 = vadd.f32 %v2612_v16, %v2608_v12  ;;  %v7170_v16 = vrot.slane %v7086_v24, %v6825_v8 }
 0x2e6   : > { %s10551_s2 = sld [smem:[#allocation83_spill]]  ;;  %v10561_v17 = vstv %s10549_s22 }
 0x2e7   : > { %10550 = sst [smem:[#allocation60_spill]] %s7103_s6  ;;  %v2212_v28 = vmul.f32 %v10561_v17, %v6763_v60  ;;  %v9892_v17 = vmov 24   ;;  %10578 = vst [vmem:[#allocation215_spill] sm:$0xff] %v7170_v16 }
 0x2e8   : > { %s7126_s10 = sld [smem:[#allocation5 + $0xae]]  ;;  %v10565_v46 = vstv %s10552_s17  ;;  %5219 = vset.pattern.permute.xlu1 %v9892_v17 }
 0x2e9   : > { %s7137_s4 = sld [smem:[#allocation5 + $0x68]]  ;;  %v2090_v40 = vmul.f32 %v10565_v46, %v6805_v43  ;;  %v10572_v46 = vstv %s10367_s28  ;;  %2894 = vperm.xlu1 %5219, %v6333_v27  }
 0x2ea   : > { %10555 = sst [smem:[#allocation61_spill]] %s7116_s25  ;;  %v2806_v50 = vmul.f32 %v10572_v46, %v6763_v60  ;;  %v2222_v46 = vmul.f32 %v10580_v41, %v6805_v43 }
 0x2eb   : > { %s7149_s22 = sld [smem:[#allocation5 + $0x88]]  ;;  %v7187_v17 = vadd.f32 %v2090_v40, %v2086_v21  ;;  %v10594_v40 = vmov 19  }
 0x2ec   : > { %v10562_v33 = vstv %s10551_s2  ;;  %s10570_s2 = sld [smem:[#allocation88_spill]]  ;;  %v2812_v41 = vadd.f32 %v2810_v54, %v2806_v50  ;;  %v10596_v50 = vstv %s10375_s13 }
 0x2ed   : > { %v2216_v19 = vmul.f32 %v10562_v33, %v6749_v62  ;;  %v10569_v33 = vmov 15   ;;  %s10571_s5 = sld [smem:[#allocation89_spill]]  ;;  %10585 = vst [vmem:[#allocation216_spill] sm:$0xff] %v7187_v17  ;;  %5220 = vset.pattern.permute.xlu1 %v5540_v42  ;;  %v10605_v17 = vstv %s10251_s3 }
 0x2ee   : > { %10559 = sst [smem:[#allocation62_spill]] %s7126_s10  ;;  %5241 = vset.pattern.permute.xlu0 %v10569_v33  ;;  %2960 = vperm.xlu1 %5220, %v6333_v27  }
 0x2ef   : > { %10563 = sst [smem:[#allocation63_spill]] %s7137_s4  ;;  %2296 = vperm.xlu0 %5241, %v6920_v63   ;;  %v2218_v12 = vadd.f32 %v2216_v19, %v2212_v28  ;;  %v7191_v28 = vrot.slane %v6946_v36, %v6828_v34  ;;  %v10613_v36 = vstv %s10382_s8 }
 0x2f0   : > { %s7160_s19 = sld [smem:[#allocation5 + $0xb7]]  ;;  %v3206_v32 = vmul.f32 %v10613_v36, %v6749_v62 }
 0x2f1   : > { %10568 = sst [smem:[#allocation64_spill]] %s7149_s22  ;;  %10586 = vst [vmem:[#allocation217_spill] sm:$0xff] %v7191_v28  ;;  %v7225_v28 = vld [vmem:[#allocation2 + $0x18] sm:$0xff] }
 0x2f2   : > { %s7172_s28 = sld [smem:[#allocation5 + $0xb8]]  ;;  %v10581_v23 = vstv %s10570_s2 }
 0x2f3   : > { %v2278_v14 = vmul.f32 %v10581_v23, %v6763_v60  ;;  %v10582_v10 = vstv %s10571_s5  ;;  %s7183_s18 = sld [smem:[#allocation5 + $0xb9]]  ;;  %v7196_v23 = vadd.f32 %v2618_v31, %v2614_v30  ;;  %5245 = vset.pattern.permute.xlu0 %v10594_v40  ;;  %v3004_v31 = vmul.f32 %v10596_v50, %v6763_v60 }
 0x2f4   : > { %v2282_v33 = vmul.f32 %v10582_v10, %v6749_v62  ;;  %s7193_s12 = sld [smem:[#allocation5 + $0xba]]  ;;  %v10590_v10 = vstv %s10384_s14  ;;  %v10597_v30 = vstv %s10376_s9  ;;  %2560 = vperm.xlu0 %5245, %v6920_v63   ;;  %v7220_v40 = vadd.f32 %v2222_v46, %v2218_v12 }
 0x2f5   : > { %10589 = vst [vmem:[#allocation218_spill] sm:$0xff] %v7196_v23  ;;  %s10591_s5 = sld [smem:[#allocation90_spill]]  ;;  %v2816_v9 = vmul.f32 %v10590_v10, %v6805_v43  ;;  %v3008_v54 = vmul.f32 %v10597_v30, %v6749_v62  ;;  %v2410_v10 = vmul.f32 %v10605_v17, %v6763_v60  ;;  %v10606_v12 = vstv %s10255_s7 }
 0x2f6   : > { %10576 = sst [smem:[#allocation65_spill]] %s7160_s19  ;;  %10601 = vst [vmem:[#allocation220_spill] sm:$0xff] %v7220_v40  ;;  %v2284_v21 = vadd.f32 %v2282_v33, %v2278_v14  ;;  %v2414_v14 = vmul.f32 %v10606_v12, %v6749_v62  ;;  %v10616_v12 = vstv %s10389_s0  ;;  %v7259_v33 = vrot.slane %v7225_v28, %v6025_v3 }
 0x2f7   : > { %s7201_s17 = sld [smem:[#allocation5 + $0x6b]]  ;;  %v7243_v46 = vadd.f32 %v2816_v9, %v2812_v41  ;;  %v3010_v40 = vadd.f32 %v3008_v54, %v3004_v31  ;;  %v3014_v23 = vmul.f32 %v10616_v12, %v6805_v43  ;;  %v9897_v9 = vmov 27  }
 0x2f8   : > { %10579 = sst [smem:[#allocation67_spill]] %s7172_s28  ;;  %10618 = vst [vmem:[#allocation223_spill] sm:$0xff] %v7259_v33  ;;  %5222 = vset.pattern.permute.xlu1 %v9897_v9  ;;  %v10621_v41 = vmov 22   ;;  %v7342_v33 = vrot.slane %v7086_v24, %v6822_v13 }
 0x2f9   : > { %10584 = sst [smem:[#allocation68_spill]] %s7183_s18  ;;  %10611 = vst [vmem:[#allocation222_spill] sm:$0xff] %v7243_v46  ;;  %5248 = vset.pattern.permute.xlu0 %v10621_v41  ;;  %3092 = vperm.xlu1 %5222, %v6333_v27   ;;  %v2416_v41 = vadd.f32 %v2414_v14, %v2410_v10  ;;  %v7301_v46 = vadd.f32 %v3014_v23, %v3010_v40  ;;  %v5542_v23 = vmov 28  }
 0x2fa   : > { %10587 = sst [smem:[#allocation66_spill]] %s7193_s12  ;;  %2758 = vperm.xlu0 %5248, %v6920_v63   ;;  %10664 = vst [vmem:[#allocation230_spill] sm:$0xff] %v7342_v33 }
 0x2fb   : > { %s7215_s15 = sld [smem:[#allocation5 + $0x8b]]  ;;  %v10602_v19 = vstv %s10591_s5 }
 0x2fc   : > { %v2288_v50 = vmul.f32 %v10602_v19, %v6805_v43  ;;  %s7227_s13 = sld [smem:[#allocation5 + $0xc3]]  ;;  %v10612_v19 = vstv %s10380_s11 }
 0x2fd   : > { %10592 = sst [smem:[#allocation70_spill]] %s7201_s17  ;;  %v3202_v30 = vmul.f32 %v10612_v19, %v6763_v60  ;;  %5223 = vset.pattern.permute.xlu1 %v5542_v23 }
 0x2fe   : > { %s7240_s2 = sld [smem:[#allocation5 + $0xc4]]  ;;  %v7266_v31 = vadd.f32 %v2288_v50, %v2284_v21  ;;  %5251 = vset.pattern.permute.xlu0 %v5540_v42 }
 0x2ff   : > { %s10609_s5 = sld [smem:[#allocation102_spill]]  ;;  %2956 = vperm.xlu0 %5251, %v6920_v63  }
 0x300   : > { %s10610_s22 = sld [smem:[#allocation103_spill]]  ;;  %10624 = vst [vmem:[#allocation224_spill] sm:$0xff] %v7266_v31 }
 0x301   : > { %10599 = sst [smem:[#allocation71_spill]] %s7215_s15 }
 0x302   : > { %10603 = sst [smem:[#allocation72_spill]] %s7227_s13 }
 0x303   : > { %s7251_s23 = sld [smem:[#allocation5 + $0xc5]]  ;;  %5254 = vset.pattern.permute.xlu0 %v5542_v23 }
 0x304   : > { %10608 = sst [smem:[#allocation76_spill]] %s7240_s2  ;;  %3154 = vperm.xlu0 %5254, %v6920_v63  }
 0x305   : > { %s10617_s7 = sld [smem:[#allocation96_spill]]  ;;  %v10625_v54 = vstv %s10609_s5 }
 0x306   : > { %s7261_s14 = sld [smem:[#allocation5 + $0xc6]]  ;;  %v2476_v36 = vmul.f32 %v10625_v54, %v6763_v60  ;;  %v10627_v12 = vstv %s10610_s22  ;;  %v7284_v54 = vrot.slane %v7086_v24, %v6022_v2 }
 0x307   : > { %s10620_s11 = sld [smem:[#allocation99_spill]]  ;;  %v2480_v17 = vmul.f32 %v10627_v12, %v6749_v62  ;;  %v3208_v12 = vadd.f32 %v3206_v32, %v3202_v30  ;;  %v7305_v32 = vrot.slane %v7225_v28, %v6835_v57 }
 0x308   : > { %s10622_s8 = sld [smem:[#allocation105_spill]]  ;;  %10634 = vst [vmem:[#allocation225_spill] sm:$0xff] %v7284_v54 }
 0x309   : > { %10614 = sst [smem:[#allocation77_spill]] %s7251_s23  ;;  %10642 = vst [vmem:[#allocation226_spill] sm:$0xff] %v7305_v32  ;;  %v2482_v30 = vadd.f32 %v2480_v17, %v2476_v36 }
 0x30a   : > { %s10623_s26 = sld [smem:[#allocation106_spill]] }
 0x30b   : > { %s10630_s23 = sld [smem:[#allocation104_spill]]  ;;  %v10631_v21 = vstv %s10617_s7 }
 0x30c   : > { %10619 = sst [smem:[#allocation82_spill]] %s7261_s14  ;;  %v2420_v50 = vmul.f32 %v10631_v21, %v6805_v43 }
 0x30d   : > { %s7274_s14 = sld [smem:[#allocation5 + $0x6f]]  ;;  %v10636_v19 = vstv %s10620_s11 }
 0x30e   : > { %s10632_s9 = sld [smem:[#allocation108_spill]]  ;;  %v3212_v27 = vmul.f32 %v10636_v19, %v6805_v43  ;;  %v10637_v31 = vstv %s10622_s8  ;;  %v7322_v36 = vadd.f32 %v2420_v50, %v2416_v41 }
 0x30f   : > { %s10633_s5 = sld [smem:[#allocation109_spill]]  ;;  %v2542_v9 = vmul.f32 %v10637_v31, %v6763_v60 }
 0x310   : > { %s7286_s22 = sld [smem:[#allocation5 + $0x8f]]  ;;  %v10638_v10 = vstv %s10623_s26  ;;  %10653 = vst [vmem:[#allocation227_spill] sm:$0xff] %v7322_v36 }
 0x311   : > { %v2546_v14 = vmul.f32 %v10638_v10, %v6749_v62  ;;  %s7307_s11 = sld [smem:[#allocation5 + $0xd4]]  ;;  %v10644_v19 = vstv %s10630_s23 }
 0x312   : > { %v2486_v31 = vmul.f32 %v10644_v19, %v6805_v43  ;;  %s10648_s26 = sld [smem:[#allocation107_spill]]  ;;  %v7326_v19 = vrot.slane %v7086_v24, %v6025_v3 }
 0x313   : > { %10629 = sst [smem:[#allocation83_spill]] %s7274_s14  ;;  %v2548_v17 = vadd.f32 %v2546_v14, %v2542_v9 }
 0x314   : > { %s7297_s14 = sld [smem:[#allocation5 + $0xd3]]  ;;  %v10646_v10 = vstv %s10632_s9  ;;  %10655 = vst [vmem:[#allocation228_spill] sm:$0xff] %v7326_v19 }
 0x315   : > { %v2674_v54 = vmul.f32 %v10646_v10, %v6763_v60  ;;  %v10647_v18 = vstv %s10633_s5  ;;  %s7318_s1 = sld [smem:[#allocation5 + $0xd5]]  ;;  %v7332_v10 = vadd.f32 %v3212_v27, %v3208_v12  ;;  %v7353_v27 = vadd.f32 %v2486_v31, %v2482_v30 }
 0x316   : > { %10635 = sst [smem:[#allocation78_spill]] %s7286_s22  ;;  %v2678_v21 = vmul.f32 %v10647_v18, %v6749_v62  ;;  %v5291_v18 = vld [vmem:[#allocation3 + $0x8] sm:$0xff] }
 0x317   : > { %10643 = sst [smem:[#allocation89_spill]] %s7307_s11  ;;  %3158 = vperm.xlu1 %5223, %v5291_v18   ;;  %10659 = vst [vmem:[#allocation229_spill] sm:$0xff] %v7332_v10 }
 0x318   : > { %s10652_s11 = sld [smem:[#allocation112_spill]]  ;;  %v10661_v41 = vstv %s10648_s26  ;;  %v2680_v14 = vadd.f32 %v2678_v21, %v2674_v54  ;;  %v9915_v54 = vmov 30  }
 0x319   : > { %s7328_s9 = sld [smem:[#allocation5 + $0xd6]]  ;;  %v2552_v50 = vmul.f32 %v10661_v41, %v6805_v43 }
 0x31a   : > { %10641 = sst [smem:[#allocation88_spill]] %s7297_s14 }
 0x31b   : > { %10649 = sst [smem:[#allocation90_spill]] %s7318_s1  ;;  %5225 = vset.pattern.permute.xlu1 %v9915_v54  ;;  %v7375_v31 = vadd.f32 %v2552_v50, %v2548_v17 }
 0x31c   : > { %s10651_s14 = sld [smem:[#allocation111_spill]]  ;;  %3290 = vperm.xlu1 %5225, %v5291_v18  }
 0x31d   : > { %s10657_s5 = sld [smem:[#allocation110_spill]] }
 0x31e   : > { %s10660_s3 = sld [smem:[#allocation114_spill]]  ;;  %v10666_v42 = vstv %s10652_s11 }
 0x31f   : > { %10656 = sst [smem:[#allocation102_spill]] %s7328_s9  ;;  %v2744_v12 = vmul.f32 %v10666_v42, %v6749_v62 }
 0x320   : > { %s10662_s7 = sld [smem:[#allocation115_spill]] }
 0x321   : > { %s7337_s22 = sld [smem:[#allocation5 + $0x72]] }
 0x322   : > { %v10665_v3 = vstv %s10651_s14  ;;  %s7350_s9 = sld [smem:[#allocation5 + $0x92]] }
 0x323   : > { %v2740_v19 = vmul.f32 %v10665_v3, %v6763_v60  ;;  %s10669_s2 = sld [smem:[#allocation113_spill]]  ;;  %v10670_v41 = vstv %s10657_s5  ;;  %v7363_v3 = vrot.slane %v7086_v24, %v6835_v57 }
 0x324   : > { %v2684_v40 = vmul.f32 %v10670_v41, %v6805_v43  ;;  %s7358_s26 = sld [smem:[#allocation5 + $0xdf]]  ;;  %v10674_v42 = vstv %s10660_s3 }
 0x325   : > { %10673 = vst [vmem:[#allocation231_spill] sm:$0xff] %v7363_v3  ;;  %v2872_v36 = vmul.f32 %v10674_v42, %v6763_v60  ;;  %s10676_s14 = sld [smem:[#allocation117_spill]]  ;;  %v2746_v54 = vadd.f32 %v2744_v12, %v2740_v19 }
 0x326   : > { %v10675_v10 = vstv %s10662_s7  ;;  %s10677_s11 = sld [smem:[#allocation118_spill]]  ;;  %v7397_v33 = vadd.f32 %v2684_v40, %v2680_v14 }
 0x327   : > { %10663 = sst [smem:[#allocation103_spill]] %s7337_s22  ;;  %v2876_v30 = vmul.f32 %v10675_v10, %v6749_v62  ;;  %v7382_v10 = vrot.slane %v7086_v24, %v6828_v34 }
 0x328   : > { %10668 = sst [smem:[#allocation96_spill]] %s7350_s9  ;;  %10694 = vst [vmem:[#allocation233_spill] sm:$0xff] %v7397_v33  ;;  %v10710_v33 = vmov 0  }
 0x329   : > { %s7371_s23 = sld [smem:[#allocation5 + $0xe0]]  ;;  %v10682_v41 = vstv %s10669_s2  ;;  %10684 = vst [vmem:[#allocation232_spill] sm:$0xff] %v7382_v10  ;;  %v2878_v9 = vadd.f32 %v2876_v30, %v2872_v36  ;;  %5226 = vset.pattern.permute.xlu1 %v10710_v33 }
 0x32a   : > { %10671 = sst [smem:[#allocation99_spill]] %s7358_s26  ;;  %v2750_v42 = vmul.f32 %v10682_v41, %v6805_v43  ;;  %1313 = vperm.xlu1 %5226, %v6920_v63  }
 0x32b   : > { %s10680_s1 = sld [smem:[#allocation121_spill]]  ;;  %v10690_v17 = vstv %s10676_s14 }
 0x32c   : > { %s10681_s26 = sld [smem:[#allocation84_spill]]  ;;  %v2938_v50 = vmul.f32 %v10690_v17, %v6763_v60  ;;  %v10692_v41 = vstv %s10677_s11  ;;  %v7434_v10 = vadd.f32 %v2750_v42, %v2746_v54 }
 0x32d   : > { %s10683_s3 = sld [smem:[#allocation116_spill]]  ;;  %v2942_v24 = vmul.f32 %v10692_v41, %v6749_v62 }
 0x32e   : > { %s7384_s7 = sld [smem:[#allocation5 + $0xe1]] }
 0x32f   : > { %10678 = sst [smem:[#allocation105_spill]] %s7371_s23 }
 0x330   : > { %s10686_s23 = sld [smem:[#allocation123_spill]] }
 0x331   : > { %s10687_s9 = sld [smem:[#allocation124_spill]]  ;;  %v10696_v18 = vstv %s10680_s1 }
 0x332   : > { %s7388_s8 = sld [smem:[#allocation5 + $0xe2]]  ;;  %v3070_v23 = vmul.f32 %v10696_v18, %v6763_v60  ;;  %v10698_v19 = vstv %s10681_s26  ;;  %v7421_v18 = vrot.slane %v7225_v28, %v5852_v35  ;;  %v2944_v35 = vadd.f32 %v2942_v24, %v2938_v50 }
 0x333   : > { %s10691_s2 = sld [smem:[#allocation127_spill]]  ;;  %v3074_v12 = vmul.f32 %v10698_v19, %v6749_v62  ;;  %v10699_v57 = vstv %s10683_s3 }
 0x334   : > { %10685 = sst [smem:[#allocation106_spill]] %s7384_s7  ;;  %v2882_v17 = vmul.f32 %v10699_v57, %v6805_v43  ;;  %10705 = vst [vmem:[#allocation234_spill] sm:$0xff] %v7421_v18 }
 0x335   : > { %s10693_s13 = sld [smem:[#allocation128_spill]]  ;;  %v3076_v54 = vadd.f32 %v3074_v12, %v3070_v23 }
 0x336   : > { %s7399_s7 = sld [smem:[#allocation5 + $0x76]]  ;;  %v10702_v41 = vstv %s10686_s23 }
 0x337   : > { %s10700_s14 = sld [smem:[#allocation120_spill]]  ;;  %v3136_v40 = vmul.f32 %v10702_v41, %v6763_v60  ;;  %v10703_v14 = vstv %s10687_s9  ;;  %v9926_v41 = vmov 31  }
 0x338   : > { %10689 = sst [smem:[#allocation104_spill]] %s7388_s8  ;;  %v3140_v21 = vmul.f32 %v10703_v14, %v6749_v62  ;;  %5257 = vset.pattern.permute.xlu0 %v9926_v41  ;;  %v10778_v14 = vmov 4  }
 0x339   : > { %s7410_s11 = sld [smem:[#allocation5 + $0x96]]  ;;  %v10707_v36 = vstv %s10691_s2  ;;  %3352 = vperm.xlu0 %5257, %v6920_v63  }
 0x33a   : > { %s7423_s1 = sld [smem:[#allocation5 + $0xef]]  ;;  %v3268_v30 = vmul.f32 %v10707_v36, %v6763_v60  ;;  %v7446_v36 = vrot.slane %v7225_v28, %v6022_v2  ;;  %v7464_v2 = vrot.slane %v7225_v28, %v6822_v13 }
 0x33b   : > { %v10708_v57 = vstv %s10693_s13  ;;  %s10709_s26 = sld [smem:[#allocation122_spill]] }
 0x33c   : > { %10695 = sst [smem:[#allocation108_spill]] %s7399_s7  ;;  %v3272_v19 = vmul.f32 %v10708_v57, %v6749_v62  ;;  %v3142_v57 = vadd.f32 %v3140_v21, %v3136_v40  ;;  %10725 = vst [vmem:[#allocation235_spill] sm:$0xff] %v7464_v2  ;;  %v7479_v40 = vrot.slane %v7225_v28, %v6825_v8 }
 0x33d   : > { %s10712_s9 = sld [smem:[#allocation125_spill]]  ;;  %v10714_v18 = vstv %s10700_s14 }
 0x33e   : > { %v2948_v3 = vmul.f32 %v10714_v18, %v6805_v43  ;;  %s7439_s2 = sld [smem:[#allocation5 + $0xf0]]  ;;  %v7454_v18 = vadd.f32 %v2882_v17, %v2878_v9  ;;  %v3274_v23 = vadd.f32 %v3272_v19, %v3268_v30  ;;  %v1319_v17 = vpop.permute.xlu0 %1318  ;;  %v10837_v30 = vmov 9  }
 0x33f   : > { %10701 = sst [smem:[#allocation109_spill]] %s7410_s11 }
 0x340   : > { %10706 = sst [smem:[#allocation107_spill]] %s7423_s1  ;;  %v7473_v21 = vadd.f32 %v2948_v3, %v2944_v35  ;;  %v7490_v35 = vrot.slane %v7225_v28, %v6828_v34 }
 0x341   : > { %s10716_s13 = sld [smem:[#allocation129_spill]]  ;;  %v10720_v42 = vstv %s10709_s26 }
 0x342   : > { %s7448_s5 = sld [smem:[#allocation5 + $0xf1]]  ;;  %v3080_v50 = vmul.f32 %v10720_v42, %v6805_v43  ;;  %10740 = vst [vmem:[#allocation236_spill] sm:$0xff] %v7490_v35 }
 0x343   : > { %s7456_s1 = sld [smem:[#allocation5 + $0xf2]]  ;;  %v10724_v41 = vstv %s10712_s9 }
 0x344   : > { %10715 = sst [smem:[#allocation111_spill]] %s7439_s2  ;;  %v3146_v33 = vmul.f32 %v10724_v41, %v6805_v43  ;;  %v10734_v41 = vmov 1   ;;  %v7484_v19 = vadd.f32 %v3080_v50, %v3076_v54  ;;  %v7501_v50 = vrot.slane %v7225_v28, %v6838_v59 }
 0x345   : > { %5227 = vset.pattern.permute.xlu1 %v10734_v41  ;;  %s7486_s22 = sld [smem:[#allocation5 + $0xfb]]  ;;  %v10825_v28 = vmov 7  }
 0x346   : > { %1372 = vperm.xlu1 %5227, %v6920_v63   ;;  %s7495_s8 = sld [smem:[#allocation5 + $0xfc]]  ;;  %v7497_v54 = vadd.f32 %v3146_v33, %v3142_v57  ;;  %10747 = vst [vmem:[#allocation238_spill] sm:$0xff] %v7501_v50  ;;  %v1377_v57 = vpop.permute.xlu1 %1376 }
 0x347   : > { %v10729_v9 = vstv %s10716_s13  ;;  %s7506_s12 = sld [smem:[#allocation5 + $0xfd]] }
 0x348   : > { %10719 = sst [smem:[#allocation112_spill]] %s7448_s5  ;;  %v3278_v12 = vmul.f32 %v10729_v9, %v6805_v43  ;;  %10746 = vst [vmem:[#allocation237_spill] sm:$0xff] %v7497_v54 }
 0x349   : > { %10723 = sst [smem:[#allocation110_spill]] %s7456_s1 }
 0x34a   : > { %s7466_s5 = sld [smem:[#allocation5 + $0x79]]  ;;  %v7508_v9 = vadd.f32 %v3278_v12, %v3274_v23  ;;  %v10759_v23 = vmov 3  }
 0x34b   : > { %s7475_s1 = sld [smem:[#allocation5 + $0x99]]  ;;  %5229 = vset.pattern.permute.xlu1 %v10759_v23 }
 0x34c   : > { %10738 = sst [smem:[#allocation113_spill]] %s7486_s22  ;;  %10751 = vst [vmem:[#allocation239_spill] sm:$0xff] %v7508_v9  ;;  %1504 = vperm.xlu1 %5229, %v6920_v63  }
 0x34d   : > { %10744 = sst [smem:[#allocation117_spill]] %s7495_s8 }
 0x34e   : > { %10750 = sst [smem:[#allocation118_spill]] %s7506_s12 }
 0x34f   : > { %s7514_s0 = sld [smem:[#allocation5 + $0xfe]] }
 0x350   : > { %10727 = sst [smem:[#allocation114_spill]] %s7466_s5  ;;  %5230 = vset.pattern.permute.xlu1 %v10778_v14 }
 0x351   : > { %10732 = sst [smem:[#allocation115_spill]] %s7475_s1  ;;  %1570 = vperm.xlu1 %5230, %v6920_v63  }
 0x352   : > { %s7520_s8 = sld [smem:[#allocation5 + $0x7c]] }
 0x353   : > { %s7527_s1 = sld [smem:[#allocation5 + $0x9c]] }
 0x354   : > { %s10768_s7 = sld [smem:[#allocation130_spill]] }
 0x355   : > { %10753 = sst [smem:[#allocation121_spill]] %s7514_s0 }
 0x356   : > { %s7534_s22 = sld [smem:[#allocation5 + $0x107]] }
 0x357   : > { %s7540_s16 = sld [smem:[#allocation5 + $0x108]] }
 0x358   : > { %10758 = sst [smem:[#allocation84_spill]] %s7520_s8 }
 0x359   : > { %10765 = sst [smem:[#allocation116_spill]] %s7527_s1 }
 0x35a   : > { %s10769_s8 = sld [smem:[#allocation131_spill]]  ;;  %v10776_v24 = vstv %s10768_s7 }
 0x35b   : > { %s7546_s26 = sld [smem:[#allocation5 + $0x109]]  ;;  %v3334_v3 = vmul.f32 %v10776_v24, %v6763_v60  ;;  %v10803_v24 = vmov 6  }
 0x35c   : > { %10770 = sst [smem:[#allocation123_spill]] %s7534_s22  ;;  %5232 = vset.pattern.permute.xlu1 %v10803_v24 }
 0x35d   : > { %10772 = sst [smem:[#allocation124_spill]] %s7540_s16  ;;  %1702 = vperm.xlu1 %5232, %v6920_v63  }
 0x35e   : > { %s7550_s24 = sld [smem:[#allocation5 + $0x10a]] }
 0x35f   : > { %s7563_s2 = sld [smem:[#allocation5 + $0x7f]] }
 0x360   : > { %v10777_v33 = vstv %s10769_s8  ;;  %s10782_s14 = sld [smem:[#allocation132_spill]] }
 0x361   : > { %10773 = sst [smem:[#allocation127_spill]] %s7546_s26  ;;  %v3338_v12 = vmul.f32 %v10777_v33, %v6749_v62  ;;  %5233 = vset.pattern.permute.xlu1 %v10825_v28 }
 0x362   : > { %s7570_s11 = sld [smem:[#allocation5 + $0x9f]]  ;;  %1768 = vperm.xlu1 %5233, %v6920_v63  }
 0x363   : > { %s7576_s23 = sld [smem:[#allocation5 + $0x113]]  ;;  %v3340_v33 = vadd.f32 %v3338_v12, %v3334_v3 }
 0x364   : > { %10775 = sst [smem:[#allocation128_spill]] %s7550_s24 }
 0x365   : > { %10781 = sst [smem:[#allocation120_spill]] %s7563_s2 }
 0x366   : > { %s7580_s25 = sld [smem:[#allocation5 + $0x114]]  ;;  %v10796_v41 = vstv %s10782_s14  ;;  %5235 = vset.pattern.permute.xlu1 %v10837_v30 }
 0x367   : > { %v3344_v14 = vmul.f32 %v10796_v41, %v6805_v43  ;;  %s7589_s6 = sld [smem:[#allocation5 + $0x115]]  ;;  %1900 = vperm.xlu1 %5235, %v6920_v63  }
 0x368   : > { %10787 = sst [smem:[#allocation122_spill]] %s7570_s11 }
 0x369   : > { %10792 = sst [smem:[#allocation125_spill]] %s7576_s23  ;;  %v7610_v12 = vadd.f32 %v3344_v14, %v3340_v33  ;;  %v1380_v33 = vsub.f32 %v6997_v6, %v1377_v57  ;;  %v1322_v14 = vsub.f32 %v7000_v39, %v1319_v17 }
 0x36a   : > { %s10804_s15 = sld [smem:[#allocation106_spill]] }
 0x36b   : > { %s10805_s0 = sld [smem:[#allocation104_spill]]  ;;  %10815 = vst [vmem:[#allocation240_spill] sm:$0xff] %v7610_v12  ;;  %v1382_v17 = vadd.f32 %v1380_v33, %v6942_v61  ;;  %v1324_v28 = vadd.f32 %v1322_v14, %v6944_v11  ;;  %v1443_v11 = vpop.permute.xlu1 %1442  ;;  %v1509_v33 = vpop.permute.xlu0 %1508 }
 0x36c   : > { %10794 = sst [smem:[#allocation129_spill]] %s7580_s25  ;;  %v1446_v59 = vsub.f32 %v7003_v47, %v1443_v11  ;;  %v1512_v3 = vsub.f32 %v7006_v44, %v1509_v33 }
 0x36d   : > { %10802 = sst [smem:[#allocation130_spill]] %s7589_s6 }
 0x36e   : > { %s10806_s14 = sld [smem:[#allocation108_spill]]  ;;  %v1448_v30 = vadd.f32 %v1446_v59, %v6950_v48 }
 0x36f   : > { %s10807_s20 = sld [smem:[#allocation109_spill]]  ;;  %v1575_v48 = vpop.permute.xlu1 %1574  ;;  %v1707_v59 = vpop.permute.xlu0 %1706 }
 0x370   : > { %s7596_s21 = sld [smem:[#allocation5 + $0x116]] }
 0x371   : > { %s7603_s7 = sld [smem:[#allocation5 + $0x82]] }
 0x372   : > { %s7608_s29 = sld [smem:[#allocation5 + $0xa2]] }
 0x373   : > { %s7616_s10 = sld [smem:[#allocation5 + $0x11f]]  ;;  %v1905_v39 = vpop.permute.xlu0 %1904 }
 0x374   : > { %s7622_s18 = sld [smem:[#allocation5 + $0x120]] }
 0x375   : > { %s7629_s12 = sld [smem:[#allocation5 + $0x121]] }
 0x376   : > { %10808 = sst [smem:[#allocation131_spill]] %s7596_s21 }
 0x377   : > { %10812 = sst [smem:[#allocation132_spill]] %s7603_s7 }
 0x378   : > { %10814 = sst [smem:[#allocation106_spill]] %s7608_s29 }
 0x379   : > { %10819 = sst [smem:[#allocation104_spill]] %s7616_s10 }
 0x37a   : > { %10824 = sst [smem:[#allocation108_spill]] %s7622_s18 }
 0x37b   : > { %10826 = sst [smem:[#allocation109_spill]] %s7629_s12 }
 0x37c   : > { %s10827_s30 = sld [smem:[#allocation94_spill]] }
 0x37d   : > { %s10828_s5 = sld [smem:[#allocation138_spill]] }
 0x37e   : > { %s7636_s8 = sld [smem:[#allocation5 + $0x122]] }
 0x37f   : > { %s7642_s13 = sld [smem:[#allocation5 + $0x67]] }
 0x380   : > { %s10831_s3 = sld [smem:[#allocation95_spill]] }
 0x381   : > { %s10832_s28 = sld [smem:[#allocation139_spill]] }
 0x382   : > { %s7648_s17 = sld [smem:[#allocation5 + $0x87]]  ;;  %v10834_v57 = vstv %s10827_s30 }
 0x383   : > { %v1386_v24 = vmul.f32 %v10834_v57, %v1382_v17  ;;  %v10835_v34 = vstv %s10828_s5  ;;  %s7656_s22 = sld [smem:[#allocation5 + $0xb3]]  ;;  %v1514_v17 = vadd.f32 %v1512_v3, %v6952_v7  ;;  %v10853_v7 = vstv %s7065_s27 }
 0x384   : > { %10829 = sst [smem:[#allocation241_spill]] %s7636_s8  ;;  %v1328_v61 = vmul.f32 %v10835_v34, %v1324_v28  ;;  %v1452_v3 = vmul.f32 %v10853_v7, %v1448_v30 }
 0x385   : > { %10830 = sst [smem:[#allocation242_spill]] %s7642_s13 }
 0x386   : > { %s10838_s30 = sld [smem:[#allocation147_spill]]  ;;  %v10840_v34 = vstv %s10831_s3 }
 0x387   : > { %s7663_s5 = sld [smem:[#allocation5 + $0xb4]]  ;;  %v1390_v28 = vadd.f32 %v10840_v34, %v1386_v24  ;;  %v10841_v14 = vstv %s10832_s28 }
 0x388   : > { %10833 = sst [smem:[#allocation243_spill]] %s7648_s17  ;;  %v1332_v42 = vadd.f32 %v10841_v14, %v1328_v61 }
 0x389   : > { %10836 = sst [smem:[#allocation244_spill]] %s7656_s22  ;;  %v1392_v24 = vmax.f32 %v1390_v28, 0.0 }
 0x38a   : > { %s10842_s11 = sld [smem:[#allocation134_spill]]  ;;  %v1334_v61 = vmax.f32 %v1332_v42, 0.0 }
 0x38b   : > { %s10843_s23 = sld [smem:[#allocation135_spill]] }
 0x38c   : > { %s10844_s25 = sld [smem:[#allocation136_spill]]  ;;  %v10851_v33 = vstv %s10838_s30 }
 0x38d   : > { %10839 = sst [smem:[#allocation245_spill]] %s7663_s5  ;;  %v1518_v11 = vmul.f32 %v10851_v33, %v1514_v17  ;;  %v10859_v33 = vmov 10  }
 0x38e   : > { %s10845_s24 = sld [smem:[#allocation137_spill]]  ;;  %5236 = vset.pattern.permute.xlu1 %v10859_v33  ;;  %v7754_v33 = vld [vmem:[#allocation3] sm:$0xff] }
 0x38f   : > { %s10846_s3 = sld [smem:[#allocation140_spill]]  ;;  %1966 = vperm.xlu1 %5236, %v6920_v63  }
 0x390   : > { %s10847_s28 = sld [smem:[#allocation141_spill]]  ;;  %v10855_v23 = vstv %s10842_s11 }
 0x391   : > { %s10848_s26 = sld [smem:[#allocation143_spill]]  ;;  %v1396_v42 = vmul.f32 %v10855_v23, %v1392_v24  ;;  %v10856_v14 = vstv %s10843_s23 }
 0x392   : > { %s10849_s6 = sld [smem:[#allocation145_spill]]  ;;  %v1402_v34 = vmul.f32 %v10856_v14, %v1392_v24  ;;  %v10857_v41 = vstv %s10844_s25  ;;  %v1578_v14 = vsub.f32 %v7011_v38, %v1575_v48 }
 0x393   : > { %s7678_s2 = sld [smem:[#allocation5 + $0xb5]]  ;;  %v1408_v8 = vmul.f32 %v10857_v41, %v1392_v24  ;;  %v1710_v41 = vsub.f32 %v7022_v51, %v1707_v59 }
 0x394   : > { %s10852_s21 = sld [smem:[#allocation150_spill]]  ;;  %v10858_v13 = vstv %s10845_s24 }
 0x395   : > { %s10854_s7 = sld [smem:[#allocation58_spill]]  ;;  %v1414_v17 = vmul.f32 %v10858_v13, %v1392_v24  ;;  %v10860_v43 = vstv %s10846_s3  ;;  %v10018_v24 = vstv %s7642_s13 }
 0x396   : > { %v1338_v60 = vmul.f32 %v10860_v43, %v1334_v61  ;;  %v10861_v30 = vstv %s10847_s28  ;;  %s10866_s8 = sld [smem:[#allocation152_spill]] }
 0x397   : > { %v1342_v7 = vmul.f32 %v10861_v30, %v1334_v61  ;;  %v10862_v57 = vstv %s10848_s26  ;;  %s10867_s12 = sld [smem:[#allocation158_spill]] }
 0x398   : > { %v1346_v62 = vmul.f32 %v10862_v57, %v1334_v61  ;;  %v10863_v28 = vstv %s10849_s6  ;;  %v1398_v30 = vadd.f32 %v1396_v42, %v1338_v60  ;;  %s10868_s18 = sld [smem:[#allocation59_spill]]  ;;  %v1908_v60 = vsub.f32 %v6979_v49, %v1905_v39 }
 0x399   : > { %10850 = sst [smem:[#allocation246_spill]] %s7678_s2  ;;  %v1350_v12 = vmul.f32 %v10863_v28, %v1334_v61  ;;  %v1712_v61 = vadd.f32 %v1710_v41, %v6956_v58  ;;  %v1641_v28 = vpop.permute.xlu1 %1640 }
 0x39a   : > { %v10864_v23 = vstv %s10852_s21  ;;  %s10869_s21 = sld [smem:[#allocation155_spill]]  ;;  %v1410_v48 = vadd.f32 %v1408_v8, %v1346_v62  ;;  %v1644_v59 = vsub.f32 %v7025_v15, %v1641_v28  ;;  %v1910_v41 = vadd.f32 %v1908_v60, %v6975_v37 }
 0x39b   : > { %v1522_v44 = vadd.f32 %v10864_v23, %v1518_v11  ;;  %v10865_v6 = vstv %s10854_s7  ;;  %s7715_s24 = sld [smem:[#allocation5 + $0xb6]]  ;;  %v1416_v58 = vadd.f32 %v1414_v17, %v1350_v12  ;;  %v1580_v23 = vadd.f32 %v1578_v14, %v6954_v4 }
 0x39c   : > { %v1456_v13 = vadd.f32 %v10865_v6, %v1452_v3  ;;  %s10871_s25 = sld [smem:[#allocation60_spill]]  ;;  %v1404_v6 = vadd.f32 %v1402_v34, %v1342_v7  ;;  %v10877_v3 = vstv %s10866_s8  ;;  %v1646_v8 = vadd.f32 %v1644_v59, %v6960_v29  ;;  %v1971_v59 = vpop.permute.xlu0 %1970 }
 0x39d   : > { %v1524_v57 = vmax.f32 %v1522_v44, 0.0  ;;  %s10872_s23 = sld [smem:[#allocation61_spill]]  ;;  %v10874_v44 = vmov 11   ;;  %v10879_v7 = vstv %s10867_s12  ;;  %v1773_v37 = vpop.permute.xlu1 %1772  ;;  %v10892_v34 = vmov 13  }
 0x39e   : > { %v1458_v11 = vmax.f32 %v1456_v13, 0.0  ;;  %s10873_s11 = sld [smem:[#allocation62_spill]]  ;;  %5237 = vset.pattern.permute.xlu1 %v10874_v44  ;;  %v1716_v62 = vmul.f32 %v10879_v7, %v1712_v61  ;;  %v10880_v39 = vstv %s10868_s18 }
 0x39f   : > { %s10875_s30 = sld [smem:[#allocation161_spill]]  ;;  %v1528_v42 = vmul.f32 %v10877_v3, %v1524_v57  ;;  %2032 = vperm.xlu1 %5237, %v6920_v63  }
 0x3a0   : > { %s10876_s6 = sld [smem:[#allocation73_spill]]  ;;  %v1462_v13 = vmul.f32 %v10880_v39, %v1458_v11  ;;  %v10881_v28 = vstv %s10869_s21 }
 0x3a1   : > { %10870 = sst [smem:[#allocation58_spill]] %s7715_s24  ;;  %v1534_v44 = vmul.f32 %v10881_v28, %v1524_v57  ;;  %v10958_v49 = vstv %s7715_s24 }
 0x3a2   : > { %s10878_s26 = sld [smem:[#allocation63_spill]]  ;;  %v10882_v9 = vstv %s10871_s25  ;;  %v1464_v60 = vadd.f32 %v1462_v13, %v1398_v30  ;;  %v1584_v30 = vmul.f32 %v10018_v24, %v1580_v23 }
 0x3a3   : > { %s10883_s28 = sld [smem:[#allocation156_spill]]  ;;  %v1468_v12 = vmul.f32 %v10882_v9, %v1458_v11  ;;  %v10884_v17 = vstv %s10872_s23  ;;  %v1776_v9 = vsub.f32 %v7047_v0, %v1773_v37  ;;  %5239 = vset.pattern.permute.xlu1 %v10892_v34  ;;  %v2169_v37 = vpop.permute.xlu0 %2168  ;;  %v10960_v0 = vld [vmem:[#allocation214_spill] sm:$0xff] }
 0x3a4   : > { %v1474_v3 = vmul.f32 %v10884_v17, %v1458_v11  ;;  %v10885_v4 = vstv %s10873_s11  ;;  %s10886_s8 = sld [smem:[#allocation74_spill]]  ;;  %v1974_v17 = vsub.f32 %v7051_v52, %v1971_v59  ;;  %2164 = vperm.xlu1 %5239, %v7754_v33  }
 0x3a5   : > { %v1480_v63 = vmul.f32 %v10885_v4, %v1458_v11  ;;  %s7739_s3 = sld [smem:[#allocation5 + $0x6a]]  ;;  %v10888_v14 = vstv %s10875_s30  ;;  %v1470_v11 = vadd.f32 %v1468_v12, %v1404_v6  ;;  %v1778_v13 = vadd.f32 %v1776_v9, %v7027_v5 }
 0x3a6   : > { %v1720_v61 = vadd.f32 %v10888_v14, %v1716_v62  ;;  %v10889_v7 = vstv %s10876_s6  ;;  %s10890_s12 = sld [smem:[#allocation157_spill]]  ;;  %v1476_v4 = vadd.f32 %v1474_v3, %v1410_v48  ;;  %v1976_v48 = vadd.f32 %v1974_v17, %v7060_v53 }
 0x3a7   : > { %v1914_v29 = vmul.f32 %v10889_v7, %v1910_v41  ;;  %s10894_s6 = sld [smem:[#allocation163_spill]]  ;;  %v7768_v12 = vadd.f32 %v1528_v42, %v1464_v60  ;;  %v7770_v23 = vadd.f32 %v1534_v44, %v1470_v11  ;;  %v10913_v9 = vmov 14  }
 0x3a8   : > { %v10891_v39 = vstv %s10878_s26  ;;  %v1722_v14 = vmax.f32 %v1720_v61, 0.0  ;;  %s10896_s30 = sld [smem:[#allocation175_spill]]  ;;  %5240 = vset.pattern.permute.xlu1 %v10913_v9  ;;  %v10914_v17 = vstv %s7648_s17 }
 0x3a9   : > { %v1650_v28 = vmul.f32 %v10891_v39, %v1646_v8  ;;  %v10893_v43 = vstv %s10883_s28  ;;  %s10897_s21 = sld [smem:[#allocation64_spill]]  ;;  %v2172_v39 = vsub.f32 %v7070_v56, %v2169_v37  ;;  %v1588_v11 = vadd.f32 %v10914_v17, %v1584_v30  ;;  %2230 = vperm.xlu1 %5240, %v7754_v33  }
 0x3aa   : > { %v1540_v62 = vmul.f32 %v10893_v43, %v1524_v57  ;;  %v10895_v41 = vstv %s10886_s8  ;;  %s7759_s10 = sld [smem:[#allocation5 + $0x8a]]  ;;  %v1482_v43 = vadd.f32 %v1480_v63, %v1416_v58 }
 0x3ab   : > { %10887 = sst [smem:[#allocation59_spill]] %s7739_s3  ;;  %v1918_v7 = vadd.f32 %v10895_v41, %v1914_v29  ;;  %v1839_v29 = vpop.permute.xlu1 %1838  ;;  %v2174_v30 = vadd.f32 %v2172_v39, %v7108_v20  ;;  %v2367_v39 = vpop.permute.xlu0 %2366 }
 0x3ac   : > { %v10899_v8 = vstv %s10890_s12  ;;  %s10900_s29 = sld [smem:[#allocation164_spill]]  ;;  %v7772_v3 = vadd.f32 %v1540_v62, %v1476_v4  ;;  %v1842_v60 = vsub.f32 %v7055_v55, %v1839_v29 }
 0x3ad   : > { %v1546_v6 = vmul.f32 %v10899_v8, %v1524_v57  ;;  %s7765_s8 = sld [smem:[#allocation5 + $0xbf]]  ;;  %v10904_v61 = vstv %s10894_s6  ;;  %v1920_v53 = vmax.f32 %v1918_v7, 0.0  ;;  %v10017_v8 = vstv %s7739_s3 }
 0x3ae   : > { %s10902_s28 = sld [smem:[#allocation69_spill]]  ;;  %v7776_v57 = vmul.f32 %v10904_v61, %v1722_v14  ;;  %v10906_v58 = vstv %s10896_s30  ;;  %v1844_v17 = vadd.f32 %v1842_v60, %v7081_v45 }
 0x3af   : > { %s10903_s16 = sld [smem:[#allocation166_spill]]  ;;  %v1980_v63 = vmul.f32 %v10906_v58, %v1976_v48  ;;  %v10908_v59 = vstv %s10897_s21 }
 0x3b0   : > { %10898 = sst [smem:[#allocation60_spill]] %s7759_s10  ;;  %v1654_v5 = vadd.f32 %v10908_v59, %v1650_v28  ;;  %v7800_v28 = vadd.f32 %v1546_v6, %v1482_v43 }
 0x3b1   : > { %s10905_s12 = sld [smem:[#allocation170_spill]] }
 0x3b2   : > { %s10907_s13 = sld [smem:[#allocation79_spill]]  ;;  %v10910_v42 = vstv %s10900_s29  ;;  %v1656_v37 = vmax.f32 %v1654_v5, 0.0  ;;  %v2037_v5 = vpop.permute.xlu1 %2036 }
 0x3b3   : > { %10901 = sst [smem:[#allocation61_spill]] %s7765_s8  ;;  %v7784_v44 = vmul.f32 %v10910_v42, %v1722_v14 }
 0x3b4   : > { %s10909_s1 = sld [smem:[#allocation75_spill]]  ;;  %v10916_v4 = vstv %s10902_s28 }
 0x3b5   : > { %s10911_s19 = sld [smem:[#allocation172_spill]]  ;;  %v7793_v62 = vmul.f32 %v10916_v4, %v1722_v14  ;;  %v10917_v41 = vstv %s10903_s16 }
 0x3b6   : > { %s10912_s4 = sld [smem:[#allocation174_spill]]  ;;  %v7797_v7 = vmul.f32 %v10917_v41, %v1722_v14  ;;  %v1590_v41 = vmax.f32 %v1588_v11, 0.0 }
 0x3b7   : > { %s10915_s30 = sld [smem:[#allocation85_spill]]  ;;  %v10918_v48 = vstv %s10905_s12 }
 0x3b8   : > { %v7805_v61 = vmul.f32 %v10918_v48, %v1920_v53  ;;  %v10919_v58 = vstv %s10907_s13  ;;  %s10920_s29 = sld [smem:[#allocation65_spill]]  ;;  %v1782_v48 = vmul.f32 %v10017_v8, %v1778_v13 }
 0x3b9   : > { %v1984_v29 = vadd.f32 %v10919_v58, %v1980_v63  ;;  %s10924_s16 = sld [smem:[#allocation67_spill]]  ;;  %v10933_v58 = vmov 16  }
 0x3ba   : > { %v10921_v59 = vstv %s10909_s1  ;;  %s10925_s12 = sld [smem:[#allocation68_spill]]  ;;  %5242 = vset.pattern.permute.xlu1 %v10933_v58 }
 0x3bb   : > { %v7812_v14 = vmul.f32 %v10921_v59, %v1920_v53  ;;  %v10922_v42 = vstv %s10911_s19  ;;  %s10926_s13 = sld [smem:[#allocation66_spill]]  ;;  %v1986_v63 = vmax.f32 %v1984_v29, 0.0  ;;  %v2040_v59 = vsub.f32 %v7095_v1, %v2037_v5  ;;  %2362 = vperm.xlu1 %5242, %v7754_v33  }
 0x3bc   : > { %v7816_v9 = vmul.f32 %v10922_v42, %v1920_v53  ;;  %v10923_v6 = vstv %s10912_s4  ;;  %s10928_s28 = sld [smem:[#allocation80_spill]] }
 0x3bd   : > { %v7820_v43 = vmul.f32 %v10923_v6, %v1920_v53  ;;  %v10927_v4 = vstv %s10915_s30  ;;  %s10929_s6 = sld [smem:[#allocation86_spill]]  ;;  %v2370_v53 = vsub.f32 %v7124_v26, %v2367_v39 }
 0x3be   : > { %v2178_v20 = vmul.f32 %v10927_v4, %v2174_v30  ;;  %s10930_s1 = sld [smem:[#allocation70_spill]]  ;;  %v10934_v45 = vstv %s10920_s29 }
 0x3bf   : > { %s10931_s19 = sld [smem:[#allocation177_spill]]  ;;  %v1660_v60 = vmul.f32 %v10934_v45, %v1656_v37  ;;  %v10937_v11 = vstv %s10924_s16  ;;  %v2372_v30 = vadd.f32 %v2370_v53, %v7166_v25  ;;  %v2631_v53 = vpop.permute.xlu0 %2630 }
 0x3c0   : > { %s10932_s4 = sld [smem:[#allocation180_spill]]  ;;  %v1666_v42 = vmul.f32 %v10937_v11, %v1656_v37  ;;  %v10938_v13 = vstv %s10925_s12 }
 0x3c1   : > { %s10935_s30 = sld [smem:[#allocation81_spill]]  ;;  %v1672_v6 = vmul.f32 %v10938_v13, %v1656_v37  ;;  %v10940_v4 = vstv %s10926_s13  ;;  %v10946_v13 = vstv %s7656_s22 }
 0x3c2   : > { %s10936_s17 = sld [smem:[#allocation33_spill]]  ;;  %v1678_v39 = vmul.f32 %v10940_v4, %v1656_v37  ;;  %v10941_v8 = vstv %s10928_s28  ;;  %v1594_v1 = vmul.f32 %v10946_v13, %v1590_v41  ;;  %v10947_v37 = vstv %s7663_s5 }
 0x3c3   : > { %s10939_s3 = sld [smem:[#allocation71_spill]]  ;;  %v7843_v58 = vmul.f32 %v10941_v8, %v1986_v63  ;;  %v10942_v24 = vstv %s10929_s6  ;;  %v1600_v4 = vmul.f32 %v10947_v37, %v1590_v41  ;;  %v2634_v13 = vsub.f32 %v7170_v16, %v2631_v53  ;;  %v10965_v16 = vld [vmem:[#allocation218_spill] sm:$0xff] }
 0x3c4   : > { %v2182_v45 = vadd.f32 %v10942_v24, %v2178_v20  ;;  %v10943_v29 = vstv %s10930_s1  ;;  %s10949_s6 = sld [smem:[#allocation182_spill]]  ;;  %v10956_v37 = vmov 17  }
 0x3c5   : > { %v1848_v5 = vmul.f32 %v10943_v29, %v1844_v17  ;;  %v10944_v34 = vstv %s10931_s19  ;;  %s10951_s28 = sld [smem:[#allocation98_spill]]  ;;  %v2103_v17 = vpop.permute.xlu1 %2102  ;;  %5243 = vset.pattern.permute.xlu1 %v10956_v37  ;;  %v2636_v38 = vadd.f32 %v2634_v13, %v10965_v16  ;;  %v2829_v16 = vpop.permute.xlu0 %2828 }
 0x3c6   : > { %v7852_v26 = vmul.f32 %v10944_v34, %v1986_v63  ;;  %v10945_v11 = vstv %s10932_s4  ;;  %v2184_v24 = vmax.f32 %v2182_v45, 0.0  ;;  %s10953_s19 = sld [smem:[#allocation91_spill]]  ;;  %v1612_v45 = vmul.f32 %v10958_v49, %v1590_v41  ;;  %2428 = vperm.xlu1 %5243, %v7754_v33  }
 0x3c7   : > { %v7856_v56 = vmul.f32 %v10945_v11, %v1986_v63  ;;  %v10948_v8 = vstv %s10935_s30  ;;  %s10954_s4 = sld [smem:[#allocation92_spill]]  ;;  %v2106_v11 = vsub.f32 %v7144_v22, %v2103_v17  ;;  %v10961_v17 = vstv %s7759_s10 }
 0x3c8   : > { %v7864_v52 = vmul.f32 %v10948_v8, %v1986_v63  ;;  %v10950_v25 = vstv %s10936_s17  ;;  %s10955_s5 = sld [smem:[#allocation97_spill]]  ;;  %v10957_v63 = vstv %s7678_s2  ;;  %v1614_v13 = vadd.f32 %v1612_v45, %v7800_v28 }
 0x3c9   : > { %v2376_v20 = vmul.f32 %v10950_v25, %v2372_v30  ;;  %v10952_v34 = vstv %s10939_s3  ;;  %v1606_v8 = vmul.f32 %v10957_v63, %v1590_v41  ;;  %s10959_s30 = sld [smem:[#allocation34_spill]]  ;;  %v7878_v30 = vadd.f32 %v2040_v59, %v10960_v0 }
 0x3ca   : > { %v1852_v29 = vadd.f32 %v10952_v34, %v1848_v5  ;;  %v1596_v5 = vadd.f32 %v1594_v1, %v7768_v12  ;;  %v1602_v25 = vadd.f32 %v1600_v4, %v7770_v23  ;;  %v1786_v34 = vadd.f32 %v10961_v17, %v1782_v48  ;;  %s10964_s17 = sld [smem:[#allocation72_spill]]  ;;  %v10970_v23 = vld [vmem:[#allocation216_spill] sm:$0xff]  ;;  %v2235_v17 = vpop.permute.xlu1 %2234 }
 0x3cb   : > { %v10962_v51 = vstv %s10949_s6  ;;  %v10963_v37 = vstv %s10951_s28  ;;  %s10971_s10 = sld [smem:[#allocation76_spill]]  ;;  %v2108_v48 = vadd.f32 %v2106_v11, %v10970_v23  ;;  %v1680_v35 = vadd.f32 %v1678_v39, %v1614_v13  ;;  %v11012_v39 = vld [vmem:[#allocation223_spill] sm:$0xff] }
 0x3cc   : > { %v7887_v53 = vmul.f32 %v10962_v51, %v2184_v24  ;;  %v2380_v63 = vadd.f32 %v10963_v37, %v2376_v20  ;;  %v1854_v49 = vmax.f32 %v1852_v29, 0.0  ;;  %v10966_v41 = vstv %s10953_s19  ;;  %s10972_s6 = sld [smem:[#allocation77_spill]]  ;;  %v10977_v37 = vld [vmem:[#allocation219_spill] sm:$0xff] }
 0x3cd   : > { %v7894_v0 = vmul.f32 %v10966_v41, %v2184_v24  ;;  %v10967_v59 = vstv %s10954_s4  ;;  %s10974_s28 = sld [smem:[#allocation82_spill]]  ;;  %v1608_v29 = vadd.f32 %v1606_v8, %v7772_v3  ;;  %v10979_v41 = vmov 18  }
 0x3ce   : > { %v7898_v50 = vmul.f32 %v10967_v59, %v2184_v24  ;;  %v10968_v1 = vstv %s10955_s5  ;;  %v2382_v51 = vmax.f32 %v2380_v63, 0.0  ;;  %s10975_s24 = sld [smem:[#allocation87_spill]]  ;;  %5244 = vset.pattern.permute.xlu1 %v10979_v41  ;;  %v1662_v63 = vadd.f32 %v1660_v60, %v1596_v5 }
 0x3cf   : > { %v7902_v12 = vmul.f32 %v10968_v1, %v2184_v24  ;;  %v10973_v4 = vstv %s10959_s30  ;;  %s10976_s19 = sld [smem:[#allocation35_spill]]  ;;  %v2832_v24 = vsub.f32 %v10977_v37, %v2829_v16  ;;  %v10983_v1 = vld [vmem:[#allocation217_spill] sm:$0xff]  ;;  %2494 = vperm.xlu1 %5244, %v7754_v33  }
 0x3d0   : > { %v2640_v20 = vmul.f32 %v10973_v4, %v2636_v38  ;;  %s10978_s5 = sld [smem:[#allocation83_spill]]  ;;  %v10980_v59 = vstv %s10964_s17  ;;  %v1668_v38 = vadd.f32 %v1666_v42, %v1602_v25  ;;  %v2238_v23 = vsub.f32 %v10983_v1, %v2235_v17  ;;  %v10994_v17 = vld [vmem:[#allocation222_spill] sm:$0xff] }
 0x3d1   : > { %10969 = vst [vmem:[#allocation214_spill] sm:$0xff] %v7902_v12  ;;  %s10981_s4 = sld [smem:[#allocation93_spill]]  ;;  %v7913_v11 = vmul.f32 %v10980_v59, %v1854_v49  ;;  %v10985_v3 = vstv %s10971_s10  ;;  %v2834_v41 = vadd.f32 %v2832_v24, %v10994_v17  ;;  %v1728_v13 = vadd.f32 %v7776_v57, %v1662_v63 }
 0x3d2   : > { %s10982_s30 = sld [smem:[#allocation185_spill]]  ;;  %v7921_v28 = vmul.f32 %v10985_v3, %v1854_v49  ;;  %v10987_v8 = vstv %s10972_s6 }
 0x3d3   : > { %s7915_s2 = sld [smem:[#allocation5 + $0xc0]]  ;;  %v7925_v45 = vmul.f32 %v10987_v8, %v1854_v49  ;;  %v10988_v4 = vstv %s10974_s28 }
 0x3d4   : > { %s10984_s22 = sld [smem:[#allocation187_spill]]  ;;  %v7929_v16 = vmul.f32 %v10988_v4, %v1854_v49  ;;  %v10991_v60 = vstv %s10975_s24  ;;  %v1674_v4 = vadd.f32 %v1672_v6, %v1608_v29  ;;  %v1788_v29 = vmax.f32 %v1786_v34, 0.0 }
 0x3d5   : > { %s10986_s9 = sld [smem:[#allocation43_spill]]  ;;  %v7935_v42 = vmul.f32 %v10991_v60, %v2382_v51  ;;  %v10993_v5 = vstv %s10976_s19 }
 0x3d6   : > { %s10989_s17 = sld [smem:[#allocation78_spill]]  ;;  %v2644_v25 = vadd.f32 %v10993_v5, %v2640_v20  ;;  %v10995_v59 = vstv %s10978_s5  ;;  %v2301_v5 = vpop.permute.xlu1 %2300 }
 0x3d7   : > { %s7931_s13 = sld [smem:[#allocation5 + $0xc1]]  ;;  %10992 = vst [vmem:[#allocation218_spill] sm:$0xff] %v7935_v42  ;;  %v2112_v37 = vmul.f32 %v10995_v59, %v2108_v48  ;;  %v10997_v3 = vstv %s10981_s4  ;;  %v3027_v48 = vpop.permute.xlu0 %3026 }
 0x3d8   : > { %s7942_s10 = sld [smem:[#allocation5 + $0xc2]]  ;;  %v7946_v8 = vmul.f32 %v10997_v3, %v2382_v51  ;;  %v10999_v1 = vstv %s10982_s30  ;;  %v2646_v60 = vmax.f32 %v2644_v25, 0.0  ;;  %v11008_v3 = vld [vmem:[#allocation220_spill] sm:$0xff]  ;;  %v1734_v25 = vadd.f32 %v7784_v44, %v1668_v38 }
 0x3d9   : > { %v7950_v49 = vmul.f32 %v10999_v1, %v2382_v51  ;;  %s11003_s24 = sld [smem:[#allocation37_spill]]  ;;  %v11010_v1 = vld [vmem:[#allocation221_spill] sm:$0xff] }
 0x3da   : > { %10998 = vst [vmem:[#allocation216_spill] sm:$0xff] %v7946_v8  ;;  %v11001_v54 = vstv %s10984_s22  ;;  %s11005_s19 = sld [smem:[#allocation44_spill]]  ;;  %v7961_v8 = vadd.f32 %v2238_v23, %v11008_v3  ;;  %v2304_v6 = vsub.f32 %v11010_v1, %v2301_v5  ;;  %v7971_v23 = vadd.f32 %v7797_v7, %v1680_v35  ;;  %v11025_v7 = vld [vmem:[#allocation224_spill] sm:$0xff]  ;;  %v2433_v3 = vpop.permute.xlu1 %2432 }
 0x3db   : > { %11000 = vst [vmem:[#allocation222_spill] sm:$0xff] %v7950_v49  ;;  %v7954_v12 = vmul.f32 %v11001_v54, %v2382_v51  ;;  %v11004_v20 = vstv %s10986_s9  ;;  %s11007_s28 = sld [smem:[#allocation38_spill]]  ;;  %v3030_v54 = vsub.f32 %v11012_v39, %v3027_v48  ;;  %v11013_v51 = vmov 20  }
 0x3dc   : > { %v2838_v24 = vmul.f32 %v11004_v20, %v2834_v41  ;;  %v11006_v17 = vstv %s10989_s17  ;;  %s11009_s4 = sld [smem:[#allocation40_spill]]  ;;  %5246 = vset.pattern.permute.xlu1 %v11013_v51  ;;  %v11032_v51 = vstv %s7765_s8 }
 0x3dd   : > { %10990 = sst [smem:[#allocation62_spill]] %s7931_s13  ;;  %11002 = vst [vmem:[#allocation247_spill] sm:$0xff] %v7954_v12  ;;  %v2116_v59 = vadd.f32 %v11006_v17, %v2112_v37  ;;  %2626 = vperm.xlu1 %5246, %v7754_v33   ;;  %v1740_v37 = vadd.f32 %v7793_v62, %v1674_v4  ;;  %v3032_v34 = vadd.f32 %v3030_v54, %v7301_v46  ;;  %v3225_v54 = vpop.permute.xlu0 %3224  ;;  %v11055_v42 = vstv %s7931_s13 }
 0x3de   : > { %10996 = sst [smem:[#allocation63_spill]] %s7942_s10  ;;  %v2306_v4 = vadd.f32 %v2304_v6, %v11025_v7  ;;  %v11036_v6 = vmov 21  }
 0x3df   : > { %s11011_s30 = sld [smem:[#allocation41_spill]]  ;;  %v11015_v41 = vstv %s11003_s24  ;;  %v2118_v17 = vmax.f32 %v2116_v59, 0.0 }
 0x3e0   : > { %s11014_s9 = sld [smem:[#allocation36_spill]]  ;;  %v7975_v20 = vmul.f32 %v11015_v41, %v2646_v60  ;;  %v11017_v5 = vstv %s11005_s19  ;;  %v1792_v41 = vmul.f32 %v11032_v51, %v1788_v29 }
 0x3e1   : > { %v2842_v48 = vadd.f32 %v11017_v5, %v2838_v24  ;;  %s11018_s22 = sld [smem:[#allocation88_spill]]  ;;  %v11019_v57 = vstv %s11007_s28  ;;  %v3228_v5 = vsub.f32 %v7305_v32, %v3225_v54  ;;  %5247 = vset.pattern.permute.xlu1 %v11036_v6 }
 0x3e2   : > { %11016 = vst [vmem:[#allocation220_spill] sm:$0xff] %v7975_v20  ;;  %v7982_v44 = vmul.f32 %v11019_v57, %v2646_v60  ;;  %v11021_v63 = vstv %s11009_s4  ;;  %s11026_s24 = sld [smem:[#allocation89_spill]]  ;;  %2692 = vperm.xlu1 %5247, %v7754_v33  }
 0x3e3   : > { %v7986_v62 = vmul.f32 %v11021_v63, %v2646_v60  ;;  %s11027_s19 = sld [smem:[#allocation90_spill]]  ;;  %v2844_v46 = vmax.f32 %v2842_v48, 0.0 }
 0x3e4   : > { %11020 = vst [vmem:[#allocation221_spill] sm:$0xff] %v7982_v44  ;;  %s7993_s6 = sld [smem:[#allocation5 + $0x6e]] }
 0x3e5   : > { %11022 = vst [vmem:[#allocation248_spill] sm:$0xff] %v7986_v62  ;;  %v11023_v38 = vstv %s11011_s30  ;;  %s11028_s17 = sld [smem:[#allocation102_spill]] }
 0x3e6   : > { %v7990_v35 = vmul.f32 %v11023_v38, %v2646_v60  ;;  %v11029_v24 = vstv %s11014_s9  ;;  %s11030_s5 = sld [smem:[#allocation46_spill]]  ;;  %v11039_v38 = vld [vmem:[#allocation225_spill] sm:$0xff] }
 0x3e7   : > { %v3036_v59 = vmul.f32 %v11029_v24, %v3032_v34  ;;  %s11031_s28 = sld [smem:[#allocation52_spill]]  ;;  %v11037_v57 = vstv %s11018_s22  ;;  %v2436_v7 = vsub.f32 %v11039_v38, %v2433_v3 }
 0x3e8   : > { %11024 = vst [vmem:[#allocation249_spill] sm:$0xff] %v7990_v35  ;;  %s11033_s4 = sld [smem:[#allocation103_spill]]  ;;  %v8004_v48 = vmul.f32 %v11037_v57, %v2118_v17  ;;  %v11041_v24 = vstv %s11026_s24  ;;  %v11048_v35 = vld [vmem:[#allocation229_spill] sm:$0xff] }
 0x3e9   : > { %s11034_s30 = sld [smem:[#allocation47_spill]]  ;;  %v8012_v51 = vmul.f32 %v11041_v24, %v2118_v17  ;;  %v11042_v60 = vstv %s11027_s19  ;;  %v3230_v62 = vadd.f32 %v3228_v5, %v11048_v35  ;;  %v2499_v5 = vpop.permute.xlu1 %2498 }
 0x3ea   : > { %s11035_s12 = sld [smem:[#allocation49_spill]]  ;;  %v8016_v54 = vmul.f32 %v11042_v60, %v2118_v17  ;;  %v11054_v60 = vstv %s7915_s2 }
 0x3eb   : > { %s11038_s9 = sld [smem:[#allocation50_spill]]  ;;  %v11044_v6 = vstv %s11028_s17  ;;  %v1798_v49 = vmul.f32 %v11054_v60, %v1788_v29 }
 0x3ec   : > { %s11040_s16 = sld [smem:[#allocation42_spill]]  ;;  %v8020_v32 = vmul.f32 %v11044_v6, %v2118_v17  ;;  %v11045_v57 = vstv %s11030_s5  ;;  %v1804_v17 = vmul.f32 %v11055_v42, %v1788_v29 }
 0x3ed   : > { %s11043_s8 = sld [smem:[#allocation96_spill]]  ;;  %v8024_v39 = vmul.f32 %v11045_v57, %v2844_v46  ;;  %v11047_v34 = vstv %s11031_s28 }
 0x3ee   : > { %v3040_v63 = vadd.f32 %v11047_v34, %v3036_v59  ;;  %v11049_v3 = vstv %s11033_s4  ;;  %s11058_s28 = sld [smem:[#allocation53_spill]] }
 0x3ef   : > { %11046 = vst [vmem:[#allocation224_spill] sm:$0xff] %v8024_v39  ;;  %v2310_v38 = vmul.f32 %v11049_v3, %v2306_v4  ;;  %v11050_v44 = vstv %s11034_s30  ;;  %s11060_s5 = sld [smem:[#allocation45_spill]] }
 0x3f0   : > { %v8033_v20 = vmul.f32 %v11050_v44, %v2844_v46  ;;  %v11052_v24 = vstv %s11035_s12  ;;  %v3042_v59 = vmax.f32 %v3040_v63, 0.0  ;;  %v1439_v44 = vpop.permute.xlu0 %1438  ;;  %s11062_s12 = sld [smem:[#allocation39_spill]]  ;;  %v1794_v63 = vadd.f32 %v1792_v41, %v1728_v13 }
 0x3f1   : > { %v8037_v12 = vmul.f32 %v11052_v24, %v2844_v46  ;;  %v11056_v6 = vstv %s11038_s9  ;;  %v11063_v24 = vld [vmem:[#allocation227_spill] sm:$0xff]  ;;  %s11064_s30 = sld [smem:[#allocation55_spill]] }
 0x3f2   : > { %11051 = vst [vmem:[#allocation229_spill] sm:$0xff] %v8033_v20  ;;  %v8045_v57 = vmul.f32 %v11056_v6, %v2844_v46  ;;  %v11059_v35 = vstv %s11040_s16  ;;  %v8052_v60 = vadd.f32 %v2436_v7, %v11063_v24  ;;  %s11067_s13 = sld [smem:[#allocation56_spill]]  ;;  %v1445_v46 = vsub.f32 %v7003_v47, %v1439_v44 }
 0x3f3   : > { %11053 = vst [vmem:[#allocation250_spill] sm:$0xff] %v8037_v12  ;;  %v3234_v4 = vmul.f32 %v11059_v35, %v3230_v62  ;;  %v11061_v34 = vstv %s11043_s8  ;;  %v11066_v12 = vld [vmem:[#allocation228_spill] sm:$0xff]  ;;  %v11068_v6 = vmov 23   ;;  %v1800_v62 = vadd.f32 %v1798_v49, %v1734_v25  ;;  %s11079_s16 = sld [smem:[#allocation99_spill]] }
 0x3f4   : > { %11057 = vst [vmem:[#allocation251_spill] sm:$0xff] %v8045_v57  ;;  %v2314_v3 = vadd.f32 %v11061_v34, %v2310_v38  ;;  %11065 = vst [vmem:[#allocation227_spill] sm:$0xff] %v8052_v60  ;;  %v2502_v42 = vsub.f32 %v11066_v12, %v2499_v5  ;;  %5249 = vset.pattern.permute.xlu1 %v11068_v6  ;;  %v1806_v35 = vadd.f32 %v1804_v17, %v1740_v37  ;;  %v11073_v60 = vld [vmem:[#allocation142_spill] sm:$0xff]  ;;  %s11081_s9 = sld [smem:[#allocation105_spill]] }
 0x3f5   : > { %2824 = vperm.xlu1 %5249, %v7754_v33   ;;  %v11069_v57 = vstv %s7942_s10  ;;  %v10040_v38 = vstv %s7993_s6  ;;  %v11070_v34 = vstv %s11058_s28  ;;  %v11072_v7 = vstv %s11060_s5  ;;  %s11085_s5 = sld [smem:[#allocation48_spill]] }
 0x3f6   : > { %v1810_v20 = vmul.f32 %v11069_v57, %v1788_v29  ;;  %v8063_v39 = vmul.f32 %v11070_v34, %v3042_v59  ;;  %v3238_v24 = vadd.f32 %v11072_v7, %v3234_v4  ;;  %v1447_v5 = vadd.f32 %v1445_v46, %v11073_v60  ;;  %v2565_v57 = vpop.permute.xlu1 %2564  ;;  %v1637_v4 = vpop.permute.xlu0 %1636  ;;  %v11083_v46 = vld [vmem:[#allocation230_spill] sm:$0xff]  ;;  %s11093_s28 = sld [smem:[#allocation57_spill]] }
 0x3f7   : > { %v2316_v12 = vmax.f32 %v2314_v3, 0.0  ;;  %v11074_v47 = vstv %s11062_s12  ;;  %v11076_v6 = vstv %s11064_s30  ;;  %v8081_v29 = vadd.f32 %v2502_v42, %v7353_v27  ;;  %s11088_s30 = sld [smem:[#allocation54_spill]] }
 0x3f8   : > { %11071 = vst [vmem:[#allocation252_spill] sm:$0xff] %v8063_v39  ;;  %v8070_v44 = vmul.f32 %v11074_v47, %v3042_v59  ;;  %v8074_v13 = vmul.f32 %v11076_v6, %v3042_v59  ;;  %v11078_v41 = vstv %s11067_s13  ;;  %v3240_v25 = vmax.f32 %v3238_v24, 0.0  ;;  %s11086_s13 = sld [smem:[#allocation51_spill]] }
 0x3f9   : > { %v8078_v49 = vmul.f32 %v11078_v41, %v3042_v59  ;;  %v11082_v37 = vstv %s7065_s27  ;;  %v1860_v3 = vadd.f32 %v7913_v11, %v1794_v63  ;;  %v1866_v60 = vadd.f32 %v7921_v28, %v1800_v62  ;;  %s8092_s27 = sld [smem:[#allocation5 + $0x8e]] }
 0x3fa   : > { %11075 = vst [vmem:[#allocation142_spill] sm:$0xff] %v8070_v44  ;;  %11077 = vst [vmem:[#allocation253_spill] sm:$0xff] %v8074_v13  ;;  %v1451_v17 = vmul.f32 %v11082_v37, %v1447_v5  ;;  %v2568_v34 = vsub.f32 %v11083_v46, %v2565_v57  ;;  %v1643_v59 = vsub.f32 %v7025_v15, %v1637_v4  ;;  %v11084_v7 = vmov 24   ;;  %s8111_s12 = sld [smem:[#allocation5 + $0xcf]] }
 0x3fb   : > { %11080 = vst [vmem:[#allocation254_spill] sm:$0xff] %v8078_v49  ;;  %5250 = vset.pattern.permute.xlu1 %v11084_v7  ;;  %v1812_v27 = vadd.f32 %v1810_v20, %v7971_v23  ;;  %v1872_v42 = vadd.f32 %v7925_v45, %v1806_v35  ;;  %v11087_v24 = vstv %s11079_s16  ;;  %v11089_v28 = vstv %s11081_s9  ;;  %v11094_v35 = vld [vmem:[#allocation144_spill] sm:$0xff]  ;;  %s8118_s10 = sld [smem:[#allocation5 + $0xd0]] }
 0x3fc   : > { %2890 = vperm.xlu1 %5250, %v7754_v33   ;;  %v8097_v11 = vmul.f32 %v11087_v24, %v2316_v12  ;;  %v8101_v63 = vmul.f32 %v11089_v28, %v2316_v12  ;;  %v11090_v15 = vstv %s10804_s15  ;;  %v11091_v5 = vstv %s10805_s0  ;;  %v2697_v24 = vpop.permute.xlu1 %2696  ;;  %v1835_v28 = vpop.permute.xlu0 %1834 }
 0x3fd   : > { %v8105_v62 = vmul.f32 %v11090_v15, %v2316_v12  ;;  %v8109_v47 = vmul.f32 %v11091_v5, %v2316_v12  ;;  %v11092_v45 = vstv %s10854_s7  ;;  %v2570_v20 = vadd.f32 %v2568_v34, %v7375_v31  ;;  %s8130_s7 = sld [smem:[#allocation5 + $0xd1]] }
 0x3fe   : > { %v1455_v23 = vadd.f32 %v11092_v45, %v1451_v17  ;;  %v1645_v6 = vadd.f32 %v1643_v59, %v11094_v35  ;;  %v1878_v41 = vadd.f32 %v7929_v16, %v1812_v27  ;;  %v11095_v37 = vstv %s11085_s5  ;;  %s11140_s5 = sld [smem:[#allocation77_spill]] }
 0x3ff   : > { %v8122_v57 = vmul.f32 %v11095_v37, %v3240_v25  ;;  %v11097_v12 = vstv %s11086_s13  ;;  %v1926_v7 = vadd.f32 %v7805_v61, %v1860_v3  ;;  %v1932_v17 = vadd.f32 %v7812_v14, %v1866_v60  ;;  %v11105_v14 = vld [vmem:[#allocation231_spill] sm:$0xff]  ;;  %s11134_s13 = sld [smem:[#allocation72_spill]] }
 0x400   : > { %v8126_v4 = vmul.f32 %v11097_v12, %v3240_v25  ;;  %v11099_v31 = vstv %s11088_s30  ;;  %v1457_v16 = vmax.f32 %v1455_v23, 0.0  ;;  %v11101_v59 = vstv %s10878_s26  ;;  %s8168_s26 = sld [smem:[#allocation5 + $0xd2]] }
 0x401   : > { %11096 = vst [vmem:[#allocation230_spill] sm:$0xff] %v8122_v57  ;;  %v8134_v34 = vmul.f32 %v11099_v31, %v3240_v25  ;;  %v1649_v27 = vmul.f32 %v11101_v59, %v1645_v6  ;;  %v11102_v15 = vstv %s10806_s14  ;;  %v11103_v45 = vstv %s11093_s28  ;;  %s11126_s28 = sld [smem:[#allocation111_spill]] }
 0x402   : > { %11098 = vst [vmem:[#allocation144_spill] sm:$0xff] %v8126_v4  ;;  %v2574_v5 = vmul.f32 %v11102_v15, %v2570_v20  ;;  %v8142_v61 = vmul.f32 %v11103_v45, %v3240_v25  ;;  %v2700_v3 = vsub.f32 %v11105_v14, %v2697_v24  ;;  %v1841_v60 = vsub.f32 %v7055_v55, %v1835_v28  ;;  %s11128_s30 = sld [smem:[#allocation112_spill]] }
 0x403   : > { %11100 = vst [vmem:[#allocation255_spill] sm:$0xff] %v8134_v34  ;;  %v11106_v35 = vmov 26   ;;  %v2046_v23 = vmul.f32 %v10040_v38, %v7878_v30  ;;  %v1938_v20 = vadd.f32 %v7816_v9, %v1872_v42  ;;  %v1944_v25 = vadd.f32 %v7820_v43, %v1878_v41  ;;  %v11109_v30 = vld [vmem:[#allocation146_spill] sm:$0xff] }
 0x404   : > { %11104 = vst [vmem:[#allocation256_spill] sm:$0xff] %v8142_v61  ;;  %5252 = vset.pattern.permute.xlu1 %v11106_v35  ;;  %v8154_v6 = vadd.f32 %v7843_v58, %v1926_v7  ;;  %v8157_v37 = vadd.f32 %v7852_v26, %v1932_v17  ;;  %v11107_v55 = vstv %s10868_s18  ;;  %v11108_v31 = vstv %s10897_s21  ;;  %v2763_v35 = vpop.permute.xlu1 %2762  ;;  %s11116_s21 = sld [smem:[#allocation67_spill]] }
 0x405   : > { %3022 = vperm.xlu1 %5252, %v7754_v33   ;;  %v8161_v12 = vmul.f32 %v11107_v55, %v1457_v16  ;;  %v1653_v59 = vadd.f32 %v11108_v31, %v1649_v27  ;;  %v1843_v24 = vadd.f32 %v1841_v60, %v11109_v30  ;;  %v11110_v28 = vstv %s10807_s20  ;;  %v11114_v27 = vld [vmem:[#allocation233_spill] sm:$0xff]  ;;  %v2099_v55 = vpop.permute.xlu0 %2098  ;;  %v11117_v30 = vld [vmem:[#allocation232_spill] sm:$0xff]  ;;  %s11119_s18 = sld [smem:[#allocation66_spill]] }
 0x406   : > { %v2578_v15 = vadd.f32 %v11110_v28, %v2574_v5  ;;  %v11111_v9 = vstv %s10871_s25  ;;  %v11112_v58 = vstv %s10872_s23  ;;  %v11113_v41 = vstv %s10873_s11  ;;  %s11118_s25 = sld [smem:[#allocation68_spill]] }
 0x407   : > { %v8172_v43 = vmul.f32 %v11111_v9, %v1457_v16  ;;  %v8176_v42 = vmul.f32 %v11112_v58, %v1457_v16  ;;  %v8180_v26 = vmul.f32 %v11113_v41, %v1457_v16  ;;  %v10039_v7 = vstv %s8092_s27  ;;  %s11121_s11 = sld [smem:[#allocation83_spill]] }
 0x408   : > { %v1655_v17 = vmax.f32 %v1653_v59, 0.0  ;;  %v8184_v45 = vadd.f32 %v2700_v3, %v11114_v27  ;;  %v11115_v5 = vstv %s10930_s1  ;;  %v2050_v31 = vadd.f32 %v10039_v7, %v2046_v23  ;;  %s11122_s1 = sld [smem:[#allocation107_spill]] }
 0x409   : > { %v1847_v60 = vmul.f32 %v11115_v5, %v1843_v24  ;;  %v2766_v16 = vsub.f32 %v11117_v30, %v2763_v35  ;;  %v2105_v28 = vsub.f32 %v7144_v22, %v2099_v55  ;;  %v11120_v9 = vmov 27   ;;  %s11123_s23 = sld [smem:[#allocation114_spill]]  ;;  %v11127_v55 = vld [vmem:[#allocation148_spill] sm:$0xff] }
 0x40a   : > { %5253 = vset.pattern.permute.xlu1 %v11120_v9  ;;  %v2580_v59 = vmax.f32 %v2578_v15, 0.0  ;;  %v2004_v3 = vadd.f32 %v7856_v56, %v1938_v20  ;;  %v2010_v24 = vadd.f32 %v7864_v52, %v1944_v25  ;;  %v11124_v27 = vstv %s10920_s29  ;;  %s11132_s29 = sld [smem:[#allocation110_spill]] }
 0x40b   : > { %3088 = vperm.xlu1 %5253, %v7754_v33   ;;  %v8201_v5 = vmul.f32 %v11124_v27, %v1655_v17  ;;  %v11125_v35 = vstv %s10939_s3  ;;  %v2768_v15 = vadd.f32 %v2766_v16, %v7434_v10  ;;  %v2107_v56 = vadd.f32 %v2105_v28, %v11127_v55  ;;  %s8219_s3 = sld [smem:[#allocation5 + $0x71]]  ;;  %v2895_v28 = vpop.permute.xlu1 %2894 }
 0x40c   : > { %v1851_v22 = vadd.f32 %v11125_v35, %v1847_v60  ;;  %v11129_v20 = vstv %s11116_s21  ;;  %v11130_v52 = vstv %s11118_s25  ;;  %v11131_v7 = vstv %s11119_s18  ;;  %s11135_s21 = sld [smem:[#allocation78_spill]]  ;;  %v2297_v35 = vpop.permute.xlu0 %2296 }
 0x40d   : > { %v8209_v9 = vmul.f32 %v11129_v20, %v1655_v17  ;;  %v8213_v25 = vmul.f32 %v11130_v52, %v1655_v17  ;;  %v8217_v38 = vmul.f32 %v11131_v7, %v1655_v17  ;;  %v2052_v27 = vmax.f32 %v2050_v31, 0.0  ;;  %s11137_s25 = sld [smem:[#allocation115_spill]] }
 0x40e   : > { %v1853_v10 = vmax.f32 %v1851_v22, 0.0  ;;  %v11133_v60 = vstv %s11121_s11  ;;  %v11136_v55 = vstv %s11122_s1  ;;  %s11139_s18 = sld [smem:[#allocation76_spill]]  ;;  %v2303_v17 = vsub.f32 %v11010_v1, %v2297_v35 }
 0x40f   : > { %v2111_v16 = vmul.f32 %v11133_v60, %v2107_v56  ;;  %v8225_v20 = vmul.f32 %v11136_v55, %v2580_v59  ;;  %v11138_v52 = vstv %s11123_s23  ;;  %v11141_v31 = vmov 29   ;;  %s11144_s11 = sld [smem:[#allocation82_spill]]  ;;  %v11145_v55 = vld [vmem:[#allocation234_spill] sm:$0xff] }
 0x410   : > { %v2772_v7 = vmul.f32 %v11138_v52, %v2768_v15  ;;  %5255 = vset.pattern.permute.xlu1 %v11141_v31  ;;  %v11142_v22 = vstv %s11126_s28  ;;  %v11143_v56 = vstv %s11128_s30  ;;  %v2898_v58 = vsub.f32 %v11145_v55, %v2895_v28 }
 0x411   : > { %v8233_v23 = vmul.f32 %v11142_v22, %v2580_v59  ;;  %v8237_v60 = vmul.f32 %v11143_v56, %v2580_v59  ;;  %3220 = vperm.xlu1 %5255, %v7754_v33   ;;  %v11146_v15 = vstv %s11132_s29  ;;  %v11147_v1 = vstv %s8111_s12  ;;  %v11151_v56 = vld [vmem:[#allocation149_spill] sm:$0xff] }
 0x412   : > { %v8244_v52 = vmul.f32 %v11146_v15, %v2580_v59  ;;  %v2056_v35 = vmul.f32 %v11147_v1, %v2052_v27  ;;  %v11148_v31 = vstv %s8118_s10  ;;  %v11149_v34 = vstv %s11134_s13  ;;  %s11163_s13 = sld [smem:[#allocation84_spill]] }
 0x413   : > { %v2062_v61 = vmul.f32 %v11148_v31, %v2052_v27  ;;  %v8252_v22 = vmul.f32 %v11149_v34, %v1853_v10  ;;  %v11150_v4 = vstv %s11135_s21  ;;  %v2305_v49 = vadd.f32 %v2303_v17, %v11151_v56  ;;  %s11165_s21 = sld [smem:[#allocation118_spill]] }
 0x414   : > { %v2115_v57 = vadd.f32 %v11150_v4, %v2111_v16  ;;  %v11152_v41 = vstv %s11137_s25  ;;  %v11153_v44 = vstv %s11139_s18  ;;  %v11154_v39 = vstv %s11140_s5  ;;  %s11160_s5 = sld [smem:[#allocation113_spill]] }
 0x415   : > { %v2776_v13 = vadd.f32 %v11152_v41, %v2772_v7  ;;  %v8261_v28 = vmul.f32 %v11153_v44, %v1853_v10  ;;  %v8265_v55 = vmul.f32 %v11154_v39, %v1853_v10  ;;  %v11155_v59 = vstv %s8130_s7  ;;  %v2961_v41 = vpop.permute.xlu1 %2960  ;;  %v2561_v7 = vpop.permute.xlu0 %2560  ;;  %s8295_s18 = sld [smem:[#allocation5 + $0x91]] }
 0x416   : > { %v2068_v15 = vmul.f32 %v11155_v59, %v2052_v27  ;;  %v11156_v1 = vstv %s8168_s26  ;;  %v11157_v31 = vstv %s11144_s11  ;;  %v2117_v4 = vmax.f32 %v2115_v57, 0.0  ;;  %s11169_s11 = sld [smem:[#allocation121_spill]] }
 0x417   : > { %v2074_v14 = vmul.f32 %v11156_v1, %v2052_v27  ;;  %v8273_v34 = vmul.f32 %v11157_v31, %v1853_v10  ;;  %v11158_v16 = vstv %s11033_s4  ;;  %v2778_v44 = vmax.f32 %v2776_v13, 0.0  ;;  %s11161_s4 = sld [smem:[#allocation117_spill]] }
 0x418   : > { %v2309_v17 = vmul.f32 %v11158_v16, %v2305_v49  ;;  %v8278_v39 = vadd.f32 %v2898_v58, %v7454_v18  ;;  %v2964_v56 = vsub.f32 %v7446_v36, %v2961_v41  ;;  %v2567_v27 = vsub.f32 %v11083_v46, %v2561_v7  ;;  %v11166_v41 = vld [vmem:[#allocation162_spill] sm:$0xff] }
 0x419   : > { %v11159_v10 = vmov 30   ;;  %v2058_v57 = vadd.f32 %v2056_v35, %v8154_v6  ;;  %v2064_v13 = vadd.f32 %v2062_v61, %v8157_v37  ;;  %v2070_v49 = vadd.f32 %v2068_v15, %v2004_v3  ;;  %v11181_v58 = vld [vmem:[#allocation169_spill] sm:$0xff] }
 0x41a   : > { %5256 = vset.pattern.permute.xlu1 %v11159_v10  ;;  %v2076_v18 = vadd.f32 %v2074_v14, %v2010_v24  ;;  %v11162_v59 = vstv %s11018_s22  ;;  %v11164_v31 = vstv %s11043_s8  ;;  %v2966_v16 = vadd.f32 %v2964_v56, %v7473_v21  ;;  %s8313_s22 = sld [smem:[#allocation5 + $0xdb]]  ;;  %v3093_v56 = vpop.permute.xlu1 %3092 }
 0x41b   : > { %3286 = vperm.xlu1 %5256, %v7754_v33   ;;  %v8289_v1 = vmul.f32 %v11162_v59, %v2117_v4  ;;  %v2313_v46 = vadd.f32 %v11164_v31, %v2309_v17  ;;  %v2569_v6 = vadd.f32 %v2567_v27, %v11166_v41  ;;  %v11167_v33 = vstv %s11026_s24  ;;  %v2759_v59 = vpop.permute.xlu0 %2758  ;;  %s11175_s24 = sld [smem:[#allocation116_spill]] }
 0x41c   : > { %v8299_v35 = vmul.f32 %v11167_v33, %v2117_v4  ;;  %v11168_v61 = vstv %s11027_s19  ;;  %v11170_v37 = vstv %s11028_s17  ;;  %v11171_v24 = vstv %s11160_s5  ;;  %s8347_s19 = sld [smem:[#allocation5 + $0xdc]] }
 0x41d   : > { %v8303_v14 = vmul.f32 %v11168_v61, %v2117_v4  ;;  %v8307_v3 = vmul.f32 %v11170_v37, %v2117_v4  ;;  %v8311_v15 = vmul.f32 %v11171_v24, %v2778_v44  ;;  %v2315_v21 = vmax.f32 %v2313_v46, 0.0  ;;  %s8375_s17 = sld [smem:[#allocation5 + $0xde]] }
 0x41e   : > { %v11172_v17 = vstv %s10806_s14  ;;  %v11173_v27 = vstv %s11161_s4  ;;  %v11174_v31 = vstv %s11163_s13  ;;  %v3096_v4 = vsub.f32 %v7464_v2, %v3093_v56  ;;  %s11201_s8 = sld [smem:[#allocation128_spill]] }
 0x41f   : > { %v2573_v7 = vmul.f32 %v11172_v17, %v2569_v6  ;;  %v8319_v10 = vmul.f32 %v11173_v27, %v2778_v44  ;;  %v2970_v41 = vmul.f32 %v11174_v31, %v2966_v16  ;;  %v11176_v33 = vstv %s11165_s21  ;;  %v5293_v27 = vld [vmem:[#allocation3 + $0x8] sm:$0xff]  ;;  %s11231_s14 = sld [smem:[#allocation125_spill]] }
 0x420   : > { %v8326_v61 = vmul.f32 %v11176_v33, %v2778_v44  ;;  %v2765_v46 = vsub.f32 %v11117_v30, %v2759_v59  ;;  %v11177_v6 = vmov 31   ;;  %v2124_v37 = vadd.f32 %v8004_v48, %v2058_v57 }
 0x421   : > { %5258 = vset.pattern.permute.xlu1 %v11177_v6  ;;  %v11178_v24 = vstv %s11169_s11  ;;  %v2130_v16 = vadd.f32 %v8012_v51, %v2064_v13  ;;  %v2136_v56 = vadd.f32 %v8016_v54, %v2070_v49  ;;  %v2142_v31 = vadd.f32 %v8020_v32, %v2076_v18 }
 0x422   : > { %v8333_v17 = vmul.f32 %v11178_v24, %v2778_v44  ;;  %3356 = vperm.xlu1 %5258, %v5293_v27   ;;  %v11179_v33 = vstv %s11079_s16  ;;  %v11180_v59 = vstv %s10807_s20  ;;  %v2767_v48 = vadd.f32 %v2765_v46, %v11181_v58  ;;  %s8364_s16 = sld [smem:[#allocation5 + $0xdd]]  ;;  %v2957_v46 = vpop.permute.xlu0 %2956 }
 0x423   : > { %v8340_v30 = vmul.f32 %v11179_v33, %v2315_v21  ;;  %v2577_v6 = vadd.f32 %v11180_v59, %v2573_v7  ;;  %v11182_v57 = vstv %s11175_s24  ;;  %v11183_v24 = vstv %s11081_s9  ;;  %s11189_s20 = sld [smem:[#allocation123_spill]] }
 0x424   : > { %v2974_v44 = vadd.f32 %v11182_v57, %v2970_v41  ;;  %v8351_v27 = vmul.f32 %v11183_v24, %v2315_v21  ;;  %v11184_v51 = vstv %s10804_s15  ;;  %v11185_v32 = vstv %s10805_s0  ;;  %v3159_v41 = vpop.permute.xlu1 %3158  ;;  %s11190_s15 = sld [smem:[#allocation124_spill]] }
 0x425   : > { %v8355_v54 = vmul.f32 %v11184_v51, %v2315_v21  ;;  %v8359_v13 = vmul.f32 %v11185_v32, %v2315_v21  ;;  %v8362_v49 = vadd.f32 %v3096_v4, %v7484_v19  ;;  %v2579_v18 = vmax.f32 %v2577_v6, 0.0  ;;  %s11191_s0 = sld [smem:[#allocation120_spill]] }
 0x426   : > { %v11187_v58 = vstv %s11123_s23  ;;  %v2190_v33 = vadd.f32 %v7887_v53, %v2124_v37  ;;  %v11188_v21 = vstv %s8219_s3  ;;  %v3162_v19 = vsub.f32 %v7479_v40, %v3159_v41  ;;  %v11192_v37 = vld [vmem:[#allocation214_spill] sm:$0xff]  ;;  %s11199_s9 = sld [smem:[#allocation127_spill]] }
 0x427   : > { %11186 = vst [vmem:[#allocation146_spill] sm:$0xff] %v8362_v49  ;;  %v2771_v7 = vmul.f32 %v11187_v58, %v2767_v48  ;;  %v2244_v59 = vmul.f32 %v11188_v21, %v7961_v8  ;;  %v2976_v4 = vmax.f32 %v2974_v44, 0.0  ;;  %v2963_v57 = vsub.f32 %v7446_v36, %v2957_v46  ;;  %v11198_v46 = vld [vmem:[#allocation237_spill] sm:$0xff]  ;;  %s8468_s23 = sld [smem:[#allocation5 + $0xe7]] }
 0x428   : > { %v10041_v6 = vstv %s8295_s18  ;;  %v2196_v48 = vadd.f32 %v7894_v0, %v2130_v16  ;;  %v2202_v53 = vadd.f32 %v7898_v50, %v2136_v56  ;;  %v2208_v24 = vadd.f32 %v11192_v37, %v2142_v31  ;;  %v11205_v31 = vld [vmem:[#allocation178_spill] sm:$0xff] }
 0x429   : > { %v11193_v51 = vstv %s11122_s1  ;;  %v11195_v44 = vstv %s11126_s28  ;;  %v11197_v36 = vstv %s11137_s25  ;;  %v3164_v21 = vadd.f32 %v3162_v19, %v11198_v46  ;;  %s11207_s28 = sld [smem:[#allocation122_spill]]  ;;  %v3291_v46 = vpop.permute.xlu1 %3290 }
 0x42a   : > { %v8383_v32 = vmul.f32 %v11193_v51, %v2579_v18  ;;  %v8387_v58 = vmul.f32 %v11195_v44, %v2579_v18  ;;  %v2775_v41 = vadd.f32 %v11197_v36, %v2771_v7  ;;  %v11200_v0 = vstv %s11128_s30  ;;  %s8445_s30 = sld [smem:[#allocation5 + $0x74]] }
 0x42b   : > { %v8394_v16 = vmul.f32 %v11200_v0, %v2579_v18  ;;  %v11203_v50 = vstv %s11132_s29  ;;  %v2965_v37 = vadd.f32 %v2963_v57, %v11205_v31  ;;  %v2248_v51 = vadd.f32 %v10041_v6, %v2244_v59  ;;  %s8459_s1 = sld [smem:[#allocation5 + $0x94]] }
 0x42c   : > { %11194 = vst [vmem:[#allocation233_spill] sm:$0xff] %v8383_v32  ;;  %11196 = vst [vmem:[#allocation232_spill] sm:$0xff] %v8387_v58  ;;  %v8398_v56 = vmul.f32 %v11203_v50, %v2579_v18  ;;  %v2777_v44 = vmax.f32 %v2775_v41, 0.0  ;;  %v11206_v8 = vstv %s11189_s20  ;;  %v11209_v19 = vstv %s11190_s15  ;;  %v3155_v50 = vpop.permute.xlu0 %3154  ;;  %s11244_s29 = sld [smem:[#allocation132_spill]] }
 0x42d   : > { %11202 = vst [vmem:[#allocation148_spill] sm:$0xff] %v8394_v16  ;;  %v8405_v7 = vmul.f32 %v11206_v8, %v2976_v4  ;;  %v8409_v36 = vmul.f32 %v11209_v19, %v2976_v4  ;;  %v11211_v0 = vstv %s11191_s0  ;;  %v11212_v57 = vstv %s11163_s13  ;;  %s11247_s25 = sld [smem:[#allocation138_spill]] }
 0x42e   : > { %11204 = vst [vmem:[#allocation149_spill] sm:$0xff] %v8398_v56  ;;  %v3168_v18 = vmul.f32 %v11211_v0, %v3164_v21  ;;  %v2969_v31 = vmul.f32 %v11212_v57, %v2965_v37  ;;  %v3161_v59 = vsub.f32 %v7479_v40, %v3155_v50  ;;  %v2250_v41 = vmax.f32 %v2248_v51, 0.0  ;;  %v11222_v51 = vld [vmem:[#allocation188_spill] sm:$0xff]  ;;  %s11253_s13 = sld [smem:[#allocation130_spill]] }
 0x42f   : > { %11208 = vst [vmem:[#allocation162_spill] sm:$0xff] %v8405_v7  ;;  %11210 = vst [vmem:[#allocation169_spill] sm:$0xff] %v8409_v36  ;;  %v11213_v8 = vstv %s11199_s9  ;;  %v11215_v19 = vstv %s11201_s8  ;;  %v11217_v7 = vld [vmem:[#allocation236_spill] sm:$0xff]  ;;  %v11218_v0 = vstv %s11160_s5  ;;  %v11220_v58 = vstv %s11175_s24  ;;  %s8486_s5 = sld [smem:[#allocation5 + $0xe8]] }
 0x430   : > { %v8419_v2 = vmul.f32 %v11213_v8, %v2976_v4  ;;  %v8423_v36 = vmul.f32 %v11215_v19, %v2976_v4  ;;  %v3294_v56 = vsub.f32 %v11217_v7, %v3291_v46  ;;  %v8429_v16 = vmul.f32 %v11218_v0, %v2777_v44  ;;  %s8500_s24 = sld [smem:[#allocation5 + $0xea]] }
 0x431   : > { %v2973_v37 = vadd.f32 %v11220_v58, %v2969_v31  ;;  %v11221_v57 = vstv %s11207_s28  ;;  %v3163_v50 = vadd.f32 %v3161_v59, %v11222_v51  ;;  %v11223_v8 = vstv %s11161_s4  ;;  %v1314_v51 = vpop.permute.xlu1 %1313  ;;  %s11250_s4 = sld [smem:[#allocation129_spill]] }
 0x432   : > { %11214 = vst [vmem:[#allocation214_spill] sm:$0xff] %v8419_v2  ;;  %11216 = vst [vmem:[#allocation237_spill] sm:$0xff] %v8423_v36  ;;  %v3172_v40 = vadd.f32 %v11221_v57, %v3168_v18  ;;  %v8438_v6 = vmul.f32 %v11223_v8, %v2777_v44  ;;  %v11225_v2 = vstv %s8313_s22  ;;  %v11226_v19 = vstv %s8347_s19  ;;  %v3353_v57 = vpop.permute.xlu0 %3352  ;;  %v11230_v8 = vld [vmem:[#allocation238_spill] sm:$0xff]  ;;  %v11237_v36 = vld [vmem:[#allocation239_spill] sm:$0xff] }
 0x433   : > { %11219 = vst [vmem:[#allocation178_spill] sm:$0xff] %v8429_v16  ;;  %v2254_v4 = vmul.f32 %v11225_v2, %v2250_v41  ;;  %v2260_v46 = vmul.f32 %v11226_v19, %v2250_v41  ;;  %v11227_v0 = vstv %s11165_s21  ;;  %v2975_v58 = vmax.f32 %v2973_v37, 0.0  ;;  %v11232_v19 = vld [vmem:[#allocation205_spill] sm:$0xff]  ;;  %s11255_s21 = sld [smem:[#allocation131_spill]] }
 0x434   : > { %11224 = vst [vmem:[#allocation188_spill] sm:$0xff] %v8438_v6  ;;  %v8449_v7 = vmul.f32 %v11227_v0, %v2777_v44  ;;  %v3174_v18 = vmax.f32 %v3172_v40, 0.0  ;;  %v11229_v31 = vstv %s11191_s0  ;;  %v3359_v2 = vsub.f32 %v11230_v8, %v3353_v57  ;;  %s8520_s0 = sld [smem:[#allocation5 + $0x75]] }
 0x435   : > { %v3167_v59 = vmul.f32 %v11229_v31, %v3163_v50  ;;  %v1321_v21 = vsub.f32 %v11232_v19, %v1314_v51  ;;  %v11233_v6 = vstv %s8364_s16  ;;  %v11234_v0 = vstv %s8375_s17 }
 0x436   : > { %11228 = vst [vmem:[#allocation257_spill] sm:$0xff] %v8449_v7  ;;  %v2266_v16 = vmul.f32 %v11233_v6, %v2250_v41  ;;  %v2272_v7 = vmul.f32 %v11234_v0, %v2250_v41  ;;  %v11235_v37 = vstv %s11169_s11  ;;  %v8466_v50 = vadd.f32 %v3294_v56, %v11237_v36  ;;  %s8496_s11 = sld [smem:[#allocation5 + $0xe9]] }
 0x437   : > { %v8463_v40 = vmul.f32 %v11235_v37, %v2777_v44  ;;  %v2256_v31 = vadd.f32 %v2254_v4, %v2190_v33  ;;  %v2262_v32 = vadd.f32 %v2260_v46, %v2196_v48  ;;  %v11239_v57 = vstv %s11189_s20  ;;  %v11254_v4 = vld [vmem:[#allocation189_spill] sm:$0xff]  ;;  %11258 = sst [smem:[#allocation65_spill]] %s8500_s24 }
 0x438   : > { %11238 = vst [vmem:[#allocation239_spill] sm:$0xff] %v8466_v50  ;;  %v8472_v8 = vmul.f32 %v11239_v57, %v2975_v58  ;;  %v11241_v51 = vstv %s11190_s15  ;;  %v11243_v6 = vstv %s11199_s9  ;;  %v11246_v0 = vstv %s11201_s8  ;;  %v11256_v37 = vld [vmem:[#allocation151_spill] sm:$0xff]  ;;  %s11259_s20 = sld [smem:[#allocation106_spill]] }
 0x439   : > { %11236 = vst [vmem:[#allocation205_spill] sm:$0xff] %v8463_v40  ;;  %v8476_v19 = vmul.f32 %v11241_v51, %v2975_v58  ;;  %v8480_v41 = vmul.f32 %v11243_v6, %v2975_v58  ;;  %v8484_v44 = vmul.f32 %v11246_v0, %v2975_v58  ;;  %v11249_v33 = vstv %s11231_s14  ;;  %v1373_v51 = vpop.permute.xlu1 %1372  ;;  %s11261_s15 = sld [smem:[#allocation139_spill]] }
 0x43a   : > { %11240 = vst [vmem:[#allocation258_spill] sm:$0xff] %v8472_v8  ;;  %v8490_v48 = vmul.f32 %v11249_v33, %v3174_v18  ;;  %v11252_v56 = vstv %s11207_s28  ;;  %v3361_v46 = vadd.f32 %v3359_v2, %v11254_v4  ;;  %v1323_v57 = vadd.f32 %v1321_v21, %v11256_v37  ;;  %v11263_v21 = vld [vmem:[#allocation204_spill] sm:$0xff]  ;;  %s11271_s9 = sld [smem:[#allocation94_spill]] }
 0x43b   : > { %11242 = vst [vmem:[#allocation259_spill] sm:$0xff] %v8476_v19  ;;  %11245 = vst [vmem:[#allocation260_spill] sm:$0xff] %v8480_v41  ;;  %v3171_v36 = vadd.f32 %v11252_v56, %v3167_v59  ;;  %v2268_v58 = vadd.f32 %v2266_v16, %v2202_v53  ;;  %v2274_v6 = vadd.f32 %v2272_v7, %v2208_v24  ;;  %v11260_v33 = vstv %s11244_s29  ;;  %s8526_s8 = sld [smem:[#allocation5 + $0x95]] }
 0x43c   : > { %11248 = vst [vmem:[#allocation261_spill] sm:$0xff] %v8484_v44  ;;  %11251 = vst [vmem:[#allocation262_spill] sm:$0xff] %v8490_v48  ;;  %11257 = sst [smem:[#allocation64_spill]] %s8496_s11  ;;  %v2322_v0 = vadd.f32 %v8097_v11, %v2256_v31  ;;  %v2328_v50 = vadd.f32 %v8101_v63, %v2262_v32  ;;  %v3365_v2 = vmul.f32 %v11260_v33, %v3361_v46  ;;  %v11262_v56 = vstv %s11247_s25  ;;  %v11272_v46 = vld [vmem:[#allocation216_spill] sm:$0xff] }
 0x43d   : > { %v3173_v59 = vmax.f32 %v3171_v36, 0.0  ;;  %v1327_v4 = vmul.f32 %v11262_v56, %v1323_v57  ;;  %v1379_v37 = vsub.f32 %v11263_v21, %v1373_v51  ;;  %v11264_v48 = vstv %s11250_s4  ;;  %v11270_v36 = vld [vmem:[#allocation218_spill] sm:$0xff]  ;;  %s8537_s28 = sld [smem:[#allocation5 + $0xeb]] }
 0x43e   : > { %v8509_v53 = vmul.f32 %v11264_v48, %v3174_v18  ;;  %v11266_v24 = vstv %s11253_s13  ;;  %v11268_v63 = vstv %s11255_s21  ;;  %v10043_v16 = vstv %s8445_s30  ;;  %s11284_s25 = sld [smem:[#allocation140_spill]] }
 0x43f   : > { %v8513_v11 = vmul.f32 %v11266_v24, %v3174_v18  ;;  %v8517_v32 = vmul.f32 %v11268_v63, %v3174_v18  ;;  %v2334_v7 = vadd.f32 %v8105_v62, %v2268_v58  ;;  %v2340_v31 = vadd.f32 %v8109_v47, %v2274_v6  ;;  %v11277_v63 = vld [vmem:[#allocation153_spill] sm:$0xff]  ;;  %s11288_s29 = sld [smem:[#allocation95_spill]] }
 0x440   : > { %11265 = vst [vmem:[#allocation189_spill] sm:$0xff] %v8509_v53  ;;  %v2388_v48 = vadd.f32 %v11270_v36, %v2322_v0  ;;  %v2394_v57 = vadd.f32 %v11272_v46, %v2328_v50  ;;  %v11273_v51 = vstv %s11231_s14  ;;  %v11275_v33 = vstv %s11259_s20  ;;  %s11282_s14 = sld [smem:[#allocation104_spill]]  ;;  %v1505_v0 = vpop.permute.xlu1 %1504  ;;  %v11314_v53 = vld [vmem:[#allocation159_spill] sm:$0xff] }
 0x441   : > { %11267 = vst [vmem:[#allocation151_spill] sm:$0xff] %v8513_v11  ;;  %11269 = vst [vmem:[#allocation204_spill] sm:$0xff] %v8517_v32  ;;  %v8530_v18 = vmul.f32 %v11273_v51, %v3173_v59  ;;  %v3369_v56 = vadd.f32 %v11275_v33, %v3365_v2  ;;  %v11276_v21 = vstv %s11261_s15  ;;  %v1381_v62 = vadd.f32 %v1379_v37, %v11277_v63  ;;  %v11283_v2 = vld [vmem:[#allocation227_spill] sm:$0xff]  ;;  %s11285_s15 = sld [smem:[#allocation141_spill]] }
 0x442   : > { %v1331_v24 = vadd.f32 %v11276_v21, %v1327_v4  ;;  %v11278_v47 = vstv %s11250_s4  ;;  %v11280_v58 = vstv %s11253_s13  ;;  %v2442_v4 = vmul.f32 %v10043_v16, %v11283_v2  ;;  %s11286_s20 = sld [smem:[#allocation143_spill]]  ;;  %v11290_v21 = vld [vmem:[#allocation206_spill] sm:$0xff] }
 0x443   : > { %11274 = vst [vmem:[#allocation218_spill] sm:$0xff] %v8530_v18  ;;  %v8541_v50 = vmul.f32 %v11278_v47, %v3173_v59  ;;  %v8545_v6 = vmul.f32 %v11280_v58, %v3173_v59  ;;  %v10044_v36 = vstv %s8459_s1  ;;  %v8551_v37 = vmax.f32 %v3369_v56, 0.0  ;;  %v11294_v18 = vld [vmem:[#allocation247_spill] sm:$0xff]  ;;  %s11295_s4 = sld [smem:[#allocation145_spill]] }
 0x444   : > { %v1333_v46 = vmax.f32 %v1331_v24, 0.0  ;;  %v11289_v51 = vstv %s11271_s9  ;;  %v1511_v63 = vsub.f32 %v11290_v21, %v1505_v0  ;;  %v11291_v47 = vstv %s11255_s21  ;;  %s11296_s13 = sld [smem:[#allocation147_spill]] }
 0x445   : > { %11279 = vst [vmem:[#allocation216_spill] sm:$0xff] %v8541_v50  ;;  %11281 = vst [vmem:[#allocation153_spill] sm:$0xff] %v8545_v6  ;;  %v1385_v33 = vmul.f32 %v11289_v51, %v1381_v62  ;;  %v8558_v58 = vmul.f32 %v11291_v47, %v3173_v59  ;;  %v11293_v6 = vld [vmem:[#allocation222_spill] sm:$0xff]  ;;  %v8562_v2 = vadd.f32 %v11294_v18, %v2340_v31  ;;  %v11299_v51 = vstv %s11284_s25  ;;  %s11304_s21 = sld [smem:[#allocation134_spill]]  ;;  %v1571_v62 = vpop.permute.xlu1 %1570 }
 0x446   : > { %11287 = vst [vmem:[#allocation227_spill] sm:$0xff] %v8551_v37  ;;  %v2400_v50 = vadd.f32 %v11293_v6, %v2334_v7  ;;  %v2446_v16 = vadd.f32 %v10044_v36, %v2442_v4  ;;  %v11297_v0 = vstv %s11282_s14  ;;  %v1337_v7 = vmul.f32 %v11299_v51, %v1333_v46  ;;  %v11303_v36 = vld [vmem:[#allocation154_spill] sm:$0xff]  ;;  %s11305_s9 = sld [smem:[#allocation135_spill]] }
 0x447   : > { %11292 = vst [vmem:[#allocation206_spill] sm:$0xff] %v8558_v58  ;;  %v8573_v59 = vmul.f32 %v11297_v0, %v8551_v37  ;;  %v11300_v6 = vstv %s11285_s15  ;;  %v11302_v21 = vstv %s11288_s29  ;;  %v1513_v32 = vadd.f32 %v1511_v63, %v11303_v36  ;;  %s11306_s14 = sld [smem:[#allocation136_spill]] }
 0x448   : > { %v1341_v31 = vmul.f32 %v11300_v6, %v1333_v46  ;;  %v11301_v18 = vstv %s11286_s20  ;;  %v1389_v47 = vadd.f32 %v11302_v21, %v1385_v33  ;;  %v2448_v24 = vmax.f32 %v2446_v16, 0.0  ;;  %s11308_s25 = sld [smem:[#allocation137_spill]] }
 0x449   : > { %11298 = vst [vmem:[#allocation222_spill] sm:$0xff] %v8573_v59  ;;  %v1345_v4 = vmul.f32 %v11301_v18, %v1333_v46  ;;  %v10047_v0 = vstv %s8520_s0  ;;  %v11307_v56 = vstv %s11295_s4  ;;  %v11309_v59 = vld [vmem:[#allocation207_spill] sm:$0xff]  ;;  %s11310_s15 = sld [smem:[#allocation150_spill]]  ;;  %v11313_v63 = vstv %s8468_s23 }
 0x44a   : > { %v1349_v51 = vmul.f32 %v11307_v56, %v1333_v46  ;;  %v1577_v6 = vsub.f32 %v11309_v59, %v1571_v62  ;;  %s11311_s29 = sld [smem:[#allocation242_spill]]  ;;  %v2508_v18 = vmul.f32 %v10047_v0, %v8081_v29  ;;  %v1391_v21 = vmax.f32 %v1389_v47, 0.0 }
 0x44b   : > { %v11312_v58 = vstv %s11296_s13  ;;  %v2452_v11 = vmul.f32 %v11313_v63, %v2448_v24  ;;  %v11315_v44 = vstv %s8486_s5  ;;  %v11316_v46 = vstv %s8496_s11  ;;  %s11319_s20 = sld [smem:[#allocation243_spill]] }
 0x44c   : > { %v1517_v36 = vmul.f32 %v11312_v58, %v1513_v32  ;;  %v1579_v37 = vadd.f32 %v1577_v6, %v11314_v53  ;;  %v2458_v41 = vmul.f32 %v11315_v44, %v2448_v24  ;;  %v2464_v56 = vmul.f32 %v11316_v46, %v2448_v24  ;;  %v1703_v53 = vpop.permute.xlu1 %1702  ;;  %s11325_s4 = sld [smem:[#allocation152_spill]] }
 0x44d   : > { %v11317_v19 = vstv %s8500_s24  ;;  %v11318_v59 = vstv %s11304_s21  ;;  %v11320_v29 = vstv %s11305_s9  ;;  %v11321_v47 = vstv %s11306_s14  ;;  %s11327_s13 = sld [smem:[#allocation155_spill]] }
 0x44e   : > { %v2470_v62 = vmul.f32 %v11317_v19, %v2448_v24  ;;  %v1395_v8 = vmul.f32 %v11318_v59, %v1391_v21  ;;  %v1401_v0 = vmul.f32 %v11320_v29, %v1391_v21  ;;  %v1407_v33 = vmul.f32 %v11321_v47, %v1391_v21  ;;  %s11328_s24 = sld [smem:[#allocation156_spill]] }
 0x44f   : > { %v11322_v40 = vstv %s11308_s25  ;;  %v11323_v58 = vstv %s11310_s15  ;;  %v2454_v44 = vadd.f32 %v2452_v11, %v2388_v48  ;;  %v11326_v6 = vstv %s8526_s8  ;;  %s8618_s21 = sld [smem:[#allocation5 + $0xec]] }
 0x450   : > { %v1413_v32 = vmul.f32 %v11322_v40, %v1391_v21  ;;  %v1521_v63 = vadd.f32 %v11323_v58, %v1517_v36  ;;  %v11324_v16 = vstv %s11311_s29  ;;  %v2512_v46 = vadd.f32 %v11326_v6, %v2508_v18  ;;  %s11330_s11 = sld [smem:[#allocation157_spill]]  ;;  %v11332_v36 = vld [vmem:[#allocation208_spill] sm:$0xff] }
 0x451   : > { %v1583_v49 = vmul.f32 %v11324_v16, %v1579_v37  ;;  %v1397_v19 = vadd.f32 %v1395_v8, %v1337_v7  ;;  %v1403_v24 = vadd.f32 %v1401_v0, %v1341_v31  ;;  %v1409_v59 = vadd.f32 %v1407_v33, %v1345_v4  ;;  %s11334_s14 = sld [smem:[#allocation244_spill]] }
 0x452   : > { %v1415_v29 = vadd.f32 %v1413_v32, %v1349_v51  ;;  %v1523_v47 = vmax.f32 %v1521_v63, 0.0  ;;  %v11331_v40 = vstv %s11319_s20  ;;  %v1709_v58 = vsub.f32 %v11332_v36, %v1703_v53  ;;  %s11336_s9 = sld [smem:[#allocation245_spill]] }
 0x453   : > { %v1587_v21 = vadd.f32 %v11331_v40, %v1583_v49  ;;  %v2460_v37 = vadd.f32 %v2458_v41, %v2394_v57  ;;  %v1463_v16 = vadd.f32 %v8161_v12, %v1397_v19  ;;  %v1469_v11 = vadd.f32 %v8172_v43, %v1403_v24  ;;  %s11338_s25 = sld [smem:[#allocation246_spill]]  ;;  %v11343_v43 = vld [vmem:[#allocation160_spill] sm:$0xff] }
 0x454   : > { %v1475_v48 = vadd.f32 %v8176_v42, %v1409_v59  ;;  %v1481_v18 = vadd.f32 %v8180_v26, %v1415_v29  ;;  %v11333_v6 = vstv %s11325_s4  ;;  %v11335_v7 = vstv %s11327_s13  ;;  %s11340_s15 = sld [smem:[#allocation58_spill]]  ;;  %v1769_v26 = vpop.permute.xlu1 %1768 }
 0x455   : > { %11329 = sst [smem:[#allocation70_spill]] %s8618_s21  ;;  %v1527_v8 = vmul.f32 %v11333_v6, %v1523_v47  ;;  %v1533_v31 = vmul.f32 %v11335_v7, %v1523_v47  ;;  %v11337_v4 = vstv %s11328_s24  ;;  %v1589_v12 = vmax.f32 %v1587_v21, 0.0 }
 0x456   : > { %v1539_v49 = vmul.f32 %v11337_v4, %v1523_v47  ;;  %v11339_v0 = vstv %s11330_s11  ;;  %s11341_s29 = sld [smem:[#allocation158_spill]]  ;;  %v1711_v42 = vadd.f32 %v1709_v58, %v11343_v43  ;;  %v2466_v57 = vadd.f32 %v2464_v56, %v2400_v50  ;;  %v11351_v50 = vld [vmem:[#allocation209_spill] sm:$0xff] }
 0x457   : > { %v1545_v41 = vmul.f32 %v11339_v0, %v1523_v47  ;;  %s8635_s20 = sld [smem:[#allocation5 + $0xed]]  ;;  %v2514_v51 = vmax.f32 %v2512_v46, 0.0  ;;  %v1529_v33 = vadd.f32 %v1527_v8, %v1463_v16  ;;  %v1535_v32 = vadd.f32 %v1533_v31, %v1469_v11 }
 0x458   : > { %s8638_s4 = sld [smem:[#allocation5 + $0xee]]  ;;  %v1541_v63 = vadd.f32 %v1539_v49, %v1475_v48  ;;  %v11346_v19 = vstv %s11334_s14  ;;  %v11347_v59 = vstv %s11336_s9  ;;  %v1775_v56 = vsub.f32 %v11351_v50, %v1769_v26  ;;  %v11355_v49 = vld [vmem:[#allocation165_spill] sm:$0xff] }
 0x459   : > { %s11345_s24 = sld [smem:[#allocation161_spill]]  ;;  %v1547_v53 = vadd.f32 %v1545_v41, %v1481_v18  ;;  %v1593_v24 = vmul.f32 %v11346_v19, %v1589_v12  ;;  %v1599_v29 = vmul.f32 %v11347_v59, %v1589_v12  ;;  %v11348_v47 = vstv %s11338_s25  ;;  %v1901_v41 = vpop.permute.xlu1 %1900 }
 0x45a   : > { %v1605_v40 = vmul.f32 %v11348_v47, %v1589_v12  ;;  %v11349_v21 = vstv %s11340_s15  ;;  %v11352_v46 = vstv %s8537_s28  ;;  %v2522_v16 = vstv %s8618_s21  ;;  %s8654_s11 = sld [smem:[#allocation5 + $0x78]] }
 0x45b   : > { %v1611_v36 = vmul.f32 %v11349_v21, %v1589_v12  ;;  %v2518_v7 = vmul.f32 %v11352_v46, %v2514_v51  ;;  %s11353_s13 = sld [smem:[#allocation59_spill]]  ;;  %v1595_v11 = vadd.f32 %v1593_v24, %v1529_v33  ;;  %v1601_v48 = vadd.f32 %v1599_v29, %v1535_v32 }
 0x45c   : > { %v11350_v58 = vstv %s11341_s29  ;;  %v1607_v18 = vadd.f32 %v1605_v40, %v1541_v63  ;;  %v1777_v0 = vadd.f32 %v1775_v56, %v11355_v49  ;;  %s11356_s14 = sld [smem:[#allocation163_spill]]  ;;  %v2472_v12 = vadd.f32 %v2470_v62, %v8562_v2  ;;  %v11362_v2 = vld [vmem:[#allocation203_spill] sm:$0xff]  ;;  %v11369_v56 = vld [vmem:[#allocation167_spill] sm:$0xff] }
 0x45d   : > { %11342 = sst [smem:[#allocation71_spill]] %s8635_s20  ;;  %v1715_v6 = vmul.f32 %v11350_v58, %v1711_v42  ;;  %v1613_v8 = vadd.f32 %v1611_v36, %v1547_v53  ;;  %v2524_v43 = vmul.f32 %v2522_v16, %v2514_v51  ;;  %v1661_v42 = vadd.f32 %v8201_v5, %v1595_v11 }
 0x45e   : > { %11344 = sst [smem:[#allocation88_spill]] %s8638_s4  ;;  %v1667_v26 = vadd.f32 %v8209_v9, %v1601_v48  ;;  %v1673_v33 = vadd.f32 %v8213_v25, %v1607_v18  ;;  %v2520_v32 = vadd.f32 %v2518_v7, %v2454_v44  ;;  %v1907_v62 = vsub.f32 %v11362_v2, %v1901_v41  ;;  %v1967_v7 = vpop.permute.xlu1 %1966  ;;  %v11375_v41 = vld [vmem:[#allocation210_spill] sm:$0xff] }
 0x45f   : > { %v11354_v31 = vstv %s11345_s24  ;;  %s11357_s9 = sld [smem:[#allocation164_spill]]  ;;  %v1679_v63 = vadd.f32 %v8217_v38, %v1613_v8  ;;  %v2526_v59 = vadd.f32 %v2524_v43, %v2460_v37  ;;  %v2528_v29 = vstv %s8635_s20 }
 0x460   : > { %v1719_v4 = vadd.f32 %v11354_v31, %v1715_v6  ;;  %s11358_s25 = sld [smem:[#allocation69_spill]]  ;;  %v2534_v47 = vstv %s8638_s4  ;;  %v2586_v5 = vadd.f32 %v8225_v20, %v2520_v32  ;;  %v1909_v46 = vadd.f32 %v1907_v62, %v11369_v56 }
 0x461   : > { %s11359_s15 = sld [smem:[#allocation166_spill]]  ;;  %v11361_v19 = vstv %s11353_s13  ;;  %v2530_v37 = vmul.f32 %v2528_v29, %v2514_v51  ;;  %v2536_v11 = vmul.f32 %v2534_v47, %v2514_v51  ;;  %v2704_v8 = vstv %s8654_s11 }
 0x462   : > { %s11360_s29 = sld [smem:[#allocation60_spill]]  ;;  %v1721_v53 = vmax.f32 %v1719_v4, 0.0  ;;  %v1781_v24 = vmul.f32 %v11361_v19, %v1777_v0  ;;  %v11363_v40 = vstv %s11356_s14  ;;  %v1973_v43 = vsub.f32 %v11375_v41, %v1967_v7 }
 0x463   : > { %s11364_s24 = sld [smem:[#allocation73_spill]]  ;;  %v2532_v32 = vadd.f32 %v2530_v37, %v2466_v57  ;;  %v2592_v51 = vadd.f32 %v8233_v23, %v2526_v59  ;;  %v2033_v59 = vpop.permute.xlu1 %2032 }
 0x464   : > { %v1725_v9 = vmul.f32 %v11363_v40, %v1721_v53  ;;  %s11370_s13 = sld [smem:[#allocation61_spill]] }
 0x465   : > { %v11365_v25 = vstv %s11357_s9  ;;  %s11371_s14 = sld [smem:[#allocation62_spill]] }
 0x466   : > { %v1731_v44 = vmul.f32 %v11365_v25, %v1721_v53  ;;  %v11366_v21 = vstv %s11358_s25  ;;  %v1727_v20 = vadd.f32 %v1725_v9, %v1661_v42  ;;  %s11372_s9 = sld [smem:[#allocation63_spill]]  ;;  %v11376_v42 = vld [vmem:[#allocation220_spill] sm:$0xff]  ;;  %v11383_v25 = vld [vmem:[#allocation168_spill] sm:$0xff] }
 0x467   : > { %v1737_v36 = vmul.f32 %v11366_v21, %v1721_v53  ;;  %v11367_v38 = vstv %s11359_s15  ;;  %s11373_s25 = sld [smem:[#allocation74_spill]]  ;;  %v8695_v19 = vadd.f32 %v11376_v42, %v2586_v5  ;;  %v1975_v23 = vadd.f32 %v1973_v43, %v11383_v25 }
 0x468   : > { %v1743_v58 = vmul.f32 %v11367_v38, %v1721_v53  ;;  %v11368_v6 = vstv %s11360_s29  ;;  %v1733_v48 = vadd.f32 %v1731_v44, %v1667_v26  ;;  %s8691_s15 = sld [smem:[#allocation5 + $0x98]]  ;;  %v2538_v53 = vadd.f32 %v2536_v11, %v2472_v12 }
 0x469   : > { %v1785_v50 = vadd.f32 %v11368_v6, %v1781_v24  ;;  %v1739_v18 = vadd.f32 %v1737_v36, %v1673_v33  ;;  %v11374_v49 = vstv %s11364_s24  ;;  %s8697_s29 = sld [smem:[#allocation5 + $0xf7]]  ;;  %v2598_v5 = vadd.f32 %v8237_v60, %v2532_v32 }
 0x46a   : > { %v1745_v31 = vadd.f32 %v1743_v58, %v1679_v63  ;;  %v1913_v0 = vmul.f32 %v11374_v49, %v1909_v46  ;;  %v11377_v26 = vstv %s11370_s13  ;;  %v11378_v63 = vstv %s7915_s2  ;;  %s11379_s4 = sld [smem:[#allocation175_spill]]  ;;  %v11390_v46 = vld [vmem:[#allocation212_spill] sm:$0xff] }
 0x46b   : > { %v1787_v4 = vmax.f32 %v1785_v50, 0.0  ;;  %v11380_v2 = vstv %s11371_s14  ;;  %s8707_s24 = sld [smem:[#allocation5 + $0xf8]]  ;;  %v2706_v44 = vmul.f32 %v2704_v8, %v8184_v45  ;;  %v2039_v7 = vsub.f32 %v11390_v46, %v2033_v59 }
 0x46c   : > { %v11381_v40 = vstv %s11372_s9  ;;  %s11384_s13 = sld [smem:[#allocation170_spill]]  ;;  %v2604_v60 = vadd.f32 %v8244_v52, %v2538_v53 }
 0x46d   : > { %v1791_v33 = vmul.f32 %v11377_v26, %v1787_v4  ;;  %v1797_v24 = vmul.f32 %v11378_v63, %v1787_v4  ;;  %v1803_v62 = vmul.f32 %v11380_v2, %v1787_v4  ;;  %v1809_v9 = vmul.f32 %v11381_v40, %v1787_v4  ;;  %s8716_s2 = sld [smem:[#allocation5 + $0xf9]] }
 0x46e   : > { %v11382_v57 = vstv %s11373_s25  ;;  %s11385_s20 = sld [smem:[#allocation75_spill]]  ;;  %v11404_v40 = vstv %s7993_s6  ;;  %v2708_v25 = vstv %s8691_s15 }
 0x46f   : > { %v1917_v12 = vadd.f32 %v11382_v57, %v1913_v0  ;;  %v1793_v21 = vadd.f32 %v1791_v33, %v1727_v20  ;;  %s11386_s14 = sld [smem:[#allocation172_spill]]  ;;  %v1799_v36 = vadd.f32 %v1797_v24, %v1733_v48  ;;  %v1805_v38 = vadd.f32 %v1803_v62, %v1739_v18  ;;  %v11391_v20 = vld [vmem:[#allocation221_spill] sm:$0xff]  ;;  %v11403_v24 = vld [vmem:[#allocation249_spill] sm:$0xff] }
 0x470   : > { %s11387_s9 = sld [smem:[#allocation174_spill]]  ;;  %v1811_v58 = vadd.f32 %v1809_v9, %v1745_v31  ;;  %v11389_v50 = vstv %s11379_s4  ;;  %v2658_v48 = vadd.f32 %v11391_v20, %v2592_v51  ;;  %v2165_v51 = vpop.permute.xlu1 %2164  ;;  %v8744_v2 = vadd.f32 %v11403_v24, %v2604_v60  ;;  %v11405_v57 = vld [vmem:[#allocation211_spill] sm:$0xff] }
 0x471   : > { %s11388_s21 = sld [smem:[#allocation79_spill]]  ;;  %v1919_v6 = vmax.f32 %v1917_v12, 0.0  ;;  %v1979_v56 = vmul.f32 %v11389_v50, %v1975_v23  ;;  %v1859_v45 = vadd.f32 %v8252_v22, %v1793_v21  ;;  %v1865_v37 = vadd.f32 %v8261_v28, %v1799_v36 }
 0x472   : > { %s8722_s25 = sld [smem:[#allocation5 + $0xfa]]  ;;  %v1871_v11 = vadd.f32 %v8265_v55, %v1805_v38  ;;  %v1877_v18 = vadd.f32 %v8273_v34, %v1811_v58  ;;  %v11392_v31 = vstv %s11384_s13  ;;  %v11397_v55 = vld [vmem:[#allocation171_spill] sm:$0xff]  ;;  %v11399_v34 = vld [vmem:[#allocation248_spill] sm:$0xff]  ;;  %v2171_v12 = vsub.f32 %v11405_v57, %v2165_v51 }
 0x473   : > { %v1923_v4 = vmul.f32 %v11392_v31, %v1919_v6  ;;  %v2041_v53 = vadd.f32 %v2039_v7, %v11397_v55  ;;  %s11398_s4 = sld [smem:[#allocation80_spill]]  ;;  %v8741_v42 = vadd.f32 %v11399_v34, %v2598_v5  ;;  %v2710_v23 = vadd.f32 %v2708_v25, %v2706_v44 }
 0x474   : > { %v11393_v49 = vstv %s11385_s20  ;;  %s11400_s13 = sld [smem:[#allocation177_spill]]  ;;  %v2714_v59 = vstv %s8697_s29  ;;  %v2720_v5 = vstv %s8707_s24  ;;  %v2726_v21 = vstv %s8716_s2 }
 0x475   : > { %v1929_v0 = vmul.f32 %v11393_v49, %v1919_v6  ;;  %v11394_v41 = vstv %s11386_s14  ;;  %s11401_s20 = sld [smem:[#allocation180_spill]]  ;;  %v1925_v26 = vadd.f32 %v1923_v4, %v1859_v45  ;;  %v2045_v9 = vmul.f32 %v11404_v40, %v2041_v53 }
 0x476   : > { %v1935_v52 = vmul.f32 %v11394_v41, %v1919_v6  ;;  %v11395_v43 = vstv %s11387_s9  ;;  %s11402_s14 = sld [smem:[#allocation81_spill]]  ;;  %v11411_v60 = vstv %s8092_s27  ;;  %v2712_v20 = vmax.f32 %v2710_v23, 0.0 }
 0x477   : > { %v1941_v22 = vmul.f32 %v11395_v43, %v1919_v6  ;;  %v11396_v32 = vstv %s11388_s21  ;;  %v1931_v33 = vadd.f32 %v1929_v0, %v1865_v37  ;;  %s8750_s21 = sld [smem:[#allocation5 + $0x7b]]  ;;  %v2049_v45 = vadd.f32 %v11411_v60, %v2045_v9  ;;  %v11412_v37 = vld [vmem:[#allocation173_spill] sm:$0xff] }
 0x478   : > { %v1983_v28 = vadd.f32 %v11396_v32, %v1979_v56  ;;  %v1937_v63 = vadd.f32 %v1935_v52, %v1871_v11  ;;  %s11406_s9 = sld [smem:[#allocation85_spill]]  ;;  %v2173_v44 = vadd.f32 %v2171_v12, %v11412_v37  ;;  %v2231_v11 = vpop.permute.xlu1 %2230  ;;  %v2732_v31 = vstv %s8722_s25 }
 0x479   : > { %v11407_v36 = vstv %s11398_s4  ;;  %v1943_v4 = vadd.f32 %v1941_v22, %v1877_v18  ;;  %s11413_s6 = sld [smem:[#allocation86_spill]]  ;;  %v2051_v52 = vmax.f32 %v2049_v45, 0.0  ;;  %v2716_v53 = vmul.f32 %v2714_v59, %v2712_v20 }
 0x47a   : > { %v1985_v62 = vmax.f32 %v1983_v28, 0.0  ;;  %v11408_v58 = vstv %s11400_s13  ;;  %v11415_v28 = vld [vmem:[#allocation217_spill] sm:$0xff]  ;;  %v2722_v34 = vmul.f32 %v2720_v5, %v2712_v20  ;;  %v2728_v24 = vmul.f32 %v2726_v21, %v2712_v20  ;;  %s11422_s27 = sld [smem:[#allocation182_spill]] }
 0x47b   : > { %v11409_v50 = vstv %s11401_s20  ;;  %v2237_v55 = vsub.f32 %v11415_v28, %v2231_v11  ;;  %v2734_v18 = vmul.f32 %v2732_v31, %v2712_v20  ;;  %v11416_v22 = vstv %s8111_s12  ;;  %s11423_s4 = sld [smem:[#allocation91_spill]]  ;;  %v11427_v11 = vld [vmem:[#allocation213_spill] sm:$0xff] }
 0x47c   : > { %v1989_v38 = vmul.f32 %v11407_v36, %v1985_v62  ;;  %v1995_v6 = vmul.f32 %v11408_v58, %v1985_v62  ;;  %v2001_v56 = vmul.f32 %v11409_v50, %v1985_v62  ;;  %v11410_v46 = vstv %s11402_s14  ;;  %v11421_v36 = vld [vmem:[#allocation176_spill] sm:$0xff]  ;;  %v2363_v58 = vpop.permute.xlu1 %2362  ;;  %s11424_s13 = sld [smem:[#allocation92_spill]] }
 0x47d   : > { %v2007_v7 = vmul.f32 %v11410_v46, %v1985_v62  ;;  %v11418_v62 = vstv %s8130_s7  ;;  %v11419_v9 = vstv %s8168_s26  ;;  %v2902_v50 = vstv %s8750_s21  ;;  %s11425_s20 = sld [smem:[#allocation97_spill]] }
 0x47e   : > { %v1991_v49 = vadd.f32 %v1989_v38, %v1925_v26  ;;  %v1997_v0 = vadd.f32 %v1995_v6, %v1931_v33  ;;  %v2003_v41 = vadd.f32 %v2001_v56, %v1937_v63  ;;  %v11414_v43 = vstv %s11406_s9  ;;  %s8814_s12 = sld [smem:[#allocation5 + $0x9b]] }
 0x47f   : > { %v2177_v32 = vmul.f32 %v11414_v43, %v2173_v44  ;;  %v2009_v51 = vadd.f32 %v2007_v7, %v1943_v4  ;;  %v2055_v26 = vmul.f32 %v11416_v22, %v2051_v52  ;;  %v11417_v33 = vstv %s8118_s10  ;;  %s11429_s10 = sld [smem:[#allocation33_spill]] }
 0x480   : > { %v2061_v63 = vmul.f32 %v11417_v33, %v2051_v52  ;;  %v2067_v40 = vmul.f32 %v11418_v62, %v2051_v52  ;;  %v2073_v57 = vmul.f32 %v11419_v9, %v2051_v52  ;;  %v11420_v12 = vstv %s11413_s6  ;;  %s11435_s7 = sld [smem:[#allocation98_spill]] }
 0x481   : > { %v2181_v23 = vadd.f32 %v11420_v12, %v2177_v32  ;;  %v2239_v38 = vadd.f32 %v2237_v55, %v11421_v36  ;;  %v2718_v6 = vadd.f32 %v2716_v53, %v8695_v19  ;;  %v2057_v56 = vadd.f32 %v2055_v26, %v1991_v49  ;;  %s8820_s26 = sld [smem:[#allocation5 + $0x103]] }
 0x482   : > { %v2063_v46 = vadd.f32 %v2061_v63, %v1997_v0  ;;  %v2069_v7 = vadd.f32 %v2067_v40, %v2003_v41  ;;  %v2075_v60 = vadd.f32 %v2073_v57, %v2009_v51  ;;  %v11426_v37 = vstv %s8219_s3  ;;  %s8827_s3 = sld [smem:[#allocation5 + $0x104]] }
 0x483   : > { %v2183_v45 = vmax.f32 %v2181_v23, 0.0  ;;  %v2243_v44 = vmul.f32 %v11426_v37, %v2239_v38  ;;  %v2369_v20 = vsub.f32 %v11427_v11, %v2363_v58  ;;  %v2724_v4 = vadd.f32 %v2722_v34, %v2658_v48  ;;  %v11434_v48 = vld [vmem:[#allocation179_spill] sm:$0xff]  ;;  %v11437_v23 = vld [vmem:[#allocation225_spill] sm:$0xff]  ;;  %v11438_v58 = vld [vmem:[#allocation224_spill] sm:$0xff]  ;;  %s8848_s14 = sld [smem:[#allocation5 + $0x7e]] }
 0x484   : > { %v2123_v52 = vadd.f32 %v8289_v1, %v2057_v56  ;;  %v2129_v43 = vadd.f32 %v8299_v35, %v2063_v46  ;;  %v2135_v19 = vadd.f32 %v8303_v14, %v2069_v7  ;;  %v2141_v32 = vadd.f32 %v8307_v3, %v2075_v60  ;;  %v2429_v1 = vpop.permute.xlu1 %2428  ;;  %s8856_s9 = sld [smem:[#allocation5 + $0x106]] }
 0x485   : > { %v11428_v28 = vstv %s11422_s27  ;;  %v11430_v0 = vstv %s11423_s4  ;;  %v11431_v55 = vstv %s11424_s13  ;;  %v11432_v51 = vstv %s11425_s20  ;;  %s11461_s6 = sld [smem:[#allocation65_spill]] }
 0x486   : > { %v2187_v49 = vmul.f32 %v11428_v28, %v2183_v45  ;;  %v2193_v41 = vmul.f32 %v11430_v0, %v2183_v45  ;;  %v2199_v53 = vmul.f32 %v11431_v55, %v2183_v45  ;;  %v2205_v22 = vmul.f32 %v11432_v51, %v2183_v45  ;;  %v11451_v55 = vld [vmem:[#allocation228_spill] sm:$0xff]  ;;  %s11464_s27 = sld [smem:[#allocation34_spill]] }
 0x487   : > { %v11433_v26 = vstv %s8295_s18  ;;  %v2371_v34 = vadd.f32 %v2369_v20, %v11434_v48  ;;  %v2730_v35 = vadd.f32 %v2728_v24, %v8741_v42  ;;  %v2784_v14 = vadd.f32 %v8311_v15, %v2718_v6  ;;  %s8837_s18 = sld [smem:[#allocation5 + $0x105]]  ;;  %v11445_v20 = vld [vmem:[#allocation229_spill] sm:$0xff]  ;;  %v11452_v51 = vld [vmem:[#allocation250_spill] sm:$0xff] }
 0x488   : > { %v2247_v33 = vadd.f32 %v11433_v26, %v2243_v44  ;;  %v2189_v3 = vadd.f32 %v2187_v49, %v2123_v52  ;;  %v2195_v63 = vadd.f32 %v2193_v41, %v2129_v43  ;;  %v2201_v62 = vadd.f32 %v2199_v53, %v2135_v19  ;;  %v11444_v44 = vld [vmem:[#allocation181_spill] sm:$0xff]  ;;  %v2495_v11 = vpop.permute.xlu1 %2494  ;;  %s11474_s4 = sld [smem:[#allocation35_spill]] }
 0x489   : > { %v2736_v40 = vadd.f32 %v2734_v18, %v8744_v2  ;;  %v11436_v57 = vstv %s11429_s10  ;;  %v2435_v36 = vsub.f32 %v11437_v23, %v2429_v1  ;;  %v2790_v42 = vadd.f32 %v8319_v10, %v2724_v4  ;;  %s11482_s13 = sld [smem:[#allocation38_spill]] }
 0x48a   : > { %v2249_v9 = vmax.f32 %v2247_v33, 0.0  ;;  %v2375_v12 = vmul.f32 %v11436_v57, %v2371_v34  ;;  %v2207_v15 = vadd.f32 %v2205_v22, %v2141_v32  ;;  %v2796_v24 = vadd.f32 %v8326_v61, %v2730_v35  ;;  %v11458_v57 = vld [vmem:[#allocation186_spill] sm:$0xff]  ;;  %s11483_s20 = sld [smem:[#allocation40_spill]] }
 0x48b   : > { %v2802_v38 = vadd.f32 %v8333_v17, %v2736_v40  ;;  %v8825_v2 = vadd.f32 %v11438_v58, %v2784_v14  ;;  %v11439_v18 = vstv %s8313_s22  ;;  %v11440_v56 = vstv %s8347_s19  ;;  %s11446_s22 = sld [smem:[#allocation87_spill]] }
 0x48c   : > { %v2253_v6 = vmul.f32 %v11439_v18, %v2249_v9  ;;  %v2259_v46 = vmul.f32 %v11440_v56, %v2249_v9  ;;  %v11441_v7 = vstv %s8364_s16  ;;  %v11442_v60 = vstv %s8375_s17  ;;  %s11447_s19 = sld [smem:[#allocation93_spill]]  ;;  %v11463_v56 = vld [vmem:[#allocation215_spill] sm:$0xff] }
 0x48d   : > { %v2265_v10 = vmul.f32 %v11441_v7, %v2249_v9  ;;  %v2271_v45 = vmul.f32 %v11442_v60, %v2249_v9  ;;  %v11443_v37 = vstv %s11435_s7  ;;  %v2437_v17 = vadd.f32 %v2435_v36, %v11444_v44  ;;  %s11448_s16 = sld [smem:[#allocation185_spill]] }
 0x48e   : > { %v2379_v61 = vadd.f32 %v11443_v37, %v2375_v12  ;;  %v8843_v4 = vadd.f32 %v11445_v20, %v2790_v42  ;;  %v2904_v52 = vmul.f32 %v2902_v50, %v8278_v39  ;;  %v2255_v43 = vadd.f32 %v2253_v6, %v2189_v3  ;;  %s11449_s17 = sld [smem:[#allocation187_spill]]  ;;  %v11459_v12 = vld [vmem:[#allocation251_spill] sm:$0xff] }
 0x48f   : > { %v2261_v19 = vadd.f32 %v2259_v46, %v2195_v63  ;;  %v2267_v32 = vadd.f32 %v2265_v10, %v2201_v62  ;;  %v2273_v28 = vadd.f32 %v2271_v45, %v2207_v15  ;;  %v11450_v0 = vstv %s8445_s30  ;;  %s11460_s30 = sld [smem:[#allocation64_spill]] }
 0x490   : > { %v2381_v49 = vmax.f32 %v2379_v61, 0.0  ;;  %v2441_v41 = vmul.f32 %v11450_v0, %v2437_v17  ;;  %v2501_v53 = vsub.f32 %v11451_v55, %v2495_v11  ;;  %v8854_v22 = vadd.f32 %v11452_v51, %v2796_v24  ;;  %s11484_s10 = sld [smem:[#allocation41_spill]] }
 0x491   : > { %v2321_v39 = vadd.f32 %v8340_v30, %v2255_v43  ;;  %v2327_v26 = vadd.f32 %v8351_v27, %v2261_v19  ;;  %v2333_v33 = vadd.f32 %v8355_v54, %v2267_v32  ;;  %v2339_v48 = vadd.f32 %v8359_v13, %v2273_v28  ;;  %v2627_v54 = vpop.permute.xlu1 %2626  ;;  %v11470_v28 = vld [vmem:[#allocation190_spill] sm:$0xff]  ;;  %s11497_s11 = sld [smem:[#allocation44_spill]] }
 0x492   : > { %v11453_v34 = vstv %s11446_s22  ;;  %v11454_v35 = vstv %s11447_s19  ;;  %v11457_v9 = vstv %s8459_s1  ;;  %v2503_v27 = vadd.f32 %v2501_v53, %v11458_v57  ;;  %s8883_s1 = sld [smem:[#allocation5 + $0x9e]] }
 0x493   : > { %v2385_v1 = vmul.f32 %v11453_v34, %v2381_v49  ;;  %v2391_v14 = vmul.f32 %v11454_v35, %v2381_v49  ;;  %v11455_v3 = vstv %s11448_s16  ;;  %v2445_v30 = vadd.f32 %v11457_v9, %v2441_v41  ;;  %v11477_v35 = vld [vmem:[#allocation231_spill] sm:$0xff]  ;;  %s8952_s15 = sld [smem:[#allocation5 + $0x10f]] }
 0x494   : > { %v2397_v63 = vmul.f32 %v11455_v3, %v2381_v49  ;;  %v11456_v62 = vstv %s11449_s17  ;;  %v8874_v13 = vadd.f32 %v11459_v12, %v2802_v38  ;;  %v2906_v23 = vstv %s8814_s12  ;;  %s8958_s7 = sld [smem:[#allocation5 + $0x110]] }
 0x495   : > { %v2403_v40 = vmul.f32 %v11456_v62, %v2381_v49  ;;  %v2387_v36 = vadd.f32 %v2385_v1, %v2321_v39  ;;  %v2393_v42 = vadd.f32 %v2391_v14, %v2327_v26  ;;  %v2912_v24 = vstv %s8820_s26  ;;  %v2693_v0 = vpop.permute.xlu1 %2692  ;;  %v11475_v26 = vld [vmem:[#allocation146_spill] sm:$0xff]  ;;  %s8968_s22 = sld [smem:[#allocation5 + $0x111]] }
 0x496   : > { %v2399_v15 = vadd.f32 %v2397_v63, %v2333_v33  ;;  %v2447_v58 = vmax.f32 %v2445_v30, 0.0  ;;  %v11462_v18 = vstv %s8520_s0  ;;  %v2633_v46 = vsub.f32 %v11463_v56, %v2627_v54  ;;  %s11507_s19 = sld [smem:[#allocation46_spill]] }
 0x497   : > { %v2507_v6 = vmul.f32 %v11462_v18, %v2503_v27  ;;  %v2908_v7 = vadd.f32 %v2906_v23, %v2904_v52  ;;  %v2405_v38 = vadd.f32 %v2403_v40, %v2339_v48  ;;  %v2918_v10 = vstv %s8827_s3  ;;  %s11508_s29 = sld [smem:[#allocation47_spill]] }
 0x498   : > { %v2924_v60 = vstv %s8837_s18  ;;  %v3100_v45 = vstv %s8848_s14  ;;  %v11465_v37 = vstv %s8468_s23  ;;  %v11466_v44 = vstv %s8486_s5  ;;  %s11509_s24 = sld [smem:[#allocation49_spill]] }
 0x499   : > { %v2451_v61 = vmul.f32 %v11465_v37, %v2447_v58  ;;  %v2457_v17 = vmul.f32 %v11466_v44, %v2447_v58  ;;  %v11467_v11 = vstv %s11460_s30  ;;  %v11468_v43 = vstv %s11461_s6  ;;  %v2825_v18 = vpop.permute.xlu1 %2824  ;;  %v11485_v37 = vld [vmem:[#allocation219_spill] sm:$0xff]  ;;  %s8976_s16 = sld [smem:[#allocation5 + $0x112]] }
 0x49a   : > { %v2463_v20 = vmul.f32 %v11467_v11, %v2447_v58  ;;  %v2469_v19 = vmul.f32 %v11468_v43, %v2447_v58  ;;  %v11469_v32 = vstv %s8526_s8  ;;  %v2635_v49 = vadd.f32 %v2633_v46, %v11470_v28  ;;  %s11481_s8 = sld [smem:[#allocation37_spill]] }
 0x49b   : > { %v2511_v52 = vadd.f32 %v11469_v32, %v2507_v6  ;;  %v2910_v41 = vmax.f32 %v2908_v7, 0.0  ;;  %v2930_v55 = vstv %s8856_s9  ;;  %v2453_v53 = vadd.f32 %v2451_v61, %v2387_v36  ;;  %v11489_v32 = vld [vmem:[#allocation149_spill] sm:$0xff]  ;;  %s11510_s2 = sld [smem:[#allocation50_spill]] }
 0x49c   : > { %v2459_v51 = vadd.f32 %v2457_v17, %v2393_v42  ;;  %v2465_v39 = vadd.f32 %v2463_v20, %v2399_v15  ;;  %v3102_v33 = vmul.f32 %v3100_v45, %v11475_v26  ;;  %v11476_v34 = vstv %s11464_s27  ;;  %v11480_v15 = vld [vmem:[#allocation191_spill] sm:$0xff]  ;;  %v11486_v17 = vld [vmem:[#allocation233_spill] sm:$0xff]  ;;  %v11487_v20 = vld [vmem:[#allocation232_spill] sm:$0xff]  ;;  %s11517_s25 = sld [smem:[#allocation36_spill]] }
 0x49d   : > { %v2513_v48 = vmax.f32 %v2511_v52, 0.0  ;;  %v2639_v1 = vmul.f32 %v11476_v34, %v2635_v49  ;;  %v2699_v14 = vsub.f32 %v11477_v35, %v2693_v0  ;;  %v2914_v3 = vmul.f32 %v2912_v24, %v2910_v41  ;;  %s11524_s21 = sld [smem:[#allocation52_spill]] }
 0x49e   : > { %v2471_v63 = vadd.f32 %v2469_v19, %v2405_v38  ;;  %v2920_v62 = vmul.f32 %v2918_v10, %v2910_v41  ;;  %v2926_v40 = vmul.f32 %v2924_v60, %v2910_v41  ;;  %v2932_v9 = vmul.f32 %v2930_v55, %v2910_v41  ;;  %s9008_s12 = sld [smem:[#allocation5 + $0x81]] }
 0x49f   : > { %v11478_v30 = vstv %s8537_s28  ;;  %v2523_v27 = vmul.f32 %v2522_v16, %v2513_v48  ;;  %v2529_v54 = vmul.f32 %v2528_v29, %v2513_v48  ;;  %v2535_v12 = vmul.f32 %v2534_v47, %v2513_v48  ;;  %s11491_s28 = sld [smem:[#allocation43_spill]] }
 0x4a0   : > { %v2517_v57 = vmul.f32 %v11478_v30, %v2513_v48  ;;  %v11479_v36 = vstv %s11474_s4  ;;  %v2701_v58 = vadd.f32 %v2699_v14, %v11480_v15  ;;  %v2916_v6 = vadd.f32 %v2914_v3, %v8825_v2  ;;  %v11488_v2 = vld [vmem:[#allocation148_spill] sm:$0xff]  ;;  %v2891_v14 = vpop.permute.xlu1 %2890  ;;  %s9018_s17 = sld [smem:[#allocation5 + $0xa1]] }
 0x4a1   : > { %v2643_v42 = vadd.f32 %v11479_v36, %v2639_v1  ;;  %v3104_v56 = vstv %s8883_s1  ;;  %v2525_v7 = vadd.f32 %v2523_v27, %v2459_v51  ;;  %v2531_v16 = vadd.f32 %v2529_v54, %v2465_v39  ;;  %v11496_v1 = vld [vmem:[#allocation162_spill] sm:$0xff]  ;;  %s9025_s30 = sld [smem:[#allocation5 + $0x11b]] }
 0x4a2   : > { %v2519_v46 = vadd.f32 %v2517_v57, %v2453_v53  ;;  %v2537_v38 = vadd.f32 %v2535_v12, %v2471_v63  ;;  %v2705_v47 = vmul.f32 %v2704_v8, %v2701_v58  ;;  %v2831_v61 = vsub.f32 %v11485_v37, %v2825_v18  ;;  %v11499_v12 = vld [vmem:[#allocation169_spill] sm:$0xff]  ;;  %s11528_s26 = sld [smem:[#allocation53_spill]] }
 0x4a3   : > { %v2645_v29 = vmax.f32 %v2643_v42, 0.0  ;;  %v2922_v44 = vadd.f32 %v2920_v62, %v8843_v4  ;;  %v2591_v43 = vadd.f32 %v11487_v20, %v2525_v7  ;;  %v2597_v19 = vadd.f32 %v11488_v2, %v2531_v16  ;;  %v11495_v4 = vld [vmem:[#allocation192_spill] sm:$0xff]  ;;  %v11501_v42 = vld [vmem:[#allocation237_spill] sm:$0xff]  ;;  %v11502_v58 = vld [vmem:[#allocation234_spill] sm:$0xff]  ;;  %s11529_s3 = sld [smem:[#allocation39_spill]] }
 0x4a4   : > { %v2585_v11 = vadd.f32 %v11486_v17, %v2519_v46  ;;  %v2603_v52 = vadd.f32 %v11489_v32, %v2537_v38  ;;  %v11490_v28 = vstv %s11481_s8  ;;  %v11492_v0 = vstv %s11482_s13  ;;  %v11511_v2 = vld [vmem:[#allocation223_spill] sm:$0xff]  ;;  %s11530_s18 = sld [smem:[#allocation55_spill]] }
 0x4a5   : > { %v2649_v49 = vmul.f32 %v11490_v28, %v2645_v29  ;;  %v2655_v41 = vmul.f32 %v11492_v0, %v2645_v29  ;;  %v11493_v53 = vstv %s11483_s20  ;;  %v11494_v8 = vstv %s11484_s10  ;;  %v11512_v32 = vld [vmem:[#allocation253_spill] sm:$0xff]  ;;  %v11513_v28 = vld [vmem:[#allocation178_spill] sm:$0xff]  ;;  %s11531_s9 = sld [smem:[#allocation56_spill]] }
 0x4a6   : > { %v2661_v51 = vmul.f32 %v11493_v53, %v2645_v29  ;;  %v2667_v39 = vmul.f32 %v11494_v8, %v2645_v29  ;;  %v2709_v26 = vadd.f32 %v2708_v25, %v2705_v47  ;;  %v2833_v48 = vadd.f32 %v2831_v61, %v11495_v4  ;;  %v11505_v47 = vld [vmem:[#allocation193_spill] sm:$0xff]  ;;  %v3023_v61 = vpop.permute.xlu1 %3022  ;;  %s11532_s6 = sld [smem:[#allocation108_spill]] }
 0x4a7   : > { %v2928_v34 = vadd.f32 %v2926_v40, %v8854_v22  ;;  %v2982_v35 = vadd.f32 %v11496_v1, %v2916_v6  ;;  %v2651_v3 = vadd.f32 %v2649_v49, %v2585_v11  ;;  %v2657_v63 = vadd.f32 %v2655_v41, %v2591_v43  ;;  %v11500_v22 = vld [vmem:[#allocation214_spill] sm:$0xff]  ;;  %v11515_v41 = vld [vmem:[#allocation257_spill] sm:$0xff]  ;;  %s9027_s27 = sld [smem:[#allocation5 + $0x11c]] }
 0x4a8   : > { %v2663_v62 = vadd.f32 %v2661_v51, %v2597_v19  ;;  %v2934_v30 = vadd.f32 %v2932_v9, %v8874_v13  ;;  %v2669_v57 = vadd.f32 %v2667_v39, %v2603_v52  ;;  %v2711_v27 = vmax.f32 %v2709_v26, 0.0  ;;  %v11503_v6 = vld [vmem:[#allocation252_spill] sm:$0xff]  ;;  %v11516_v51 = vld [vmem:[#allocation205_spill] sm:$0xff]  ;;  %s11533_s0 = sld [smem:[#allocation109_spill]] }
 0x4a9   : > { %v11498_v25 = vstv %s11491_s28  ;;  %v2988_v36 = vadd.f32 %v11499_v12, %v2922_v44  ;;  %v2994_v40 = vadd.f32 %v11500_v22, %v2928_v34  ;;  %v2897_v18 = vsub.f32 %v11502_v58, %v2891_v14  ;;  %v11506_v44 = vld [vmem:[#allocation142_spill] sm:$0xff]  ;;  %s9031_s23 = sld [smem:[#allocation5 + $0x11d]] }
 0x4aa   : > { %v2837_v54 = vmul.f32 %v11498_v25, %v2833_v48  ;;  %v3000_v15 = vadd.f32 %v11501_v42, %v2934_v30  ;;  %v3048_v46 = vadd.f32 %v11503_v6, %v2982_v35  ;;  %v2715_v13 = vmul.f32 %v2714_v59, %v2711_v27  ;;  %v11523_v12 = vld [vmem:[#allocation254_spill] sm:$0xff]  ;;  %s9037_s5 = sld [smem:[#allocation5 + $0x11e]] }
 0x4ab   : > { %v2721_v9 = vmul.f32 %v2720_v5, %v2711_v27  ;;  %v2727_v7 = vmul.f32 %v2726_v21, %v2711_v27  ;;  %v2733_v16 = vmul.f32 %v2732_v31, %v2711_v27  ;;  %v11504_v38 = vstv %s11497_s11  ;;  %s9065_s4 = sld [smem:[#allocation5 + $0x123]] }
 0x4ac   : > { %v2841_v29 = vadd.f32 %v11504_v38, %v2837_v54  ;;  %v2899_v37 = vadd.f32 %v2897_v18, %v11505_v47  ;;  %v3054_v17 = vadd.f32 %v11506_v44, %v2988_v36  ;;  %v3106_v59 = vadd.f32 %v3104_v56, %v3102_v33  ;;  %v11514_v33 = vld [vmem:[#allocation188_spill] sm:$0xff]  ;;  %v11527_v44 = vld [vmem:[#allocation235_spill] sm:$0xff]  ;;  %s11550_s8 = sld [smem:[#allocation42_spill]] }
 0x4ad   : > { %v2717_v5 = vadd.f32 %v2715_v13, %v2651_v3  ;;  %v2723_v21 = vadd.f32 %v2721_v9, %v2657_v63  ;;  %v2729_v31 = vadd.f32 %v2727_v7, %v2663_v62  ;;  %v2735_v11 = vadd.f32 %v2733_v16, %v2669_v57  ;;  %v11522_v3 = vld [vmem:[#allocation194_spill] sm:$0xff]  ;;  %v3089_v57 = vpop.permute.xlu1 %3088  ;;  %s9069_s13 = sld [smem:[#allocation5 + $0x124]] }
 0x4ae   : > { %v2843_v20 = vmax.f32 %v2841_v29, 0.0  ;;  %v2903_v43 = vmul.f32 %v2902_v50, %v2899_v37  ;;  %v3029_v19 = vsub.f32 %v11511_v2, %v3023_v61  ;;  %v3060_v52 = vadd.f32 %v11512_v32, %v2994_v40  ;;  %v11535_v2 = vld [vmem:[#allocation259_spill] sm:$0xff]  ;;  %v11536_v32 = vld [vmem:[#allocation260_spill] sm:$0xff]  ;;  %s9076_s14 = sld [smem:[#allocation5 + $0x127]] }
 0x4af   : > { %v2783_v49 = vadd.f32 %v11513_v28, %v2717_v5  ;;  %v2789_v0 = vadd.f32 %v11514_v33, %v2723_v21  ;;  %v2795_v53 = vadd.f32 %v11515_v41, %v2729_v31  ;;  %v2801_v8 = vadd.f32 %v11516_v51, %v2735_v11  ;;  %s9081_s20 = sld [smem:[#allocation5 + $0x128]] }
 0x4b0   : > { %v11518_v39 = vstv %s11507_s19  ;;  %v11519_v4 = vstv %s11508_s29  ;;  %v11520_v50 = vstv %s11509_s24  ;;  %v11521_v1 = vstv %s11510_s2  ;;  %s11555_s10 = sld [smem:[#allocation45_spill]] }
 0x4b1   : > { %v2847_v26 = vmul.f32 %v11518_v39, %v2843_v20  ;;  %v2853_v48 = vmul.f32 %v11519_v4, %v2843_v20  ;;  %v2859_v34 = vmul.f32 %v11520_v50, %v2843_v20  ;;  %v2865_v35 = vmul.f32 %v11521_v1, %v2843_v20  ;;  %v11534_v20 = vld [vmem:[#allocation258_spill] sm:$0xff]  ;;  %s9087_s1 = sld [smem:[#allocation5 + $0x125]] }
 0x4b2   : > { %v2907_v14 = vadd.f32 %v2906_v23, %v2903_v43  ;;  %v3031_v63 = vadd.f32 %v3029_v19, %v11522_v3  ;;  %v3108_v62 = vmax.f32 %v3106_v59, 0.0  ;;  %v3110_v30 = vstv %s8952_s15  ;;  %v11545_v1 = vld [vmem:[#allocation262_spill] sm:$0xff]  ;;  %s9092_s28 = sld [smem:[#allocation5 + $0x129]] }
 0x4b3   : > { %v2849_v27 = vadd.f32 %v2847_v26, %v2783_v49  ;;  %v2855_v25 = vadd.f32 %v2853_v48, %v2789_v0  ;;  %v2861_v54 = vadd.f32 %v2859_v34, %v2795_v53  ;;  %v3066_v36 = vadd.f32 %v11523_v12, %v3000_v15  ;;  %v11537_v49 = vld [vmem:[#allocation261_spill] sm:$0xff]  ;;  %s9102_s11 = sld [smem:[#allocation5 + $0x126]] }
 0x4b4   : > { %v2909_v22 = vmax.f32 %v2907_v14, 0.0  ;;  %v11525_v40 = vstv %s11517_s25  ;;  %v3112_v42 = vmul.f32 %v3110_v30, %v3108_v62  ;;  %v3116_v58 = vstv %s8958_s7  ;;  %v11542_v26 = vld [vmem:[#allocation227_spill] sm:$0xff]  ;;  %s9111_s19 = sld [smem:[#allocation5 + $0x12a]] }
 0x4b5   : > { %v3035_v23 = vmul.f32 %v11525_v40, %v3031_v63  ;;  %v2867_v18 = vadd.f32 %v2865_v35, %v2801_v8  ;;  %v3118_v6 = vmul.f32 %v3116_v58, %v3108_v62  ;;  %v3122_v13 = vstv %s8968_s22  ;;  %v11546_v14 = vld [vmem:[#allocation195_spill] sm:$0xff]  ;;  %v11549_v40 = vld [vmem:[#allocation226_spill] sm:$0xff]  ;;  %s11563_s15 = sld [smem:[#allocation48_spill]] }
 0x4b6   : > { %v3128_v9 = vstv %s8976_s16  ;;  %v2913_v7 = vmul.f32 %v2912_v24, %v2909_v22  ;;  %v2919_v16 = vmul.f32 %v2918_v10, %v2909_v22  ;;  %v2925_v15 = vmul.f32 %v2924_v60, %v2909_v22  ;;  %s11564_s7 = sld [smem:[#allocation51_spill]] }
 0x4b7   : > { %v2931_v38 = vmul.f32 %v2930_v55, %v2909_v22  ;;  %v11526_v29 = vstv %s11524_s21  ;;  %v3114_v37 = vadd.f32 %v3112_v42, %v3048_v46  ;;  %v3124_v61 = vmul.f32 %v3122_v13, %v3108_v62  ;;  %v3221_v55 = vpop.permute.xlu1 %3220  ;;  %s11565_s22 = sld [smem:[#allocation54_spill]] }
 0x4b8   : > { %v3039_v47 = vadd.f32 %v11526_v29, %v3035_v23  ;;  %v3095_v59 = vsub.f32 %v11527_v44, %v3089_v57  ;;  %v2915_v5 = vadd.f32 %v2913_v7, %v2849_v27  ;;  %v2921_v24 = vadd.f32 %v2919_v16, %v2855_v25  ;;  %v11547_v57 = vld [vmem:[#allocation189_spill] sm:$0xff]  ;;  %s11566_s29 = sld [smem:[#allocation57_spill]] }
 0x4b9   : > { %v2927_v10 = vadd.f32 %v2925_v15, %v2861_v54  ;;  %v2933_v60 = vadd.f32 %v2931_v38, %v2867_v18  ;;  %v3120_v21 = vadd.f32 %v3118_v6, %v3054_v17  ;;  %v3126_v31 = vadd.f32 %v3124_v61, %v3060_v52  ;;  %v11548_v25 = vld [vmem:[#allocation151_spill] sm:$0xff]  ;;  %v11552_v38 = vld [vmem:[#allocation204_spill] sm:$0xff]  ;;  %s9113_s24 = sld [smem:[#allocation5 + $0x12b]] }
 0x4ba   : > { %v3041_v46 = vmax.f32 %v3039_v47, 0.0  ;;  %v3130_v11 = vmul.f32 %v3128_v9, %v3108_v62  ;;  %v2981_v43 = vadd.f32 %v11534_v20, %v2915_v5  ;;  %v2987_v19 = vadd.f32 %v11535_v2, %v2921_v24  ;;  %v11553_v47 = vld [vmem:[#allocation197_spill] sm:$0xff]  ;;  %v11554_v24 = vld [vmem:[#allocation236_spill] sm:$0xff]  ;;  %s11567_s16 = sld [smem:[#allocation241_spill]] }
 0x4bb   : > { %v2993_v28 = vadd.f32 %v11536_v32, %v2927_v10  ;;  %v2999_v33 = vadd.f32 %v11537_v49, %v2933_v60  ;;  %v11538_v0 = vstv %s11528_s26  ;;  %v11539_v17 = vstv %s11529_s3  ;;  %v3287_v18 = vpop.permute.xlu1 %3286  ;;  %v11558_v20 = vld [vmem:[#allocation201_spill] sm:$0xff]  ;;  %s9117_s2 = sld [smem:[#allocation5 + $0x12f]] }
 0x4bc   : > { %v3045_v41 = vmul.f32 %v11538_v0, %v3041_v46  ;;  %v3051_v52 = vmul.f32 %v11539_v17, %v3041_v46  ;;  %v11540_v53 = vstv %s11530_s18  ;;  %v11541_v8 = vstv %s11531_s9  ;;  %v11559_v2 = vld [vmem:[#allocation144_spill] sm:$0xff]  ;;  %s9123_s25 = sld [smem:[#allocation5 + $0x133]] }
 0x4bd   : > { %v3057_v51 = vmul.f32 %v11540_v53, %v3041_v46  ;;  %v3063_v39 = vmul.f32 %v11541_v8, %v3041_v46  ;;  %v11543_v4 = vstv %s11532_s6  ;;  %v11544_v50 = vstv %s11533_s0  ;;  %v11560_v32 = vld [vmem:[#allocation255_spill] sm:$0xff]  ;;  %v11562_v8 = vld [vmem:[#allocation256_spill] sm:$0xff]  ;;  %s9133_s21 = sld [smem:[#allocation5 + $0x137]] }
 0x4be   : > { %v9050_v48 = vmul.f32 %v11543_v4, %v11542_v26  ;;  %v9055_v34 = vmul.f32 %v11544_v50, %v11542_v26  ;;  %v3180_v35 = vadd.f32 %v11545_v1, %v3114_v37  ;;  %v3097_v3 = vadd.f32 %v3095_v59, %v11546_v14  ;;  %v11568_v14 = vld [vmem:[#allocation218_spill] sm:$0xff]  ;;  %s9153_s26 = sld [smem:[#allocation5 + $0x130]] }
 0x4bf   : > { %v3047_v63 = vadd.f32 %v3045_v41, %v2981_v43  ;;  %v3132_v62 = vadd.f32 %v3130_v11, %v3066_v36  ;;  %v3186_v27 = vadd.f32 %v11547_v57, %v3120_v21  ;;  %v3192_v54 = vadd.f32 %v11548_v25, %v3126_v31  ;;  %v11551_v36 = vld [vmem:[#allocation239_spill] sm:$0xff]  ;;  %v11557_v21 = vld [vmem:[#allocation230_spill] sm:$0xff]  ;;  %s11578_s3 = sld [smem:[#allocation132_spill]] }
 0x4c0   : > { %v3053_v12 = vadd.f32 %v3051_v52, %v2987_v19  ;;  %v3101_v22 = vmul.f32 %v3100_v45, %v3097_v3  ;;  %v3227_v23 = vsub.f32 %v11549_v40, %v3221_v55  ;;  %v3298_v42 = vstv %s9008_s12  ;;  %v11570_v57 = vld [vmem:[#allocation153_spill] sm:$0xff]  ;;  %s9140_s12 = sld [smem:[#allocation5 + $0x13b]] }
 0x4c1   : > { %v3059_v6 = vadd.f32 %v3057_v51, %v2993_v28  ;;  %v3065_v7 = vadd.f32 %v3063_v39, %v2999_v33  ;;  %v3300_v16 = vmul.f32 %v3298_v42, %v11551_v36  ;;  %v3302_v15 = vstv %s9018_s17  ;;  %v11571_v25 = vld [vmem:[#allocation206_spill] sm:$0xff]  ;;  %v3357_v36 = vpop.permute.xlu1 %3356  ;;  %s9150_s17 = sld [smem:[#allocation5 + $0x12c]] }
 0x4c2   : > { %v3198_v29 = vadd.f32 %v11552_v38, %v3132_v62  ;;  %v3105_v45 = vadd.f32 %v3104_v56, %v3101_v22  ;;  %v3229_v37 = vadd.f32 %v3227_v23, %v11553_v47  ;;  %v3308_v61 = vstv %s9025_s30  ;;  %s9157_s18 = sld [smem:[#allocation5 + $0x134]] }
 0x4c3   : > { %v3304_v44 = vadd.f32 %v3302_v15, %v3300_v16  ;;  %v3314_v59 = vstv %s9027_s27  ;;  %v3320_v5 = vstv %s9031_s23  ;;  %v3293_v10 = vsub.f32 %v11554_v24, %v3287_v18  ;;  %s11580_s9 = sld [smem:[#allocation106_spill]] }
 0x4c4   : > { %v3107_v60 = vmax.f32 %v3105_v45, 0.0  ;;  %v11556_v55 = vstv %s11550_s8  ;;  %v3326_v46 = vstv %s9037_s5  ;;  %v3246_v31 = vadd.f32 %v11557_v21, %v3180_v35  ;;  %s9169_s30 = sld [smem:[#allocation5 + $0x138]] }
 0x4c5   : > { %v3233_v56 = vmul.f32 %v11556_v55, %v3229_v37  ;;  %v3306_v11 = vmax.f32 %v3304_v44, 0.0  ;;  %v3295_v43 = vadd.f32 %v3293_v10, %v11558_v20  ;;  %v3252_v19 = vadd.f32 %v11559_v2, %v3186_v27  ;;  %v11577_v55 = vld [vmem:[#allocation238_spill] sm:$0xff]  ;;  %s9179_s27 = sld [smem:[#allocation5 + $0x13c]] }
 0x4c6   : > { %v3258_v28 = vadd.f32 %v11560_v32, %v3192_v54  ;;  %v3111_v49 = vmul.f32 %v3110_v30, %v3107_v60  ;;  %v3117_v33 = vmul.f32 %v3116_v58, %v3107_v60  ;;  %v3123_v0 = vmul.f32 %v3122_v13, %v3107_v60  ;;  %s11584_s23 = sld [smem:[#allocation104_spill]] }
 0x4c7   : > { %v3129_v41 = vmul.f32 %v3128_v9, %v3107_v60  ;;  %v11561_v17 = vstv %s11555_s10  ;;  %v3310_v53 = vmul.f32 %v3308_v61, %v3306_v11  ;;  %v3316_v51 = vmul.f32 %v3314_v59, %v3306_v11  ;;  %s9205_s5 = sld [smem:[#allocation5 + $0x12d]] }
 0x4c8   : > { %v3237_v52 = vadd.f32 %v11561_v17, %v3233_v56  ;;  %v3264_v39 = vadd.f32 %v11562_v8, %v3198_v29  ;;  %v3113_v30 = vadd.f32 %v3111_v49, %v3047_v63  ;;  %v3119_v58 = vadd.f32 %v3117_v33, %v3053_v12  ;;  %v11569_v63 = vld [vmem:[#allocation216_spill] sm:$0xff]  ;;  %s9231_s8 = sld [smem:[#allocation5 + $0x139]] }
 0x4c9   : > { %v3125_v13 = vadd.f32 %v3123_v0, %v3059_v6  ;;  %v3131_v9 = vadd.f32 %v3129_v41, %v3065_v7  ;;  %v3322_v50 = vmul.f32 %v3320_v5, %v3306_v11  ;;  %v3328_v1 = vmul.f32 %v3326_v46, %v3306_v11  ;;  %s9286_s10 = sld [smem:[#allocation5 + $0x13a]] }
 0x4ca   : > { %v3239_v4 = vmax.f32 %v3237_v52, 0.0  ;;  %v3299_v35 = vmul.f32 %v3298_v42, %v3295_v43  ;;  %v3179_v3 = vadd.f32 %v11568_v14, %v3113_v30  ;;  %v3185_v62 = vadd.f32 %v11569_v63, %v3119_v58 }
 0x4cb   : > { %v3191_v27 = vadd.f32 %v11570_v57, %v3125_v13  ;;  %v3197_v54 = vadd.f32 %v11571_v25, %v3131_v9  ;;  %v11572_v12 = vstv %s11563_s15  ;;  %v11573_v40 = vstv %s11564_s7  ;;  %s5548_s15 = smov 8   ;;  %s5549_s7 = smov 16  }
 0x4cc   : > { %v3243_v22 = vmul.f32 %v11572_v12, %v3239_v4  ;;  %v3249_v23 = vmul.f32 %v11573_v40, %v3239_v4  ;;  %v11574_v18 = vstv %s11565_s22  ;;  %v11575_v42 = vstv %s11566_s29  ;;  %s5550_s22 = smov 24  }
 0x4cd   : > { %v3255_v6 = vmul.f32 %v11574_v18, %v3239_v4  ;;  %v3261_v7 = vmul.f32 %v11575_v42, %v3239_v4  ;;  %v11576_v16 = vstv %s11567_s16  ;;  %v3303_v29 = vadd.f32 %v3302_v15, %v3299_v35  ;;  %s11597_s16 = sld [smem:[#allocation276_spill]] }
 0x4ce   : > { %v3393_v38 = vmul.f32 %v11576_v16, %v11542_v26  ;;  %v3398_v45 = vstv %s9065_s4  ;;  %v3408_v47 = vstv %s9069_s13  ;;  %v9142_v37 = vadd.f32 %v3310_v53, %v3246_v31  ;;  %s9254_s4 = sld [smem:[#allocation5 + $0x12e]] }
 0x4cf   : > { %v9144_v44 = vadd.f32 %v3316_v51, %v3252_v19  ;;  %v9146_v24 = vadd.f32 %v3322_v50, %v3258_v28  ;;  %v9148_v10 = vadd.f32 %v3328_v1, %v3264_v39  ;;  %v3245_v26 = vadd.f32 %v3243_v22, %v3179_v3  ;;  %v11579_v28 = vld [vmem:[#allocation240_spill] sm:$0xff]  ;;  %v11582_v39 = vld [vmem:[#allocation222_spill] sm:$0xff]  ;;  %s9259_s13 = sld [smem:[#allocation5 + $0x132]] }
 0x4d0   : > { %v3251_v15 = vadd.f32 %v3249_v23, %v3185_v62  ;;  %v3305_v60 = vmax.f32 %v3303_v29, 0.0  ;;  %v3360_v56 = vsub.f32 %v11577_v55, %v3357_v36  ;;  %v3257_v21 = vadd.f32 %v3255_v6, %v3191_v27 }
 0x4d1   : > { %v3263_v31 = vadd.f32 %v3261_v7, %v3197_v54  ;;  %v3402_v11 = vstv %s9076_s14  ;;  %v3412_v20 = vstv %s9081_s20  ;;  %v3418_v33 = vstv %s9087_s1  ;;  %s9266_s14 = sld [smem:[#allocation5 + $0x136]] }
 0x4d2   : > { %v3309_v43 = vmul.f32 %v3308_v61, %v3305_v60  ;;  %v3315_v2 = vmul.f32 %v3314_v59, %v3305_v60  ;;  %v3321_v19 = vmul.f32 %v3320_v5, %v3305_v60  ;;  %v3327_v32 = vmul.f32 %v3326_v46, %v3305_v60  ;;  %s9278_s20 = sld [smem:[#allocation5 + $0x13d]] }
 0x4d3   : > { %v3362_v49 = vadd.f32 %v3360_v56, %v11579_v28  ;;  %v3422_v0 = vstv %s9092_s28  ;;  %v3428_v41 = vstv %s9102_s11  ;;  %v11581_v59 = vstv %s11578_s3  ;;  %s9297_s1 = sld [smem:[#allocation5 + $0x13e]]  ;;  %s5545_s28 = smov 120  }
 0x4d4   : > { %v3311_v17 = vadd.f32 %v3309_v43, %v3245_v26  ;;  %v3317_v52 = vadd.f32 %v3315_v2, %v3251_v15  ;;  %v3323_v53 = vadd.f32 %v3321_v19, %v3257_v21  ;;  %v3329_v61 = vadd.f32 %v3327_v32, %v3263_v31  ;;  %s5546_s11 = smov 112   ;;  %s11604_s3 = sld [smem:[#allocation264_spill]] }
 0x4d5   : > { %v3366_v5 = vmul.f32 %v11581_v59, %v3362_v49  ;;  %v3432_v46 = vstv %s9111_s19  ;;  %v3438_v51 = vstv %s9113_s24  ;;  %v3442_v8 = vstv %s9117_s2  ;;  %s5547_s19 = smov 104   ;;  %s11600_s2 = sld [smem:[#allocation22_spill]] }
 0x4d6   : > { %v3377_v30 = vadd.f32 %v11582_v39, %v3311_v17  ;;  %v3383_v58 = vadd.f32 %v9050_v48, %v3317_v52  ;;  %v3389_v13 = vadd.f32 %v9055_v34, %v3323_v53  ;;  %v3395_v9 = vadd.f32 %v3393_v38, %v3329_v61 }
 0x4d7   : > { %v11583_v4 = vstv %s11580_s9  ;;  %v3448_v1 = vstv %s9123_s25  ;;  %v3454_v35 = vstv %s9133_s21  ;;  %v3460_v14 = vstv %s9140_s12  ;;  %s11601_s25 = sld [smem:[#allocation31_spill]] }
 0x4d8   : > { %v3370_v50 = vadd.f32 %v11583_v4, %v3366_v5  ;;  %v3399_v3 = vmul.f32 %v3398_v45, %v3377_v30  ;;  %v3409_v48 = vmul.f32 %v3408_v47, %v3383_v58  ;;  %v3419_v63 = vmul.f32 %v3418_v33, %v3389_v13  ;;  %s11603_s21 = sld [smem:[#allocation24_spill]] }
 0x4d9   : > { %v3429_v62 = vmul.f32 %v3428_v41, %v3395_v9  ;;  %v3489_v57 = vstv %s9150_s17  ;;  %v3493_v27 = vstv %s9153_s26  ;;  %v3499_v25 = vstv %s9157_s18 }
 0x4da   : > { %v3372_v34 = vmax.f32 %v3370_v50, 0.0  ;;  %v3403_v54 = vadd.f32 %v3402_v11, %v3399_v3  ;;  %v3413_v12 = vadd.f32 %v3412_v20, %v3409_v48  ;;  %v3423_v22 = vadd.f32 %v3422_v0, %v3419_v63 }
 0x4db   : > { %v3433_v40 = vadd.f32 %v3432_v46, %v3429_v62  ;;  %v11585_v23 = vstv %s11584_s23  ;;  %v11586_v6 = vstv %s11532_s6  ;;  %v11587_v7 = vstv %s11533_s0  ;;  %s9214_s6 = sld [smem:[#allocation5 + $0x131]]  ;;  %s648_s12 = sand.u32 1, %s11600_s2  }
 0x4dc   : > { %v3376_v18 = vmul.f32 %v11585_v23, %v3372_v34  ;;  %v3382_v42 = vmul.f32 %v11586_v6, %v3372_v34  ;;  %v3388_v36 = vmul.f32 %v11587_v7, %v3372_v34  ;;  %v3394_v38 = vmul.f32 %v11576_v16, %v3372_v34  ;;  %s9220_s0 = sld [smem:[#allocation5 + $0x135]]  ;;  %s4524_s9 = sshll.u32 %s648_s12, 4 }
 0x4dd   : > { %v9207_v29 = vmax.f32 %v3403_v54, 0.0  ;;  %v9209_v26 = vmax.f32 %v3413_v12, 0.0  ;;  %v9211_v15 = vmax.f32 %v3423_v22, 0.0  ;;  %v3505_v60 = vstv %s9169_s30  ;;  %s659_s18 = scalar_lea.vmem %s11604_s3, %s11601_s25  ;;  %s650_s23 = scalar_lea.vmem [#allocation15], %s4524_s9 }
 0x4de   : > { %v3378_v55 = vadd.f32 %v3376_v18, %v9142_v37  ;;  %v3384_v56 = vadd.f32 %v3382_v42, %v9144_v44  ;;  %v3390_v21 = vadd.f32 %v3388_v36, %v9146_v24  ;;  %v3396_v31 = vadd.f32 %v3394_v38, %v9148_v10 }
 0x4df   : > { %v9222_v43 = vmax.f32 %v3433_v40, 0.0  ;;  %v3439_v2 = vmul.f32 %v3438_v51, %v9207_v29  ;;  %v3443_v19 = vmul.f32 %v3442_v8, %v9209_v26  ;;  %v3511_v37 = vstv %s9179_s27  ;;  %s4885_s27 = sshll.u32 %s11603_s21, 8 }
 0x4e0   : > { %v3400_v44 = vmul.f32 %v3398_v45, %v3378_v55  ;;  %v3410_v24 = vmul.f32 %v3408_v47, %v3384_v56  ;;  %v3420_v10 = vmul.f32 %v3418_v33, %v3390_v21  ;;  %v3430_v32 = vmul.f32 %v3428_v41, %v3396_v31 }
 0x4e1   : > { %v3445_v28 = vadd.f32 %v3443_v19, %v3439_v2  ;;  %v3449_v49 = vmul.f32 %v3448_v1, %v9211_v15  ;;  %v3490_v17 = vmul.f32 %v3489_v57, %v9207_v29  ;;  %v3494_v52 = vmul.f32 %v3493_v27, %v9209_v26 }
 0x4e2   : > { %v3404_v53 = vadd.f32 %v3402_v11, %v3400_v44  ;;  %v3414_v61 = vadd.f32 %v3412_v20, %v3410_v24  ;;  %v3424_v59 = vadd.f32 %v3422_v0, %v3420_v10  ;;  %v3434_v45 = vadd.f32 %v3432_v46, %v3430_v32 }
 0x4e3   : > { %v3451_v47 = vadd.f32 %v3449_v49, %v3445_v28  ;;  %v3455_v33 = vmul.f32 %v3454_v35, %v9222_v43  ;;  %v3496_v41 = vadd.f32 %v3494_v52, %v3490_v17  ;;  %v3500_v5 = vmul.f32 %v3499_v25, %v9211_v15 }
 0x4e4   : > { %v3406_v39 = vmax.f32 %v3404_v53, 0.0  ;;  %v3416_v30 = vmax.f32 %v3414_v61, 0.0  ;;  %v3426_v11 = vmax.f32 %v3424_v59, 0.0  ;;  %v9252_v58 = vmax.f32 %v3434_v45, 0.0 }
 0x4e5   : > { %v3457_v20 = vadd.f32 %v3455_v33, %v3451_v47  ;;  %v3506_v0 = vmul.f32 %v3505_v60, %v9222_v43  ;;  %v3539_v46 = vstv %s9205_s5  ;;  %v3543_v13 = vstv %s9214_s6  ;;  %s4321_s5 = sshll.u32 %s650_s23, 4  ;;  %s9488_s5 = int_to_ptr.vmem [resolvable:$true] %s4321_s5 }
 0x4e6   : > { %v3440_v9 = vmul.f32 %v3438_v51, %v3406_v39  ;;  %v3444_v4 = vmul.f32 %v3442_v8, %v3416_v30  ;;  %v3502_v50 = vadd.f32 %v3500_v5, %v3496_v41  ;;  %v3549_v3 = vstv %s9220_s0 }
 0x4e7   : > { %v9270_v48 = vadd.f32 %v3460_v14, %v3457_v20  ;;  %v3491_v63 = vmul.f32 %v3489_v57, %v3406_v39  ;;  %v3495_v62 = vmul.f32 %v3493_v27, %v3416_v30  ;;  %v3555_v34 = vstv %s9231_s8  ;;  %s11607_s8 = sld [smem:[#allocation278_spill]] }
 0x4e8   : > { %v3446_v54 = vadd.f32 %v3444_v4, %v3440_v9  ;;  %v3450_v12 = vmul.f32 %v3448_v1, %v3426_v11  ;;  %v3456_v22 = vmul.f32 %v3454_v35, %v9252_v58  ;;  %v3541_v51 = vmul.f32 %v3539_v46, %v3406_v39 }
 0x4e9   : > { %v3464_v8 = vsel %vm944_vm1, %v9270_v48, -inf  ;;  %v3497_v40 = vadd.f32 %v3495_v62, %v3491_v63  ;;  %v3501_v23 = vmul.f32 %v3499_v25, %v3426_v11  ;;  %v3545_v18 = vmul.f32 %v3543_v13, %v3416_v30  ;;  %v9318_v62 = vld [vmem:[#allocation4] sm:$0xff] }
 0x4ea   : > { %3465 = vmax.xlane.f32.xlu1 %v3464_v8  ;;  %v3452_v57 = vadd.f32 %v3450_v12, %v3446_v54  ;;  %v3507_v27 = vmul.f32 %v3505_v60, %v9252_v58  ;;  %v3508_v1 = vadd.f32 %v3506_v0, %v3502_v50  ;;  %v3540_v6 = vmul.f32 %v3539_v46, %v9207_v29 }
 0x4eb   : > { %v3503_v35 = vadd.f32 %v3501_v23, %v3497_v40  ;;  %v3547_v42 = vadd.f32 %v3545_v18, %v3541_v51  ;;  %v3551_v7 = vmul.f32 %v3549_v3, %v3426_v11  ;;  %v3544_v36 = vmul.f32 %v3543_v13, %v9209_v26 }
 0x4ec   : > { %v3458_v25 = vadd.f32 %v3456_v22, %v3452_v57  ;;  %v3557_v16 = vmul.f32 %v3555_v34, %v9252_v58  ;;  %v3550_v38 = vmul.f32 %v3549_v3, %v9211_v15  ;;  %v3589_v60 = vstv %s9254_s4 }
 0x4ed   : > { %v3509_v55 = vadd.f32 %v3507_v27, %v3503_v35  ;;  %v3553_v56 = vadd.f32 %v3551_v7, %v3547_v42  ;;  %v3546_v21 = vadd.f32 %v3544_v36, %v3540_v6  ;;  %v3591_v31 = vmul.f32 %v3589_v60, %v3406_v39  ;;  %s9485_s4 = scalar_lea.hbm %s11607_s8, %s4885_s27 }
 0x4ee   : > { %v3462_v2 = vadd.f32 %v3460_v14, %v3458_v25  ;;  %v3556_v19 = vmul.f32 %v3555_v34, %v9222_v43  ;;  %v3593_v44 = vstv %s9259_s13  ;;  %v3599_v24 = vstv %s9266_s14  ;;  %v9322_v34 = vld [vmem:[#allocation4 + $0x8] sm:$0xff]  ;;  %s9491_s13 = scalar_lea.sflag [#allocation7], %s648_s12  ;;  %s5412_s14 = scalar_lea.vmem %s9488_s5, 256 }
 0x4ef   : > { %v3513_v10 = vadd.f32 %v3511_v37, %v3509_v55  ;;  %v3559_v32 = vadd.f32 %v3557_v16, %v3553_v56  ;;  %v3552_v28 = vadd.f32 %v3550_v38, %v3546_v21  ;;  %v3595_v49 = vmul.f32 %v3593_v44, %v3416_v30  ;;  %p5413_p10 = scmp.ne.s32.totalorder %s9488_s5, %s5412_s14 }
 0x4f0   : > { %v3467_v17 = vsel %vm944_vm1, %v3462_v2, -inf  ;;  %v3512_v52 = vadd.f32 %v3511_v37, %v3508_v1  ;;  %v3561_v53 = vstv %s9278_s20  ;;  %v3601_v61 = vmul.f32 %v3599_v24, %v3426_v11  ;;  %s5551_s20 = smov [#allocation15]  }
 0x4f1   : > { %3468 = vmax.xlane.f32.xlu0 %v3467_v17  ;;  %v3517_v14 = vsel %vm944_vm1, %v3513_v10, -inf  ;;  %v3563_v59 = vadd.f32 %v3561_v53, %v3559_v32  ;;  %v3558_v45 = vadd.f32 %v3556_v19, %v3552_v28  ;;  %v3597_v47 = vadd.f32 %v3595_v49, %v3591_v31  ;;  %p5414_p11 = pnand %p5413_p10, %p5673_p4 }
 0x4f2   : > { %3518 = vmax.xlane.f32.xlu1 %v3517_v14  ;;  %v3605_v33 = vstv %s9286_s10  ;;  %v3590_v41 = vmul.f32 %v3589_v60, %v9207_v29  ;;  %v3594_v5 = vmul.f32 %v3593_v44, %v9209_v26  ;;  %v3514_v37 = vsel %vm944_vm1, %v3512_v52, -inf  ;;  %s5416_s10 = sshll.u32 %s5551_s20, 4  ;;  %s5417_s10 = int_to_ptr.vmem [resolvable:$false] %s5416_s10 }
 0x4f3   : > { %v3603_v39 = vadd.f32 %v3601_v61, %v3597_v47  ;;  %v3607_v30 = vmul.f32 %v3605_v33, %v9252_v58  ;;  %v3562_v20 = vadd.f32 %v3561_v53, %v3558_v45  ;;  %v3600_v0 = vmul.f32 %v3599_v24, %v9211_v15  ;;  %p5415_p13 = pneg %p5414_p11  ;;  %p5419_p0 = scmp.lt.s32.totalorder %s9488_s5, %s5417_s10 }
 0x4f4   : > { %v3596_v11 = vadd.f32 %v3594_v5, %v3590_v41  ;;  %v3567_v46 = vsel %vm944_vm1, %v3563_v59, -inf  ;;  %v3611_v9 = vstv %s9297_s1  ;;  %v3606_v29 = vmul.f32 %v3605_v33, %v9222_v43  ;;  %s5418_s1 = scalar_lea.vmem %s5417_s10, 512 }
 0x4f5   : > { %3515 = vmax.xlane.f32.xlu0 %v3514_v37  ;;  %v3609_v13 = vadd.f32 %v3607_v30, %v3603_v39  ;;  %v3564_v26 = vsel %vm944_vm1, %v3562_v20, -inf  ;;  %p5420_p5 = scmp.lt.s32.totalorder %s5418_s1, %s5412_s14 }
 0x4f6   : > { %3568 = vmax.xlane.f32.xlu1 %v3567_v46  ;;  %v3602_v4 = vadd.f32 %v3600_v0, %v3596_v11 }
 0x4f7   : > { %v3613_v50 = vadd.f32 %v3611_v9, %v3609_v13  ;;  %p5421_p6 = por %p5420_p5, %p5419_p0 }
 0x4f8   : > { %v3608_v3 = vadd.f32 %v3606_v29, %v3602_v4 }
 0x4f9   : > { %3565 = vmax.xlane.f32.xlu0 %v3564_v26  ;;  %v3617_v58 = vsel %vm944_vm1, %v3613_v50, -inf  ;;  %p5422_p7 = pnand %p5421_p6, %p5415_p13 }
 0x4fa   : > { %3618 = vmax.xlane.f32.xlu1 %v3617_v58  ;;  %v3612_v63 = vadd.f32 %v3611_v9, %v3608_v3 }
 0x4fc   : > { %v3614_v15 = vsel %vm944_vm1, %v3612_v63, -inf }
 0x4fd   : > { %3615 = vmax.xlane.f32.xlu0 %v3614_v15  ;;  %v11588_v15 = vld [vmem:[#allocation183_spill] sm:$0xff] }
 0x50b   : > { %3802 = vrot.lane.b32.xlu1 %v9318_v62, %s5545_s28 }
 0x50f   : > { %3933 = vrot.lane.b32.xlu1 %v9322_v34, %s5546_s11 }
 0x513   : > { %3804 = vrot.lane.b32.xlu0 %v9322_v34, %s5545_s28 }
 0x517   : > { %3931 = vrot.lane.b32.xlu0 %v9318_v62, %s5546_s11 }
 0x573   : > { %v3466_v43 = vpop.xlane.xlu1 %3465 }
 0x574   : > { %v3470_v54 = vsub.f32 %v9270_v48, %v3466_v43 }
 0x576   : > { %v3472_v12 = vmul.f32 1.442695, %v3470_v54 }
 0x578   : > { %5259 = vpow2.f32 %v3472_v12 }
 0x57a   : > { %v3469_v22 = vpop.xlane.xlu0 %3468 }
 0x57b   : > { %v3471_v51 = vsub.f32 %v3462_v2, %v3469_v22  ;;  %v3519_v8 = vpop.xlane.xlu1 %3518 }
 0x57c   : > { %v3521_v40 = vsub.f32 %v3513_v10, %v3519_v8 }
 0x57d   : > { %v3474_v23 = vmul.f32 1.442695, %v3471_v51 }
 0x57e   : > { %v3524_v18 = vmul.f32 1.442695, %v3521_v40  ;;  %v3516_v57 = vpop.xlane.xlu0 %3515 }
 0x57f   : > { %5261 = vpow2.f32 %v3474_v23  ;;  %v3520_v27 = vsub.f32 %v3512_v52, %v3516_v57  ;;  %v3569_v1 = vpop.xlane.xlu1 %3568 }
 0x580   : > { %v3571_v6 = vsub.f32 %v3563_v59, %v3569_v1  ;;  %5263 = vpow2.f32 %v3524_v18 }
 0x581   : > { %v3522_v35 = vmul.f32 1.442695, %v3520_v27 }
 0x582   : > { %v3574_v42 = vmul.f32 1.442695, %v3571_v6  ;;  %v3566_v7 = vpop.xlane.xlu0 %3565 }
 0x583   : > { %5265 = vpow2.f32 %v3522_v35  ;;  %v3570_v36 = vsub.f32 %v3562_v20, %v3566_v7  ;;  %v3619_v48 = vpop.xlane.xlu1 %3618 }
 0x584   : > { %v3621_v25 = vsub.f32 %v3613_v50, %v3619_v48  ;;  %5267 = vpow2.f32 %v3574_v42 }
 0x585   : > { %v5260_v16 = vpop.eup %5259  ;;  %v3572_v38 = vmul.f32 1.442695, %v3570_v36  ;;  %v11590_v36 = vld [vmem:[#allocation196_spill] sm:$0xff] }
 0x586   : > { %v3624_v60 = vmul.f32 1.442695, %v3621_v25  ;;  %v3616_v55 = vpop.xlane.xlu0 %3615  ;;  %v3476_v56 = vsel %vm944_vm1, %v5260_v16, 0.0 }
 0x587   : > { %5269 = vpow2.f32 %v3572_v38  ;;  %v3620_v21 = vsub.f32 %v3612_v63, %v3616_v55  ;;  %3477 = vadd.xlane.f32.xlu0 %v3476_v56  ;;  %v3803_v33 = vpop.permute.xlu1 %3802  ;;  %v11591_v55 = vld [vmem:[#allocation126_spill] sm:$0xff] }
 0x588   : > { %5271 = vpow2.f32 %v3624_v60 }
 0x589   : > { %v3622_v31 = vmul.f32 1.442695, %v3620_v21 }
 0x58a   : > { %v3805_v2 = vpop.permute.xlu0 %3804 }
 0x58b   : > { %5273 = vpow2.f32 %v3622_v31  ;;  %5010 = vmatprep.subr.mxu1 %v3805_v2  ;;  %v3934_v5 = vpop.permute.xlu1 %3933 }
 0x58c   : > { %v5262_v19 = vpop.eup %5261 }
 0x58d   : > { %v3479_v44 = vsel %vm944_vm1, %v5262_v19, 0.0  ;;  %v5264_v24 = vpop.eup %5263 }
 0x58e   : > { %3480 = vadd.xlane.f32.xlu1 %v3479_v44  ;;  %v3529_v28 = vsel %vm944_vm1, %v5264_v24, 0.0  ;;  %v3932_v47 = vpop.permute.xlu0 %3931 }
 0x590   : > { %v5266_v10 = vpop.eup %5265 }
 0x591   : > { %v3526_v32 = vsel %vm944_vm1, %v5266_v10, 0.0  ;;  %v5268_v49 = vpop.eup %5267 }
 0x592   : > { %3527 = vadd.xlane.f32.xlu0 %v3526_v32  ;;  %3530 = vadd.xlane.f32.xlu1 %v3529_v28  ;;  %v3579_v53 = vsel %vm944_vm1, %v5268_v49, 0.0  ;;  %v11593_v28 = vld [vmem:[#allocation133_spill] sm:$0xff] }
 0x594   : > { %v5270_v17 = vpop.eup %5269 }
 0x595   : > { %v3576_v52 = vsel %vm944_vm1, %v5270_v17, 0.0  ;;  %v9337_v61 = vpop.eup %5271 }
 0x596   : > { %3577 = vadd.xlane.f32.xlu0 %v3576_v52  ;;  %3580 = vadd.xlane.f32.xlu1 %v3579_v53  ;;  %v3629_v45 = vsel %vm944_vm1, %v9337_v61, 0.0 }
 0x598   : > { %v9339_v14 = vpop.eup %5273 }
 0x599   : > { %v3626_v59 = vsel %vm944_vm1, %v9339_v14, 0.0 }
 0x59a   : > { %3627 = vadd.xlane.f32.xlu0 %v3626_v59  ;;  %3630 = vadd.xlane.f32.xlu1 %v3629_v45 }
 0x5ab   : > { %4062 = vrot.lane.b32.xlu1 %v9322_v34, %s5547_s19  ;;  %v11589_v34 = vld [vmem:[#allocation184_spill] sm:$0xff] }
 0x5b0   : > { %4060 = vrot.lane.b32.xlu0 %v9318_v62, %s5547_s19 }
 0x610   : > { %v3478_v41 = vpop.xlane.xlu0 %3477 }
 0x611   : > { %5275 = vrcp.f32 %v3478_v41 }
 0x617   : > { %v3481_v39 = vpop.xlane.xlu1 %3480 }
 0x618   : > { %5277 = vrcp.f32 %v3481_v39 }
 0x61b   : > { %v3528_v30 = vpop.xlane.xlu0 %3527  ;;  %v3531_v37 = vpop.xlane.xlu1 %3530 }
 0x61c   : > { %5279 = vrcp.f32 %v3528_v30 }
 0x61d   : > { %5281 = vrcp.f32 %v3531_v37 }
 0x61e   : > { %v5276_v20 = vpop.eup %5275 }
 0x61f   : > { %v3578_v11 = vpop.xlane.xlu0 %3577  ;;  %v3581_v0 = vpop.xlane.xlu1 %3580  ;;  %v9349_v46 = vmul.f32 %v5276_v20, %v5260_v16 }
 0x620   : > { %5283 = vrcp.f32 %v3578_v11 }
 0x621   : > { %5285 = vrcp.f32 %v3581_v0  ;;  %5007 = vmatprep.mubr.msk.f32.mxu1 %vm944_vm1, %v9349_v46  ;;  %v3647_v11 = vmul.f32 %v9349_v46, %v11591_v55 }
 0x623   : > { %v3628_v13 = vpop.xlane.xlu0 %3627  ;;  %v3631_v9 = vpop.xlane.xlu1 %3630 }
 0x624   : > { %5287 = vrcp.f32 %v3628_v13  ;;  %v3649_v13 = vsel %vm944_vm1, %v3647_v11, 0.0 }
 0x625   : > { %v5278_v4 = vpop.eup %5277  ;;  %5289 = vrcp.f32 %v3631_v9  ;;  %v3638_v9 = vld [vmem:[#allocation12] sm:$0x7] }
 0x626   : > { %v9353_v29 = vmul.f32 %v5278_v4, %v5262_v19  ;;  %v11592_v19 = vld [vmem:[#allocation119_spill] sm:$0xff] }
 0x627   : > { %v4063_v23 = vpop.permute.xlu1 %4062  ;;  %v4061_v6 = vpop.permute.xlu0 %4060  ;;  %v3639_v37 = vmul.f32 %v9349_v46, %v11592_v19 }
 0x628   : > { %5008 = vmatmul.mubr.msk.f32.vlgmr.msra.gmra.mxu1 %vm944_vm1, %v9353_v29  ;;  %v3640_v11 = vmul.f32 %v9353_v29, %v11589_v34 }
 0x629   : > { %v5280_v50 = vpop.eup %5279  ;;  %5011 = vmatpush3.msra.mxu1 %v3805_v2  ;;  %v3641_v0 = vsel %vm944_vm1, %v3639_v37, 0.0 }
 0x62a   : > { %v5282_v26 = vpop.eup %5281  ;;  %5012 = vmatprep.subr.mxu1 %v3803_v33  ;;  %v3536_v3 = vmul.f32 %v5280_v50, %v5266_v10  ;;  %v11594_v50 = vld [vmem:[#allocation32_spill] sm:$0xff] }
 0x62b   : > { %5013 = vmatpush3.msra.mxu1 %v3803_v33  ;;  %v3537_v58 = vmul.f32 %v5282_v26, %v5264_v24  ;;  %v9408_v26 = vrot.slane %v3638_v9, %v11594_v50  ;;  %v3656_v50 = vmul.f32 %v9353_v29, %v11590_v36 }
 0x62c   : > { %5017 = vmatprep.subr.mxu1 %v3934_v5  ;;  %5014 = vmatprep.mubr.msk.f32.mxu1 %vm944_vm1, %v3536_v3  ;;  %v3774_v56 = vmul.f32 %v3536_v3, %v11591_v55  ;;  %v3766_v10 = vmul.f32 %v3536_v3, %v11592_v19 }
 0x62d   : > { %v5284_v63 = vpop.eup %5283  ;;  %5015 = vmatmul.mubr.msk.f32.vlgmr.msra.gmra.mxu1 %vm944_vm1, %v3537_v58  ;;  %v3775_v62 = vmul.f32 %v3537_v58, %v11588_v15  ;;  %v3767_v43 = vmul.f32 %v3537_v58, %v11589_v34  ;;  %v3783_v48 = vmul.f32 %v3537_v58, %v11590_v36 }
 0x62e   : > { %v5286_v54 = vpop.eup %5285  ;;  %5018 = vmatpush3.msra.mxu1 %v3934_v5  ;;  %v3586_v12 = vmul.f32 %v5284_v63, %v5270_v17  ;;  %v3776_v2 = vsel %vm944_vm1, %v3774_v56, 0.0  ;;  %v3768_v17 = vsel %vm944_vm1, %v3766_v10, 0.0 }
 0x62f   : > { %5019 = vmatprep.subr.mxu1 %v3932_v47  ;;  %v3779_v22 = vsel %vm944_vm1, %v3775_v62, 0.0  ;;  %v3771_v51 = vsel %vm944_vm1, %v3767_v43, 0.0  ;;  %v3587_v8 = vmul.f32 %v5286_v54, %v5268_v49  ;;  %v3787_v16 = vsel %vm944_vm1, %v3783_v48, 0.0 }
 0x630   : > { %5020 = vmatpush3.msra.mxu1 %v3932_v47  ;;  %3780 = vadd.xlane.f32.xlu1 %v3779_v22  ;;  %v3897_v44 = vmul.f32 %v3586_v12, %v11592_v19  ;;  %v3782_v49 = vmul.f32 %v3536_v3, %v11593_v28  ;;  %v3905_v52 = vmul.f32 %v3586_v12, %v11591_v55  ;;  %v11595_v3 = vld [vmem:[#allocation100_spill] sm:$0xff] }
 0x631   : > { %v5288_v40 = vpop.eup %5287  ;;  %3772 = vadd.xlane.f32.xlu0 %v3771_v51  ;;  %5021 = vmatprep.mubr.msk.f32.mxu1 %vm944_vm1, %v3586_v12  ;;  %v3906_v18 = vmul.f32 %v3587_v8, %v11588_v15  ;;  %v3898_v57 = vmul.f32 %v3587_v8, %v11589_v34  ;;  %v3914_v31 = vmul.f32 %v3587_v8, %v11590_v36 }
 0x632   : > { %v5290_v27 = vpop.eup %5289  ;;  %5024 = vmatprep.subr.mxu1 %v4063_v23  ;;  %5022 = vmatmul.mubr.msk.f32.vlgmr.msra.gmra.mxu1 %vm944_vm1, %v3587_v8  ;;  %v3636_v1 = vmul.f32 %v5288_v40, %v9339_v14  ;;  %v3899_v32 = vsel %vm944_vm1, %v3897_v44, 0.0  ;;  %v3784_v53 = vsel %vm944_vm1, %v3782_v49, 0.0  ;;  %v3907_v14 = vsel %vm944_vm1, %v3905_v52, 0.0 }
 0x633   : > { %5025 = vmatpush3.msra.mxu1 %v4063_v23  ;;  %v3910_v35 = vsel %vm944_vm1, %v3906_v18, 0.0  ;;  %v3902_v42 = vsel %vm944_vm1, %v3898_v57, 0.0  ;;  %v3637_v7 = vmul.f32 %v5290_v27, %v9337_v61  ;;  %v3918_v24 = vsel %vm944_vm1, %v3914_v31, 0.0 }
 0x634   : > { %5026 = vmatprep.subr.mxu1 %v4061_v6  ;;  %3903 = vadd.xlane.f32.xlu1 %v3902_v42  ;;  %v4034_v61 = vmul.f32 %v3636_v1, %v11591_v55  ;;  %v4026_v59 = vmul.f32 %v3636_v1, %v11592_v19  ;;  %v3913_v47 = vmul.f32 %v3586_v12, %v11593_v28  ;;  %v11596_v12 = vld [vmem:[#allocation101_spill] sm:$0xff] }
 0x635   : > { %3911 = vadd.xlane.f32.xlu0 %v3910_v35  ;;  %5027 = vmatpush3.msra.mxu1 %v4061_v6  ;;  %v4035_v25 = vmul.f32 %v3637_v7, %v11588_v15  ;;  %v4027_v60 = vmul.f32 %v3637_v7, %v11589_v34  ;;  %v4043_v41 = vmul.f32 %v3637_v7, %v11590_v36 }
 0x636   : > { %5028 = vmatprep.mubr.msk.f32.mxu1 %vm944_vm1, %v3636_v1  ;;  %v4036_v45 = vsel %vm944_vm1, %v4034_v61, 0.0  ;;  %v4028_v33 = vsel %vm944_vm1, %v4026_v59, 0.0  ;;  %v3915_v5 = vsel %vm944_vm1, %v3913_v47, 0.0  ;;  %v4042_v39 = vmul.f32 %v3636_v1, %v11593_v28 }
 0x637   : > { %5029 = vmatmul.mubr.msk.f32.vlgmr.msra.gmra.mxu1 %vm944_vm1, %v3637_v7  ;;  %v4039_v38 = vsel %vm944_vm1, %v4035_v25, 0.0  ;;  %v4031_v21 = vsel %vm944_vm1, %v4027_v60, 0.0  ;;  %v4047_v30 = vsel %vm944_vm1, %v4043_v41, 0.0  ;;  %v9411_v58 = vrot.slane %v3638_v9, %v11595_v3 }
 0x638   : > { %3788 = vadd.xlane.f32.xlu1 %v3787_v16  ;;  %v4044_v20 = vsel %vm944_vm1, %v4042_v39, 0.0  ;;  %v9416_v22 = vrot.slane %v3638_v9, %v11596_v12  ;;  %v3655_v9 = vmul.f32 %v9349_v46, %v11593_v28  ;;  %v3660_v3 = vsel %vm944_vm1, %v3656_v50, 0.0 }
 0x639   : > { %4040 = vadd.xlane.f32.xlu0 %v4039_v38 }
 0x63c   : > { %4032 = vadd.xlane.f32.xlu1 %v4031_v21 }
 0x63d   : > { %3777 = vadd.xlane.f32.xlu0 %v3776_v2 }
 0x640   : > { %3919 = vadd.xlane.f32.xlu1 %v3918_v24 }
 0x641   : > { %3900 = vadd.xlane.f32.xlu0 %v3899_v32 }
 0x644   : > { %3769 = vadd.xlane.f32.xlu1 %v3768_v17 }
 0x645   : > { %3785 = vadd.xlane.f32.xlu0 %v3784_v53  ;;  %v3648_v53 = vmul.f32 %v9353_v29, %v11588_v15 }
 0x647   : > { %v3652_v61 = vsel %vm944_vm1, %v3648_v53, 0.0 }
 0x648   : > { %3908 = vadd.xlane.f32.xlu1 %v3907_v14 }
 0x649   : > { %4037 = vadd.xlane.f32.xlu0 %v4036_v45 }
 0x64c   : > { %4029 = vadd.xlane.f32.xlu1 %v4028_v33 }
 0x64d   : > { %3916 = vadd.xlane.f32.xlu0 %v3915_v5 }
 0x650   : > { %4048 = vadd.xlane.f32.xlu1 %v4047_v30 }
 0x651   : > { %4045 = vadd.xlane.f32.xlu0 %v4044_v20 }
 0x654   : > { %3642 = vadd.xlane.f32.xlu1 %v3641_v0 }
 0x655   : > { %3650 = vadd.xlane.f32.xlu0 %v3649_v13  ;;  %v3644_v13 = vsel %vm944_vm1, %v3640_v11, 0.0 }
 0x6b9   : > { %v3781_v4 = vpop.xlane.xlu1 %3780 }
 0x6ba   : > { %v3773_v63 = vpop.xlane.xlu0 %3772  ;;  %v3793_v54 = vmul.f32 %v3781_v4, %v9411_v58  ;;  %v3657_v4 = vsel %vm944_vm1, %v3655_v9, 0.0 }
 0x6bb   : > { %v3791_v43 = vmul.f32 %v3773_v63, %v9408_v26 }
 0x6bd   : > { %v3904_v62 = vpop.xlane.xlu1 %3903  ;;  %v3795_v8 = vadd.f32 %v3793_v54, %v3791_v43 }
 0x6be   : > { %v3912_v23 = vpop.xlane.xlu0 %3911  ;;  %v3922_v1 = vmul.f32 %v3904_v62, %v9408_v26 }
 0x6bf   : > { %v3924_v27 = vmul.f32 %v3912_v23, %v9411_v58 }
 0x6c1   : > { %v3789_v51 = vpop.xlane.xlu1 %3788  ;;  %v3926_v42 = vadd.f32 %v3924_v27, %v3922_v1 }
 0x6c2   : > { %v3797_v40 = vmul.f32 %v3789_v51, %v9416_v22  ;;  %v4041_v6 = vpop.xlane.xlu0 %4040 }
 0x6c3   : > { %v4053_v21 = vmul.f32 %v4041_v6, %v9411_v58 }
 0x6c4   : > { %v3799_v18 = vadd.f32 %v3797_v40, %v3795_v8 }
 0x6c5   : > { %v4033_v57 = vpop.xlane.xlu1 %4032 }
 0x6c6   : > { %3812 = vrot.lane.b32.xlu1 %v3799_v18, %s5545_s28  ;;  %v3778_v16 = vpop.xlane.xlu0 %3777  ;;  %v4051_v56 = vmul.f32 %v4033_v57, %v9408_v26 }
 0x6c7   : > { %v3792_v19 = vmul.f32 %v3778_v16, %v9411_v58 }
 0x6c8   : > { %v4055_v44 = vadd.f32 %v4053_v21, %v4051_v56 }
 0x6c9   : > { %v3920_v35 = vpop.xlane.xlu1 %3919 }
 0x6ca   : > { %v3928_v7 = vmul.f32 %v3920_v35, %v9416_v22  ;;  %v3901_v60 = vpop.xlane.xlu0 %3900 }
 0x6cb   : > { %v3921_v47 = vmul.f32 %v3901_v60, %v9408_v26  ;;  %v4209_v60 = vld [vmem:[#allocation13] sm:$0xff] }
 0x6cc   : > { %v3930_v48 = vadd.f32 %v3928_v7, %v3926_v42  ;;  %v4212_v42 = vld [vmem:[#allocation13 + $0x18] sm:$0xff]  ;;  %v4211_v7 = vld [vmem:[#allocation13 + $0x10] sm:$0xff] }
 0x6cd   : > { %v3770_v25 = vpop.xlane.xlu1 %3769  ;;  %5031 = vmatprep.subr.mxu0 %v4212_v42 }
 0x6ce   : > { %3941 = vrot.lane.b32.xlu0 %v3930_v48, %s5546_s11  ;;  %v3790_v31 = vmul.f32 %v3770_v25, %v9408_v26  ;;  %v3786_v10 = vpop.xlane.xlu0 %3785  ;;  %5032 = vmatpush3.msra.mxu0 %v4212_v42  ;;  %v4210_v48 = vld [vmem:[#allocation13 + $0x8] sm:$0xff] }
 0x6cf   : > { %v3796_v17 = vmul.f32 %v3786_v10, %v9416_v22  ;;  %5033 = vmatprep.subr.mxu0 %v4211_v7 }
 0x6d0   : > { %v3794_v32 = vadd.f32 %v3792_v19, %v3790_v31  ;;  %5034 = vmatpush3.msra.mxu0 %v4211_v7 }
 0x6d1   : > { %v3909_v38 = vpop.xlane.xlu1 %3908  ;;  %5035 = vmatprep.subr.mxu0 %v4210_v48 }
 0x6d2   : > { %v3798_v52 = vadd.f32 %v3796_v17, %v3794_v32  ;;  %v4038_v14 = vpop.xlane.xlu0 %4037  ;;  %v3923_v45 = vmul.f32 %v3909_v38, %v9411_v58  ;;  %5036 = vmatpush3.msra.mxu0 %v4210_v48 }
 0x6d3   : > { %v4052_v30 = vmul.f32 %v4038_v14, %v9411_v58  ;;  %5037 = vmatprep.subr.mxu0 %v4209_v60 }
 0x6d4   : > { %v3925_v5 = vadd.f32 %v3923_v45, %v3921_v47  ;;  %5038 = vmatpush3.msra.mxu0 %v4209_v60 }
 0x6d5   : > { %v4030_v55 = vpop.xlane.xlu1 %4029 }
 0x6d6   : > { %v3917_v59 = vpop.xlane.xlu0 %3916  ;;  %v4050_v39 = vmul.f32 %v4030_v55, %v9408_v26 }
 0x6d7   : > { %v3927_v33 = vmul.f32 %v3917_v59, %v9416_v22 }
 0x6d8   : > { %v4054_v20 = vadd.f32 %v4052_v30, %v4050_v39  ;;  %v11599_v30 = vld [vmem:[#allocation199_spill] sm:$0xff] }
 0x6d9   : > { %v4049_v2 = vpop.xlane.xlu1 %4048  ;;  %v3929_v37 = vadd.f32 %v3927_v33, %v3925_v5  ;;  %v11598_v5 = vld [vmem:[#allocation198_spill] sm:$0xff] }
 0x6da   : > { %v4057_v24 = vmul.f32 %v4049_v2, %v9416_v22  ;;  %v4046_v41 = vpop.xlane.xlu0 %4045 }
 0x6db   : > { %v4056_v15 = vmul.f32 %v4046_v41, %v9416_v22  ;;  %v5296_v41 = vld [vmem:[%s11597_s16] sm:$0xff] }
 0x6dc   : > { %v4059_v49 = vadd.f32 %v4057_v24, %v4055_v44 }
 0x6dd   : > { %v4058_v0 = vadd.f32 %v4056_v15, %v4054_v20  ;;  %v3643_v34 = vpop.xlane.xlu1 %3642 }
 0x6de   : > { %4070 = vrot.lane.b32.xlu0 %v4059_v49, %s5547_s19  ;;  %v3651_v46 = vpop.xlane.xlu0 %3650  ;;  %v3667_v17 = vmul.f32 %v9408_v26, %v3643_v34 }
 0x6df   : > { %v3673_v49 = vmul.f32 %v9411_v58, %v3651_v46 }
 0x6e2   : > { %3810 = vrot.lane.b32.xlu0 %v3798_v52, %s5545_s28 }
 0x6e8   : > { %v5009_v63 = vpop.f32.mrf.mxu1 }
 0x6ea   : > { %3653 = vadd.xlane.f32.xlu1 %v3652_v61  ;;  %v9452_v62 = vpop.f32.mrf.mxu1  ;;  %v3675_v61 = vadd.f32 %v3673_v49, %v3667_v17 }
 0x6ed   : > { %v5016_v43 = vpop.f32.mrf.mxu1 }
 0x6ef   : > { %v3888_v28 = vpop.f32.mrf.mxu1 }
 0x6f2   : > { %v5023_v51 = vpop.f32.mrf.mxu1 }
 0x6f4   : > { %v4017_v36 = vpop.f32.mrf.mxu1 }
 0x6f7   : > { %v5030_v57 = vpop.f32.mrf.mxu1 }
 0x6f9   : > { %v4146_v25 = vpop.f32.mrf.mxu1 }
 0x6fb   : > { %3939 = vrot.lane.b32.xlu1 %v3929_v37, %s5546_s11  ;;  %v4196_v37 = vrot.slane %v5296_v41, %v11599_v30 }
 0x6ff   : > { %4068 = vrot.lane.b32.xlu1 %v4058_v0, %s5547_s19 }
 0x701   : > { %3645 = vadd.xlane.f32.xlu0 %v3644_v13  ;;  %v11602_v13 = vld [vmem:[#allocation202_spill] sm:$0xff] }
 0x702   : > { %v4202_v9 = vrot.slane %v5296_v41, %v11602_v13 }
 0x705   : > { %3658 = vadd.xlane.f32.xlu0 %v3657_v4 }
 0x723   : > { %3661 = vadd.xlane.f32.xlu1 %v3660_v3 }
 0x738   : > { %v3813_v54 = vpop.permute.xlu1 %3812 }
 0x739   : > { %v3894_v12 = vadd.f32 %v5016_v43, %v3813_v54 }
 0x73b   : > { %4159 = vrot.lane.b32.xlu1 %v3894_v12, %s5548_s15  ;;  %v11605_v12 = vld [vmem:[#allocation200_spill] sm:$0xff] }
 0x73c   : > { %v4216_v46 = vrot.slane %v5296_v41, %v11605_v12 }
 0x740   : > { %v3942_v8 = vpop.permute.xlu0 %3941 }
 0x741   : > { %v4023_v40 = vadd.f32 %v5023_v51, %v3942_v8 }
 0x743   : > { %4167 = vrot.lane.b32.xlu0 %v4023_v40, %s5549_s7  ;;  %v4207_v40 = vld [vmem:[%s659_s18] sm:$0xff] }
 0x750   : > { %v4071_v29 = vpop.permute.xlu0 %4070 }
 0x751   : > { %v4152_v27 = vadd.f32 %v5030_v57, %v4071_v29 }
 0x754   : > { %v3811_v23 = vpop.permute.xlu0 %3810 }
 0x755   : > { %v3889_v18 = vadd.f32 %v3888_v28, %v3811_v23  ;;  %v4208_v28 = vld [vmem:[%s659_s18 + $0x8] sm:$0xff] }
 0x757   : > { %4157 = vrot.lane.b32.xlu0 %v3889_v18, %s5548_s15 }
 0x75b   : > { %4175 = vrot.lane.b32.xlu0 %v4152_v27, %s5550_s22 }
 0x773   : > { %v3654_v1 = vpop.xlane.xlu1 %3653 }
 0x774   : > { %v3674_v2 = vmul.f32 %v9411_v58, %v3654_v1  ;;  %v4190_v58 = vrot.slane %v5296_v41, %v11598_v5 }
 0x777   : > { %v3940_v6 = vpop.permute.xlu1 %3939 }
 0x778   : > { %v4018_v35 = vadd.f32 %v4017_v36, %v3940_v6 }
 0x77a   : > { %4165 = vrot.lane.b32.xlu1 %v4018_v35, %s5549_s7 }
 0x77b   : > { %v4069_v16 = vpop.permute.xlu1 %4068 }
 0x77c   : > { %v4147_v38 = vadd.f32 %v4146_v25, %v4069_v16 }
 0x77e   : > { %4173 = vrot.lane.b32.xlu1 %v4147_v38, %s5550_s22 }
 0x78a   : > { %v3646_v55 = vpop.xlane.xlu0 %3645 }
 0x78b   : > { %v3668_v31 = vmul.f32 %v9408_v26, %v3646_v55 }
 0x78d   : > { %v3676_v24 = vadd.f32 %v3674_v2, %v3668_v31 }
 0x78e   : > { %v3659_v56 = vpop.xlane.xlu0 %3658 }
 0x78f   : > { %v3681_v53 = vmul.f32 %v9416_v22, %v3659_v56 }
 0x791   : > { %v3683_v47 = vadd.f32 %v3681_v53, %v3675_v61 }
 0x7ac   : > { %v3662_v21 = vpop.xlane.xlu1 %3661 }
 0x7ad   : > { %v3682_v19 = vmul.f32 %v9416_v22, %v3662_v21  ;;  %v3758_v22 = vadd.f32 %v9452_v62, %v3683_v47 }
 0x7af   : > { %v3684_v10 = vadd.f32 %v3682_v19, %v3676_v24 }
 0x7b0   : > { %v4160_v14 = vpop.permute.xlu1 %4159 }
 0x7b1   : > { %v3763_v52 = vadd.f32 %v5009_v63, %v3684_v10 }
 0x7b3   : > { %v4181_v45 = vsel %vm4179_vm2, %v3763_v52, %v4160_v14 }
 0x7b5   : > { %v4168_v44 = vpop.permute.xlu0 %4167 }
 0x7b6   : > { %v4183_v33 = vsel %vm944_vm1, %v4181_v45, %v4168_v44 }
 0x7c9   : > { %v4158_v32 = vpop.permute.xlu0 %4157 }
 0x7ca   : > { %v4180_v20 = vsel %vm4179_vm2, %v3758_v22, %v4158_v32 }
 0x7cd   : > { %v4176_v59 = vpop.permute.xlu0 %4175 }
 0x7ce   : > { %v4186_v26 = vsel %vm4184_vm3, %v4183_v33, %v4176_v59 }
 0x7cf   : > { %v4192_v15 = vadd.f32 %v4190_v58, %v4186_v26 }
 0x7d1   : > { %v4198_v4 = vmul.f32 %v4196_v37, %v4192_v15 }
 0x7d3   : > { %v4204_v34 = vadd.f32 %v4202_v9, %v4198_v4 }
 0x7d5   : > { %v4206_v54 = vmax.f32 %v4204_v34, 0.0 }
 0x7ec   : > { %v4166_v39 = vpop.permute.xlu1 %4165 }
 0x7ed   : > { %v4182_v11 = vsel %vm944_vm1, %v4180_v20, %v4166_v39 }
 0x7f0   : > { %v4174_v0 = vpop.permute.xlu1 %4173 }
 0x7f1   : > { %v4185_v50 = vsel %vm4184_vm3, %v4182_v11, %v4174_v0 }
 0x7f2   : > { %v4191_v3 = vadd.f32 %v4190_v58, %v4185_v50 }
 0x7f4   : > { %v4197_v63 = vmul.f32 %v4196_v37, %v4191_v3 }
 0x7f6   : > { %v4203_v43 = vadd.f32 %v4202_v9, %v4197_v63 }
 0x7f8   : > { %v4205_v62 = vmax.f32 %v4203_v43, 0.0 }
 0x7fa   : > { %5039 = vmatprep.mubr.msk.f32.mxu0 %vm725_vm0, %v4205_v62 }
 0x7fb   : > { %5040 = vmatmul.mubr.msk.f32.vlgmr.msra.gmra.mxu0 %vm725_vm0, %v4206_v54 }
 0x8bb   : > { %v5041_v51 = vpop.f32.mrf.mxu0 }
 0x8bc   : > { %v4296_v8 = vadd.f32 %v5041_v51, %v4216_v46 }
 0x8bd   : > { %v4290_v29 = vpop.f32.mrf.mxu0 }
 0x8be   : > { %v4300_v36 = vadd.f32 %v4296_v8, %v4208_v28  ;;  %v4291_v23 = vadd.f32 %v4290_v29, %v4216_v46 }
 0x8c0   : > { %v4302_v18 = vmax.f32 %v4300_v36, 0.0  ;;  %v4299_v57 = vadd.f32 %v4291_v23, %v4207_v40 }
 0x8c2   : > { %4304 = vst.msk [vmem:[%s650_s23 + $0x8] sm:$0xff] %vm725_vm0, %v4302_v18  ;;  %v4301_v27 = vmax.f32 %v4299_v57, 0.0 }
 0x8c4   : > { %4303 = vst.msk [vmem:[%s650_s23] sm:$0xff] %vm725_vm0, %v4301_v27 }
 0x8c5   : > { %5425 = shalt.err (!%p5422_p7)
}
 0x8c6   : > { %s5426_s28 = scalar_lea.hbm %s9485_s4, 256  ;;  %s5430_s7 = scalar_lea.hbm %s11607_s8, 512 }
 0x8c7   : > { %p5427_p9 = scmp.ne.s32.totalorder %s9485_s4, %s5426_s28  ;;  %p5431_p1 = scmp.lt.s32.totalorder %s9485_s4, %s11607_s8 }
 0x8c8   : > { %p5432_p2 = scmp.lt.s32.totalorder %s5430_s7, %s5426_s28 }
 0x8c9   : > { %p5428_p12 = pnand %p5427_p9, %p5673_p4 }
 0x8ca   : > { %p5433_p8 = por %p5432_p2, %p5431_p1 }
 0x8cb   : > { %p5429_p3 = pneg %p5428_p12 }
 0x8cd   : > { %p5434_p10 = pnand %p5433_p8, %p5429_p3 }
 0x8cf   : > { %5437 = shalt.err (!%p5434_p10)
}
 0x8d0   : > { %s5552_s24 = smov 128  }
 0x8d1   : > { %5062 = dma.vmem_to_hbm [thread:$0]  (%p5673_p4), %s9488_s5, 256, %s9485_s4, %s9491_s13, %s5552_s24, %s5552_s24, %s5548_s15  }
 0x8d2 PF: > { %s11608_s16 = sld [smem:[#allocation26_spill]] }
 0x8d3   : > { %s11609_s2 = sld [smem:[#allocation21_spill]] }
 0x8d4   : > { %s11610_s25 = sld [smem:[#allocation29_spill]] }
 0x8d8   : > { %p5094_p11 = scmp.ge.s32.totalorder %s11608_s16, 2 }
 0x8d9   : > { %s4336_s21 = sand.u32 1, %s11609_s2  }
 0x8da   : > { %p11611_p13 = scmp.ne.s32.totalorder %s11610_s25, 0  ;;  %s4337_s12 = scalar_lea.sflag [#allocation7], %s4336_s21 }
 0x8dc   : > { %p5081_p0 = pnand %p5094_p11, %p11611_p13 }
 0x8de   : > { %p5082_p5 = pneg %p5081_p0 }
 0x8e0   : > { %5479 = dma.done.wait (%p5082_p5), %s4337_s12, 256  }
 0x8e1   : > { %5481 = vsyncadd (%p5082_p5), %s4337_s12, 4294967040  ;;  %s32_s23 = sadd.s32 1, %s11608_s16   ;;  %s11612_s18 = sld [smem:[#allocation22_spill]] }
 0x8e2   : > { %p29_p6 = scmp.ge.s32.totalorder %s32_s23, 4   ;;  %s11613_s19 = sld [smem:[#allocation23_spill]] }
 0x8e3   : > { %s11614_s20 = sld [smem:[#allocation30_spill]] }
 0x8e4   : > { %s11615_s21 = sld [smem:[#allocation25_spill]]  ;;  %31 = sbr.rel (!%p29_p6) target bundleno = 25 (0x19), region = 154 }
 0x8e5   : > { %s11616_s22 = sld [smem:[#allocation27_spill]] }
 0x8e9   :  { %4342 = vsyncpa [#allocation6], 1 }
 0x8ea   :  { %4344 = vsyncpa [#allocation6 + $0x1], 1 }
 0x8eb   :  { %4345 = vsyncpa [#allocation11], 1 }
 0x8ec   :  { %4346 = vsyncpa [#allocation14], 1 }
 0x8ed   :  { %4347 = vsyncpa [#allocation7], 1 }
 0x8ee   :  { %4349 = vsyncpa [#allocation7 + $0x1], 1 }
 0x8ef   :  { %4350 = vsyncpa [#allocation8], 1 }
 0x8f0   :  { %4352 = vsyncpa [#allocation8 + $0x1], 1 }

</bundles_post_ra>
